<compile_context>
chip_gen: v5e
topology: v5e:2x2
jax: 0.10.0
libtpu: 0.0.40
codegen_flags: <defaults>
</compile_context>

<pallas_src>
import jax
import jax.numpy as jnp
import numpy as np
from jax import lax
from jax.experimental import pallas as pl
from jax.experimental.pallas import tpu as pltpu

INPUT_SIZE = 2
HIDDEN_SIZE = 128
NUM_LAYERS = 2
NUM_CLASSES = 4


def _gesture_lstm_kernel(x_ref,                 # (T, B, I)   time-major input
                         wih0_ref, whh0_ref,    # (I, 4H), (H, 4H)
                         b0_ref,                # (1, 4H)     b_ih0 + b_hh0
                         wih1_ref, whh1_ref,    # (H, 4H), (H, 4H)
                         b1_ref,                # (1, 4H)     b_ih1 + b_hh1
                         wfc_ref, bfc_ref,      # (H, C), (1, C)
                         out_ref):              # (B, C)
    T, B, _ = x_ref.shape
    G = whh0_ref.shape[1]
    H = G // 4

    # Loop-invariant loads / broadcasts hoisted out of the unrolled time loop.
    wih0 = wih0_ref[...]
    whh0 = whh0_ref[...]
    wih1 = wih1_ref[...]
    whh1 = whh1_ref[...]
    b0 = jnp.broadcast_to(b0_ref[...], (B, G))
    b1 = jnp.broadcast_to(b1_ref[...], (B, G))

    def gates_to_hc(gates, c_prev):
        i_g = jax.nn.sigmoid(gates[:, 0 * H:1 * H])
        f_g = jax.nn.sigmoid(gates[:, 1 * H:2 * H])
        g_g = jnp.tanh(gates[:, 2 * H:3 * H])
        o_g = jax.nn.sigmoid(gates[:, 3 * H:4 * H])
        c_new = f_g * c_prev + i_g * g_g
        h_new = o_g * jnp.tanh(c_new)
        return h_new, c_new

    def step(t, carry):
        h0, c0, h1, c1 = carry
        x_t = x_ref[t]                                              # (B, I)
        # Layer 0: tiny K=I input projection + K=H recurrent matmul.
        gates0 = (jnp.dot(x_t, wih0, preferred_element_type=jnp.float32)
                  + jnp.dot(h0, whh0, preferred_element_type=jnp.float32)
                  + b0)
        h0n, c0n = gates_to_hc(gates0, c0)
        # Layer 1: two K=H gate matmuls (no per-step lane concat of [h0; h1]).
        gates1 = (jnp.dot(h0n, wih1, preferred_element_type=jnp.float32)
                  + jnp.dot(h1, whh1, preferred_element_type=jnp.float32)
                  + b1)
        h1n, c1n = gates_to_hc(gates1, c1)
        return h0n, c0n, h1n, c1n

    zeros = jnp.zeros((B, H), jnp.float32)
    _, _, h1_final, _ = lax.fori_loop(
        0, T, step, (zeros, zeros, zeros, zeros), unroll=True)

    # Fused FC head on the last hidden state of the top layer.
    logits = (jnp.dot(h1_final, wfc_ref[...],
                      preferred_element_type=jnp.float32) + bfc_ref[...])
    out_ref[...] = logits.astype(out_ref.dtype)


def gesture_model_forward(x, params):
    """x: (B, T, input_size) float32, batch_first (same as the PyTorch module)."""
    B, T, I = x.shape
    C = params["wfc"].shape[1]

    # Time-major layout so the kernel can index the sequence ref along axis 0.
    x_tbi = jnp.transpose(x, (1, 0, 2))                 # (T, B, I), ~512 B

    vmem = lambda: pl.BlockSpec(memory_space=pltpu.MemorySpace.VMEM)
    return pl.pallas_call(
        _gesture_lstm_kernel,
        out_shape=jax.ShapeDtypeStruct((B, C), jnp.float32),
        in_specs=[vmem() for _ in range(9)],
        out_specs=vmem(),
    )(x_tbi,
      params["wih0"], params["whh0"], params["b0"],
      params["wih1"], params["whh1"], params["b1"],
      params["wfc"], params["bfc"])


def init_params(key, input_size=INPUT_SIZE, hidden_size=HIDDEN_SIZE,
                num_classes=NUM_CLASSES):
    """Deterministic init mimicking PyTorch's U(-1/sqrt(H), 1/sqrt(H)).
    Weights are stored pre-transposed for row-major matmuls in the kernel."""
    H = hidden_size
    bound = 1.0 / np.sqrt(H)
    ks = jax.random.split(key, 10)
    u = lambda k, shape: jax.random.uniform(k, shape, jnp.float32, -bound, bound)
    # Layer 0
    wih0 = u(ks[0], (input_size, 4 * H))
    whh0 = u(ks[1], (H, 4 * H))
    b0 = u(ks[2], (1, 4 * H)) + u(ks[3], (1, 4 * H))      # b_ih + b_hh
    # Layer 1
    wih1 = u(ks[4], (H, 4 * H))
    whh1 = u(ks[5], (H, 4 * H))
    b1 = u(ks[6], (1, 4 * H)) + u(ks[7], (1, 4 * H))
    # FC head
    wfc = jax.random.uniform(ks[8], (H, num_classes), jnp.float32, -bound, bound)
    bfc = jax.random.uniform(ks[9], (1, num_classes), jnp.float32, -bound, bound)
    return dict(wih0=wih0, whh0=whh0, b0=b0,
                wih1=wih1, whh1=whh1, b1=b1,
                wfc=wfc, bfc=bfc)


def reference_forward(x, p):
    """Pure-JAX reference reproducing PyTorch LSTM (eval) + Linear semantics."""
    B, T, _ = x.shape
    H = p["whh0"].shape[0]

    def cell(x_t, h, c, wih, whh, b):
        gates = x_t @ wih + h @ whh + b
        i = jax.nn.sigmoid(gates[:, 0 * H:1 * H])
        f = jax.nn.sigmoid(gates[:, 1 * H:2 * H])
        g = jnp.tanh(gates[:, 2 * H:3 * H])
        o = jax.nn.sigmoid(gates[:, 3 * H:4 * H])
        c = f * c + i * g
        h = o * jnp.tanh(c)
        return h, c

    h0 = c0 = h1 = c1 = jnp.zeros((B, H), jnp.float32)
    for t in range(T):
        h0, c0 = cell(x[:, t], h0, c0, p["wih0"], p["whh0"], p["b0"])
        h1, c1 = cell(h0, h1, c1, p["wih1"], p["whh1"], p["b1"])
    return h1 @ p["wfc"] + p["bfc"]


if __name__ == "__main__":
    key = jax.random.PRNGKey(0)
    k_x, k_p = jax.random.split(key)

    B, T = 8, 8  # batch, sequence length
    x = jax.random.normal(k_x, (B, T, INPUT_SIZE), jnp.float32)
    params = init_params(k_p)

    out = jax.block_until_ready(gesture_model_forward(x, params))

    ref = reference_forward(x, params)
    np.testing.assert_allclose(np.asarray(out), np.asarray(ref),
                               rtol=1e-4, atol=1e-4)
    assert out.shape == (B, NUM_CLASSES)
    print("KERNEL_OK")
</pallas_src>

<mosaic_0001>
module attributes {stable_mosaic.version = 11 : i64} {
  func.func @_gesture_lstm_kernel(%arg0: memref<8x8x2xf32, #tpu.memory_space<vmem>>, %arg1: memref<2x512xf32, #tpu.memory_space<vmem>>, %arg2: memref<128x512xf32, #tpu.memory_space<vmem>>, %arg3: memref<1x512xf32, #tpu.memory_space<vmem>>, %arg4: memref<128x512xf32, #tpu.memory_space<vmem>>, %arg5: memref<128x512xf32, #tpu.memory_space<vmem>>, %arg6: memref<1x512xf32, #tpu.memory_space<vmem>>, %arg7: memref<128x4xf32, #tpu.memory_space<vmem>>, %arg8: memref<1x4xf32, #tpu.memory_space<vmem>>, %arg9: memref<8x4xf32, #tpu.memory_space<vmem>>) attributes {dimension_semantics = [], scalar_prefetch = 0 : i64, scratch_operands = 0 : i64, tpu.core_type = #tpu.core_type<tc>} {
    %c0 = arith.constant 0 : index
    %c0_0 = arith.constant 0 : index
    %0 = vector.load %arg1[%c0, %c0_0] : memref<2x512xf32, #tpu.memory_space<vmem>>, vector<2x512xf32>
    %c0_1 = arith.constant 0 : index
    %c0_2 = arith.constant 0 : index
    %1 = vector.load %arg2[%c0_1, %c0_2] : memref<128x512xf32, #tpu.memory_space<vmem>>, vector<128x512xf32>
    %c0_3 = arith.constant 0 : index
    %c0_4 = arith.constant 0 : index
    %2 = vector.load %arg4[%c0_3, %c0_4] : memref<128x512xf32, #tpu.memory_space<vmem>>, vector<128x512xf32>
    %c0_5 = arith.constant 0 : index
    %c0_6 = arith.constant 0 : index
    %3 = vector.load %arg5[%c0_5, %c0_6] : memref<128x512xf32, #tpu.memory_space<vmem>>, vector<128x512xf32>
    %c0_7 = arith.constant 0 : index
    %c0_8 = arith.constant 0 : index
    %4 = vector.load %arg3[%c0_7, %c0_8] : memref<1x512xf32, #tpu.memory_space<vmem>>, vector<1x512xf32>
    %5 = vector.shape_cast %4 : vector<1x512xf32> to vector<1x512xf32>
    %6 = vector.broadcast %5 : vector<1x512xf32> to vector<8x512xf32>
    %c0_9 = arith.constant 0 : index
    %c0_10 = arith.constant 0 : index
    %7 = vector.load %arg6[%c0_9, %c0_10] : memref<1x512xf32, #tpu.memory_space<vmem>>, vector<1x512xf32>
    %8 = vector.shape_cast %7 : vector<1x512xf32> to vector<1x512xf32>
    %9 = vector.broadcast %8 : vector<1x512xf32> to vector<8x512xf32>
    %cst = arith.constant 0.000000e+00 : f32
    %10 = vector.broadcast %cst : f32 to vector<8x128xf32>
    %c0_i32 = arith.constant 0 : i32
    %11 = arith.index_cast %c0_i32 : i32 to index
    %c0_11 = arith.constant 0 : index
    %c0_12 = arith.constant 0 : index
    %12 = vector.load %arg0[%11, %c0_11, %c0_12] : memref<8x8x2xf32, #tpu.memory_space<vmem>>, vector<1x8x2xf32>
    %13 = vector.shape_cast %12 : vector<1x8x2xf32> to vector<8x2xf32>
    %cst_13 = arith.constant dense<0.000000e+00> : vector<8x512xf32>
    %14 = tpu.matmul %13, %0, %cst_13 {dimension_numbers = #tpu.dot_dimension_numbers<[1], [0], [0], [1], [0, 0, 1, 1], [], []>} : vector<8x2xf32>, vector<2x512xf32>, vector<8x512xf32> -> vector<8x512xf32>
    %cst_14 = arith.constant dense<0.000000e+00> : vector<8x512xf32>
    %15 = tpu.matmul %10, %1, %cst_14 {dimension_numbers = #tpu.dot_dimension_numbers<[1], [0], [0], [1], [0, 0, 1, 1], [], []>} : vector<8x128xf32>, vector<128x512xf32>, vector<8x512xf32> -> vector<8x512xf32>
    %16 = arith.addf %14, %15 : vector<8x512xf32>
    %17 = arith.addf %16, %6 : vector<8x512xf32>
    %18 = vector.extract_strided_slice %17 {offsets = [0, 0], sizes = [8, 128], strides = [1, 1]} : vector<8x512xf32> to vector<8x128xf32>
    %19 = arith.negf %18 : vector<8x128xf32>
    %20 = math.exp %19 : vector<8x128xf32>
    %cst_15 = arith.constant 1.000000e+00 : f32
    %21 = vector.broadcast %cst_15 : f32 to vector<8x128xf32>
    %22 = arith.addf %21, %20 : vector<8x128xf32>
    %23 = arith.divf %21, %22 : vector<8x128xf32>
    %24 = vector.extract_strided_slice %17 {offsets = [0, 128], sizes = [8, 128], strides = [1, 1]} : vector<8x512xf32> to vector<8x128xf32>
    %25 = arith.negf %24 : vector<8x128xf32>
    %26 = math.exp %25 : vector<8x128xf32>
    %cst_16 = arith.constant 1.000000e+00 : f32
    %27 = vector.broadcast %cst_16 : f32 to vector<8x128xf32>
    %28 = arith.addf %27, %26 : vector<8x128xf32>
    %29 = arith.divf %27, %28 : vector<8x128xf32>
    %30 = vector.extract_strided_slice %17 {offsets = [0, 256], sizes = [8, 128], strides = [1, 1]} : vector<8x512xf32> to vector<8x128xf32>
    %31 = math.tanh %30 : vector<8x128xf32>
    %32 = vector.extract_strided_slice %17 {offsets = [0, 384], sizes = [8, 128], strides = [1, 1]} : vector<8x512xf32> to vector<8x128xf32>
    %33 = arith.negf %32 : vector<8x128xf32>
    %34 = math.exp %33 : vector<8x128xf32>
    %cst_17 = arith.constant 1.000000e+00 : f32
    %35 = vector.broadcast %cst_17 : f32 to vector<8x128xf32>
    %36 = arith.addf %35, %34 : vector<8x128xf32>
    %37 = arith.divf %35, %36 : vector<8x128xf32>
    %38 = arith.mulf %29, %10 : vector<8x128xf32>
    %39 = arith.mulf %23, %31 : vector<8x128xf32>
    %40 = arith.addf %38, %39 : vector<8x128xf32>
    %41 = math.tanh %40 : vector<8x128xf32>
    %42 = arith.mulf %37, %41 : vector<8x128xf32>
    %cst_18 = arith.constant dense<0.000000e+00> : vector<8x512xf32>
    %43 = tpu.matmul %42, %2, %cst_18 {dimension_numbers = #tpu.dot_dimension_numbers<[1], [0], [0], [1], [0, 0, 1, 1], [], []>} : vector<8x128xf32>, vector<128x512xf32>, vector<8x512xf32> -> vector<8x512xf32>
    %cst_19 = arith.constant dense<0.000000e+00> : vector<8x512xf32>
    %44 = tpu.matmul %10, %3, %cst_19 {dimension_numbers = #tpu.dot_dimension_numbers<[1], [0], [0], [1], [0, 0, 1, 1], [], []>} : vector<8x128xf32>, vector<128x512xf32>, vector<8x512xf32> -> vector<8x512xf32>
    %45 = arith.addf %43, %44 : vector<8x512xf32>
    %46 = arith.addf %45, %9 : vector<8x512xf32>
    %47 = vector.extract_strided_slice %46 {offsets = [0, 0], sizes = [8, 128], strides = [1, 1]} : vector<8x512xf32> to vector<8x128xf32>
    %48 = arith.negf %47 : vector<8x128xf32>
    %49 = math.exp %48 : vector<8x128xf32>
    %cst_20 = arith.constant 1.000000e+00 : f32
    %50 = vector.broadcast %cst_20 : f32 to vector<8x128xf32>
    %51 = arith.addf %50, %49 : vector<8x128xf32>
    %52 = arith.divf %50, %51 : vector<8x128xf32>
    %53 = vector.extract_strided_slice %46 {offsets = [0, 128], sizes = [8, 128], strides = [1, 1]} : vector<8x512xf32> to vector<8x128xf32>
    %54 = arith.negf %53 : vector<8x128xf32>
    %55 = math.exp %54 : vector<8x128xf32>
    %cst_21 = arith.constant 1.000000e+00 : f32
    %56 = vector.broadcast %cst_21 : f32 to vector<8x128xf32>
    %57 = arith.addf %56, %55 : vector<8x128xf32>
    %58 = arith.divf %56, %57 : vector<8x128xf32>
    %59 = vector.extract_strided_slice %46 {offsets = [0, 256], sizes = [8, 128], strides = [1, 1]} : vector<8x512xf32> to vector<8x128xf32>
    %60 = math.tanh %59 : vector<8x128xf32>
    %61 = vector.extract_strided_slice %46 {offsets = [0, 384], sizes = [8, 128], strides = [1, 1]} : vector<8x512xf32> to vector<8x128xf32>
    %62 = arith.negf %61 : vector<8x128xf32>
    %63 = math.exp %62 : vector<8x128xf32>
    %cst_22 = arith.constant 1.000000e+00 : f32
    %64 = vector.broadcast %cst_22 : f32 to vector<8x128xf32>
    %65 = arith.addf %64, %63 : vector<8x128xf32>
    %66 = arith.divf %64, %65 : vector<8x128xf32>
    %67 = arith.mulf %58, %10 : vector<8x128xf32>
    %68 = arith.mulf %52, %60 : vector<8x128xf32>
    %69 = arith.addf %67, %68 : vector<8x128xf32>
    %70 = math.tanh %69 : vector<8x128xf32>
    %71 = arith.mulf %66, %70 : vector<8x128xf32>
    %c1_i32 = arith.constant 1 : i32
    %72 = arith.index_cast %c1_i32 : i32 to index
    %c0_23 = arith.constant 0 : index
    %c0_24 = arith.constant 0 : index
    %73 = vector.load %arg0[%72, %c0_23, %c0_24] : memref<8x8x2xf32, #tpu.memory_space<vmem>>, vector<1x8x2xf32>
    %74 = vector.shape_cast %73 : vector<1x8x2xf32> to vector<8x2xf32>
    %cst_25 = arith.constant dense<0.000000e+00> : vector<8x512xf32>
    %75 = tpu.matmul %74, %0, %cst_25 {dimension_numbers = #tpu.dot_dimension_numbers<[1], [0], [0], [1], [0, 0, 1, 1], [], []>} : vector<8x2xf32>, vector<2x512xf32>, vector<8x512xf32> -> vector<8x512xf32>
    %cst_26 = arith.constant dense<0.000000e+00> : vector<8x512xf32>
    %76 = tpu.matmul %42, %1, %cst_26 {dimension_numbers = #tpu.dot_dimension_numbers<[1], [0], [0], [1], [0, 0, 1, 1], [], []>} : vector<8x128xf32>, vector<128x512xf32>, vector<8x512xf32> -> vector<8x512xf32>
    %77 = arith.addf %75, %76 : vector<8x512xf32>
    %78 = arith.addf %77, %6 : vector<8x512xf32>
    %79 = vector.extract_strided_slice %78 {offsets = [0, 0], sizes = [8, 128], strides = [1, 1]} : vector<8x512xf32> to vector<8x128xf32>
    %80 = arith.negf %79 : vector<8x128xf32>
    %81 = math.exp %80 : vector<8x128xf32>
    %cst_27 = arith.constant 1.000000e+00 : f32
    %82 = vector.broadcast %cst_27 : f32 to vector<8x128xf32>
    %83 = arith.addf %82, %81 : vector<8x128xf32>
    %84 = arith.divf %82, %83 : vector<8x128xf32>
    %85 = vector.extract_strided_slice %78 {offsets = [0, 128], sizes = [8, 128], strides = [1, 1]} : vector<8x512xf32> to vector<8x128xf32>
    %86 = arith.negf %85 : vector<8x128xf32>
    %87 = math.exp %86 : vector<8x128xf32>
    %cst_28 = arith.constant 1.000000e+00 : f32
    %88 = vector.broadcast %cst_28 : f32 to vector<8x128xf32>
    %89 = arith.addf %88, %87 : vector<8x128xf32>
    %90 = arith.divf %88, %89 : vector<8x128xf32>
    %91 = vector.extract_strided_slice %78 {offsets = [0, 256], sizes = [8, 128], strides = [1, 1]} : vector<8x512xf32> to vector<8x128xf32>
    %92 = math.tanh %91 : vector<8x128xf32>
    %93 = vector.extract_strided_slice %78 {offsets = [0, 384], sizes = [8, 128], strides = [1, 1]} : vector<8x512xf32> to vector<8x128xf32>
    %94 = arith.negf %93 : vector<8x128xf32>
    %95 = math.exp %94 : vector<8x128xf32>
    %cst_29 = arith.constant 1.000000e+00 : f32
    %96 = vector.broadcast %cst_29 : f32 to vector<8x128xf32>
    %97 = arith.addf %96, %95 : vector<8x128xf32>
    %98 = arith.divf %96, %97 : vector<8x128xf32>
    %99 = arith.mulf %90, %40 : vector<8x128xf32>
    %100 = arith.mulf %84, %92 : vector<8x128xf32>
    %101 = arith.addf %99, %100 : vector<8x128xf32>
    %102 = math.tanh %101 : vector<8x128xf32>
    %103 = arith.mulf %98, %102 : vector<8x128xf32>
    %cst_30 = arith.constant dense<0.000000e+00> : vector<8x512xf32>
    %104 = tpu.matmul %103, %2, %cst_30 {dimension_numbers = #tpu.dot_dimension_numbers<[1], [0], [0], [1], [0, 0, 1, 1], [], []>} : vector<8x128xf32>, vector<128x512xf32>, vector<8x512xf32> -> vector<8x512xf32>
    %cst_31 = arith.constant dense<0.000000e+00> : vector<8x512xf32>
    %105 = tpu.matmul %71, %3, %cst_31 {dimension_numbers = #tpu.dot_dimension_numbers<[1], [0], [0], [1], [0, 0, 1, 1], [], []>} : vector<8x128xf32>, vector<128x512xf32>, vector<8x512xf32> -> vector<8x512xf32>
    %106 = arith.addf %104, %105 : vector<8x512xf32>
    %107 = arith.addf %106, %9 : vector<8x512xf32>
    %108 = vector.extract_strided_slice %107 {offsets = [0, 0], sizes = [8, 128], strides = [1, 1]} : vector<8x512xf32> to vector<8x128xf32>
    %109 = arith.negf %108 : vector<8x128xf32>
    %110 = math.exp %109 : vector<8x128xf32>
    %cst_32 = arith.constant 1.000000e+00 : f32
    %111 = vector.broadcast %cst_32 : f32 to vector<8x128xf32>
    %112 = arith.addf %111, %110 : vector<8x128xf32>
    %113 = arith.divf %111, %112 : vector<8x128xf32>
    %114 = vector.extract_strided_slice %107 {offsets = [0, 128], sizes = [8, 128], strides = [1, 1]} : vector<8x512xf32> to vector<8x128xf32>
    %115 = arith.negf %114 : vector<8x128xf32>
    %116 = math.exp %115 : vector<8x128xf32>
    %cst_33 = arith.constant 1.000000e+00 : f32
    %117 = vector.broadcast %cst_33 : f32 to vector<8x128xf32>
    %118 = arith.addf %117, %116 : vector<8x128xf32>
    %119 = arith.divf %117, %118 : vector<8x128xf32>
    %120 = vector.extract_strided_slice %107 {offsets = [0, 256], sizes = [8, 128], strides = [1, 1]} : vector<8x512xf32> to vector<8x128xf32>
    %121 = math.tanh %120 : vector<8x128xf32>
    %122 = vector.extract_strided_slice %107 {offsets = [0, 384], sizes = [8, 128], strides = [1, 1]} : vector<8x512xf32> to vector<8x128xf32>
    %123 = arith.negf %122 : vector<8x128xf32>
    %124 = math.exp %123 : vector<8x128xf32>
    %cst_34 = arith.constant 1.000000e+00 : f32
    %125 = vector.broadcast %cst_34 : f32 to vector<8x128xf32>
    %126 = arith.addf %125, %124 : vector<8x128xf32>
    %127 = arith.divf %125, %126 : vector<8x128xf32>
    %128 = arith.mulf %119, %69 : vector<8x128xf32>
    %129 = arith.mulf %113, %121 : vector<8x128xf32>
    %130 = arith.addf %128, %129 : vector<8x128xf32>
    %131 = math.tanh %130 : vector<8x128xf32>
    %132 = arith.mulf %127, %131 : vector<8x128xf32>
    %c2_i32 = arith.constant 2 : i32
    %133 = arith.index_cast %c2_i32 : i32 to index
    %c0_35 = arith.constant 0 : index
    %c0_36 = arith.constant 0 : index
    %134 = vector.load %arg0[%133, %c0_35, %c0_36] : memref<8x8x2xf32, #tpu.memory_space<vmem>>, vector<1x8x2xf32>
    %135 = vector.shape_cast %134 : vector<1x8x2xf32> to vector<8x2xf32>
    %cst_37 = arith.constant dense<0.000000e+00> : vector<8x512xf32>
    %136 = tpu.matmul %135, %0, %cst_37 {dimension_numbers = #tpu.dot_dimension_numbers<[1], [0], [0], [1], [0, 0, 1, 1], [], []>} : vector<8x2xf32>, vector<2x512xf32>, vector<8x512xf32> -> vector<8x512xf32>
    %cst_38 = arith.constant dense<0.000000e+00> : vector<8x512xf32>
    %137 = tpu.matmul %103, %1, %cst_38 {dimension_numbers = #tpu.dot_dimension_numbers<[1], [0], [0], [1], [0, 0, 1, 1], [], []>} : vector<8x128xf32>, vector<128x512xf32>, vector<8x512xf32> -> vector<8x512xf32>
    %138 = arith.addf %136, %137 : vector<8x512xf32>
    %139 = arith.addf %138, %6 : vector<8x512xf32>
    %140 = vector.extract_strided_slice %139 {offsets = [0, 0], sizes = [8, 128], strides = [1, 1]} : vector<8x512xf32> to vector<8x128xf32>
    %141 = arith.negf %140 : vector<8x128xf32>
    %142 = math.exp %141 : vector<8x128xf32>
    %cst_39 = arith.constant 1.000000e+00 : f32
    %143 = vector.broadcast %cst_39 : f32 to vector<8x128xf32>
    %144 = arith.addf %143, %142 : vector<8x128xf32>
    %145 = arith.divf %143, %144 : vector<8x128xf32>
    %146 = vector.extract_strided_slice %139 {offsets = [0, 128], sizes = [8, 128], strides = [1, 1]} : vector<8x512xf32> to vector<8x128xf32>
    %147 = arith.negf %146 : vector<8x128xf32>
    %148 = math.exp %147 : vector<8x128xf32>
    %cst_40 = arith.constant 1.000000e+00 : f32
    %149 = vector.broadcast %cst_40 : f32 to vector<8x128xf32>
    %150 = arith.addf %149, %148 : vector<8x128xf32>
    %151 = arith.divf %149, %150 : vector<8x128xf32>
    %152 = vector.extract_strided_slice %139 {offsets = [0, 256], sizes = [8, 128], strides = [1, 1]} : vector<8x512xf32> to vector<8x128xf32>
    %153 = math.tanh %152 : vector<8x128xf32>
    %154 = vector.extract_strided_slice %139 {offsets = [0, 384], sizes = [8, 128], strides = [1, 1]} : vector<8x512xf32> to vector<8x128xf32>
    %155 = arith.negf %154 : vector<8x128xf32>
    %156 = math.exp %155 : vector<8x128xf32>
    %cst_41 = arith.constant 1.000000e+00 : f32
    %157 = vector.broadcast %cst_41 : f32 to vector<8x128xf32>
    %158 = arith.addf %157, %156 : vector<8x128xf32>
    %159 = arith.divf %157, %158 : vector<8x128xf32>
    %160 = arith.mulf %151, %101 : vector<8x128xf32>
    %161 = arith.mulf %145, %153 : vector<8x128xf32>
    %162 = arith.addf %160, %161 : vector<8x128xf32>
    %163 = math.tanh %162 : vector<8x128xf32>
    %164 = arith.mulf %159, %163 : vector<8x128xf32>
    %cst_42 = arith.constant dense<0.000000e+00> : vector<8x512xf32>
    %165 = tpu.matmul %164, %2, %cst_42 {dimension_numbers = #tpu.dot_dimension_numbers<[1], [0], [0], [1], [0, 0, 1, 1], [], []>} : vector<8x128xf32>, vector<128x512xf32>, vector<8x512xf32> -> vector<8x512xf32>
    %cst_43 = arith.constant dense<0.000000e+00> : vector<8x512xf32>
    %166 = tpu.matmul %132, %3, %cst_43 {dimension_numbers = #tpu.dot_dimension_numbers<[1], [0], [0], [1], [0, 0, 1, 1], [], []>} : vector<8x128xf32>, vector<128x512xf32>, vector<8x512xf32> -> vector<8x512xf32>
    %167 = arith.addf %165, %166 : vector<8x512xf32>
    %168 = arith.addf %167, %9 : vector<8x512xf32>
    %169 = vector.extract_strided_slice %168 {offsets = [0, 0], sizes = [8, 128], strides = [1, 1]} : vector<8x512xf32> to vector<8x128xf32>
    %170 = arith.negf %169 : vector<8x128xf32>
    %171 = math.exp %170 : vector<8x128xf32>
    %cst_44 = arith.constant 1.000000e+00 : f32
    %172 = vector.broadcast %cst_44 : f32 to vector<8x128xf32>
    %173 = arith.addf %172, %171 : vector<8x128xf32>
    %174 = arith.divf %172, %173 : vector<8x128xf32>
    %175 = vector.extract_strided_slice %168 {offsets = [0, 128], sizes = [8, 128], strides = [1, 1]} : vector<8x512xf32> to vector<8x128xf32>
    %176 = arith.negf %175 : vector<8x128xf32>
    %177 = math.exp %176 : vector<8x128xf32>
    %cst_45 = arith.constant 1.000000e+00 : f32
    %178 = vector.broadcast %cst_45 : f32 to vector<8x128xf32>
    %179 = arith.addf %178, %177 : vector<8x128xf32>
    %180 = arith.divf %178, %179 : vector<8x128xf32>
    %181 = vector.extract_strided_slice %168 {offsets = [0, 256], sizes = [8, 128], strides = [1, 1]} : vector<8x512xf32> to vector<8x128xf32>
    %182 = math.tanh %181 : vector<8x128xf32>
    %183 = vector.extract_strided_slice %168 {offsets = [0, 384], sizes = [8, 128], strides = [1, 1]} : vector<8x512xf32> to vector<8x128xf32>
    %184 = arith.negf %183 : vector<8x128xf32>
    %185 = math.exp %184 : vector<8x128xf32>
    %cst_46 = arith.constant 1.000000e+00 : f32
    %186 = vector.broadcast %cst_46 : f32 to vector<8x128xf32>
    %187 = arith.addf %186, %185 : vector<8x128xf32>
    %188 = arith.divf %186, %187 : vector<8x128xf32>
    %189 = arith.mulf %180, %130 : vector<8x128xf32>
    %190 = arith.mulf %174, %182 : vector<8x128xf32>
    %191 = arith.addf %189, %190 : vector<8x128xf32>
    %192 = math.tanh %191 : vector<8x128xf32>
    %193 = arith.mulf %188, %192 : vector<8x128xf32>
    %c3_i32 = arith.constant 3 : i32
    %194 = arith.index_cast %c3_i32 : i32 to index
    %c0_47 = arith.constant 0 : index
    %c0_48 = arith.constant 0 : index
    %195 = vector.load %arg0[%194, %c0_47, %c0_48] : memref<8x8x2xf32, #tpu.memory_space<vmem>>, vector<1x8x2xf32>
    %196 = vector.shape_cast %195 : vector<1x8x2xf32> to vector<8x2xf32>
    %cst_49 = arith.constant dense<0.000000e+00> : vector<8x512xf32>
    %197 = tpu.matmul %196, %0, %cst_49 {dimension_numbers = #tpu.dot_dimension_numbers<[1], [0], [0], [1], [0, 0, 1, 1], [], []>} : vector<8x2xf32>, vector<2x512xf32>, vector<8x512xf32> -> vector<8x512xf32>
    %cst_50 = arith.constant dense<0.000000e+00> : vector<8x512xf32>
    %198 = tpu.matmul %164, %1, %cst_50 {dimension_numbers = #tpu.dot_dimension_numbers<[1], [0], [0], [1], [0, 0, 1, 1], [], []>} : vector<8x128xf32>, vector<128x512xf32>, vector<8x512xf32> -> vector<8x512xf32>
    %199 = arith.addf %197, %198 : vector<8x512xf32>
    %200 = arith.addf %199, %6 : vector<8x512xf32>
    %201 = vector.extract_strided_slice %200 {offsets = [0, 0], sizes = [8, 128], strides = [1, 1]} : vector<8x512xf32> to vector<8x128xf32>
    %202 = arith.negf %201 : vector<8x128xf32>
    %203 = math.exp %202 : vector<8x128xf32>
    %cst_51 = arith.constant 1.000000e+00 : f32
    %204 = vector.broadcast %cst_51 : f32 to vector<8x128xf32>
    %205 = arith.addf %204, %203 : vector<8x128xf32>
    %206 = arith.divf %204, %205 : vector<8x128xf32>
    %207 = vector.extract_strided_slice %200 {offsets = [0, 128], sizes = [8, 128], strides = [1, 1]} : vector<8x512xf32> to vector<8x128xf32>
    %208 = arith.negf %207 : vector<8x128xf32>
    %209 = math.exp %208 : vector<8x128xf32>
    %cst_52 = arith.constant 1.000000e+00 : f32
    %210 = vector.broadcast %cst_52 : f32 to vector<8x128xf32>
    %211 = arith.addf %210, %209 : vector<8x128xf32>
    %212 = arith.divf %210, %211 : vector<8x128xf32>
    %213 = vector.extract_strided_slice %200 {offsets = [0, 256], sizes = [8, 128], strides = [1, 1]} : vector<8x512xf32> to vector<8x128xf32>
    %214 = math.tanh %213 : vector<8x128xf32>
    %215 = vector.extract_strided_slice %200 {offsets = [0, 384], sizes = [8, 128], strides = [1, 1]} : vector<8x512xf32> to vector<8x128xf32>
    %216 = arith.negf %215 : vector<8x128xf32>
    %217 = math.exp %216 : vector<8x128xf32>
    %cst_53 = arith.constant 1.000000e+00 : f32
    %218 = vector.broadcast %cst_53 : f32 to vector<8x128xf32>
    %219 = arith.addf %218, %217 : vector<8x128xf32>
    %220 = arith.divf %218, %219 : vector<8x128xf32>
    %221 = arith.mulf %212, %162 : vector<8x128xf32>
    %222 = arith.mulf %206, %214 : vector<8x128xf32>
    %223 = arith.addf %221, %222 : vector<8x128xf32>
    %224 = math.tanh %223 : vector<8x128xf32>
    %225 = arith.mulf %220, %224 : vector<8x128xf32>
    %cst_54 = arith.constant dense<0.000000e+00> : vector<8x512xf32>
    %226 = tpu.matmul %225, %2, %cst_54 {dimension_numbers = #tpu.dot_dimension_numbers<[1], [0], [0], [1], [0, 0, 1, 1], [], []>} : vector<8x128xf32>, vector<128x512xf32>, vector<8x512xf32> -> vector<8x512xf32>
    %cst_55 = arith.constant dense<0.000000e+00> : vector<8x512xf32>
    %227 = tpu.matmul %193, %3, %cst_55 {dimension_numbers = #tpu.dot_dimension_numbers<[1], [0], [0], [1], [0, 0, 1, 1], [], []>} : vector<8x128xf32>, vector<128x512xf32>, vector<8x512xf32> -> vector<8x512xf32>
    %228 = arith.addf %226, %227 : vector<8x512xf32>
    %229 = arith.addf %228, %9 : vector<8x512xf32>
    %230 = vector.extract_strided_slice %229 {offsets = [0, 0], sizes = [8, 128], strides = [1, 1]} : vector<8x512xf32> to vector<8x128xf32>
    %231 = arith.negf %230 : vector<8x128xf32>
    %232 = math.exp %231 : vector<8x128xf32>
    %cst_56 = arith.constant 1.000000e+00 : f32
    %233 = vector.broadcast %cst_56 : f32 to vector<8x128xf32>
    %234 = arith.addf %233, %232 : vector<8x128xf32>
    %235 = arith.divf %233, %234 : vector<8x128xf32>
    %236 = vector.extract_strided_slice %229 {offsets = [0, 128], sizes = [8, 128], strides = [1, 1]} : vector<8x512xf32> to vector<8x128xf32>
    %237 = arith.negf %236 : vector<8x128xf32>
    %238 = math.exp %237 : vector<8x128xf32>
    %cst_57 = arith.constant 1.000000e+00 : f32
    %239 = vector.broadcast %cst_57 : f32 to vector<8x128xf32>
    %240 = arith.addf %239, %238 : vector<8x128xf32>
    %241 = arith.divf %239, %240 : vector<8x128xf32>
    %242 = vector.extract_strided_slice %229 {offsets = [0, 256], sizes = [8, 128], strides = [1, 1]} : vector<8x512xf32> to vector<8x128xf32>
    %243 = math.tanh %242 : vector<8x128xf32>
    %244 = vector.extract_strided_slice %229 {offsets = [0, 384], sizes = [8, 128], strides = [1, 1]} : vector<8x512xf32> to vector<8x128xf32>
    %245 = arith.negf %244 : vector<8x128xf32>
    %246 = math.exp %245 : vector<8x128xf32>
    %cst_58 = arith.constant 1.000000e+00 : f32
    %247 = vector.broadcast %cst_58 : f32 to vector<8x128xf32>
    %248 = arith.addf %247, %246 : vector<8x128xf32>
    %249 = arith.divf %247, %248 : vector<8x128xf32>
    %250 = arith.mulf %241, %191 : vector<8x128xf32>
    %251 = arith.mulf %235, %243 : vector<8x128xf32>
    %252 = arith.addf %250, %251 : vector<8x128xf32>
    %253 = math.tanh %252 : vector<8x128xf32>
    %254 = arith.mulf %249, %253 : vector<8x128xf32>
    %c4_i32 = arith.constant 4 : i32
    %255 = arith.index_cast %c4_i32 : i32 to index
    %c0_59 = arith.constant 0 : index
    %c0_60 = arith.constant 0 : index
    %256 = vector.load %arg0[%255, %c0_59, %c0_60] : memref<8x8x2xf32, #tpu.memory_space<vmem>>, vector<1x8x2xf32>
    %257 = vector.shape_cast %256 : vector<1x8x2xf32> to vector<8x2xf32>
    %cst_61 = arith.constant dense<0.000000e+00> : vector<8x512xf32>
    %258 = tpu.matmul %257, %0, %cst_61 {dimension_numbers = #tpu.dot_dimension_numbers<[1], [0], [0], [1], [0, 0, 1, 1], [], []>} : vector<8x2xf32>, vector<2x512xf32>, vector<8x512xf32> -> vector<8x512xf32>
    %cst_62 = arith.constant dense<0.000000e+00> : vector<8x512xf32>
    %259 = tpu.matmul %225, %1, %cst_62 {dimension_numbers = #tpu.dot_dimension_numbers<[1], [0], [0], [1], [0, 0, 1, 1], [], []>} : vector<8x128xf32>, vector<128x512xf32>, vector<8x512xf32> -> vector<8x512xf32>
    %260 = arith.addf %258, %259 : vector<8x512xf32>
    %261 = arith.addf %260, %6 : vector<8x512xf32>
    %262 = vector.extract_strided_slice %261 {offsets = [0, 0], sizes = [8, 128], strides = [1, 1]} : vector<8x512xf32> to vector<8x128xf32>
    %263 = arith.negf %262 : vector<8x128xf32>
    %264 = math.exp %263 : vector<8x128xf32>
    %cst_63 = arith.constant 1.000000e+00 : f32
    %265 = vector.broadcast %cst_63 : f32 to vector<8x128xf32>
    %266 = arith.addf %265, %264 : vector<8x128xf32>
    %267 = arith.divf %265, %266 : vector<8x128xf32>
    %268 = vector.extract_strided_slice %261 {offsets = [0, 128], sizes = [8, 128], strides = [1, 1]} : vector<8x512xf32> to vector<8x128xf32>
    %269 = arith.negf %268 : vector<8x128xf32>
    %270 = math.exp %269 : vector<8x128xf32>
    %cst_64 = arith.constant 1.000000e+00 : f32
    %271 = vector.broadcast %cst_64 : f32 to vector<8x128xf32>
    %272 = arith.addf %271, %270 : vector<8x128xf32>
    %273 = arith.divf %271, %272 : vector<8x128xf32>
    %274 = vector.extract_strided_slice %261 {offsets = [0, 256], sizes = [8, 128], strides = [1, 1]} : vector<8x512xf32> to vector<8x128xf32>
    %275 = math.tanh %274 : vector<8x128xf32>
    %276 = vector.extract_strided_slice %261 {offsets = [0, 384], sizes = [8, 128], strides = [1, 1]} : vector<8x512xf32> to vector<8x128xf32>
    %277 = arith.negf %276 : vector<8x128xf32>
    %278 = math.exp %277 : vector<8x128xf32>
    %cst_65 = arith.constant 1.000000e+00 : f32
    %279 = vector.broadcast %cst_65 : f32 to vector<8x128xf32>
    %280 = arith.addf %279, %278 : vector<8x128xf32>
    %281 = arith.divf %279, %280 : vector<8x128xf32>
    %282 = arith.mulf %273, %223 : vector<8x128xf32>
    %283 = arith.mulf %267, %275 : vector<8x128xf32>
    %284 = arith.addf %282, %283 : vector<8x128xf32>
    %285 = math.tanh %284 : vector<8x128xf32>
    %286 = arith.mulf %281, %285 : vector<8x128xf32>
    %cst_66 = arith.constant dense<0.000000e+00> : vector<8x512xf32>
    %287 = tpu.matmul %286, %2, %cst_66 {dimension_numbers = #tpu.dot_dimension_numbers<[1], [0], [0], [1], [0, 0, 1, 1], [], []>} : vector<8x128xf32>, vector<128x512xf32>, vector<8x512xf32> -> vector<8x512xf32>
    %cst_67 = arith.constant dense<0.000000e+00> : vector<8x512xf32>
    %288 = tpu.matmul %254, %3, %cst_67 {dimension_numbers = #tpu.dot_dimension_numbers<[1], [0], [0], [1], [0, 0, 1, 1], [], []>} : vector<8x128xf32>, vector<128x512xf32>, vector<8x512xf32> -> vector<8x512xf32>
    %289 = arith.addf %287, %288 : vector<8x512xf32>
    %290 = arith.addf %289, %9 : vector<8x512xf32>
    %291 = vector.extract_strided_slice %290 {offsets = [0, 0], sizes = [8, 128], strides = [1, 1]} : vector<8x512xf32> to vector<8x128xf32>
    %292 = arith.negf %291 : vector<8x128xf32>
    %293 = math.exp %292 : vector<8x128xf32>
    %cst_68 = arith.constant 1.000000e+00 : f32
    %294 = vector.broadcast %cst_68 : f32 to vector<8x128xf32>
    %295 = arith.addf %294, %293 : vector<8x128xf32>
    %296 = arith.divf %294, %295 : vector<8x128xf32>
    %297 = vector.extract_strided_slice %290 {offsets = [0, 128], sizes = [8, 128], strides = [1, 1]} : vector<8x512xf32> to vector<8x128xf32>
    %298 = arith.negf %297 : vector<8x128xf32>
    %299 = math.exp %298 : vector<8x128xf32>
    %cst_69 = arith.constant 1.000000e+00 : f32
    %300 = vector.broadcast %cst_69 : f32 to vector<8x128xf32>
    %301 = arith.addf %300, %299 : vector<8x128xf32>
    %302 = arith.divf %300, %301 : vector<8x128xf32>
    %303 = vector.extract_strided_slice %290 {offsets = [0, 256], sizes = [8, 128], strides = [1, 1]} : vector<8x512xf32> to vector<8x128xf32>
    %304 = math.tanh %303 : vector<8x128xf32>
    %305 = vector.extract_strided_slice %290 {offsets = [0, 384], sizes = [8, 128], strides = [1, 1]} : vector<8x512xf32> to vector<8x128xf32>
    %306 = arith.negf %305 : vector<8x128xf32>
    %307 = math.exp %306 : vector<8x128xf32>
    %cst_70 = arith.constant 1.000000e+00 : f32
    %308 = vector.broadcast %cst_70 : f32 to vector<8x128xf32>
    %309 = arith.addf %308, %307 : vector<8x128xf32>
    %310 = arith.divf %308, %309 : vector<8x128xf32>
    %311 = arith.mulf %302, %252 : vector<8x128xf32>
    %312 = arith.mulf %296, %304 : vector<8x128xf32>
    %313 = arith.addf %311, %312 : vector<8x128xf32>
    %314 = math.tanh %313 : vector<8x128xf32>
    %315 = arith.mulf %310, %314 : vector<8x128xf32>
    %c5_i32 = arith.constant 5 : i32
    %316 = arith.index_cast %c5_i32 : i32 to index
    %c0_71 = arith.constant 0 : index
    %c0_72 = arith.constant 0 : index
    %317 = vector.load %arg0[%316, %c0_71, %c0_72] : memref<8x8x2xf32, #tpu.memory_space<vmem>>, vector<1x8x2xf32>
    %318 = vector.shape_cast %317 : vector<1x8x2xf32> to vector<8x2xf32>
    %cst_73 = arith.constant dense<0.000000e+00> : vector<8x512xf32>
    %319 = tpu.matmul %318, %0, %cst_73 {dimension_numbers = #tpu.dot_dimension_numbers<[1], [0], [0], [1], [0, 0, 1, 1], [], []>} : vector<8x2xf32>, vector<2x512xf32>, vector<8x512xf32> -> vector<8x512xf32>
    %cst_74 = arith.constant dense<0.000000e+00> : vector<8x512xf32>
    %320 = tpu.matmul %286, %1, %cst_74 {dimension_numbers = #tpu.dot_dimension_numbers<[1], [0], [0], [1], [0, 0, 1, 1], [], []>} : vector<8x128xf32>, vector<128x512xf32>, vector<8x512xf32> -> vector<8x512xf32>
    %321 = arith.addf %319, %320 : vector<8x512xf32>
    %322 = arith.addf %321, %6 : vector<8x512xf32>
    %323 = vector.extract_strided_slice %322 {offsets = [0, 0], sizes = [8, 128], strides = [1, 1]} : vector<8x512xf32> to vector<8x128xf32>
    %324 = arith.negf %323 : vector<8x128xf32>
    %325 = math.exp %324 : vector<8x128xf32>
    %cst_75 = arith.constant 1.000000e+00 : f32
    %326 = vector.broadcast %cst_75 : f32 to vector<8x128xf32>
    %327 = arith.addf %326, %325 : vector<8x128xf32>
    %328 = arith.divf %326, %327 : vector<8x128xf32>
    %329 = vector.extract_strided_slice %322 {offsets = [0, 128], sizes = [8, 128], strides = [1, 1]} : vector<8x512xf32> to vector<8x128xf32>
    %330 = arith.negf %329 : vector<8x128xf32>
    %331 = math.exp %330 : vector<8x128xf32>
    %cst_76 = arith.constant 1.000000e+00 : f32
    %332 = vector.broadcast %cst_76 : f32 to vector<8x128xf32>
    %333 = arith.addf %332, %331 : vector<8x128xf32>
    %334 = arith.divf %332, %333 : vector<8x128xf32>
    %335 = vector.extract_strided_slice %322 {offsets = [0, 256], sizes = [8, 128], strides = [1, 1]} : vector<8x512xf32> to vector<8x128xf32>
    %336 = math.tanh %335 : vector<8x128xf32>
    %337 = vector.extract_strided_slice %322 {offsets = [0, 384], sizes = [8, 128], strides = [1, 1]} : vector<8x512xf32> to vector<8x128xf32>
    %338 = arith.negf %337 : vector<8x128xf32>
    %339 = math.exp %338 : vector<8x128xf32>
    %cst_77 = arith.constant 1.000000e+00 : f32
    %340 = vector.broadcast %cst_77 : f32 to vector<8x128xf32>
    %341 = arith.addf %340, %339 : vector<8x128xf32>
    %342 = arith.divf %340, %341 : vector<8x128xf32>
    %343 = arith.mulf %334, %284 : vector<8x128xf32>
    %344 = arith.mulf %328, %336 : vector<8x128xf32>
    %345 = arith.addf %343, %344 : vector<8x128xf32>
    %346 = math.tanh %345 : vector<8x128xf32>
    %347 = arith.mulf %342, %346 : vector<8x128xf32>
    %cst_78 = arith.constant dense<0.000000e+00> : vector<8x512xf32>
    %348 = tpu.matmul %347, %2, %cst_78 {dimension_numbers = #tpu.dot_dimension_numbers<[1], [0], [0], [1], [0, 0, 1, 1], [], []>} : vector<8x128xf32>, vector<128x512xf32>, vector<8x512xf32> -> vector<8x512xf32>
    %cst_79 = arith.constant dense<0.000000e+00> : vector<8x512xf32>
    %349 = tpu.matmul %315, %3, %cst_79 {dimension_numbers = #tpu.dot_dimension_numbers<[1], [0], [0], [1], [0, 0, 1, 1], [], []>} : vector<8x128xf32>, vector<128x512xf32>, vector<8x512xf32> -> vector<8x512xf32>
    %350 = arith.addf %348, %349 : vector<8x512xf32>
    %351 = arith.addf %350, %9 : vector<8x512xf32>
    %352 = vector.extract_strided_slice %351 {offsets = [0, 0], sizes = [8, 128], strides = [1, 1]} : vector<8x512xf32> to vector<8x128xf32>
    %353 = arith.negf %352 : vector<8x128xf32>
    %354 = math.exp %353 : vector<8x128xf32>
    %cst_80 = arith.constant 1.000000e+00 : f32
    %355 = vector.broadcast %cst_80 : f32 to vector<8x128xf32>
    %356 = arith.addf %355, %354 : vector<8x128xf32>
    %357 = arith.divf %355, %356 : vector<8x128xf32>
    %358 = vector.extract_strided_slice %351 {offsets = [0, 128], sizes = [8, 128], strides = [1, 1]} : vector<8x512xf32> to vector<8x128xf32>
    %359 = arith.negf %358 : vector<8x128xf32>
    %360 = math.exp %359 : vector<8x128xf32>
    %cst_81 = arith.constant 1.000000e+00 : f32
    %361 = vector.broadcast %cst_81 : f32 to vector<8x128xf32>
    %362 = arith.addf %361, %360 : vector<8x128xf32>
    %363 = arith.divf %361, %362 : vector<8x128xf32>
    %364 = vector.extract_strided_slice %351 {offsets = [0, 256], sizes = [8, 128], strides = [1, 1]} : vector<8x512xf32> to vector<8x128xf32>
    %365 = math.tanh %364 : vector<8x128xf32>
    %366 = vector.extract_strided_slice %351 {offsets = [0, 384], sizes = [8, 128], strides = [1, 1]} : vector<8x512xf32> to vector<8x128xf32>
    %367 = arith.negf %366 : vector<8x128xf32>
    %368 = math.exp %367 : vector<8x128xf32>
    %cst_82 = arith.constant 1.000000e+00 : f32
    %369 = vector.broadcast %cst_82 : f32 to vector<8x128xf32>
    %370 = arith.addf %369, %368 : vector<8x128xf32>
    %371 = arith.divf %369, %370 : vector<8x128xf32>
    %372 = arith.mulf %363, %313 : vector<8x128xf32>
    %373 = arith.mulf %357, %365 : vector<8x128xf32>
    %374 = arith.addf %372, %373 : vector<8x128xf32>
    %375 = math.tanh %374 : vector<8x128xf32>
    %376 = arith.mulf %371, %375 : vector<8x128xf32>
    %c6_i32 = arith.constant 6 : i32
    %377 = arith.index_cast %c6_i32 : i32 to index
    %c0_83 = arith.constant 0 : index
    %c0_84 = arith.constant 0 : index
    %378 = vector.load %arg0[%377, %c0_83, %c0_84] : memref<8x8x2xf32, #tpu.memory_space<vmem>>, vector<1x8x2xf32>
    %379 = vector.shape_cast %378 : vector<1x8x2xf32> to vector<8x2xf32>
    %cst_85 = arith.constant dense<0.000000e+00> : vector<8x512xf32>
    %380 = tpu.matmul %379, %0, %cst_85 {dimension_numbers = #tpu.dot_dimension_numbers<[1], [0], [0], [1], [0, 0, 1, 1], [], []>} : vector<8x2xf32>, vector<2x512xf32>, vector<8x512xf32> -> vector<8x512xf32>
    %cst_86 = arith.constant dense<0.000000e+00> : vector<8x512xf32>
    %381 = tpu.matmul %347, %1, %cst_86 {dimension_numbers = #tpu.dot_dimension_numbers<[1], [0], [0], [1], [0, 0, 1, 1], [], []>} : vector<8x128xf32>, vector<128x512xf32>, vector<8x512xf32> -> vector<8x512xf32>
    %382 = arith.addf %380, %381 : vector<8x512xf32>
    %383 = arith.addf %382, %6 : vector<8x512xf32>
    %384 = vector.extract_strided_slice %383 {offsets = [0, 0], sizes = [8, 128], strides = [1, 1]} : vector<8x512xf32> to vector<8x128xf32>
    %385 = arith.negf %384 : vector<8x128xf32>
    %386 = math.exp %385 : vector<8x128xf32>
    %cst_87 = arith.constant 1.000000e+00 : f32
    %387 = vector.broadcast %cst_87 : f32 to vector<8x128xf32>
    %388 = arith.addf %387, %386 : vector<8x128xf32>
    %389 = arith.divf %387, %388 : vector<8x128xf32>
    %390 = vector.extract_strided_slice %383 {offsets = [0, 128], sizes = [8, 128], strides = [1, 1]} : vector<8x512xf32> to vector<8x128xf32>
    %391 = arith.negf %390 : vector<8x128xf32>
    %392 = math.exp %391 : vector<8x128xf32>
    %cst_88 = arith.constant 1.000000e+00 : f32
    %393 = vector.broadcast %cst_88 : f32 to vector<8x128xf32>
    %394 = arith.addf %393, %392 : vector<8x128xf32>
    %395 = arith.divf %393, %394 : vector<8x128xf32>
    %396 = vector.extract_strided_slice %383 {offsets = [0, 256], sizes = [8, 128], strides = [1, 1]} : vector<8x512xf32> to vector<8x128xf32>
    %397 = math.tanh %396 : vector<8x128xf32>
    %398 = vector.extract_strided_slice %383 {offsets = [0, 384], sizes = [8, 128], strides = [1, 1]} : vector<8x512xf32> to vector<8x128xf32>
    %399 = arith.negf %398 : vector<8x128xf32>
    %400 = math.exp %399 : vector<8x128xf32>
    %cst_89 = arith.constant 1.000000e+00 : f32
    %401 = vector.broadcast %cst_89 : f32 to vector<8x128xf32>
    %402 = arith.addf %401, %400 : vector<8x128xf32>
    %403 = arith.divf %401, %402 : vector<8x128xf32>
    %404 = arith.mulf %395, %345 : vector<8x128xf32>
    %405 = arith.mulf %389, %397 : vector<8x128xf32>
    %406 = arith.addf %404, %405 : vector<8x128xf32>
    %407 = math.tanh %406 : vector<8x128xf32>
    %408 = arith.mulf %403, %407 : vector<8x128xf32>
    %cst_90 = arith.constant dense<0.000000e+00> : vector<8x512xf32>
    %409 = tpu.matmul %408, %2, %cst_90 {dimension_numbers = #tpu.dot_dimension_numbers<[1], [0], [0], [1], [0, 0, 1, 1], [], []>} : vector<8x128xf32>, vector<128x512xf32>, vector<8x512xf32> -> vector<8x512xf32>
    %cst_91 = arith.constant dense<0.000000e+00> : vector<8x512xf32>
    %410 = tpu.matmul %376, %3, %cst_91 {dimension_numbers = #tpu.dot_dimension_numbers<[1], [0], [0], [1], [0, 0, 1, 1], [], []>} : vector<8x128xf32>, vector<128x512xf32>, vector<8x512xf32> -> vector<8x512xf32>
    %411 = arith.addf %409, %410 : vector<8x512xf32>
    %412 = arith.addf %411, %9 : vector<8x512xf32>
    %413 = vector.extract_strided_slice %412 {offsets = [0, 0], sizes = [8, 128], strides = [1, 1]} : vector<8x512xf32> to vector<8x128xf32>
    %414 = arith.negf %413 : vector<8x128xf32>
    %415 = math.exp %414 : vector<8x128xf32>
    %cst_92 = arith.constant 1.000000e+00 : f32
    %416 = vector.broadcast %cst_92 : f32 to vector<8x128xf32>
    %417 = arith.addf %416, %415 : vector<8x128xf32>
    %418 = arith.divf %416, %417 : vector<8x128xf32>
    %419 = vector.extract_strided_slice %412 {offsets = [0, 128], sizes = [8, 128], strides = [1, 1]} : vector<8x512xf32> to vector<8x128xf32>
    %420 = arith.negf %419 : vector<8x128xf32>
    %421 = math.exp %420 : vector<8x128xf32>
    %cst_93 = arith.constant 1.000000e+00 : f32
    %422 = vector.broadcast %cst_93 : f32 to vector<8x128xf32>
    %423 = arith.addf %422, %421 : vector<8x128xf32>
    %424 = arith.divf %422, %423 : vector<8x128xf32>
    %425 = vector.extract_strided_slice %412 {offsets = [0, 256], sizes = [8, 128], strides = [1, 1]} : vector<8x512xf32> to vector<8x128xf32>
    %426 = math.tanh %425 : vector<8x128xf32>
    %427 = vector.extract_strided_slice %412 {offsets = [0, 384], sizes = [8, 128], strides = [1, 1]} : vector<8x512xf32> to vector<8x128xf32>
    %428 = arith.negf %427 : vector<8x128xf32>
    %429 = math.exp %428 : vector<8x128xf32>
    %cst_94 = arith.constant 1.000000e+00 : f32
    %430 = vector.broadcast %cst_94 : f32 to vector<8x128xf32>
    %431 = arith.addf %430, %429 : vector<8x128xf32>
    %432 = arith.divf %430, %431 : vector<8x128xf32>
    %433 = arith.mulf %424, %374 : vector<8x128xf32>
    %434 = arith.mulf %418, %426 : vector<8x128xf32>
    %435 = arith.addf %433, %434 : vector<8x128xf32>
    %436 = math.tanh %435 : vector<8x128xf32>
    %437 = arith.mulf %432, %436 : vector<8x128xf32>
    %c7_i32 = arith.constant 7 : i32
    %438 = arith.index_cast %c7_i32 : i32 to index
    %c0_95 = arith.constant 0 : index
    %c0_96 = arith.constant 0 : index
    %439 = vector.load %arg0[%438, %c0_95, %c0_96] : memref<8x8x2xf32, #tpu.memory_space<vmem>>, vector<1x8x2xf32>
    %440 = vector.shape_cast %439 : vector<1x8x2xf32> to vector<8x2xf32>
    %cst_97 = arith.constant dense<0.000000e+00> : vector<8x512xf32>
    %441 = tpu.matmul %440, %0, %cst_97 {dimension_numbers = #tpu.dot_dimension_numbers<[1], [0], [0], [1], [0, 0, 1, 1], [], []>} : vector<8x2xf32>, vector<2x512xf32>, vector<8x512xf32> -> vector<8x512xf32>
    %cst_98 = arith.constant dense<0.000000e+00> : vector<8x512xf32>
    %442 = tpu.matmul %408, %1, %cst_98 {dimension_numbers = #tpu.dot_dimension_numbers<[1], [0], [0], [1], [0, 0, 1, 1], [], []>} : vector<8x128xf32>, vector<128x512xf32>, vector<8x512xf32> -> vector<8x512xf32>
    %443 = arith.addf %441, %442 : vector<8x512xf32>
    %444 = arith.addf %443, %6 : vector<8x512xf32>
    %445 = vector.extract_strided_slice %444 {offsets = [0, 0], sizes = [8, 128], strides = [1, 1]} : vector<8x512xf32> to vector<8x128xf32>
    %446 = arith.negf %445 : vector<8x128xf32>
    %447 = math.exp %446 : vector<8x128xf32>
    %cst_99 = arith.constant 1.000000e+00 : f32
    %448 = vector.broadcast %cst_99 : f32 to vector<8x128xf32>
    %449 = arith.addf %448, %447 : vector<8x128xf32>
    %450 = arith.divf %448, %449 : vector<8x128xf32>
    %451 = vector.extract_strided_slice %444 {offsets = [0, 128], sizes = [8, 128], strides = [1, 1]} : vector<8x512xf32> to vector<8x128xf32>
    %452 = arith.negf %451 : vector<8x128xf32>
    %453 = math.exp %452 : vector<8x128xf32>
    %cst_100 = arith.constant 1.000000e+00 : f32
    %454 = vector.broadcast %cst_100 : f32 to vector<8x128xf32>
    %455 = arith.addf %454, %453 : vector<8x128xf32>
    %456 = arith.divf %454, %455 : vector<8x128xf32>
    %457 = vector.extract_strided_slice %444 {offsets = [0, 256], sizes = [8, 128], strides = [1, 1]} : vector<8x512xf32> to vector<8x128xf32>
    %458 = math.tanh %457 : vector<8x128xf32>
    %459 = vector.extract_strided_slice %444 {offsets = [0, 384], sizes = [8, 128], strides = [1, 1]} : vector<8x512xf32> to vector<8x128xf32>
    %460 = arith.negf %459 : vector<8x128xf32>
    %461 = math.exp %460 : vector<8x128xf32>
    %cst_101 = arith.constant 1.000000e+00 : f32
    %462 = vector.broadcast %cst_101 : f32 to vector<8x128xf32>
    %463 = arith.addf %462, %461 : vector<8x128xf32>
    %464 = arith.divf %462, %463 : vector<8x128xf32>
    %465 = arith.mulf %456, %406 : vector<8x128xf32>
    %466 = arith.mulf %450, %458 : vector<8x128xf32>
    %467 = arith.addf %465, %466 : vector<8x128xf32>
    %468 = math.tanh %467 : vector<8x128xf32>
    %469 = arith.mulf %464, %468 : vector<8x128xf32>
    %cst_102 = arith.constant dense<0.000000e+00> : vector<8x512xf32>
    %470 = tpu.matmul %469, %2, %cst_102 {dimension_numbers = #tpu.dot_dimension_numbers<[1], [0], [0], [1], [0, 0, 1, 1], [], []>} : vector<8x128xf32>, vector<128x512xf32>, vector<8x512xf32> -> vector<8x512xf32>
    %cst_103 = arith.constant dense<0.000000e+00> : vector<8x512xf32>
    %471 = tpu.matmul %437, %3, %cst_103 {dimension_numbers = #tpu.dot_dimension_numbers<[1], [0], [0], [1], [0, 0, 1, 1], [], []>} : vector<8x128xf32>, vector<128x512xf32>, vector<8x512xf32> -> vector<8x512xf32>
    %472 = arith.addf %470, %471 : vector<8x512xf32>
    %473 = arith.addf %472, %9 : vector<8x512xf32>
    %474 = vector.extract_strided_slice %473 {offsets = [0, 0], sizes = [8, 128], strides = [1, 1]} : vector<8x512xf32> to vector<8x128xf32>
    %475 = arith.negf %474 : vector<8x128xf32>
    %476 = math.exp %475 : vector<8x128xf32>
    %cst_104 = arith.constant 1.000000e+00 : f32
    %477 = vector.broadcast %cst_104 : f32 to vector<8x128xf32>
    %478 = arith.addf %477, %476 : vector<8x128xf32>
    %479 = arith.divf %477, %478 : vector<8x128xf32>
    %480 = vector.extract_strided_slice %473 {offsets = [0, 128], sizes = [8, 128], strides = [1, 1]} : vector<8x512xf32> to vector<8x128xf32>
    %481 = arith.negf %480 : vector<8x128xf32>
    %482 = math.exp %481 : vector<8x128xf32>
    %cst_105 = arith.constant 1.000000e+00 : f32
    %483 = vector.broadcast %cst_105 : f32 to vector<8x128xf32>
    %484 = arith.addf %483, %482 : vector<8x128xf32>
    %485 = arith.divf %483, %484 : vector<8x128xf32>
    %486 = vector.extract_strided_slice %473 {offsets = [0, 256], sizes = [8, 128], strides = [1, 1]} : vector<8x512xf32> to vector<8x128xf32>
    %487 = math.tanh %486 : vector<8x128xf32>
    %488 = vector.extract_strided_slice %473 {offsets = [0, 384], sizes = [8, 128], strides = [1, 1]} : vector<8x512xf32> to vector<8x128xf32>
    %489 = arith.negf %488 : vector<8x128xf32>
    %490 = math.exp %489 : vector<8x128xf32>
    %cst_106 = arith.constant 1.000000e+00 : f32
    %491 = vector.broadcast %cst_106 : f32 to vector<8x128xf32>
    %492 = arith.addf %491, %490 : vector<8x128xf32>
    %493 = arith.divf %491, %492 : vector<8x128xf32>
    %494 = arith.mulf %485, %435 : vector<8x128xf32>
    %495 = arith.mulf %479, %487 : vector<8x128xf32>
    %496 = arith.addf %494, %495 : vector<8x128xf32>
    %497 = math.tanh %496 : vector<8x128xf32>
    %498 = arith.mulf %493, %497 : vector<8x128xf32>
    %c8_i32 = arith.constant 8 : i32
    %c0_107 = arith.constant 0 : index
    %c0_108 = arith.constant 0 : index
    %499 = vector.load %arg7[%c0_107, %c0_108] : memref<128x4xf32, #tpu.memory_space<vmem>>, vector<128x4xf32>
    %cst_109 = arith.constant dense<0.000000e+00> : vector<8x4xf32>
    %500 = tpu.matmul %498, %499, %cst_109 {dimension_numbers = #tpu.dot_dimension_numbers<[1], [0], [0], [1], [0, 0, 1, 1], [], []>} : vector<8x128xf32>, vector<128x4xf32>, vector<8x4xf32> -> vector<8x4xf32>
    %c0_110 = arith.constant 0 : index
    %c0_111 = arith.constant 0 : index
    %501 = vector.load %arg8[%c0_110, %c0_111] : memref<1x4xf32, #tpu.memory_space<vmem>>, vector<1x4xf32>
    %502 = vector.broadcast %501 : vector<1x4xf32> to vector<8x4xf32>
    %503 = arith.addf %500, %502 : vector<8x4xf32>
    %c0_112 = arith.constant 0 : index
    %c0_113 = arith.constant 0 : index
    %504 = vector.load %arg9[%c0_112, %c0_113] : memref<8x4xf32, #tpu.memory_space<vmem>>, vector<8x4xf32>
    tpu.vector_store %arg9[%c0_112, %c0_113], %503 {strides = array<i32>} : memref<8x4xf32, #tpu.memory_space<vmem>>, vector<8x4xf32>,
    return
  }
}

</mosaic_0001>

<bundles_post_ra>
// kernel: tpu_custom_call.1
= control target key start
LH: loop header
LB: loop body
LE: loop exit
PB: predicated region body
PF: predicated region fallthrough
CT: control target
= control target key end

     0   :  { %14 = vsyncpa [#allocation3], 0  ;;  %s9004_s0 = inlined_call_operand.vmem [shape: f32[8,8,2], index: 0, kind: input, shape index: {}]   ;;  %s9005_s1 = inlined_call_operand.vmem [shape: f32[2,512], index: 1, kind: input, shape index: {}]   ;;  %s9006_s2 = inlined_call_operand.hbm [shape: f32[128,512], index: 2, kind: input, shape index: {}]   ;;  %s9007_s3 = inlined_call_operand.vmem [shape: f32[1,512], index: 3, kind: input, shape index: {}]   ;;  %s9008_s4 = inlined_call_operand.hbm [shape: f32[128,512], index: 4, kind: input, shape index: {}]   ;;  %s9009_s5 = inlined_call_operand.hbm [shape: f32[128,512], index: 5, kind: input, shape index: {}]   ;;  %s9010_s6 = inlined_call_operand.vmem [shape: f32[1,512], index: 6, kind: input, shape index: {}]   ;;  %s9011_s7 = inlined_call_operand.vmem [shape: f32[128,4], index: 7, kind: input, shape index: {}]   ;;  %s9012_s8 = inlined_call_operand.vmem [shape: f32[1,4], index: 8, kind: input, shape index: {}]   ;;  %s9013_s9 = inlined_call_operand.vmem [shape: f32[8,4], index: 9, kind: output, shape index: {}]  }
   0x1   :  { %15 = vsyncpa [#allocation5], 0  ;;  %s39_s11 = sshll.u32 %s9008_s4, 4  ;;  %s5152_s12 = smov [#allocation4]   ;;  %s40_s11 = int_to_ptr.hbm [resolvable:$true] %s39_s11 }
   0x2   :  { %s41_s13 = sshll.u32 %s5152_s12, 4  ;;  %s24_s16 = sshll.u32 %s9006_s2, 4  ;;  %s42_s13 = int_to_ptr.vmem [resolvable:$true] %s41_s13  ;;  %s25_s16 = int_to_ptr.hbm [resolvable:$true] %s24_s16 }
   0x3   :  { %s5153_s17 = smov 512   ;;  %s5154_s18 = smov 32  }
   0x4   :  { %47 = dma.hbm_to_vmem [thread:$0]  %s40_s11, 8192, %s42_s13, [#allocation5], %s5153_s17, %s5153_s17, %s5154_s18  }
   0x5   :  { %s5155_s19 = smov [#allocation2]   ;;  %s52_s23 = sshll.u32 %s9009_s5, 4  ;;  %s53_s23 = int_to_ptr.hbm [resolvable:$true] %s52_s23 }
   0x6   :  { %s26_s20 = sshll.u32 %s5155_s19, 4  ;;  %s5156_s4 = smov [#allocation6]   ;;  %s27_s20 = int_to_ptr.vmem [resolvable:$true] %s26_s20 }
   0x7   :  { %32 = dma.hbm_to_vmem [thread:$0]  %s25_s16, 8192, %s27_s20, [#allocation3], %s5153_s17, %s5153_s17, %s5154_s18  }
   0x8   :  { %s54_s24 = sshll.u32 %s5156_s4, 4  ;;  %s55_s24 = int_to_ptr.vmem [resolvable:$true] %s54_s24 }
   0x9   :  { %60 = dma.hbm_to_vmem [thread:$0]  %s53_s23, 8192, %s55_s24, [#allocation5], %s5153_s17, %s5153_s17, %s5154_s18  }
   0xa   :  { %5148 = dma.done.wait [#allocation3], 8192  }
   0xb   :  { %5149 = vsyncadd [#allocation3], 4294959104 }
   0xc   :  { %5150 = dma.done.wait [#allocation5], 16384  }
   0xd   :  { %5151 = vsyncadd [#allocation5], 4294950912  ;;  %v5217_v0 = vld [vmem:[#allocation2 + $0x1e8] sm:$0xff]  ;;  %v5219_v1 = vld [vmem:[#allocation2 + $0x1f8] sm:$0xff]  ;;  %vm383_vm0 = vcmask 1041408   ;;  %vm379_vm1 = vcmask 15360  }
   0xe   :  { %v5221_v2 = vld [vmem:[#allocation2 + $0x1c8] sm:$0xff]  ;;  %313 = vmatpush.msra.mxu1 %v5217_v0  ;;  %353 = vmatpush.msra.mxu3 %v5219_v1  ;;  %v5225_v3 = vld [vmem:[#allocation2 + $0x1d8] sm:$0xff]  ;;  %v5231_v6 = vld [vmem:[#allocation2 + $0x1e0] sm:$0xff] }
   0xf   :  { %v5227_v4 = vld [vmem:[#allocation2 + $0x1a8] sm:$0xff]  ;;  %v5229_v5 = vld [vmem:[#allocation2 + $0x1b8] sm:$0xff]  ;;  %v5235_v7 = vld [vmem:[#allocation2 + $0x1c0] sm:$0xff]  ;;  %293 = vmatpush.msra.mxu0 %v5231_v6 }
  0x10   :  { %314 = vmatpush.msra.mxu1 %v5221_v2  ;;  %354 = vmatpush.msra.mxu3 %v5225_v3  ;;  %v5237_v8 = vld [vmem:[#allocation2 + $0x188] sm:$0xff]  ;;  %v5239_v9 = vld [vmem:[#allocation2 + $0x198] sm:$0xff]  ;;  %v5244_v10 = vld [vmem:[#allocation2 + $0x1a0] sm:$0xff] }
  0x11   :  { %v5246_v11 = vld [vmem:[#allocation2 + $0x168] sm:$0xff]  ;;  %v5248_v12 = vld [vmem:[#allocation2 + $0x178] sm:$0xff]  ;;  %294 = vmatpush.msra.mxu0 %v5235_v7  ;;  %v5251_v13 = vld [vmem:[#allocation2 + $0x1f0] sm:$0xff] }
  0x12   :  { %315 = vmatpush.msra.mxu1 %v5227_v4  ;;  %355 = vmatpush.msra.mxu3 %v5229_v5  ;;  %v5255_v14 = vld [vmem:[#allocation2 + $0x180] sm:$0xff]  ;;  %v5257_v15 = vld [vmem:[#allocation2 + $0x148] sm:$0xff]  ;;  %v5259_v16 = vld [vmem:[#allocation2 + $0x158] sm:$0xff] }
  0x13   :  { %295 = vmatpush.msra.mxu0 %v5244_v10  ;;  %333 = vmatpush.msra.mxu2 %v5251_v13  ;;  %v5263_v17 = vld [vmem:[#allocation2 + $0x1d0] sm:$0xff]  ;;  %v5267_v18 = vld [vmem:[#allocation2 + $0x160] sm:$0xff]  ;;  %v5271_v20 = vld [vmem:[#allocation2 + $0x128] sm:$0xff] }
  0x14   :  { %316 = vmatpush.msra.mxu1 %v5237_v8  ;;  %356 = vmatpush.msra.mxu3 %v5239_v9  ;;  %v5269_v19 = vld [vmem:[#allocation2 + $0x1b0] sm:$0xff]  ;;  %v5273_v21 = vld [vmem:[#allocation2 + $0x138] sm:$0xff]  ;;  %v5279_v22 = vld [vmem:[#allocation2 + $0x140] sm:$0xff] }
  0x15   :  { %296 = vmatpush.msra.mxu0 %v5255_v14  ;;  %334 = vmatpush.msra.mxu2 %v5263_v17  ;;  %v5281_v23 = vld [vmem:[#allocation2 + $0x190] sm:$0xff]  ;;  %v5283_v24 = vld [vmem:[#allocation2 + $0x108] sm:$0xff]  ;;  %v5285_v25 = vld [vmem:[#allocation2 + $0x118] sm:$0xff] }
  0x16   :  { %317 = vmatpush.msra.mxu1 %v5246_v11  ;;  %357 = vmatpush.msra.mxu3 %v5248_v12  ;;  %v5291_v26 = vld [vmem:[#allocation2 + $0x120] sm:$0xff]  ;;  %v5293_v27 = vld [vmem:[#allocation2 + $0x170] sm:$0xff]  ;;  %v5295_v28 = vld [vmem:[#allocation2 + $0xe8] sm:$0xff] }
  0x17   :  { %297 = vmatpush.msra.mxu0 %v5267_v18  ;;  %335 = vmatpush.msra.mxu2 %v5269_v19  ;;  %v5297_v29 = vld [vmem:[#allocation2 + $0xf8] sm:$0xff]  ;;  %v5303_v30 = vld [vmem:[#allocation2 + $0x100] sm:$0xff]  ;;  %v5305_v31 = vld [vmem:[#allocation2 + $0x150] sm:$0xff] }
  0x18   :  { %318 = vmatpush.msra.mxu1 %v5257_v15  ;;  %358 = vmatpush.msra.mxu3 %v5259_v16  ;;  %v5307_v32 = vld [vmem:[#allocation2 + $0xc8] sm:$0xff]  ;;  %v5309_v33 = vld [vmem:[#allocation2 + $0xd8] sm:$0xff]  ;;  %v5315_v34 = vld [vmem:[#allocation2 + $0xe0] sm:$0xff] }
  0x19   :  { %298 = vmatpush.msra.mxu0 %v5279_v22  ;;  %336 = vmatpush.msra.mxu2 %v5281_v23  ;;  %v5317_v35 = vld [vmem:[#allocation2 + $0x130] sm:$0xff]  ;;  %v5322_v36 = vld [vmem:[%s9005_s1] sm:$0xff]  ;;  %v5324_v37 = vld [vmem:[#allocation2 + $0xa8] sm:$0xff] }
  0x1a   :  { %319 = vmatpush.msra.mxu1 %v5271_v20  ;;  %359 = vmatpush.msra.mxu3 %v5273_v21  ;;  %9664 = vst [vmem:[#allocation9_spill] sm:$0xff] %v5322_v36  ;;  %v5326_v38 = vld [vmem:[#allocation2 + $0xb8] sm:$0xff]  ;;  %v5333_v39 = vld [vmem:[#allocation2 + $0xc0] sm:$0xff]  ;;  %v5335_v40 = vld [vmem:[#allocation2 + $0x110] sm:$0xff] }
  0x1b   :  { %299 = vmatpush.msra.mxu0 %v5291_v26  ;;  %337 = vmatpush.msra.mxu2 %v5293_v27  ;;  %374 = vst [vmem:[#allocation1] ss:$4 sm:$0xff] %v5322_v36  ;;  %v5337_v41 = vld [vmem:[#allocation2 + $0x88] sm:$0xff]  ;;  %v5339_v42 = vld [vmem:[#allocation2 + $0x98] sm:$0xff]  ;;  %v5345_v43 = vld [vmem:[#allocation2 + $0xa0] sm:$0xff] }
  0x1c   :  { %320 = vmatpush.msra.mxu1 %v5283_v24  ;;  %360 = vmatpush.msra.mxu3 %v5285_v25  ;;  %v5347_v44 = vld [vmem:[#allocation2 + $0xf0] sm:$0xff]  ;;  %v5349_v45 = vld [vmem:[#allocation2 + $0x68] sm:$0xff]  ;;  %v5351_v46 = vld [vmem:[#allocation2 + $0x78] sm:$0xff] }
  0x1d   :  { %300 = vmatpush.msra.mxu0 %v5303_v30  ;;  %338 = vmatpush.msra.mxu2 %v5305_v31  ;;  %9665 = vst [vmem:[#allocation10_spill] sm:$0xff] %v5351_v46  ;;  %v5354_v47 = vld [vmem:[#allocation2 + $0x48] sm:$0xff]  ;;  %v5359_v48 = vld [vmem:[#allocation2 + $0x58] sm:$0xff]  ;;  %v5361_v49 = vld [vmem:[#allocation2 + $0x80] sm:$0xff] }
  0x1e   :  { %321 = vmatpush.msra.mxu1 %v5295_v28  ;;  %361 = vmatpush.msra.mxu3 %v5297_v29  ;;  %9666 = vst [vmem:[#allocation11_spill] sm:$0xff] %v5354_v47  ;;  %v5363_v50 = vld [vmem:[#allocation2 + $0xd0] sm:$0xff]  ;;  %v5366_v51 = vld [vmem:[#allocation2 + $0x28] sm:$0xff]  ;;  %v5368_v52 = vld [vmem:[#allocation2 + $0x38] sm:$0xff] }
  0x1f   :  { %301 = vmatpush.msra.mxu0 %v5315_v34  ;;  %339 = vmatpush.msra.mxu2 %v5317_v35  ;;  %9667 = vst [vmem:[#allocation12_spill] sm:$0xff] %v5359_v48  ;;  %v5371_v53 = vld [vmem:[#allocation2 + $0x60] sm:$0xff]  ;;  %v5373_v54 = vld [vmem:[#allocation2 + $0xb0] sm:$0xff]  ;;  %v5386_v61 = vld [vmem:[#allocation2 + $0x8] sm:$0xff] }
  0x20   :  { %322 = vmatpush.msra.mxu1 %v5307_v32  ;;  %362 = vmatpush.msra.mxu3 %v5309_v33  ;;  %9668 = vst [vmem:[#allocation13_spill] sm:$0xff] %v5366_v51  ;;  %v5381_v59 = vld [vmem:[#allocation2 + $0x40] sm:$0xff]  ;;  %v5383_v60 = vld [vmem:[#allocation2 + $0x90] sm:$0xff]  ;;  %v5388_v62 = vld [vmem:[#allocation2 + $0x18] sm:$0xff] }
  0x21   :  { %302 = vmatpush.msra.mxu0 %v5333_v39  ;;  %340 = vmatpush.msra.mxu2 %v5335_v40  ;;  %9669 = vst [vmem:[#allocation14_spill] sm:$0xff] %v5368_v52  ;;  %v5395_v63 = vld [vmem:[#allocation2 + $0x20] sm:$0xff] }
  0x22   :  { %323 = vmatpush.msra.mxu1 %v5324_v37  ;;  %363 = vmatpush.msra.mxu3 %v5326_v38  ;;  %v375_v55 = vld.sshfl [vmem:[#allocation1] sm:$0xff pattern:$0x73625140]  ;;  %v378_v56 = vld.sshfl [vmem:[#allocation1 + $0x18] sm:$0xff pattern:$0x73625140] }
  0x23   :  { %303 = vmatpush.msra.mxu0 %v5345_v43  ;;  %341 = vmatpush.msra.mxu2 %v5347_v44  ;;  %v376_v57 = vld.sshfl [vmem:[#allocation1 + $0x8] sm:$0xff pattern:$0x73625140]  ;;  %v377_v58 = vld.sshfl [vmem:[#allocation1 + $0x10] sm:$0xff pattern:$0x73625140] }
  0x24   :  { %324 = vmatpush.msra.mxu1 %v5337_v41  ;;  %364 = vmatpush.msra.mxu3 %v5339_v42  ;;  %9670 = vst [vmem:[#allocation15_spill] sm:$0xff] %v5381_v59 }
  0x25   :  { %304 = vmatpush.msra.mxu0 %v5361_v49  ;;  %342 = vmatpush.msra.mxu2 %v5363_v50  ;;  %848 = vst [vmem:[#allocation1] ss:$4 sm:$0xff] %v5322_v36  ;;  %v5400_v36 = vld [vmem:[#allocation2 + $0x70] sm:$0xff] }
  0x26   :  { %325 = vmatpush.msra.mxu1 %v5349_v45  ;;  %365 = vmatpush.msra.mxu3 %v5351_v46  ;;  %9671 = vst [vmem:[#allocation16_spill] sm:$0xff] %v5386_v61  ;;  %v5466_v46 = vld [vmem:[#allocation6 + $0x160] sm:$0xff] }
  0x27   :  { %9672 = vst [vmem:[#allocation17_spill] sm:$0xff] %v5388_v62  ;;  %305 = vmatpush.msra.mxu0 %v5371_v53  ;;  %343 = vmatpush.msra.mxu2 %v5373_v54 }
  0x28   :  { %326 = vmatpush.msra.mxu1 %v5354_v47  ;;  %366 = vmatpush.msra.mxu3 %v5359_v48  ;;  %9673 = vst [vmem:[#allocation18_spill] sm:$0xff] %v5395_v63  ;;  %v9021_v48 = vmov 0.0   ;;  %v9680_v47 = vmov 0.0  }
  0x29   :  { %306 = vmatpush.msra.mxu0 %v5381_v59  ;;  %344 = vmatpush.msra.mxu2 %v5383_v60  ;;  %9674 = vst [vmem:[#allocation19_spill] sm:$0xff] %v5400_v36  ;;  %v5442_v59 = vld [vmem:[#allocation6 + $0x1c8] sm:$0xff] }
  0x2a   :  { %327 = vmatpush.msra.mxu1 %v5366_v51  ;;  %367 = vmatpush.msra.mxu3 %v5368_v52  ;;  %v5404_v51 = vld [vmem:[#allocation2] sm:$0xff]  ;;  %v5408_v52 = vld [vmem:[#allocation2 + $0x50] sm:$0xff]  ;;  %9686 = vst [vmem:[#allocation30_spill] sm:$0xff] %v5442_v59 }
  0x2b   :  { %9675 = vst [vmem:[#allocation20_spill] sm:$0xff] %v5404_v51  ;;  %307 = vmatpush.msra.mxu0 %v5395_v63  ;;  %345 = vmatpush.msra.mxu2 %v5400_v36  ;;  %v5424_v63 = vld [vmem:[#allocation6 + $0x1d8] sm:$0xff] }
  0x2c   :  { %328 = vmatpush.msra.mxu1 %v5386_v61  ;;  %368 = vmatpush.msra.mxu3 %v5388_v62  ;;  %9676 = vst [vmem:[#allocation21_spill] sm:$0xff] %v5408_v52  ;;  %v5412_v62 = vld [vmem:[#allocation6 + $0x1e0] sm:$0xff]  ;;  %v5414_v61 = vld [vmem:[#allocation6 + $0x1f8] sm:$0xff] }
  0x2d   :  { %329 = vmatmul.f32.vlgmr.msra.gmra.mxu1 %v9021_v48  ;;  %369 = vmatmul.f32.vlgmr.msra.gmra.mxu3 %v9021_v48  ;;  %9677 = vst [vmem:[#allocation22_spill] sm:$0xff] %v5412_v62  ;;  %v5418_v48 = vld [vmem:[#allocation2 + $0x30] sm:$0xff] }
  0x2e   :  { %4118 = vmatpush.msk.msrb.mxu1 %vm383_vm0, %v375_v55  ;;  %4124 = vmatpush.msk.msrb.mxu3 %vm383_vm0, %v378_v56  ;;  %9678 = vst [vmem:[#allocation23_spill] sm:$0xff] %v5414_v61  ;;  %v5422_v55 = vld [vmem:[#allocation6 + $0x1c0] sm:$0xff]  ;;  %v292_v56 = vld [vmem:[%s9004_s0] sm:$0xff] }
  0x2f   :  { %308 = vmatpush.msra.mxu0 %v5404_v51  ;;  %9679 = vst [vmem:[#allocation24_spill] sm:$0xff] %v5418_v48  ;;  %346 = vmatpush.msra.mxu2 %v5408_v52  ;;  %v5434_v51 = vld [vmem:[#allocation6 + $0x1e8] sm:$0xff]  ;;  %v5438_v52 = vld [vmem:[#allocation6 + $0x1a0] sm:$0xff] }
  0x30   :  { %4120 = vmatpush.msk.msra.mxu1 %vm383_vm0, %v376_v57  ;;  %309 = vmatmul.f32.vlgmr.msra.gmra.mxu0 %v9680_v47  ;;  %9681 = vst [vmem:[#allocation25_spill] sm:$0xff] %v5422_v55  ;;  %v5432_v57 = vld [vmem:[#allocation2 + $0x10] sm:$0xff] }
  0x31   :  { %9682 = vst [vmem:[#allocation26_spill] sm:$0xff] %v5424_v63  ;;  %539 = vmatpush.msrb.mxu0 %v5412_v62  ;;  %599 = vmatpush.msra.mxu3 %v5414_v61  ;;  %v5446_v61 = vld [vmem:[#allocation6 + $0x1f0] sm:$0xff]  ;;  %v5448_v62 = vld [vmem:[#allocation6 + $0x1b8] sm:$0xff] }
  0x32   :  { %347 = vmatpush.msra.mxu2 %v5418_v48  ;;  %9683 = vst [vmem:[#allocation27_spill] sm:$0xff] %v5432_v57  ;;  %v5458_v48 = vld [vmem:[#allocation6 + $0x1d0] sm:$0xff] }
  0x33   :  { %9684 = vst [vmem:[#allocation28_spill] sm:$0xff] %v5434_v51  ;;  %540 = vmatpush.msrb.mxu0 %v5422_v55  ;;  %600 = vmatpush.msra.mxu3 %v5424_v63  ;;  %v5452_v63 = vld [vmem:[#allocation6 + $0x1a8] sm:$0xff]  ;;  %v5454_v55 = vld [vmem:[#allocation6 + $0x180] sm:$0xff] }
  0x34   :  { %9685 = vst [vmem:[#allocation29_spill] sm:$0xff] %v5438_v52  ;;  %348 = vmatpush.msra.mxu2 %v5432_v57  ;;  %v5460_v57 = vld [vmem:[#allocation6 + $0x198] sm:$0xff] }
  0x35   :  { %4119 = vmatmul.msk.f32.vlgmr.msrb.gmra.mxu1 %vm379_vm1, %v292_v56  ;;  %4125 = vmatmul.msk.f32.vlgmr.msrb.gmra.mxu3 %vm379_vm1, %v292_v56  ;;  %9687 = vst [vmem:[#allocation31_spill] sm:$0xff] %v5446_v61 }
  0x36   :  { %559 = vmatpush.msrb.mxu1 %v5434_v51  ;;  %9688 = vst [vmem:[#allocation32_spill] sm:$0xff] %v5448_v62  ;;  %349 = vmatmul.f32.vlgmr.msra.gmra.mxu2 %v9680_v47  ;;  %v5464_v51 = vld [vmem:[#allocation6 + $0x188] sm:$0xff] }
  0x37   :  { %541 = vmatpush.msrb.mxu0 %v5438_v52  ;;  %9689 = vst [vmem:[#allocation33_spill] sm:$0xff] %v5452_v63  ;;  %4122 = vmatpush.msk.msrb.mxu2 %vm383_vm0, %v377_v58  ;;  %v5469_v52 = vld [vmem:[#allocation6 + $0x1b0] sm:$0xff]  ;;  %v5474_v58 = vld [vmem:[#allocation6 + $0x168] sm:$0xff] }
  0x38   :  { %9690 = vst [vmem:[#allocation34_spill] sm:$0xff] %v5454_v55  ;;  %560 = vmatpush.msrb.mxu1 %v5442_v59  ;;  %601 = vmatpush.msra.mxu3 %v5448_v62  ;;  %v5476_v59 = vld [vmem:[#allocation6 + $0x178] sm:$0xff]  ;;  %v5484_v62 = vld [vmem:[#allocation6 + $0x190] sm:$0xff] }
  0x39   :  { %9691 = vst [vmem:[#allocation35_spill] sm:$0xff] %v5458_v48  ;;  %579 = vmatpush.msra.mxu2 %v5446_v61  ;;  %542 = vmatpush.msrb.mxu0 %v5454_v55  ;;  %v5480_v61 = vld [vmem:[#allocation6 + $0x140] sm:$0xff]  ;;  %v5522_v55 = vld [vmem:[#allocation6 + $0xe8] sm:$0xff] }
  0x3a   :  { %9692 = vst [vmem:[#allocation36_spill] sm:$0xff] %v5460_v57  ;;  %561 = vmatpush.msrb.mxu1 %v5452_v63  ;;  %602 = vmatpush.msra.mxu3 %v5460_v57  ;;  %v5486_v63 = vld [vmem:[#allocation6 + $0x148] sm:$0xff]  ;;  %v5492_v57 = vld [vmem:[#allocation6 + $0x120] sm:$0xff] }
  0x3b   :  { %9693 = vst [vmem:[#allocation37_spill] sm:$0xff] %v5464_v51  ;;  %580 = vmatpush.msra.mxu2 %v5458_v48  ;;  %543 = vmatpush.msrb.mxu0 %v5466_v46  ;;  %v5490_v48 = vld [vmem:[#allocation6 + $0x158] sm:$0xff] }
  0x3c   :  { %9694 = vst [vmem:[#allocation38_spill] sm:$0xff] %v5466_v46  ;;  %562 = vmatpush.msrb.mxu1 %v5464_v51  ;;  %603 = vmatpush.msra.mxu3 %v5476_v59  ;;  %v5495_v51 = vld [vmem:[#allocation6 + $0x170] sm:$0xff]  ;;  %v5498_v46 = vld [vmem:[#allocation6 + $0x128] sm:$0xff] }
  0x3d   :  { %9695 = vst [vmem:[#allocation39_spill] sm:$0xff] %v5469_v52  ;;  %4121 = vmatmul.msk.f32.vlgmr.msra.gmra.mxu1 %vm379_vm1, %v292_v56  ;;  %581 = vmatpush.msra.mxu2 %v5469_v52  ;;  %v5502_v52 = vld [vmem:[#allocation6 + $0x138] sm:$0xff] }
  0x3e   :  { %9696 = vst [vmem:[#allocation40_spill] sm:$0xff] %v5474_v58  ;;  %563 = vmatpush.msrb.mxu1 %v5474_v58  ;;  %4123 = vmatmul.msk.f32.vlgmr.msrb.gmra.mxu2 %vm379_vm1, %v292_v56  ;;  %v5504_v58 = vld [vmem:[#allocation6 + $0x100] sm:$0xff]  ;;  %v5510_v56 = vld [vmem:[#allocation6 + $0x108] sm:$0xff] }
  0x3f   :  { %9697 = vst [vmem:[#allocation41_spill] sm:$0xff] %v5476_v59  ;;  %544 = vmatpush.msrb.mxu0 %v5480_v61  ;;  %582 = vmatpush.msra.mxu2 %v5484_v62  ;;  %v5506_v59 = vld [vmem:[#allocation6 + $0x150] sm:$0xff] }
  0x40   :  { %9698 = vst [vmem:[#allocation42_spill] sm:$0xff] %v5480_v61  ;;  %564 = vmatpush.msrb.mxu1 %v5486_v63  ;;  %604 = vmatpush.msra.mxu3 %v5490_v48  ;;  %v5514_v61 = vld [vmem:[#allocation6 + $0x118] sm:$0xff] }
  0x41   :  { %9699 = vst [vmem:[#allocation43_spill] sm:$0xff] %v5484_v62  ;;  %545 = vmatpush.msrb.mxu0 %v5492_v57  ;;  %583 = vmatpush.msra.mxu2 %v5495_v51  ;;  %v5516_v62 = vld [vmem:[#allocation6 + $0xe0] sm:$0xff] }
  0x42   :  { %9700 = vst [vmem:[#allocation44_spill] sm:$0xff] %v5486_v63  ;;  %565 = vmatpush.msrb.mxu1 %v5498_v46  ;;  %v5518_v63 = vld [vmem:[#allocation6 + $0x130] sm:$0xff]  ;;  %605 = vmatpush.msra.mxu3 %v5502_v52 }
  0x43   :  { %9701 = vst [vmem:[#allocation45_spill] sm:$0xff] %v5490_v48  ;;  %546 = vmatpush.msrb.mxu0 %v5504_v58  ;;  %584 = vmatpush.msra.mxu2 %v5506_v59  ;;  %v5526_v48 = vld [vmem:[#allocation6 + $0xf8] sm:$0xff] }
  0x44   :  { %9702 = vst [vmem:[#allocation46_spill] sm:$0xff] %v5492_v57  ;;  %566 = vmatpush.msrb.mxu1 %v5510_v56  ;;  %606 = vmatpush.msra.mxu3 %v5514_v61  ;;  %v5534_v57 = vld [vmem:[#allocation6 + $0xc8] sm:$0xff] }
  0x45   :  { %9703 = vst [vmem:[#allocation47_spill] sm:$0xff] %v5495_v51  ;;  %v5528_v51 = vld [vmem:[#allocation6 + $0xc0] sm:$0xff]  ;;  %547 = vmatpush.msrb.mxu0 %v5516_v62  ;;  %585 = vmatpush.msra.mxu2 %v5518_v63 }
  0x46   :  { %9704 = vst [vmem:[#allocation48_spill] sm:$0xff] %v5498_v46  ;;  %v5530_v46 = vld [vmem:[#allocation6 + $0x110] sm:$0xff]  ;;  %567 = vmatpush.msrb.mxu1 %v5522_v55  ;;  %607 = vmatpush.msra.mxu3 %v5526_v48 }
  0x47   :  { %9705 = vst [vmem:[#allocation49_spill] sm:$0xff] %v5502_v52  ;;  %v5538_v52 = vld [vmem:[#allocation6 + $0xd8] sm:$0xff]  ;;  %548 = vmatpush.msrb.mxu0 %v5528_v51  ;;  %586 = vmatpush.msra.mxu2 %v5530_v46 }
  0x48   :  { %9706 = vst [vmem:[#allocation50_spill] sm:$0xff] %v5504_v58  ;;  %v5546_v58 = vld [vmem:[#allocation6 + $0xa8] sm:$0xff]  ;;  %568 = vmatpush.msrb.mxu1 %v5534_v57  ;;  %608 = vmatpush.msra.mxu3 %v5538_v52 }
  0x49   :  { %9707 = vst [vmem:[#allocation51_spill] sm:$0xff] %v5506_v59  ;;  %v5540_v59 = vld [vmem:[#allocation6 + $0xa0] sm:$0xff] }
  0x4a   :  { %9708 = vst [vmem:[#allocation52_spill] sm:$0xff] %v5510_v56  ;;  %v5542_v56 = vld [vmem:[#allocation6 + $0xf0] sm:$0xff]  ;;  %549 = vmatpush.msrb.mxu0 %v5540_v59  ;;  %569 = vmatpush.msrb.mxu1 %v5546_v58 }
  0x4b   :  { %9709 = vst [vmem:[#allocation53_spill] sm:$0xff] %v5514_v61  ;;  %v5550_v61 = vld [vmem:[#allocation6 + $0xb8] sm:$0xff]  ;;  %587 = vmatpush.msra.mxu2 %v5542_v56 }
  0x4c   :  { %9710 = vst [vmem:[#allocation54_spill] sm:$0xff] %v5516_v62  ;;  %v5558_v62 = vld [vmem:[#allocation6 + $0x88] sm:$0xff]  ;;  %609 = vmatpush.msra.mxu3 %v5550_v61 }
  0x4d   :  { %9711 = vst [vmem:[#allocation55_spill] sm:$0xff] %v5518_v63  ;;  %v5552_v63 = vld [vmem:[#allocation6 + $0x80] sm:$0xff]  ;;  %570 = vmatpush.msrb.mxu1 %v5558_v62 }
  0x4e   :  { %9712 = vst [vmem:[#allocation56_spill] sm:$0xff] %v5522_v55  ;;  %v5554_v55 = vld [vmem:[#allocation6 + $0xd0] sm:$0xff]  ;;  %550 = vmatpush.msrb.mxu0 %v5552_v63 }
  0x4f   :  { %9713 = vst [vmem:[#allocation57_spill] sm:$0xff] %v5526_v48  ;;  %v5562_v48 = vld [vmem:[#allocation6 + $0x98] sm:$0xff]  ;;  %588 = vmatpush.msra.mxu2 %v5554_v55 }
  0x50   :  { %9714 = vst [vmem:[#allocation58_spill] sm:$0xff] %v5528_v51  ;;  %610 = vmatpush.msra.mxu3 %v5562_v48  ;;  %v5819_v51 = vld [vmem:[#allocation4 + $0x10] sm:$0xff] }
  0x51   :  { %9715 = vst [vmem:[#allocation59_spill] sm:$0xff] %v5530_v46  ;;  %v5564_v46 = vld [vmem:[#allocation6 + $0xb0] sm:$0xff] }
  0x52   :  { %9716 = vst [vmem:[#allocation60_spill] sm:$0xff] %v5534_v57  ;;  %589 = vmatpush.msra.mxu2 %v5564_v46  ;;  %v5579_v57 = vld [vmem:[#allocation6 + $0x70] sm:$0xff] }
  0x53   :  { %9717 = vst [vmem:[#allocation61_spill] sm:$0xff] %v5538_v52  ;;  %v5570_v52 = vld [vmem:[#allocation6 + $0x90] sm:$0xff] }
  0x54   :  { %9718 = vst [vmem:[#allocation62_spill] sm:$0xff] %v5540_v59  ;;  %590 = vmatpush.msra.mxu2 %v5570_v52 }
  0x55   :  { %9719 = vst [vmem:[#allocation63_spill] sm:$0xff] %v5542_v56  ;;  %v5575_v56 = vld [vmem:[#allocation6 + $0x60] sm:$0xff] }
  0x56   :  { %9720 = vst [vmem:[#allocation64_spill] sm:$0xff] %v5546_v58  ;;  %v5577_v58 = vld [vmem:[#allocation6 + $0x68] sm:$0xff]  ;;  %551 = vmatpush.msrb.mxu0 %v5575_v56  ;;  %591 = vmatpush.msra.mxu2 %v5579_v57 }
  0x57   :  { %9721 = vst [vmem:[#allocation65_spill] sm:$0xff] %v5550_v61  ;;  %571 = vmatpush.msrb.mxu1 %v5577_v58  ;;  %v5587_v61 = vld [vmem:[#allocation6 + $0x48] sm:$0xff] }
  0x58   :  { %9722 = vst [vmem:[#allocation66_spill] sm:$0xff] %v5552_v63  ;;  %v5603_v63 = vld [vmem:[#allocation6 + $0x38] sm:$0xff] }
  0x59   :  { %9723 = vst [vmem:[#allocation67_spill] sm:$0xff] %v5554_v55  ;;  %v5583_v55 = vld [vmem:[#allocation6 + $0x78] sm:$0xff]  ;;  %572 = vmatpush.msrb.mxu1 %v5587_v61 }
  0x5a   :  { %9724 = vst [vmem:[#allocation68_spill] sm:$0xff] %v5558_v62  ;;  %v5585_v62 = vld [vmem:[#allocation6 + $0x40] sm:$0xff]  ;;  %611 = vmatpush.msra.mxu3 %v5583_v55 }
  0x5b   :  { %9725 = vst [vmem:[#allocation69_spill] sm:$0xff] %v5562_v48  ;;  %v5595_v48 = vld [vmem:[#allocation6 + $0x20] sm:$0xff]  ;;  %552 = vmatpush.msrb.mxu0 %v5585_v62 }
  0x5c   :  { %9726 = vst [vmem:[#allocation70_spill] sm:$0xff] %v5564_v46  ;;  %v5593_v46 = vld [vmem:[#allocation6 + $0x58] sm:$0xff] }
  0x5d   :  { %9727 = vst [vmem:[#allocation71_spill] sm:$0xff] %v5570_v52  ;;  %v5591_v52 = vld [vmem:[#allocation6 + $0x50] sm:$0xff]  ;;  %612 = vmatpush.msra.mxu3 %v5593_v46  ;;  %553 = vmatpush.msrb.mxu0 %v5595_v48 }
  0x5e   :  { %9728 = vst [vmem:[#allocation72_spill] sm:$0xff] %v5575_v56  ;;  %v5601_v56 = vld [vmem:[#allocation6 + $0x30] sm:$0xff]  ;;  %592 = vmatpush.msra.mxu2 %v5591_v52 }
  0x5f   :  { %9729 = vst [vmem:[#allocation73_spill] sm:$0xff] %v5577_v58  ;;  %v5599_v58 = vld [vmem:[#allocation6 + $0x28] sm:$0xff]  ;;  %613 = vmatpush.msra.mxu3 %v5603_v63 }
  0x60   :  { %9730 = vst [vmem:[#allocation74_spill] sm:$0xff] %v5579_v57  ;;  %573 = vmatpush.msrb.mxu1 %v5599_v58  ;;  %593 = vmatpush.msra.mxu2 %v5601_v56  ;;  %v5611_v57 = vld [vmem:[#allocation6] sm:$0xff] }
  0x61   :  { %9731 = vst [vmem:[#allocation75_spill] sm:$0xff] %v5583_v55  ;;  %v5615_v55 = vld [vmem:[#allocation6 + $0x10] sm:$0xff]  ;;  %554 = vmatpush.msrb.mxu0 %v5611_v57 }
  0x62   :  { %9732 = vst [vmem:[#allocation76_spill] sm:$0xff] %v5585_v62  ;;  %594 = vmatpush.msra.mxu2 %v5615_v55  ;;  %v5653_v62 = vld [vmem:[#allocation4 + $0x1b8] sm:$0xff]  ;;  %555 = vmatmul.f32.vlgmr.msrb.gmra.mxu0 %v9680_v47 }
  0x63   :  { %9733 = vst [vmem:[#allocation77_spill] sm:$0xff] %v5587_v61  ;;  %v5613_v61 = vld [vmem:[#allocation6 + $0x8] sm:$0xff]  ;;  %595 = vmatmul.f32.vlgmr.msra.gmra.mxu2 %v9680_v47 }
  0x64   :  { %9734 = vst [vmem:[#allocation78_spill] sm:$0xff] %v5591_v52  ;;  %574 = vmatpush.msrb.mxu1 %v5613_v61  ;;  %v5619_v52 = vld [vmem:[#allocation6 + $0x18] sm:$0xff] }
  0x65   :  { %9735 = vst [vmem:[#allocation79_spill] sm:$0xff] %v5593_v46  ;;  %v5621_v46 = vld [vmem:[#allocation4 + $0x1e0] sm:$0xff]  ;;  %614 = vmatpush.msra.mxu3 %v5619_v52  ;;  %575 = vmatmul.f32.vlgmr.msrb.gmra.mxu1 %v9680_v47 }
  0x66   :  { %9736 = vst [vmem:[#allocation80_spill] sm:$0xff] %v5595_v48  ;;  %619 = vmatpush.msra.mxu0 %v5621_v46  ;;  %v5637_v48 = vld [vmem:[#allocation4 + $0x1d0] sm:$0xff]  ;;  %615 = vmatmul.f32.vlgmr.msra.gmra.mxu3 %v9680_v47  ;;  %v9819_v47 = vld [vmem:[#allocation17_spill] sm:$0xff] }
  0x67   :  { %9737 = vst [vmem:[#allocation81_spill] sm:$0xff] %v5599_v58  ;;  %v5629_v58 = vld [vmem:[#allocation4 + $0x1f8] sm:$0xff] }
  0x68   :  { %9738 = vst [vmem:[#allocation82_spill] sm:$0xff] %v5601_v56  ;;  %v5625_v56 = vld [vmem:[#allocation4 + $0x1e8] sm:$0xff]  ;;  %679 = vmatpush.msrb.mxu3 %v5629_v58 }
  0x69   :  { %9739 = vst [vmem:[#allocation83_spill] sm:$0xff] %v5603_v63  ;;  %v5627_v63 = vld [vmem:[#allocation4 + $0x1f0] sm:$0xff]  ;;  %639 = vmatpush.msra.mxu1 %v5625_v56 }
  0x6a   :  { %9740 = vst [vmem:[#allocation84_spill] sm:$0xff] %v5611_v57  ;;  %v5633_v57 = vld [vmem:[#allocation4 + $0x1c0] sm:$0xff]  ;;  %659 = vmatpush.msrb.mxu2 %v5627_v63 }
  0x6b   :  { %9741 = vst [vmem:[#allocation85_spill] sm:$0xff] %v5613_v61  ;;  %v5635_v61 = vld [vmem:[#allocation4 + $0x1c8] sm:$0xff]  ;;  %620 = vmatpush.msra.mxu0 %v5633_v57 }
  0x6c   :  { %9742 = vst [vmem:[#allocation86_spill] sm:$0xff] %v5615_v55  ;;  %v5641_v55 = vld [vmem:[#allocation4 + $0x1d8] sm:$0xff]  ;;  %640 = vmatpush.msra.mxu1 %v5635_v61  ;;  %660 = vmatpush.msrb.mxu2 %v5637_v48 }
  0x6d   :  { %9743 = vst [vmem:[#allocation87_spill] sm:$0xff] %v5619_v52  ;;  %v5645_v52 = vld [vmem:[#allocation4 + $0x1a0] sm:$0xff]  ;;  %680 = vmatpush.msrb.mxu3 %v5641_v55 }
  0x6e   :  { %9744 = vst [vmem:[#allocation88_spill] sm:$0xff] %v5621_v46  ;;  %v5647_v46 = vld [vmem:[#allocation4 + $0x1a8] sm:$0xff]  ;;  %621 = vmatpush.msra.mxu0 %v5645_v52 }
  0x6f   :  { %9745 = vst [vmem:[#allocation89_spill] sm:$0xff] %v5625_v56  ;;  %v5649_v56 = vld [vmem:[#allocation4 + $0x1b0] sm:$0xff]  ;;  %641 = vmatpush.msra.mxu1 %v5647_v46  ;;  %681 = vmatpush.msrb.mxu3 %v5653_v62 }
  0x70   :  { %9746 = vst [vmem:[#allocation90_spill] sm:$0xff] %v5627_v63  ;;  %v5657_v63 = vld [vmem:[#allocation4 + $0x180] sm:$0xff]  ;;  %661 = vmatpush.msrb.mxu2 %v5649_v56 }
  0x71   :  { %9747 = vst [vmem:[#allocation91_spill] sm:$0xff] %v5629_v58  ;;  %v5665_v58 = vld [vmem:[#allocation4 + $0x198] sm:$0xff]  ;;  %622 = vmatpush.msra.mxu0 %v5657_v63 }
  0x72   :  { %9748 = vst [vmem:[#allocation92_spill] sm:$0xff] %v5633_v57  ;;  %v5659_v57 = vld [vmem:[#allocation4 + $0x188] sm:$0xff]  ;;  %682 = vmatpush.msrb.mxu3 %v5665_v58 }
  0x73   :  { %9749 = vst [vmem:[#allocation93_spill] sm:$0xff] %v5635_v61  ;;  %v5661_v61 = vld [vmem:[#allocation4 + $0x190] sm:$0xff]  ;;  %642 = vmatpush.msra.mxu1 %v5659_v57 }
  0x74   :  { %9750 = vst [vmem:[#allocation94_spill] sm:$0xff] %v5637_v48  ;;  %662 = vmatpush.msrb.mxu2 %v5661_v61  ;;  %v5671_v48 = vld [vmem:[#allocation4 + $0x160] sm:$0xff] }
  0x75   :  { %9751 = vst [vmem:[#allocation95_spill] sm:$0xff] %v5641_v55  ;;  %623 = vmatpush.msra.mxu0 %v5671_v48 }
  0x76   :  { %9752 = vst [vmem:[#allocation96_spill] sm:$0xff] %v5645_v52  ;;  %v5675_v52 = vld [vmem:[#allocation4 + $0x170] sm:$0xff] }
  0x77   :  { %9753 = vst [vmem:[#allocation97_spill] sm:$0xff] %v5647_v46  ;;  %v5673_v46 = vld [vmem:[#allocation4 + $0x168] sm:$0xff]  ;;  %663 = vmatpush.msrb.mxu2 %v5675_v52 }
  0x78   :  { %9754 = vst [vmem:[#allocation98_spill] sm:$0xff] %v5649_v56  ;;  %643 = vmatpush.msra.mxu1 %v5673_v46  ;;  %v5679_v56 = vld [vmem:[#allocation4 + $0x178] sm:$0xff] }
  0x79   :  { %9755 = vst [vmem:[#allocation99_spill] sm:$0xff] %v5653_v62  ;;  %683 = vmatpush.msrb.mxu3 %v5679_v56  ;;  %v5779_v62 = vld [vmem:[#allocation4 + $0x78] sm:$0xff] }
  0x7a   :  { %9756 = vst [vmem:[#allocation100_spill] sm:$0xff] %v5657_v63  ;;  %v5691_v63 = vld [vmem:[#allocation4 + $0x158] sm:$0xff] }
  0x7b   :  { %9757 = vst [vmem:[#allocation101_spill] sm:$0xff] %v5659_v57  ;;  %v5683_v57 = vld [vmem:[#allocation4 + $0x140] sm:$0xff]  ;;  %684 = vmatpush.msrb.mxu3 %v5691_v63 }
  0x7c   :  { %9758 = vst [vmem:[#allocation102_spill] sm:$0xff] %v5661_v61  ;;  %v5685_v61 = vld [vmem:[#allocation4 + $0x148] sm:$0xff]  ;;  %624 = vmatpush.msra.mxu0 %v5683_v57 }
  0x7d   :  { %9759 = vst [vmem:[#allocation103_spill] sm:$0xff] %v5665_v58  ;;  %v5687_v58 = vld [vmem:[#allocation4 + $0x150] sm:$0xff]  ;;  %644 = vmatpush.msra.mxu1 %v5685_v61 }
  0x7e   :  { %9760 = vst [vmem:[#allocation104_spill] sm:$0xff] %v5671_v48  ;;  %664 = vmatpush.msrb.mxu2 %v5687_v58  ;;  %v5703_v48 = vld [vmem:[#allocation4 + $0x138] sm:$0xff] }
  0x7f   :  { %9761 = vst [vmem:[#allocation105_spill] sm:$0xff] %v5673_v46  ;;  %v5695_v46 = vld [vmem:[#allocation4 + $0x120] sm:$0xff]  ;;  %685 = vmatpush.msrb.mxu3 %v5703_v48 }
  0x80   :  { %9762 = vst [vmem:[#allocation106_spill] sm:$0xff] %v5675_v52  ;;  %v5697_v52 = vld [vmem:[#allocation4 + $0x128] sm:$0xff]  ;;  %625 = vmatpush.msra.mxu0 %v5695_v46 }
  0x81   :  { %9763 = vst [vmem:[#allocation107_spill] sm:$0xff] %v5679_v56  ;;  %v5699_v56 = vld [vmem:[#allocation4 + $0x130] sm:$0xff]  ;;  %645 = vmatpush.msra.mxu1 %v5697_v52 }
  0x82   :  { %9764 = vst [vmem:[#allocation108_spill] sm:$0xff] %v5683_v57  ;;  %665 = vmatpush.msrb.mxu2 %v5699_v56  ;;  %v5715_v57 = vld [vmem:[#allocation4 + $0x118] sm:$0xff] }
  0x83   :  { %9765 = vst [vmem:[#allocation109_spill] sm:$0xff] %v5685_v61  ;;  %v5707_v61 = vld [vmem:[#allocation4 + $0x100] sm:$0xff]  ;;  %686 = vmatpush.msrb.mxu3 %v5715_v57 }
  0x84   :  { %9766 = vst [vmem:[#allocation110_spill] sm:$0xff] %v5687_v58  ;;  %v5709_v58 = vld [vmem:[#allocation4 + $0x108] sm:$0xff]  ;;  %626 = vmatpush.msra.mxu0 %v5707_v61 }
  0x85   :  { %9767 = vst [vmem:[#allocation111_spill] sm:$0xff] %v5691_v63  ;;  %v5711_v63 = vld [vmem:[#allocation4 + $0x110] sm:$0xff]  ;;  %646 = vmatpush.msra.mxu1 %v5709_v58 }
  0x86   :  { %9768 = vst [vmem:[#allocation112_spill] sm:$0xff] %v5695_v46  ;;  %666 = vmatpush.msrb.mxu2 %v5711_v63  ;;  %v5727_v46 = vld [vmem:[#allocation4 + $0xf8] sm:$0xff] }
  0x87   :  { %9769 = vst [vmem:[#allocation113_spill] sm:$0xff] %v5697_v52  ;;  %v5719_v52 = vld [vmem:[#allocation4 + $0xe0] sm:$0xff]  ;;  %687 = vmatpush.msrb.mxu3 %v5727_v46 }
  0x88   :  { %9770 = vst [vmem:[#allocation114_spill] sm:$0xff] %v5699_v56  ;;  %v5721_v56 = vld [vmem:[#allocation4 + $0xe8] sm:$0xff]  ;;  %627 = vmatpush.msra.mxu0 %v5719_v52 }
  0x89   :  { %9771 = vst [vmem:[#allocation115_spill] sm:$0xff] %v5703_v48  ;;  %v5723_v48 = vld [vmem:[#allocation4 + $0xf0] sm:$0xff]  ;;  %647 = vmatpush.msra.mxu1 %v5721_v56 }
  0x8a   :  { %9772 = vst [vmem:[#allocation116_spill] sm:$0xff] %v5707_v61  ;;  %667 = vmatpush.msrb.mxu2 %v5723_v48  ;;  %v5739_v61 = vld [vmem:[#allocation4 + $0xd8] sm:$0xff] }
  0x8b   :  { %9773 = vst [vmem:[#allocation117_spill] sm:$0xff] %v5709_v58  ;;  %v5731_v58 = vld [vmem:[#allocation4 + $0xc0] sm:$0xff]  ;;  %688 = vmatpush.msrb.mxu3 %v5739_v61 }
  0x8c   :  { %9774 = vst [vmem:[#allocation118_spill] sm:$0xff] %v5711_v63  ;;  %v5733_v63 = vld [vmem:[#allocation4 + $0xc8] sm:$0xff]  ;;  %628 = vmatpush.msra.mxu0 %v5731_v58 }
  0x8d   :  { %9775 = vst [vmem:[#allocation119_spill] sm:$0xff] %v5715_v57  ;;  %v5735_v57 = vld [vmem:[#allocation4 + $0xd0] sm:$0xff]  ;;  %648 = vmatpush.msra.mxu1 %v5733_v63 }
  0x8e   :  { %9776 = vst [vmem:[#allocation120_spill] sm:$0xff] %v5719_v52  ;;  %668 = vmatpush.msrb.mxu2 %v5735_v57  ;;  %v5751_v52 = vld [vmem:[#allocation4 + $0xb8] sm:$0xff] }
  0x8f   :  { %9777 = vst [vmem:[#allocation121_spill] sm:$0xff] %v5721_v56  ;;  %v5743_v56 = vld [vmem:[#allocation4 + $0xa0] sm:$0xff]  ;;  %689 = vmatpush.msrb.mxu3 %v5751_v52 }
  0x90   :  { %9778 = vst [vmem:[#allocation122_spill] sm:$0xff] %v5723_v48  ;;  %v5745_v48 = vld [vmem:[#allocation4 + $0xa8] sm:$0xff]  ;;  %629 = vmatpush.msra.mxu0 %v5743_v56 }
  0x91   :  { %9779 = vst [vmem:[#allocation123_spill] sm:$0xff] %v5727_v46  ;;  %v5747_v46 = vld [vmem:[#allocation4 + $0xb0] sm:$0xff]  ;;  %649 = vmatpush.msra.mxu1 %v5745_v48 }
  0x92   :  { %9780 = vst [vmem:[#allocation124_spill] sm:$0xff] %v5731_v58  ;;  %669 = vmatpush.msrb.mxu2 %v5747_v46 }
  0x93   :  { %9781 = vst [vmem:[#allocation125_spill] sm:$0xff] %v5733_v63  ;;  %v5755_v63 = vld [vmem:[#allocation4 + $0x80] sm:$0xff] }
  0x94   :  { %9782 = vst [vmem:[#allocation126_spill] sm:$0xff] %v5735_v57  ;;  %v5757_v57 = vld [vmem:[#allocation4 + $0x88] sm:$0xff]  ;;  %630 = vmatpush.msra.mxu0 %v5755_v63 }
  0x95   :  { %9783 = vst [vmem:[#allocation127_spill] sm:$0xff] %v5739_v61  ;;  %v5759_v61 = vld [vmem:[#allocation4 + $0x90] sm:$0xff]  ;;  %650 = vmatpush.msra.mxu1 %v5757_v57 }
  0x96   :  { %9784 = vst [vmem:[#allocation128_spill] sm:$0xff] %v5743_v56  ;;  %670 = vmatpush.msrb.mxu2 %v5759_v61  ;;  %v5775_v56 = vld [vmem:[#allocation4 + $0x70] sm:$0xff] }
  0x97   :  { %9785 = vst [vmem:[#allocation129_spill] sm:$0xff] %v5745_v48  ;;  %v5767_v48 = vld [vmem:[#allocation4 + $0x98] sm:$0xff] }
  0x98   :  { %9786 = vst [vmem:[#allocation130_spill] sm:$0xff] %v5747_v46  ;;  %690 = vmatpush.msrb.mxu3 %v5767_v48  ;;  %v5771_v46 = vld [vmem:[#allocation4 + $0x60] sm:$0xff]  ;;  %671 = vmatpush.msrb.mxu2 %v5775_v56 }
  0x99   :  { %9787 = vst [vmem:[#allocation131_spill] sm:$0xff] %v5751_v52  ;;  %v5773_v52 = vld [vmem:[#allocation4 + $0x68] sm:$0xff]  ;;  %631 = vmatpush.msra.mxu0 %v5771_v46 }
  0x9a   :  { %9788 = vst [vmem:[#allocation132_spill] sm:$0xff] %v5755_v63  ;;  %651 = vmatpush.msra.mxu1 %v5773_v52  ;;  %691 = vmatpush.msrb.mxu3 %v5779_v62  ;;  %v5792_v63 = vld [vmem:[%s9007_s3] sm:$0xf] }
  0x9b   :  { %9789 = vst [vmem:[#allocation133_spill] sm:$0xff] %v5757_v57  ;;  %v5783_v57 = vld [vmem:[#allocation4 + $0x40] sm:$0xff] }
  0x9c   :  { %9790 = vst [vmem:[#allocation134_spill] sm:$0xff] %v5759_v61  ;;  %v5785_v61 = vld [vmem:[#allocation4 + $0x48] sm:$0xff]  ;;  %632 = vmatpush.msra.mxu0 %v5783_v57 }
  0x9d   :  { %9791 = vst [vmem:[#allocation135_spill] sm:$0xff] %v5767_v48  ;;  %v5787_v48 = vld [vmem:[#allocation4 + $0x50] sm:$0xff]  ;;  %652 = vmatpush.msra.mxu1 %v5785_v61 }
  0x9e   :  { %9792 = vst [vmem:[#allocation136_spill] sm:$0xff] %v5771_v46  ;;  %672 = vmatpush.msrb.mxu2 %v5787_v48  ;;  %v5804_v46 = vld [vmem:[#allocation4 + $0x30] sm:$0xff] }
  0x9f   :  { %9793 = vst [vmem:[#allocation137_spill] sm:$0xff] %v5773_v52  ;;  %v5796_v52 = vld [vmem:[#allocation4 + $0x58] sm:$0xff] }
  0xa0   :  { %9794 = vst [vmem:[#allocation138_spill] sm:$0xff] %v5775_v56  ;;  %692 = vmatpush.msrb.mxu3 %v5796_v52  ;;  %v5800_v56 = vld [vmem:[#allocation4 + $0x20] sm:$0xff]  ;;  %673 = vmatpush.msrb.mxu2 %v5804_v46 }
  0xa1   :  { %9795 = vst [vmem:[#allocation139_spill] sm:$0xff] %v5779_v62  ;;  %v5802_v62 = vld [vmem:[#allocation4 + $0x28] sm:$0xff]  ;;  %633 = vmatpush.msra.mxu0 %v5800_v56 }
  0xa2   :  { %9796 = vst [vmem:[#allocation140_spill] sm:$0xff] %v5783_v57  ;;  %653 = vmatpush.msra.mxu1 %v5802_v62  ;;  %v5808_v57 = vld [vmem:[#allocation4 + $0x38] sm:$0xff]  ;;  %674 = vmatpush.msrb.mxu2 %v5819_v51 }
  0xa3   :  { %9797 = vst [vmem:[#allocation141_spill] sm:$0xff] %v5785_v61  ;;  %v5811_v61 = vperm.slane %v5792_v63, 0  ;;  %693 = vmatpush.msrb.mxu3 %v5808_v57 }
  0xa4   :  { %9798 = vst [vmem:[#allocation142_spill] sm:$0xff] %v5787_v48  ;;  %v5815_v48 = vld [vmem:[#allocation4] sm:$0xff]  ;;  %808 = vmatpush.msra.mxu2 %v5251_v13 }
  0xa5   :  { %9799 = vst [vmem:[#allocation143_spill] sm:$0xff] %v5796_v52  ;;  %v5817_v52 = vld [vmem:[#allocation4 + $0x8] sm:$0xff]  ;;  %634 = vmatpush.msra.mxu0 %v5815_v48 }
  0xa6   :  { %9800 = vst [vmem:[#allocation144_spill] sm:$0xff] %v5800_v56  ;;  %654 = vmatpush.msra.mxu1 %v5817_v52  ;;  %809 = vmatpush.msra.mxu2 %v5263_v17 }
  0xa7   :  { %9801 = vst [vmem:[#allocation145_spill] sm:$0xff] %v5802_v62  ;;  %v5823_v62 = vld [vmem:[#allocation4 + $0x18] sm:$0xff]  ;;  %768 = vmatpush.msrb.mxu0 %v5231_v6 }
  0xa8   :  { %9802 = vst [vmem:[#allocation146_spill] sm:$0xff] %v5804_v46  ;;  %694 = vmatpush.msrb.mxu3 %v5823_v62  ;;  %788 = vmatpush.msrb.mxu1 %v5217_v0  ;;  %v5842_v0 = vperm.slane %v5792_v63, 1 }
  0xa9   :  { %9803 = vst [vmem:[#allocation147_spill] sm:$0xff] %v5811_v61  ;;  %769 = vmatpush.msrb.mxu0 %v5235_v7  ;;  %810 = vmatpush.msra.mxu2 %v5269_v19  ;;  %v5894_v19 = vperm.slane %v5792_v63, 2 }
  0xaa   :  { %v5763_v58 = vpop.f32.mrf.mxu1  ;;  %9804 = vst [vmem:[#allocation148_spill] sm:$0xff] %v5817_v52  ;;  %828 = vmatpush.msra.mxu3 %v5219_v1  ;;  %789 = vmatpush.msrb.mxu1 %v5221_v2 }
  0xab   :  { %9805 = vst [vmem:[#allocation149_spill] sm:$0xff] %v5842_v0  ;;  %770 = vmatpush.msrb.mxu0 %v5244_v10  ;;  %811 = vmatpush.msra.mxu2 %v5281_v23  ;;  %v9807_v23 = vld [vmem:[#allocation10_spill] sm:$0xff] }
  0xac   :  { %829 = vmatpush.msra.mxu3 %v5225_v3  ;;  %790 = vmatpush.msrb.mxu1 %v5227_v4 }
  0xad   :  { %v310_v59 = vpop.f32.mrf.mxu0  ;;  %771 = vmatpush.msrb.mxu0 %v5255_v14  ;;  %812 = vmatpush.msra.mxu2 %v5293_v27 }
  0xae   :  { %830 = vmatpush.msra.mxu3 %v5229_v5  ;;  %791 = vmatpush.msrb.mxu1 %v5237_v8 }
  0xaf   :  { %772 = vmatpush.msrb.mxu0 %v5267_v18  ;;  %813 = vmatpush.msra.mxu2 %v5305_v31  ;;  %v9812_v31 = vld [vmem:[#allocation18_spill] sm:$0xff] }
  0xb0   :  { %v370_v55 = vpop.f32.mrf.mxu3  ;;  %831 = vmatpush.msra.mxu3 %v5239_v9  ;;  %792 = vmatpush.msrb.mxu1 %v5246_v11 }
  0xb1   :  { %773 = vmatpush.msrb.mxu0 %v5279_v22  ;;  %814 = vmatpush.msra.mxu2 %v5317_v35  ;;  %v9806_v22 = vld [vmem:[#allocation19_spill] sm:$0xff]  ;;  %v9814_v35 = vld [vmem:[#allocation24_spill] sm:$0xff] }
  0xb2   :  { %v409_v36 = vpop.f32.mrf.mxu1  ;;  %832 = vmatpush.msra.mxu3 %v5248_v12  ;;  %793 = vmatpush.msrb.mxu1 %v5257_v15 }
  0xb3   :  { %v410_v56 = vadd.f32 %v409_v36, %v310_v59  ;;  %v5835_v36 = vperm.slane %v5792_v63, 3  ;;  %774 = vmatpush.msrb.mxu0 %v5291_v26  ;;  %815 = vmatpush.msra.mxu2 %v5335_v40  ;;  %v9809_v26 = vld [vmem:[#allocation11_spill] sm:$0xff] }
  0xb4   :  { %833 = vmatpush.msra.mxu3 %v5259_v16  ;;  %794 = vmatpush.msrb.mxu1 %v5271_v20 }
  0xb5   :  { %v472_v46 = vadd.f32 %v410_v56, %v5811_v61  ;;  %775 = vmatpush.msrb.mxu0 %v5303_v30  ;;  %816 = vmatpush.msra.mxu2 %v5347_v44  ;;  %v850_v56 = vld.sshfl [vmem:[#allocation1 + $0x8] sm:$0xff pattern:$0x73625140] }
  0xb6   :  { %834 = vmatpush.msra.mxu3 %v5273_v21  ;;  %795 = vmatpush.msrb.mxu1 %v5283_v24 }
  0xb7   :  { %v4126_v52 = vmul.f32 -1.442695, %v472_v46  ;;  %776 = vmatpush.msrb.mxu0 %v5315_v34  ;;  %817 = vmatpush.msra.mxu2 %v5363_v50  ;;  %v9818_v46 = vld [vmem:[#allocation27_spill] sm:$0xff] }
  0xb8   :  { %v469_v59 = vpop.f32.mrf.mxu3  ;;  %835 = vmatpush.msra.mxu3 %v5285_v25  ;;  %796 = vmatpush.msrb.mxu1 %v5295_v28  ;;  %v9808_v25 = vld [vmem:[#allocation15_spill] sm:$0xff]  ;;  %v9810_v28 = vld [vmem:[#allocation21_spill] sm:$0xff] }
  0xb9   :  { %4244 = vpow2.f32 %v4126_v52  ;;  %v470_v6 = vadd.f32 %v469_v59, %v370_v55  ;;  %v350_v5 = vpop.f32.mrf.mxu2  ;;  %777 = vmatpush.msrb.mxu0 %v5333_v39  ;;  %818 = vmatpush.msra.mxu2 %v5373_v54 }
  0xba   :  { %v429_v1 = vpop.f32.mrf.mxu1  ;;  %836 = vmatpush.msra.mxu3 %v5297_v29  ;;  %797 = vmatpush.msrb.mxu1 %v5307_v32  ;;  %v9811_v29 = vld [vmem:[#allocation12_spill] sm:$0xff]  ;;  %v9813_v32 = vld [vmem:[#allocation13_spill] sm:$0xff] }
  0xbb   :  { %v475_v2 = vadd.f32 %v470_v6, %v5835_v36  ;;  %v430_v7 = vadd.f32 %v429_v1, %v5763_v58  ;;  %778 = vmatpush.msrb.mxu0 %v5345_v43  ;;  %819 = vmatpush.msra.mxu2 %v5383_v60  ;;  %v849_v58 = vld.sshfl [vmem:[#allocation1] sm:$0xff pattern:$0x73625140]  ;;  %v852_v6 = vld.sshfl [vmem:[#allocation1 + $0x18] sm:$0xff pattern:$0x73625140] }
  0xbc   :  { %837 = vmatpush.msra.mxu3 %v5309_v33  ;;  %798 = vmatpush.msrb.mxu1 %v5324_v37  ;;  %v9815_v37 = vld [vmem:[#allocation14_spill] sm:$0xff] }
  0xbd   :  { %v4128_v3 = vmul.f32 -1.442695, %v475_v2  ;;  %v473_v4 = vadd.f32 %v430_v7, %v5842_v0  ;;  %779 = vmatpush.msrb.mxu0 %v5361_v49  ;;  %820 = vmatpush.msra.mxu2 %v9806_v22  ;;  %v851_v1 = vld.sshfl [vmem:[#allocation1 + $0x10] sm:$0xff pattern:$0x73625140]  ;;  %v9825_v22 = vld [vmem:[#allocation23_spill] sm:$0xff] }
  0xbe   :  { %838 = vmatpush.msra.mxu3 %v5326_v38  ;;  %799 = vmatpush.msrb.mxu1 %v5337_v41  ;;  %v9816_v41 = vld [vmem:[#allocation20_spill] sm:$0xff] }
  0xbf   :  { %v4245_v10 = vpop.eup %4244  ;;  %4246 = vpow2.f32 %v4128_v3  ;;  %v4127_v13 = vmul.f32 -1.442695, %v473_v4  ;;  %780 = vmatpush.msrb.mxu0 %v5371_v53  ;;  %821 = vmatpush.msra.mxu2 %v9810_v28  ;;  %v9820_v3 = vld [vmem:[#allocation9_spill] sm:$0xff] }
  0xc0   :  { %v5861_v8 = vadd.f32 1.0, %v4245_v10  ;;  %839 = vmatpush.msra.mxu3 %v5339_v42  ;;  %800 = vmatpush.msrb.mxu1 %v5349_v45  ;;  %v9817_v42 = vld [vmem:[#allocation16_spill] sm:$0xff]  ;;  %1320 = vst [vmem:[#allocation1] ss:$4 sm:$0xff] %v9820_v3  ;;  %v9830_v28 = vld [vmem:[#allocation33_spill] sm:$0xff] }
  0xc1   :  { %4248 = vpow2.f32 %v4127_v13  ;;  %v449_v15 = vpop.f32.mrf.mxu2  ;;  %781 = vmatpush.msrb.mxu0 %v9808_v25  ;;  %822 = vmatpush.msra.mxu2 %v9814_v35  ;;  %v4132_v25 = vld [vmem:[%s9004_s0 + $0x8] sm:$0xff]  ;;  %v9837_v35 = vld [vmem:[#allocation35_spill] sm:$0xff] }
  0xc2   :  { %4250 = vrcp.f32 %v5861_v8  ;;  %v450_v20 = vadd.f32 %v449_v15, %v350_v5  ;;  %840 = vmatpush.msra.mxu3 %v9807_v23  ;;  %801 = vmatpush.msrb.mxu1 %v9809_v26  ;;  %v489_v39 = vand.u32 2147483647, %v5861_v8  ;;  %v491_v40 = vand.u32 2147483648, %v5861_v8  ;;  %v9826_v23 = vld [vmem:[#allocation34_spill] sm:$0xff] }
  0xc3   :  { %782 = vmatpush.msrb.mxu0 %v9812_v31  ;;  %vm485_vm3 = vweird.f32 %v5861_v8  ;;  %823 = vmatpush.msra.mxu2 %v9818_v46  ;;  %v9828_v26 = vld [vmem:[#allocation26_spill] sm:$0xff]  ;;  %v9833_v31 = vld [vmem:[#allocation31_spill] sm:$0xff]  ;;  %v9847_v46 = vld [vmem:[#allocation49_spill] sm:$0xff] }
  0xc4   :  { %v474_v24 = vadd.f32 %v450_v20, %v5894_v19  ;;  %841 = vmatpush.msra.mxu3 %v9811_v29  ;;  %802 = vmatpush.msrb.mxu1 %v9813_v32  ;;  %vm490_vm6 = vcmp.eq.f32.partialorder %v489_v39, 8.507059e+37  ;;  %v492_v53 = vor.u32 1.1754944e-38, %v491_v40  ;;  %v9823_v20 = vld [vmem:[#allocation29_spill] sm:$0xff]  ;;  %v9831_v29 = vld [vmem:[#allocation32_spill] sm:$0xff]  ;;  %v9840_v39 = vld [vmem:[#allocation50_spill] sm:$0xff] }
  0xc5   :  { %v4247_v9 = vpop.eup %4246  ;;  %783 = vmatpush.msrb.mxu0 %v9816_v41  ;;  %v9834_v32 = vld [vmem:[#allocation37_spill] sm:$0xff]  ;;  %v9841_v40 = vld [vmem:[#allocation39_spill] sm:$0xff]  ;;  %v9842_v41 = vld [vmem:[#allocation44_spill] sm:$0xff] }
  0xc6   :  { %v5876_v11 = vadd.f32 1.0, %v4247_v9  ;;  %842 = vmatpush.msra.mxu3 %v9815_v37  ;;  %803 = vmatpush.msrb.mxu1 %v9817_v42  ;;  %v9838_v37 = vld [vmem:[#allocation40_spill] sm:$0xff]  ;;  %v9843_v42 = vld [vmem:[#allocation45_spill] sm:$0xff] }
  0xc7   :  { %v4249_v12 = vpop.eup %4248 }
  0xc8   :  { %v5882_v14 = vpop.eup %4250  ;;  %v498_v17 = vadd.f32 1.0, %v4249_v12  ;;  %4252 = vrcp.f32 %v5876_v11  ;;  %843 = vmatpush.msra.mxu3 %v9819_v47  ;;  %vm524_vm11 = vweird.f32 %v5876_v11  ;;  %v528_v9 = vand.u32 2147483647, %v5876_v11  ;;  %v9848_v47 = vld [vmem:[#allocation47_spill] sm:$0xff] }
  0xc9   :  { %v481_v16 = vmul.f32 %v5882_v14, %v5861_v8  ;;  %vm486_vm2 = vweird.f32 %v5882_v14  ;;  %v530_v8 = vand.u32 2147483648, %v5876_v11 }
  0xca   :  { %4254 = vrcp.f32 %v498_v17  ;;  %v510_v44 = vand.u32 2147483648, %v498_v17  ;;  %v508_v45 = vand.u32 2147483647, %v498_v17  ;;  %vm487_vm4 = vmor %vm485_vm3, %vm486_vm2  ;;  %vm504_vm7 = vweird.f32 %v498_v17 }
  0xcb   :  { %v482_v18 = vsub.f32 1.0, %v481_v16  ;;  %4256 = vtanh.f32 %v474_v24  ;;  %vm529_vm13 = vcmp.eq.f32.partialorder %v528_v9, 8.507059e+37  ;;  %v9827_v24 = vld [vmem:[#allocation30_spill] sm:$0xff]  ;;  %v9868_v9 = vld [vmem:[#allocation67_spill] sm:$0xff] }
  0xcc   :  { %v511_v54 = vor.u32 1.1754944e-38, %v510_v44  ;;  %vm509_vm8 = vcmp.eq.f32.partialorder %v508_v45, 8.507059e+37  ;;  %v9845_v44 = vld [vmem:[#allocation43_spill] sm:$0xff]  ;;  %v9846_v45 = vld [vmem:[#allocation48_spill] sm:$0xff] }
  0xcd   :  { %v483_v21 = vmul.f32 %v5882_v14, %v482_v18  ;;  %v9821_v18 = vld [vmem:[#allocation22_spill] sm:$0xff] }
  0xce   :  { %v4253_v27 = vpop.eup %4252 }
  0xcf   :  { %v484_v34 = vadd.f32 %v5882_v14, %v483_v21  ;;  %v520_v38 = vmul.f32 %v4253_v27, %v5876_v11  ;;  %vm525_vm10 = vweird.f32 %v4253_v27  ;;  %v9822_v11 = vld [vmem:[#allocation25_spill] sm:$0xff]  ;;  %v9824_v21 = vld [vmem:[#allocation28_spill] sm:$0xff] }
  0xd0   :  { %v4255_v30 = vpop.eup %4254  ;;  %vm526_vm12 = vmor %vm524_vm11, %vm525_vm10 }
  0xd1   :  { %v500_v33 = vmul.f32 %v4255_v30, %v498_v17  ;;  %v488_v50 = vsel %vm487_vm4, %v5882_v14, %v484_v34  ;;  %vm505_vm5 = vweird.f32 %v4255_v30  ;;  %v521_v52 = vsub.f32 1.0, %v520_v38  ;;  %v4257_v63 = vpop.eup %4256  ;;  %v9836_v34 = vld [vmem:[#allocation46_spill] sm:$0xff]  ;;  %v9839_v38 = vld [vmem:[#allocation41_spill] sm:$0xff] }
  0xd2   :  { %v493_v55 = vsel %vm490_vm6, %v492_v53, %v488_v50  ;;  %vm506_vm9 = vmor %vm504_vm7, %vm505_vm5  ;;  %v531_v14 = vor.u32 1.1754944e-38, %v530_v8  ;;  %v9850_v50 = vld [vmem:[#allocation53_spill] sm:$0xff]  ;;  %v9852_v53 = vld [vmem:[#allocation51_spill] sm:$0xff] }
  0xd3   :  { %v501_v43 = vsub.f32 1.0, %v500_v33  ;;  %v522_v2 = vmul.f32 %v4253_v27, %v521_v52  ;;  %v535_v5 = vmul.f32 %v4257_v63, %v493_v55  ;;  %v9835_v33 = vld [vmem:[#allocation36_spill] sm:$0xff]  ;;  %v9851_v52 = vld [vmem:[#allocation58_spill] sm:$0xff]  ;;  %v9856_v55 = vld [vmem:[#allocation55_spill] sm:$0xff] }
  0xd4   :  { %v9855_v63 = vld [vmem:[#allocation62_spill] sm:$0xff]  ;;  %v9867_v8 = vld [vmem:[#allocation76_spill] sm:$0xff] }
  0xd5   :  { %v502_v49 = vmul.f32 %v4255_v30, %v501_v43  ;;  %v523_v13 = vadd.f32 %v4253_v27, %v522_v2  ;;  %v9844_v43 = vld [vmem:[#allocation54_spill] sm:$0xff]  ;;  %v9862_v2 = vld [vmem:[#allocation65_spill] sm:$0xff] }
  0xd7   :  { %v503_v60 = vadd.f32 %v4255_v30, %v502_v49  ;;  %v527_v12 = vsel %vm526_vm12, %v4253_v27, %v523_v13  ;;  %v9829_v27 = vld [vmem:[#allocation38_spill] sm:$0xff]  ;;  %v9849_v49 = vld [vmem:[#allocation52_spill] sm:$0xff]  ;;  %v9866_v13 = vld [vmem:[#allocation69_spill] sm:$0xff] }
  0xd8   :  { %v532_v16 = vsel %vm529_vm13, %v531_v14, %v527_v12  ;;  %v9869_v12 = vld [vmem:[#allocation73_spill] sm:$0xff]  ;;  %v9870_v14 = vld [vmem:[#allocation75_spill] sm:$0xff] }
  0xd9   :  { %v507_v59 = vsel %vm506_vm9, %v4255_v30, %v503_v60  ;;  %v9832_v30 = vld [vmem:[#allocation42_spill] sm:$0xff]  ;;  %v9854_v60 = vld [vmem:[#allocation57_spill] sm:$0xff] }
  0xda   :  { %v512_v7 = vsel %vm509_vm8, %v511_v54, %v507_v59  ;;  %v9853_v54 = vld [vmem:[#allocation56_spill] sm:$0xff]  ;;  %v9859_v59 = vld [vmem:[#allocation66_spill] sm:$0xff] }
  0xdb   :  { %v534_v4 = vmul.f32 0.0, %v512_v7  ;;  %v9863_v7 = vld [vmem:[#allocation72_spill] sm:$0xff] }
  0xdd   :  { %v5928_v10 = vadd.f32 %v535_v5, %v534_v4  ;;  %v9864_v4 = vld [vmem:[#allocation63_spill] sm:$0xff]  ;;  %v9865_v5 = vld [vmem:[#allocation68_spill] sm:$0xff] }
  0xdf   :  { %4258 = vtanh.f32 %v5928_v10 }
  0xe5   :  { %v4259_v15 = vpop.eup %4258 }
  0xe6   :  { %v538_v17 = vmul.f32 %v4259_v15, %v532_v16  ;;  %v9871_v15 = vld [vmem:[#allocation80_spill] sm:$0xff]  ;;  %v9872_v16 = vld [vmem:[#allocation70_spill] sm:$0xff] }
  0xe8   :  { %635 = vmatmul.f32.vlgmr.msra.gmra.mxu0 %v538_v17  ;;  %655 = vmatmul.f32.vlgmr.msra.gmra.mxu1 %v538_v17 }
  0xe9   :  { %675 = vmatmul.f32.vlgmr.msrb.gmra.mxu2 %v538_v17  ;;  %695 = vmatmul.f32.vlgmr.msrb.gmra.mxu3 %v538_v17 }
  0xea   :  { %4133 = vmatpush.msk.msrb.mxu2 %vm383_vm0, %v849_v58  ;;  %4135 = vmatpush.msk.msra.mxu1 %vm383_vm0, %v850_v56  ;;  %v9857_v58 = vld [vmem:[#allocation60_spill] sm:$0xff]  ;;  %v9858_v56 = vld [vmem:[#allocation61_spill] sm:$0xff] }
  0xeb   :  { %4139 = vmatpush.msk.msrb.mxu3 %vm383_vm0, %v852_v6  ;;  %1011 = vmatpush.msra.mxu0 %v9821_v18  ;;  %v9860_v6 = vld [vmem:[#allocation59_spill] sm:$0xff] }
  0xec   :  { %v9874_v18 = vld [vmem:[#allocation79_spill] sm:$0xff] }
  0xed   :  { %1012 = vmatpush.msra.mxu0 %v9822_v11  ;;  %v9875_v11 = vld [vmem:[#allocation84_spill] sm:$0xff] }
  0xef   :  { %1013 = vmatpush.msra.mxu0 %v9823_v20  ;;  %v9876_v20 = vld [vmem:[#allocation71_spill] sm:$0xff] }
  0xf0   :  { %784 = vmatmul.f32.vlgmr.msrb.gmra.mxu0 %v538_v17  ;;  %804 = vmatmul.f32.vlgmr.msrb.gmra.mxu1 %v538_v17 }
  0xf1   :  { %824 = vmatmul.f32.vlgmr.msra.gmra.mxu2 %v538_v17  ;;  %844 = vmatmul.f32.vlgmr.msra.gmra.mxu3 %v538_v17  ;;  %v9873_v17 = vld [vmem:[#allocation77_spill] sm:$0xff] }
  0xf2   :  { %4137 = vmatpush.msk.msra.mxu2 %vm383_vm0, %v851_v1  ;;  %1031 = vmatpush.msrb.mxu1 %v9824_v21  ;;  %v9861_v1 = vld [vmem:[#allocation64_spill] sm:$0xff]  ;;  %v9877_v21 = vld [vmem:[#allocation81_spill] sm:$0xff] }
  0xf3   :  { %1071 = vmatpush.msra.mxu3 %v9825_v22  ;;  %1014 = vmatpush.msra.mxu0 %v9826_v23  ;;  %v9878_v22 = vld [vmem:[#allocation83_spill] sm:$0xff]  ;;  %v9879_v23 = vld [vmem:[#allocation88_spill] sm:$0xff] }
  0xf4   :  { %1032 = vmatpush.msrb.mxu1 %v9827_v24  ;;  %v9880_v24 = vld [vmem:[#allocation74_spill] sm:$0xff] }
  0xf5   :  { %1072 = vmatpush.msra.mxu3 %v9828_v26  ;;  %1015 = vmatpush.msra.mxu0 %v9829_v27  ;;  %v9882_v26 = vld [vmem:[#allocation87_spill] sm:$0xff]  ;;  %v9883_v27 = vld [vmem:[#allocation89_spill] sm:$0xff] }
  0xf6   :  { %1033 = vmatpush.msrb.mxu1 %v9830_v28  ;;  %v9884_v28 = vld [vmem:[#allocation78_spill] sm:$0xff] }
  0xf7   :  { %1073 = vmatpush.msra.mxu3 %v9831_v29  ;;  %1016 = vmatpush.msra.mxu0 %v9832_v30  ;;  %v9885_v29 = vld [vmem:[#allocation91_spill] sm:$0xff]  ;;  %v9886_v30 = vld [vmem:[#allocation92_spill] sm:$0xff] }
  0xf8   :  { %4136 = vmatmul.msk.f32.vlgmr.msra.gmra.mxu1 %vm379_vm1, %v4132_v25 }
  0xf9   :  { %4134 = vmatmul.msk.f32.vlgmr.msrb.gmra.mxu2 %vm379_vm1, %v4132_v25  ;;  %4140 = vmatmul.msk.f32.vlgmr.msrb.gmra.mxu3 %vm379_vm1, %v4132_v25 }
  0xfa   :  { %1051 = vmatpush.msrb.mxu2 %v9833_v31  ;;  %1034 = vmatpush.msrb.mxu1 %v9834_v32  ;;  %v9887_v31 = vld [vmem:[#allocation93_spill] sm:$0xff]  ;;  %v9888_v32 = vld [vmem:[#allocation82_spill] sm:$0xff] }
  0xfb   :  { %1074 = vmatpush.msra.mxu3 %v9835_v33  ;;  %1017 = vmatpush.msra.mxu0 %v9836_v34  ;;  %v9889_v33 = vld [vmem:[#allocation95_spill] sm:$0xff]  ;;  %v9890_v34 = vld [vmem:[#allocation96_spill] sm:$0xff] }
  0xfc   :  { %1052 = vmatpush.msrb.mxu2 %v9837_v35  ;;  %1035 = vmatpush.msrb.mxu1 %v9838_v37  ;;  %v9891_v35 = vld [vmem:[#allocation97_spill] sm:$0xff]  ;;  %v9892_v37 = vld [vmem:[#allocation86_spill] sm:$0xff] }
  0xfd   :  { %1075 = vmatpush.msra.mxu3 %v9839_v38  ;;  %1018 = vmatpush.msra.mxu0 %v9840_v39  ;;  %v9893_v38 = vld [vmem:[#allocation99_spill] sm:$0xff]  ;;  %v9894_v39 = vld [vmem:[#allocation90_spill] sm:$0xff] }
  0xfe   :  { %1053 = vmatpush.msrb.mxu2 %v9841_v40  ;;  %1036 = vmatpush.msrb.mxu1 %v9842_v41  ;;  %v9895_v40 = vld [vmem:[#allocation100_spill] sm:$0xff]  ;;  %v9896_v41 = vld [vmem:[#allocation101_spill] sm:$0xff] }
  0xff   :  { %1076 = vmatpush.msra.mxu3 %v9843_v42  ;;  %1019 = vmatpush.msra.mxu0 %v9844_v43  ;;  %v9897_v42 = vld [vmem:[#allocation103_spill] sm:$0xff]  ;;  %v9898_v43 = vld [vmem:[#allocation94_spill] sm:$0xff] }
 0x100   :  { %1054 = vmatpush.msrb.mxu2 %v9845_v44  ;;  %1037 = vmatpush.msrb.mxu1 %v9846_v45  ;;  %v9899_v44 = vld [vmem:[#allocation104_spill] sm:$0xff]  ;;  %v9900_v45 = vld [vmem:[#allocation105_spill] sm:$0xff] }
 0x101   :  { %4138 = vmatmul.msk.f32.vlgmr.msra.gmra.mxu2 %vm379_vm1, %v4132_v25  ;;  %1077 = vmatpush.msra.mxu3 %v9847_v46  ;;  %v9881_v25 = vld [vmem:[#allocation85_spill] sm:$0xff]  ;;  %v9901_v46 = vld [vmem:[#allocation107_spill] sm:$0xff] }
 0x102   :  { %1055 = vmatpush.msrb.mxu2 %v9848_v47  ;;  %1038 = vmatpush.msrb.mxu1 %v9849_v49  ;;  %v9902_v47 = vld [vmem:[#allocation98_spill] sm:$0xff]  ;;  %v9903_v49 = vld [vmem:[#allocation108_spill] sm:$0xff] }
 0x103   :  { %1078 = vmatpush.msra.mxu3 %v9850_v50  ;;  %1020 = vmatpush.msra.mxu0 %v9851_v52  ;;  %v9904_v50 = vld [vmem:[#allocation109_spill] sm:$0xff]  ;;  %v9905_v52 = vld [vmem:[#allocation111_spill] sm:$0xff] }
 0x104   :  { %1056 = vmatpush.msrb.mxu2 %v9852_v53  ;;  %1039 = vmatpush.msrb.mxu1 %v9853_v54  ;;  %v9906_v53 = vld [vmem:[#allocation102_spill] sm:$0xff]  ;;  %v9907_v54 = vld [vmem:[#allocation112_spill] sm:$0xff] }
 0x105   :  { %1079 = vmatpush.msra.mxu3 %v9854_v60  ;;  %1021 = vmatpush.msra.mxu0 %v9855_v63  ;;  %v9908_v60 = vld [vmem:[#allocation113_spill] sm:$0xff]  ;;  %v9909_v63 = vld [vmem:[#allocation115_spill] sm:$0xff] }
 0x106   :  { %1057 = vmatpush.msrb.mxu2 %v9856_v55  ;;  %1040 = vmatpush.msrb.mxu1 %v9857_v58  ;;  %v9910_v55 = vld [vmem:[#allocation106_spill] sm:$0xff]  ;;  %v9911_v58 = vld [vmem:[#allocation116_spill] sm:$0xff] }
 0x107   :  { %1080 = vmatpush.msra.mxu3 %v9858_v56  ;;  %1022 = vmatpush.msra.mxu0 %v9859_v59  ;;  %v9912_v56 = vld [vmem:[#allocation117_spill] sm:$0xff]  ;;  %v9913_v59 = vld [vmem:[#allocation119_spill] sm:$0xff] }
 0x108   :  { %1058 = vmatpush.msrb.mxu2 %v9860_v6  ;;  %1041 = vmatpush.msrb.mxu1 %v9861_v1  ;;  %v9914_v6 = vld [vmem:[#allocation110_spill] sm:$0xff]  ;;  %v9915_v1 = vld [vmem:[#allocation120_spill] sm:$0xff] }
 0x109   :  { %1081 = vmatpush.msra.mxu3 %v9862_v2  ;;  %1023 = vmatpush.msra.mxu0 %v9863_v7  ;;  %v9916_v2 = vld [vmem:[#allocation121_spill] sm:$0xff]  ;;  %v9917_v7 = vld [vmem:[#allocation123_spill] sm:$0xff] }
 0x10a   :  { %1059 = vmatpush.msrb.mxu2 %v9864_v4  ;;  %1042 = vmatpush.msrb.mxu1 %v9865_v5  ;;  %v9918_v4 = vld [vmem:[#allocation114_spill] sm:$0xff]  ;;  %v9919_v5 = vld [vmem:[#allocation124_spill] sm:$0xff] }
 0x10b   :  { %1082 = vmatpush.msra.mxu3 %v9866_v13  ;;  %1024 = vmatpush.msra.mxu0 %v9867_v8  ;;  %v9920_v13 = vld [vmem:[#allocation125_spill] sm:$0xff]  ;;  %v9921_v8 = vld [vmem:[#allocation127_spill] sm:$0xff] }
 0x10c   :  { %1060 = vmatpush.msrb.mxu2 %v9868_v9  ;;  %1043 = vmatpush.msrb.mxu1 %v9869_v12  ;;  %v9922_v9 = vld [vmem:[#allocation118_spill] sm:$0xff]  ;;  %v9923_v12 = vld [vmem:[#allocation128_spill] sm:$0xff] }
 0x10d   :  { %1083 = vmatpush.msra.mxu3 %v9870_v14  ;;  %1025 = vmatpush.msra.mxu0 %v9871_v15  ;;  %v9924_v14 = vld [vmem:[#allocation129_spill] sm:$0xff]  ;;  %v9925_v15 = vld [vmem:[#allocation131_spill] sm:$0xff] }
 0x10e   :  { %1061 = vmatpush.msrb.mxu2 %v9872_v16  ;;  %1044 = vmatpush.msrb.mxu1 %v9873_v17  ;;  %v9926_v16 = vld [vmem:[#allocation122_spill] sm:$0xff]  ;;  %v9927_v17 = vld [vmem:[#allocation132_spill] sm:$0xff] }
 0x10f   :  { %1084 = vmatpush.msra.mxu3 %v9874_v18  ;;  %1026 = vmatpush.msra.mxu0 %v9875_v11  ;;  %v9928_v18 = vld [vmem:[#allocation133_spill] sm:$0xff]  ;;  %v9929_v11 = vld [vmem:[#allocation135_spill] sm:$0xff] }
 0x110   :  { %1062 = vmatpush.msrb.mxu2 %v9876_v20  ;;  %1045 = vmatpush.msrb.mxu1 %v9877_v21  ;;  %v9930_v20 = vld [vmem:[#allocation126_spill] sm:$0xff]  ;;  %v9931_v21 = vld [vmem:[#allocation136_spill] sm:$0xff] }
 0x111   :  { %1085 = vmatpush.msra.mxu3 %v9878_v22  ;;  %1091 = vmatpush.msrb.mxu0 %v9879_v23  ;;  %v9932_v22 = vld [vmem:[#allocation137_spill] sm:$0xff]  ;;  %v9933_v23 = vld [vmem:[#allocation139_spill] sm:$0xff] }
 0x112   :  { %1063 = vmatpush.msrb.mxu2 %v9880_v24  ;;  %1046 = vmatpush.msrb.mxu1 %v9881_v25  ;;  %v9934_v24 = vld [vmem:[#allocation130_spill] sm:$0xff]  ;;  %v9935_v25 = vld [vmem:[#allocation140_spill] sm:$0xff] }
 0x113   :  { %1086 = vmatpush.msra.mxu3 %v9882_v26  ;;  %1092 = vmatpush.msrb.mxu0 %v9886_v30  ;;  %v9936_v26 = vld [vmem:[#allocation141_spill] sm:$0xff] }
 0x114   :  { %1111 = vmatpush.msra.mxu1 %v9883_v27  ;;  %1064 = vmatpush.msrb.mxu2 %v9884_v28  ;;  %v9937_v27 = vld [vmem:[#allocation143_spill] sm:$0xff]  ;;  %v9938_v28 = vld [vmem:[#allocation134_spill] sm:$0xff]  ;;  %v9940_v30 = vld [vmem:[#allocation145_spill] sm:$0xff] }
 0x115   :  { %1151 = vmatpush.msrb.mxu3 %v9885_v29  ;;  %1093 = vmatpush.msrb.mxu0 %v9890_v34  ;;  %v9939_v29 = vld [vmem:[#allocation144_spill] sm:$0xff]  ;;  %v9944_v34 = vld [vmem:[#allocation146_spill] sm:$0xff] }
 0x116   :  { %1112 = vmatpush.msra.mxu1 %v9887_v31  ;;  %1065 = vmatpush.msrb.mxu2 %v9888_v32  ;;  %v9941_v31 = vld [vmem:[#allocation138_spill] sm:$0xff]  ;;  %v9942_v32 = vld [vmem:[#allocation148_spill] sm:$0xff] }
 0x117   :  { %1152 = vmatpush.msrb.mxu3 %v9889_v33  ;;  %1094 = vmatpush.msrb.mxu0 %v9895_v40  ;;  %v9943_v33 = vld [vmem:[#allocation142_spill] sm:$0xff] }
 0x118   :  { %1113 = vmatpush.msra.mxu1 %v9891_v35  ;;  %1066 = vmatpush.msrb.mxu2 %v9892_v37  ;;  %v556_v35 = vpop.f32.mrf.mxu0  ;;  %v576_v37 = vpop.f32.mrf.mxu1 }
 0x119   :  { %1153 = vmatpush.msrb.mxu3 %v9893_v38  ;;  %1095 = vmatpush.msrb.mxu0 %v9899_v44  ;;  %v596_v38 = vpop.f32.mrf.mxu2 }
 0x11a   :  { %1131 = vmatpush.msra.mxu2 %v9894_v39  ;;  %1114 = vmatpush.msra.mxu1 %v9896_v41  ;;  %v616_v39 = vpop.f32.mrf.mxu3 }
 0x11b   :  { %1154 = vmatpush.msrb.mxu3 %v9897_v42  ;;  %1096 = vmatpush.msrb.mxu0 %v9903_v49 }
 0x11c   :  { %1132 = vmatpush.msra.mxu2 %v9898_v43  ;;  %1115 = vmatpush.msra.mxu1 %v9900_v45 }
 0x11d   :  { %1155 = vmatpush.msrb.mxu3 %v9901_v46  ;;  %1097 = vmatpush.msrb.mxu0 %v9907_v54 }
 0x11e   :  { %1133 = vmatpush.msra.mxu2 %v9902_v47  ;;  %1116 = vmatpush.msra.mxu1 %v9904_v50 }
 0x11f   :  { %1156 = vmatpush.msrb.mxu3 %v9905_v52  ;;  %1098 = vmatpush.msrb.mxu0 %v9911_v58 }
 0x120   :  { %1134 = vmatpush.msra.mxu2 %v9906_v53  ;;  %1117 = vmatpush.msra.mxu1 %v9908_v60 }
 0x121   :  { %1157 = vmatpush.msrb.mxu3 %v9909_v63  ;;  %1099 = vmatpush.msrb.mxu0 %v9915_v1 }
 0x122   :  { %1135 = vmatpush.msra.mxu2 %v9910_v55  ;;  %1118 = vmatpush.msra.mxu1 %v9912_v56 }
 0x123   :  { %1158 = vmatpush.msrb.mxu3 %v9913_v59  ;;  %1100 = vmatpush.msrb.mxu0 %v9919_v5 }
 0x124   :  { %1136 = vmatpush.msra.mxu2 %v9914_v6  ;;  %1119 = vmatpush.msra.mxu1 %v9916_v2 }
 0x125   :  { %1159 = vmatpush.msrb.mxu3 %v9917_v7  ;;  %1101 = vmatpush.msrb.mxu0 %v9923_v12 }
 0x126   :  { %1137 = vmatpush.msra.mxu2 %v9918_v4  ;;  %1120 = vmatpush.msra.mxu1 %v9920_v13 }
 0x127   :  { %1160 = vmatpush.msrb.mxu3 %v9921_v8  ;;  %1102 = vmatpush.msrb.mxu0 %v9927_v17 }
 0x128   :  { %1138 = vmatpush.msra.mxu2 %v9922_v9  ;;  %1121 = vmatpush.msra.mxu1 %v9924_v14 }
 0x129   :  { %1161 = vmatpush.msrb.mxu3 %v9925_v15  ;;  %1103 = vmatpush.msrb.mxu0 %v9931_v21 }
 0x12a   :  { %1139 = vmatpush.msra.mxu2 %v9926_v16  ;;  %1122 = vmatpush.msra.mxu1 %v9928_v18 }
 0x12b   :  { %1162 = vmatpush.msrb.mxu3 %v9929_v11  ;;  %1104 = vmatpush.msrb.mxu0 %v9935_v25 }
 0x12c   :  { %1140 = vmatpush.msra.mxu2 %v9930_v20  ;;  %1123 = vmatpush.msra.mxu1 %v9932_v22 }
 0x12d   :  { %1163 = vmatpush.msrb.mxu3 %v9933_v23  ;;  %1105 = vmatpush.msrb.mxu0 %v9939_v29 }
 0x12e   :  { %1141 = vmatpush.msra.mxu2 %v9934_v24  ;;  %1124 = vmatpush.msra.mxu1 %v9936_v26 }
 0x12f   :  { %1164 = vmatpush.msrb.mxu3 %v9937_v27  ;;  %1106 = vmatpush.msrb.mxu0 %v5815_v48 }
 0x130   :  { %1142 = vmatpush.msra.mxu2 %v9938_v28  ;;  %1125 = vmatpush.msra.mxu1 %v9940_v30 }
 0x131   :  { %1165 = vmatpush.msrb.mxu3 %v5808_v57  ;;  %v282_v57 = vld [vmem:[%s9010_s6] sm:$0xf] }
 0x132   :  { %1143 = vmatpush.msra.mxu2 %v9941_v31  ;;  %1126 = vmatpush.msra.mxu1 %v9942_v32  ;;  %v6076_v40 = vperm.slane %v282_v57, 0  ;;  %v6078_v48 = vperm.slane %v282_v57, 1  ;;  %v6082_v47 = vperm.slane %v282_v57, 3  ;;  %v6087_v2 = vperm.slane %v282_v57, 2 }
 0x133   :  { %1166 = vmatpush.msrb.mxu3 %v5823_v62 }
 0x134   :  { %1144 = vmatpush.msra.mxu2 %v9943_v33  ;;  %9945 = vst [vmem:[#allocation19_spill] sm:$0xff] %v6076_v40 }
 0x135   :  { %9946 = vst [vmem:[#allocation10_spill] sm:$0xff] %v6078_v48 }
 0x136   :  { %1145 = vmatpush.msra.mxu2 %v9944_v34  ;;  %9947 = vst [vmem:[#allocation15_spill] sm:$0xff] %v6082_v47 }
 0x137   :  { %9948 = vst [vmem:[#allocation11_spill] sm:$0xff] %v6087_v2 }
 0x138   :  { %1146 = vmatpush.msra.mxu2 %v5819_v51 }
 0x165   :  { %v636_v41 = vpop.f32.mrf.mxu0  ;;  %v656_v62 = vpop.f32.mrf.mxu1 }
 0x166   :  { %v637_v42 = vadd.f32 %v636_v41, %v556_v35  ;;  %v657_v43 = vadd.f32 %v656_v62, %v576_v37 }
 0x168   :  { %v699_v44 = vadd.f32 %v637_v42, %v6076_v40  ;;  %v700_v51 = vadd.f32 %v657_v43, %v6078_v48 }
 0x16a   :  { %v4129_v45 = vmul.f32 -1.442695, %v699_v44  ;;  %v4130_v46 = vmul.f32 -1.442695, %v700_v51 }
 0x16c   :  { %4260 = vpow2.f32 %v4129_v45  ;;  %v676_v49 = vpop.f32.mrf.mxu2  ;;  %v696_v50 = vpop.f32.mrf.mxu3 }
 0x16d   :  { %4262 = vpow2.f32 %v4130_v46  ;;  %v697_v52 = vadd.f32 %v696_v50, %v616_v39  ;;  %v805_v53 = vpop.f32.mrf.mxu1  ;;  %v677_v7 = vadd.f32 %v676_v49, %v596_v38  ;;  %v785_v14 = vpop.f32.mrf.mxu0 }
 0x16f   :  { %v702_v54 = vadd.f32 %v697_v52, %v6082_v47  ;;  %v701_v8 = vadd.f32 %v677_v7, %v6087_v2 }
 0x171   :  { %v4131_v60 = vmul.f32 -1.442695, %v702_v54 }
 0x172   :  { %v4261_v63 = vpop.eup %4260 }
 0x173   :  { %v4263_v55 = vpop.eup %4262  ;;  %v706_v58 = vadd.f32 1.0, %v4261_v63  ;;  %4264 = vpow2.f32 %v4131_v60 }
 0x174   :  { %v725_v56 = vadd.f32 1.0, %v4263_v55  ;;  %v6085_v59 = vpop.f32.mrf.mxu2  ;;  %v845_v6 = vpop.f32.mrf.mxu3 }
 0x175   :  { %4266 = vrcp.f32 %v706_v58  ;;  %v901_v1 = vpop.f32.mrf.mxu1  ;;  %v716_v23 = vand.u32 2147483647, %v706_v58  ;;  %vm712_vm14 = vweird.f32 %v706_v58  ;;  %v718_v26 = vand.u32 2147483648, %v706_v58 }
 0x176   :  { %4268 = vrcp.f32 %v725_v56  ;;  %v902_v4 = vadd.f32 %v901_v1, %v805_v53  ;;  %v737_v28 = vand.u32 2147483648, %v725_v56  ;;  %v735_v32 = vand.u32 2147483647, %v725_v56 }
 0x177   :  { %vm731_vm3 = vweird.f32 %v725_v56  ;;  %vm717_vm4 = vcmp.eq.f32.partialorder %v716_v23, 8.507059e+37  ;;  %v719_v38 = vor.u32 1.1754944e-38, %v718_v26  ;;  %v6251_v26 = vld [vmem:[#allocation2 + $0x130] sm:$0xff] }
 0x178   :  { %v945_v13 = vadd.f32 %v902_v4, %v5842_v0  ;;  %v738_v42 = vor.u32 1.1754944e-38, %v737_v28  ;;  %vm736_vm7 = vcmp.eq.f32.partialorder %v735_v32, 8.507059e+37  ;;  %v6136_v28 = vld [vmem:[#allocation2 + $0x1e0] sm:$0xff] }
 0x179   :  { %v4265_v5 = vpop.eup %4264 }
 0x17a   :  { %v6091_v9 = vadd.f32 1.0, %v4265_v5  ;;  %v4142_v15 = vmul.f32 -1.442695, %v945_v13 }
 0x17b   :  { %v4267_v12 = vpop.eup %4266 }
 0x17c   :  { %v4269_v16 = vpop.eup %4268  ;;  %v708_v17 = vmul.f32 %v4267_v12, %v706_v58  ;;  %4270 = vrcp.f32 %v6091_v9  ;;  %v881_v18 = vpop.f32.mrf.mxu2  ;;  %vm713_vm15 = vweird.f32 %v4267_v12  ;;  %v757_v58 = vand.u32 2147483648, %v6091_v9 }
 0x17d   :  { %v941_v11 = vpop.f32.mrf.mxu3  ;;  %v727_v20 = vmul.f32 %v4269_v16, %v725_v56  ;;  %4272 = vpow2.f32 %v4142_v15  ;;  %v882_v21 = vadd.f32 %v881_v18, %v785_v14  ;;  %vm732_vm2 = vweird.f32 %v4269_v16  ;;  %vm714_vm5 = vmor %vm712_vm14, %vm713_vm15 }
 0x17e   :  { %v709_v22 = vsub.f32 1.0, %v708_v17  ;;  %4274 = vtanh.f32 %v701_v8  ;;  %v942_v24 = vadd.f32 %v941_v11, %v845_v6  ;;  %vm733_vm6 = vmor %vm731_vm3, %vm732_vm2  ;;  %v755_v4 = vand.u32 2147483647, %v6091_v9 }
 0x17f   :  { %v728_v25 = vsub.f32 1.0, %v727_v20  ;;  %v944_v27 = vadd.f32 %v882_v21, %v5811_v61  ;;  %vm751_vm9 = vweird.f32 %v6091_v9  ;;  %v758_v14 = vor.u32 1.1754944e-38, %v757_v58 }
 0x180   :  { %v710_v29 = vmul.f32 %v4267_v12, %v709_v22  ;;  %v947_v30 = vadd.f32 %v942_v24, %v5835_v36  ;;  %vm756_vm11 = vcmp.eq.f32.partialorder %v755_v4, 8.507059e+37  ;;  %v6198_v4 = vld [vmem:[#allocation2 + $0x160] sm:$0xff] }
 0x181   :  { %v729_v31 = vmul.f32 %v4269_v16, %v728_v25  ;;  %v4141_v33 = vmul.f32 -1.442695, %v944_v27 }
 0x182   :  { %v4271_v34 = vpop.eup %4270  ;;  %v711_v35 = vadd.f32 %v4267_v12, %v710_v29  ;;  %v4143_v37 = vmul.f32 -1.442695, %v947_v30  ;;  %v6139_v29 = vld [vmem:[#allocation2 + $0x1e8] sm:$0xff] }
 0x183   :  { %v4273_v57 = vpop.eup %4272  ;;  %v730_v39 = vadd.f32 %v4269_v16, %v729_v31  ;;  %v747_v41 = vmul.f32 %v4271_v34, %v6091_v9  ;;  %4276 = vpow2.f32 %v4141_v33  ;;  %vm752_vm8 = vweird.f32 %v4271_v34  ;;  %v6146_v33 = vld [vmem:[#allocation2 + $0x1f0] sm:$0xff] }
 0x184   :  { %v4275_v62 = vpop.eup %4274  ;;  %v715_v43 = vsel %vm714_vm5, %v4267_v12, %v711_v35  ;;  %v6099_v44 = vadd.f32 1.0, %v4273_v57  ;;  %4278 = vpow2.f32 %v4143_v37  ;;  %v921_v6 = vpop.f32.mrf.mxu2  ;;  %vm753_vm10 = vmor %vm751_vm9, %vm752_vm8  ;;  %v6152_v57 = vld [vmem:[#allocation2 + $0x1c0] sm:$0xff] }
 0x185   :  { %v720_v51 = vsel %vm717_vm4, %v719_v38, %v715_v43  ;;  %v734_v45 = vsel %vm733_vm6, %v4269_v16, %v730_v39  ;;  %v748_v46 = vsub.f32 1.0, %v747_v41  ;;  %v922_v13 = vadd.f32 %v921_v6, %v6085_v59  ;;  %v6155_v38 = vld [vmem:[#allocation2 + $0x1c8] sm:$0xff]  ;;  %v6159_v41 = vld [vmem:[#allocation2 + $0x1d0] sm:$0xff] }
 0x186   :  { %v739_v49 = vsel %vm736_vm7, %v738_v42, %v734_v45  ;;  %v762_v50 = vmul.f32 %v4275_v62, %v720_v51  ;;  %4280 = vrcp.f32 %v6099_v44  ;;  %v982_v22 = vand.u32 2147483648, %v6099_v44  ;;  %v6162_v62 = vld [vmem:[#allocation2 + $0x1d8] sm:$0xff]  ;;  %v6170_v51 = vld [vmem:[#allocation2 + $0x1a0] sm:$0xff]  ;;  %v6173_v45 = vld [vmem:[#allocation2 + $0x1a8] sm:$0xff] }
 0x187   :  { %v761_v52 = vmul.f32 0.0, %v739_v49  ;;  %v749_v53 = vmul.f32 %v4271_v34, %v748_v46  ;;  %v946_v11 = vadd.f32 %v922_v13, %v5894_v19  ;;  %vm976_vm13 = vweird.f32 %v6099_v44  ;;  %v6178_v49 = vld [vmem:[#allocation2 + $0x1b0] sm:$0xff] }
 0x188   :  { %v980_v25 = vand.u32 2147483647, %v6099_v44  ;;  %v983_v35 = vor.u32 1.1754944e-38, %v982_v22 }
 0x189   :  { %v4277_v54 = vpop.eup %4276  ;;  %v6102_v60 = vadd.f32 %v762_v50, %v761_v52  ;;  %v750_v1 = vadd.f32 %v4271_v34, %v749_v53  ;;  %v6181_v50 = vld [vmem:[#allocation2 + $0x1b8] sm:$0xff] }
 0x18a   :  { %v4279_v63 = vpop.eup %4278  ;;  %v6104_v55 = vadd.f32 1.0, %v4277_v54  ;;  %vm981_vm3 = vcmp.eq.f32.partialorder %v980_v25, 8.507059e+37  ;;  %v6307_v25 = vld [vmem:[#allocation2 + $0xb8] sm:$0xff] }
 0x18b   :  { %v6107_v56 = vadd.f32 1.0, %v4279_v63  ;;  %4282 = vtanh.f32 %v6102_v60  ;;  %v754_v12 = vsel %vm753_vm10, %v4271_v34, %v750_v1  ;;  %v6149_v34 = vld [vmem:[#allocation2 + $0x1f8] sm:$0xff]  ;;  %v6185_v63 = vld [vmem:[#allocation2 + $0x180] sm:$0xff]  ;;  %v6192_v1 = vld [vmem:[#allocation2 + $0x190] sm:$0xff]  ;;  %9967 = vst [vmem:[#allocation25_spill] sm:$0xff] %v6307_v25 }
 0x18c   :  { %v6110_v7 = vpop.eup %4280  ;;  %4284 = vrcp.f32 %v6104_v55  ;;  %v759_v17 = vsel %vm756_vm11, %v758_v14, %v754_v12  ;;  %v963_v27 = vand.u32 2147483648, %v6104_v55  ;;  %v961_v31 = vand.u32 2147483647, %v6104_v55  ;;  %v6210_v12 = vld [vmem:[#allocation2 + $0x178] sm:$0xff] }
 0x18d   :  { %v972_v5 = vmul.f32 %v6110_v7, %v6099_v44  ;;  %4286 = vrcp.f32 %v6107_v56  ;;  %vm977_vm12 = vweird.f32 %v6110_v7  ;;  %vm957_vm2 = vweird.f32 %v6104_v55 }
 0x18e   :  { %vm6131_vm14 = vmor %vm976_vm13, %vm977_vm12  ;;  %4288 = vtanh.f32 %v946_v11  ;;  %v964_v43 = vor.u32 1.1754944e-38, %v963_v27  ;;  %vm962_vm5 = vcmp.eq.f32.partialorder %v961_v31, 8.507059e+37  ;;  %v1002_v13 = vand.u32 2147483648, %v6107_v56  ;;  %v6226_v11 = vld [vmem:[#allocation2 + $0x150] sm:$0xff]  ;;  %v6263_v31 = vld [vmem:[#allocation2 + $0x108] sm:$0xff] }
 0x18f   :  { %v973_v8 = vsub.f32 1.0, %v972_v5  ;;  %v6201_v5 = vld [vmem:[#allocation2 + $0x168] sm:$0xff]  ;;  %vm996_vm7 = vweird.f32 %v6107_v56  ;;  %v1000_v22 = vand.u32 2147483647, %v6107_v56 }
 0x191   :  { %v4283_v15 = vpop.eup %4282  ;;  %v974_v16 = vmul.f32 %v6110_v7, %v973_v8  ;;  %v6207_v8 = vld [vmem:[#allocation2 + $0x170] sm:$0xff]  ;;  %vm1001_vm9 = vcmp.eq.f32.partialorder %v1000_v22, 8.507059e+37 }
 0x192   :  { %v4285_v18 = vpop.eup %4284  ;;  %v765_v20 = vmul.f32 %v4283_v15, %v759_v17  ;;  %v6215_v15 = vld [vmem:[#allocation2 + $0x140] sm:$0xff]  ;;  %v6221_v17 = vld.sshfl [vmem:[#allocation1] sm:$0xff pattern:$0x73625140]  ;;  %v6304_v22 = vld [vmem:[#allocation2 + $0xb0] sm:$0xff] }
 0x193   :  { %v6121_v21 = vpop.eup %4286  ;;  %v953_v9 = vmul.f32 %v4285_v18, %v6104_v55  ;;  %v975_v59 = vadd.f32 %v6110_v7, %v974_v16  ;;  %vm958_vm15 = vweird.f32 %v4285_v18  ;;  %v6188_v55 = vld [vmem:[#allocation2 + $0x188] sm:$0xff]  ;;  %9966 = vst [vmem:[#allocation22_spill] sm:$0xff] %v6304_v22 }
 0x194   :  { %v992_v23 = vmul.f32 %v6121_v21, %v6107_v56  ;;  %1027 = vmatmul.f32.vlgmr.msra.gmra.mxu0 %v765_v20  ;;  %1047 = vmatmul.f32.vlgmr.msrb.gmra.mxu1 %v765_v20  ;;  %vm6166_vm4 = vmor %vm957_vm2, %vm958_vm15  ;;  %v4289_v52 = vpop.eup %4288  ;;  %vm997_vm6 = vweird.f32 %v6121_v21  ;;  %v6218_v16 = vld [vmem:[#allocation2 + $0x148] sm:$0xff]  ;;  %v6254_v56 = vld [vmem:[#allocation2 + $0x138] sm:$0xff] }
 0x195   :  { %v954_v24 = vsub.f32 1.0, %v953_v9  ;;  %1067 = vmatmul.f32.vlgmr.msrb.gmra.mxu2 %v765_v20  ;;  %1087 = vmatmul.f32.vlgmr.msra.gmra.mxu3 %v765_v20  ;;  %v979_v32 = vsel %vm6131_vm14, %v6110_v7, %v975_v59  ;;  %v6195_v7 = vld [vmem:[#allocation2 + $0x198] sm:$0xff]  ;;  %v6232_v9 = vld.sshfl [vmem:[#allocation1 + $0x10] sm:$0xff pattern:$0x73625140]  ;;  %vm6247_vm8 = vmor %vm996_vm7, %vm997_vm6 }
 0x196   :  { %1240 = vmatpush.msra.mxu0 %v6136_v28  ;;  %1260 = vmatpush.msrb.mxu1 %v6139_v29  ;;  %v993_v37 = vsub.f32 1.0, %v992_v23  ;;  %v984_v44 = vsel %vm981_vm3, %v983_v35, %v979_v32  ;;  %v6229_v20 = vld [vmem:[#allocation2 + $0x158] sm:$0xff]  ;;  %v6234_v59 = vld.sshfl [vmem:[#allocation1 + $0x18] sm:$0xff pattern:$0x73625140]  ;;  %v6238_v23 = vld [vmem:[#allocation2 + $0x120] sm:$0xff] }
 0x197   :  { %v955_v30 = vmul.f32 %v4285_v18, %v954_v24  ;;  %1280 = vmatpush.msrb.mxu2 %v6146_v33  ;;  %1300 = vmatpush.msra.mxu3 %v6149_v34  ;;  %v1006_v58 = vmul.f32 %v984_v44, %v5928_v10  ;;  %v6241_v24 = vld [vmem:[#allocation2 + $0x128] sm:$0xff]  ;;  %v1003_v32 = vor.u32 1.1754944e-38, %v1002_v13  ;;  %v6266_v35 = vld [vmem:[#allocation2 + $0x110] sm:$0xff]  ;;  %v6298_v13 = vld [vmem:[#allocation2 + $0xa0] sm:$0xff] }
 0x198   :  { %1241 = vmatpush.msra.mxu0 %v6152_v57  ;;  %1261 = vmatpush.msrb.mxu1 %v6155_v38  ;;  %v994_v53 = vmul.f32 %v6121_v21, %v993_v37  ;;  %v6269_v37 = vld [vmem:[#allocation2 + $0x118] sm:$0xff]  ;;  %v6278_v44 = vld [vmem:[#allocation2 + $0xf0] sm:$0xff]  ;;  %9964 = vst [vmem:[#allocation17_spill] sm:$0xff] %v6298_v13 }
 0x199   :  { %v956_v39 = vadd.f32 %v4285_v18, %v955_v30  ;;  %1281 = vmatpush.msrb.mxu2 %v6159_v41  ;;  %1301 = vmatpush.msra.mxu3 %v6162_v62  ;;  %v6260_v30 = vld [vmem:[#allocation2 + $0x100] sm:$0xff]  ;;  %9955 = vst [vmem:[#allocation21_spill] sm:$0xff] %v6269_v37 }
 0x19a   :  { %1242 = vmatpush.msra.mxu0 %v6170_v51  ;;  %1262 = vmatpush.msrb.mxu1 %v6173_v45  ;;  %v995_v14 = vadd.f32 %v6121_v21, %v994_v53  ;;  %9958 = vst [vmem:[#allocation13_spill] sm:$0xff] %v6278_v44  ;;  %v6286_v53 = vld [vmem:[#allocation2 + $0xc0] sm:$0xff] }
 0x19b   :  { %v960_v46 = vsel %vm6166_vm4, %v4285_v18, %v956_v39  ;;  %1282 = vmatpush.msrb.mxu2 %v6178_v49  ;;  %1302 = vmatpush.msra.mxu3 %v6181_v50  ;;  %v6223_v18 = vld.sshfl [vmem:[#allocation1 + $0x8] sm:$0xff pattern:$0x73625140]  ;;  %9960 = vst [vmem:[#allocation14_spill] sm:$0xff] %v6286_v53 }
 0x19c   :  { %v965_v54 = vsel %vm962_vm5, %v964_v43, %v960_v46  ;;  %1243 = vmatpush.msra.mxu0 %v6185_v63  ;;  %1263 = vmatpush.msrb.mxu1 %v6188_v55  ;;  %1792 = vst [vmem:[#allocation1] ss:$4 sm:$0xff] %v9820_v3  ;;  %v999_v27 = vsel %vm6247_vm8, %v6121_v21, %v995_v14  ;;  %v6272_v39 = vld [vmem:[#allocation2 + $0xe0] sm:$0xff]  ;;  %v6275_v21 = vld [vmem:[#allocation2 + $0xe8] sm:$0xff]  ;;  %v6281_v46 = vld [vmem:[#allocation2 + $0xf8] sm:$0xff] }
 0x19d   :  { %v1007_v6 = vmul.f32 %v4289_v52, %v965_v54  ;;  %1283 = vmatpush.msrb.mxu2 %v6192_v1  ;;  %1303 = vmatpush.msra.mxu3 %v6195_v7  ;;  %9956 = vst [vmem:[#allocation12_spill] sm:$0xff] %v6272_v39  ;;  %v1004_v43 = vsel %vm1001_vm9, %v1003_v32, %v999_v27  ;;  %v6289_v54 = vld [vmem:[#allocation2 + $0xc8] sm:$0xff]  ;;  %v6314_v27 = vld [vmem:[#allocation2 + $0x80] sm:$0xff] }
 0x19e   :  { %1244 = vmatpush.msra.mxu0 %v6198_v4  ;;  %1264 = vmatpush.msrb.mxu1 %v6201_v5  ;;  %9957 = vst [vmem:[#allocation18_spill] sm:$0xff] %v6275_v21  ;;  %v6301_v14 = vld [vmem:[#allocation2 + $0xa8] sm:$0xff] }
 0x19f   :  { %v6205_v10 = vadd.f32 %v1007_v6, %v1006_v58  ;;  %1284 = vmatpush.msrb.mxu2 %v6207_v8  ;;  %1304 = vmatpush.msra.mxu3 %v6210_v12  ;;  %9959 = vst [vmem:[#allocation24_spill] sm:$0xff] %v6281_v46  ;;  %v6292_v58 = vld [vmem:[#allocation2 + $0xd0] sm:$0xff]  ;;  %v6295_v6 = vld [vmem:[#allocation2 + $0xd8] sm:$0xff]  ;;  %v6317_v32 = vld [vmem:[#allocation2 + $0x88] sm:$0xff] }
 0x1a0   :  { %1245 = vmatpush.msra.mxu0 %v6215_v15  ;;  %1265 = vmatpush.msrb.mxu1 %v6218_v16  ;;  %9961 = vst [vmem:[#allocation20_spill] sm:$0xff] %v6289_v54 }
 0x1a1   :  { %4290 = vtanh.f32 %v6205_v10  ;;  %1285 = vmatpush.msrb.mxu2 %v6226_v11  ;;  %1305 = vmatpush.msra.mxu3 %v6229_v20  ;;  %9962 = vst [vmem:[#allocation16_spill] sm:$0xff] %v6292_v58 }
 0x1a2   :  { %1246 = vmatpush.msra.mxu0 %v6238_v23  ;;  %1266 = vmatpush.msrb.mxu1 %v6241_v24  ;;  %9963 = vst [vmem:[#allocation27_spill] sm:$0xff] %v6295_v6 }
 0x1a3   :  { %1286 = vmatpush.msrb.mxu2 %v6251_v26  ;;  %1306 = vmatpush.msra.mxu3 %v6254_v56  ;;  %9965 = vst [vmem:[#allocation9_spill] sm:$0xff] %v6301_v14 }
 0x1a4   :  { %1247 = vmatpush.msra.mxu0 %v6260_v30  ;;  %1267 = vmatpush.msrb.mxu1 %v6263_v31  ;;  %9968 = vst [vmem:[#allocation29_spill] sm:$0xff] %v6314_v27 }
 0x1a5   :  { %1287 = vmatpush.msrb.mxu2 %v6266_v35  ;;  %1307 = vmatpush.msra.mxu3 %v6269_v37  ;;  %9969 = vst [vmem:[#allocation28_spill] sm:$0xff] %v6317_v32 }
 0x1a6   :  { %1248 = vmatpush.msra.mxu0 %v6272_v39  ;;  %1268 = vmatpush.msrb.mxu1 %v6275_v21 }
 0x1a7   :  { %v4291_v42 = vpop.eup %4290  ;;  %1288 = vmatpush.msrb.mxu2 %v6278_v44  ;;  %1308 = vmatpush.msra.mxu3 %v6281_v46 }
 0x1a8   :  { %v6284_v52 = vmul.f32 %v4291_v42, %v1004_v43  ;;  %1249 = vmatpush.msra.mxu0 %v6286_v53  ;;  %1269 = vmatpush.msrb.mxu1 %v6289_v54  ;;  %v6320_v42 = vld [vmem:[#allocation2 + $0x90] sm:$0xff]  ;;  %v6323_v43 = vld [vmem:[#allocation2 + $0x98] sm:$0xff] }
 0x1a9   :  { %1289 = vmatpush.msrb.mxu2 %v6292_v58  ;;  %1309 = vmatpush.msra.mxu3 %v6295_v6  ;;  %9970 = vst [vmem:[#allocation23_spill] sm:$0xff] %v6320_v42 }
 0x1aa   :  { %1250 = vmatpush.msra.mxu0 %v6298_v13  ;;  %1270 = vmatpush.msrb.mxu1 %v6301_v14  ;;  %9971 = vst [vmem:[#allocation34_spill] sm:$0xff] %v6323_v43 }
 0x1ab   :  { %1290 = vmatpush.msrb.mxu2 %v6304_v22  ;;  %1310 = vmatpush.msra.mxu3 %v6307_v25  ;;  %v6326_v25 = vld [vmem:[#allocation2 + $0x60] sm:$0xff]  ;;  %v6329_v22 = vld [vmem:[#allocation2 + $0x68] sm:$0xff] }
 0x1ac   :  { %1107 = vmatmul.f32.vlgmr.msrb.gmra.mxu0 %v6284_v52  ;;  %1127 = vmatmul.f32.vlgmr.msra.gmra.mxu1 %v6284_v52  ;;  %9972 = vst [vmem:[#allocation30_spill] sm:$0xff] %v6326_v25 }
 0x1ad   :  { %1147 = vmatmul.f32.vlgmr.msra.gmra.mxu2 %v6284_v52  ;;  %1167 = vmatmul.f32.vlgmr.msrb.gmra.mxu3 %v6284_v52  ;;  %9973 = vst [vmem:[#allocation26_spill] sm:$0xff] %v6329_v22 }
 0x1ae   :  { %1251 = vmatpush.msra.mxu0 %v6314_v27  ;;  %1271 = vmatpush.msrb.mxu1 %v6317_v32  ;;  %v6332_v27 = vld [vmem:[#allocation2 + $0x70] sm:$0xff]  ;;  %v6335_v32 = vld [vmem:[#allocation2 + $0x78] sm:$0xff] }
 0x1af   :  { %1291 = vmatpush.msrb.mxu2 %v6320_v42  ;;  %1311 = vmatpush.msra.mxu3 %v6323_v43  ;;  %9974 = vst [vmem:[#allocation38_spill] sm:$0xff] %v6332_v27  ;;  %v6338_v42 = vld [vmem:[#allocation2 + $0x40] sm:$0xff]  ;;  %v6341_v43 = vld [vmem:[#allocation2 + $0x48] sm:$0xff] }
 0x1b0   :  { %1252 = vmatpush.msra.mxu0 %v6326_v25  ;;  %1272 = vmatpush.msrb.mxu1 %v6329_v22  ;;  %9975 = vst [vmem:[#allocation33_spill] sm:$0xff] %v6335_v32  ;;  %v6344_v25 = vld [vmem:[#allocation2 + $0x50] sm:$0xff]  ;;  %v6347_v22 = vld [vmem:[#allocation2 + $0x58] sm:$0xff] }
 0x1b1   :  { %1292 = vmatpush.msrb.mxu2 %v6332_v27  ;;  %1312 = vmatpush.msra.mxu3 %v6335_v32  ;;  %9976 = vst [vmem:[#allocation32_spill] sm:$0xff] %v6338_v42  ;;  %v6350_v27 = vld [vmem:[#allocation2 + $0x20] sm:$0xff]  ;;  %v6353_v32 = vld [vmem:[#allocation2 + $0x28] sm:$0xff] }
 0x1b2   :  { %1253 = vmatpush.msra.mxu0 %v6338_v42  ;;  %9977 = vst [vmem:[#allocation42_spill] sm:$0xff] %v6341_v43  ;;  %1273 = vmatpush.msrb.mxu1 %v6341_v43  ;;  %v6356_v42 = vld [vmem:[#allocation2 + $0x30] sm:$0xff]  ;;  %v6359_v43 = vld [vmem:[#allocation2 + $0x38] sm:$0xff] }
 0x1b3   :  { %9978 = vst [vmem:[#allocation31_spill] sm:$0xff] %v6344_v25  ;;  %1293 = vmatpush.msrb.mxu2 %v6344_v25  ;;  %1313 = vmatpush.msra.mxu3 %v6347_v22  ;;  %v6362_v25 = vld [vmem:[#allocation2] sm:$0xff] }
 0x1b4   :  { %9979 = vst [vmem:[#allocation37_spill] sm:$0xff] %v6347_v22  ;;  %1254 = vmatpush.msra.mxu0 %v6350_v27  ;;  %1274 = vmatpush.msrb.mxu1 %v6353_v32  ;;  %v6365_v22 = vld [vmem:[#allocation2 + $0x8] sm:$0xff] }
 0x1b5   :  { %9980 = vst [vmem:[#allocation36_spill] sm:$0xff] %v6350_v27  ;;  %1294 = vmatpush.msrb.mxu2 %v6356_v42  ;;  %1314 = vmatpush.msra.mxu3 %v6359_v43  ;;  %v6368_v27 = vld [vmem:[#allocation2 + $0x10] sm:$0xff] }
 0x1b6   :  { %9981 = vst [vmem:[#allocation46_spill] sm:$0xff] %v6353_v32  ;;  %1255 = vmatpush.msra.mxu0 %v6362_v25  ;;  %1275 = vmatpush.msrb.mxu1 %v6365_v22  ;;  %v6371_v32 = vld [vmem:[#allocation2 + $0x18] sm:$0xff] }
 0x1b7   :  { %9982 = vst [vmem:[#allocation35_spill] sm:$0xff] %v6356_v42  ;;  %1295 = vmatpush.msrb.mxu2 %v6368_v27  ;;  %1315 = vmatpush.msra.mxu3 %v6371_v32 }
 0x1b8   :  { %9983 = vst [vmem:[#allocation40_spill] sm:$0xff] %v6359_v43  ;;  %1256 = vmatmul.f32.vlgmr.msra.gmra.mxu0 %v6284_v52  ;;  %1276 = vmatmul.f32.vlgmr.msrb.gmra.mxu1 %v6284_v52 }
 0x1b9   :  { %9984 = vst [vmem:[#allocation41_spill] sm:$0xff] %v6362_v25  ;;  %1296 = vmatmul.f32.vlgmr.msrb.gmra.mxu2 %v6284_v52  ;;  %1316 = vmatmul.f32.vlgmr.msra.gmra.mxu3 %v6284_v52  ;;  %v6395_v52 = vld [vmem:[#allocation6 + $0x1f0] sm:$0xff] }
 0x1ba   :  { %9985 = vst [vmem:[#allocation50_spill] sm:$0xff] %v6365_v22  ;;  %4148 = vmatpush.msk.msrb.mxu3 %vm383_vm0, %v6221_v17  ;;  %4150 = vmatpush.msk.msra.mxu1 %vm383_vm0, %v6223_v18  ;;  %v4147_v17 = vld [vmem:[%s9004_s0 + $0x10] sm:$0xff]  ;;  %v6398_v18 = vld [vmem:[#allocation6 + $0x1c0] sm:$0xff] }
 0x1bb   :  { %9986 = vst [vmem:[#allocation39_spill] sm:$0xff] %v6368_v27  ;;  %4152 = vmatpush.msk.msra.mxu2 %vm383_vm0, %v6232_v9  ;;  %v6389_v27 = vld [vmem:[#allocation6 + $0x1e8] sm:$0xff] }
 0x1bc   :  { %9987 = vst [vmem:[#allocation44_spill] sm:$0xff] %v6371_v32  ;;  %4154 = vmatpush.msk.msra.mxu3 %vm383_vm0, %v6234_v59  ;;  %v6386_v32 = vld [vmem:[#allocation6 + $0x1e0] sm:$0xff]  ;;  %1503 = vmatpush.msrb.mxu1 %v6389_v27  ;;  %v6401_v9 = vld [vmem:[#allocation6 + $0x1c8] sm:$0xff]  ;;  %v6404_v59 = vld [vmem:[#allocation6 + $0x1d0] sm:$0xff] }
 0x1bd   :  { %9988 = vst [vmem:[#allocation45_spill] sm:$0xff] %v6386_v32  ;;  %1483 = vmatpush.msrb.mxu0 %v6386_v32  ;;  %1523 = vmatpush.msrb.mxu2 %v6395_v52  ;;  %v6428_v32 = vld [vmem:[#allocation6 + $0x188] sm:$0xff] }
 0x1be   :  { %9989 = vst [vmem:[#allocation54_spill] sm:$0xff] %v6389_v27  ;;  %1504 = vmatpush.msrb.mxu1 %v6401_v9  ;;  %v6408_v27 = vld [vmem:[#allocation6 + $0x1a0] sm:$0xff] }
 0x1bf   :  { %9990 = vst [vmem:[#allocation43_spill] sm:$0xff] %v6395_v52  ;;  %1484 = vmatpush.msrb.mxu0 %v6398_v18  ;;  %1524 = vmatpush.msrb.mxu2 %v6404_v59  ;;  %v6413_v52 = vld [vmem:[#allocation6 + $0x1f8] sm:$0xff] }
 0x1c0   :  { %9991 = vst [vmem:[#allocation48_spill] sm:$0xff] %v6398_v18  ;;  %4151 = vmatmul.msk.f32.vlgmr.msra.gmra.mxu1 %vm379_vm1, %v4147_v17  ;;  %v6416_v18 = vld [vmem:[#allocation6 + $0x1a8] sm:$0xff] }
 0x1c1   :  { %9992 = vst [vmem:[#allocation49_spill] sm:$0xff] %v6401_v9  ;;  %1485 = vmatpush.msrb.mxu0 %v6408_v27  ;;  %4149 = vmatmul.msk.f32.vlgmr.msrb.gmra.mxu3 %vm379_vm1, %v4147_v17  ;;  %v6419_v9 = vld [vmem:[#allocation6 + $0x1b0] sm:$0xff] }
 0x1c2   :  { %9993 = vst [vmem:[#allocation47_spill] sm:$0xff] %v6404_v59  ;;  %4153 = vmatmul.msk.f32.vlgmr.msra.gmra.mxu2 %vm379_vm1, %v4147_v17  ;;  %1543 = vmatpush.msrb.mxu3 %v6413_v52  ;;  %v6422_v59 = vld [vmem:[#allocation6 + $0x180] sm:$0xff] }
 0x1c3   :  { %9994 = vst [vmem:[#allocation52_spill] sm:$0xff] %v6408_v27  ;;  %1505 = vmatpush.msrb.mxu1 %v6416_v18  ;;  %1525 = vmatpush.msrb.mxu2 %v6419_v9  ;;  %v6425_v27 = vld [vmem:[#allocation6 + $0x1d8] sm:$0xff] }
 0x1c4   :  { %9995 = vst [vmem:[#allocation53_spill] sm:$0xff] %v6413_v52  ;;  %1486 = vmatpush.msrb.mxu0 %v6422_v59  ;;  %1544 = vmatpush.msrb.mxu3 %v6425_v27  ;;  %v6431_v52 = vld [vmem:[#allocation6 + $0x190] sm:$0xff] }
 0x1c5   :  { %9996 = vst [vmem:[#allocation58_spill] sm:$0xff] %v6416_v18  ;;  %1506 = vmatpush.msrb.mxu1 %v6428_v32  ;;  %1526 = vmatpush.msrb.mxu2 %v6431_v52  ;;  %v6434_v18 = vld [vmem:[#allocation6 + $0x160] sm:$0xff] }
 0x1c6   :  { %9997 = vst [vmem:[#allocation51_spill] sm:$0xff] %v6419_v9  ;;  %1487 = vmatpush.msrb.mxu0 %v6434_v18  ;;  %v6437_v9 = vld [vmem:[#allocation6 + $0x1b8] sm:$0xff] }
 0x1c7   :  { %9998 = vst [vmem:[#allocation56_spill] sm:$0xff] %v6422_v59  ;;  %1545 = vmatpush.msrb.mxu3 %v6437_v9  ;;  %v6440_v59 = vld [vmem:[#allocation6 + $0x168] sm:$0xff] }
 0x1c8   :  { %9999 = vst [vmem:[#allocation57_spill] sm:$0xff] %v6425_v27  ;;  %1507 = vmatpush.msrb.mxu1 %v6440_v59  ;;  %v6443_v27 = vld [vmem:[#allocation6 + $0x170] sm:$0xff] }
 0x1c9   :  { %10000 = vst [vmem:[#allocation62_spill] sm:$0xff] %v6428_v32  ;;  %1527 = vmatpush.msrb.mxu2 %v6443_v27  ;;  %v6446_v32 = vld [vmem:[#allocation6 + $0x140] sm:$0xff]  ;;  %4155 = vmatmul.msk.f32.vlgmr.msra.gmra.mxu3 %vm379_vm1, %v4147_v17  ;;  %v6471_v17 = vld [vmem:[#allocation6 + $0x158] sm:$0xff] }
 0x1ca   :  { %10001 = vst [vmem:[#allocation55_spill] sm:$0xff] %v6431_v52  ;;  %1488 = vmatpush.msrb.mxu0 %v6446_v32  ;;  %v6449_v52 = vld [vmem:[#allocation6 + $0x198] sm:$0xff] }
 0x1cb   :  { %10002 = vst [vmem:[#allocation60_spill] sm:$0xff] %v6434_v18  ;;  %1546 = vmatpush.msrb.mxu3 %v6449_v52  ;;  %v6452_v18 = vld [vmem:[#allocation6 + $0x148] sm:$0xff] }
 0x1cc   :  { %10003 = vst [vmem:[#allocation61_spill] sm:$0xff] %v6437_v9  ;;  %1508 = vmatpush.msrb.mxu1 %v6452_v18  ;;  %v6456_v9 = vld [vmem:[#allocation6 + $0x150] sm:$0xff] }
 0x1cd   :  { %10004 = vst [vmem:[#allocation66_spill] sm:$0xff] %v6440_v59  ;;  %1528 = vmatpush.msrb.mxu2 %v6456_v9  ;;  %v6459_v59 = vld [vmem:[#allocation6 + $0x178] sm:$0xff] }
 0x1ce   :  { %10005 = vst [vmem:[#allocation59_spill] sm:$0xff] %v6443_v27  ;;  %1547 = vmatpush.msrb.mxu3 %v6459_v59  ;;  %v6462_v27 = vld [vmem:[#allocation6 + $0x120] sm:$0xff] }
 0x1cf   :  { %10006 = vst [vmem:[#allocation64_spill] sm:$0xff] %v6446_v32  ;;  %1489 = vmatpush.msrb.mxu0 %v6462_v27  ;;  %v6465_v32 = vld [vmem:[#allocation6 + $0x128] sm:$0xff] }
 0x1d0   :  { %10007 = vst [vmem:[#allocation65_spill] sm:$0xff] %v6449_v52  ;;  %1509 = vmatpush.msrb.mxu1 %v6465_v32  ;;  %v6468_v52 = vld [vmem:[#allocation6 + $0x130] sm:$0xff]  ;;  %1548 = vmatpush.msrb.mxu3 %v6471_v17 }
 0x1d1   :  { %10008 = vst [vmem:[#allocation72_spill] sm:$0xff] %v6452_v18  ;;  %1529 = vmatpush.msrb.mxu2 %v6468_v52  ;;  %v6477_v18 = vld [vmem:[#allocation6 + $0x108] sm:$0xff] }
 0x1d2   :  { %10009 = vst [vmem:[#allocation63_spill] sm:$0xff] %v6456_v9  ;;  %v6474_v9 = vld [vmem:[#allocation6 + $0x100] sm:$0xff]  ;;  %1510 = vmatpush.msrb.mxu1 %v6477_v18 }
 0x1d3   :  { %10010 = vst [vmem:[#allocation68_spill] sm:$0xff] %v6459_v59  ;;  %1490 = vmatpush.msrb.mxu0 %v6474_v9 }
 0x1d4   :  { %10011 = vst [vmem:[#allocation69_spill] sm:$0xff] %v6462_v27  ;;  %v6480_v27 = vld [vmem:[#allocation6 + $0x110] sm:$0xff] }
 0x1d5   :  { %10012 = vst [vmem:[#allocation76_spill] sm:$0xff] %v6465_v32  ;;  %1530 = vmatpush.msrb.mxu2 %v6480_v27  ;;  %v6483_v32 = vld [vmem:[#allocation6 + $0x138] sm:$0xff] }
 0x1d6   :  { %10013 = vst [vmem:[#allocation67_spill] sm:$0xff] %v6468_v52  ;;  %1549 = vmatpush.msrb.mxu3 %v6483_v32  ;;  %v6486_v52 = vld [vmem:[#allocation6 + $0xe0] sm:$0xff] }
 0x1d7   :  { %10014 = vst [vmem:[#allocation73_spill] sm:$0xff] %v6471_v17  ;;  %1491 = vmatpush.msrb.mxu0 %v6486_v52  ;;  %v6489_v17 = vld [vmem:[#allocation6 + $0xe8] sm:$0xff] }
 0x1d8   :  { %10015 = vst [vmem:[#allocation75_spill] sm:$0xff] %v6474_v9  ;;  %1511 = vmatpush.msrb.mxu1 %v6489_v17  ;;  %v6492_v9 = vld [vmem:[#allocation6 + $0xf0] sm:$0xff] }
 0x1d9   :  { %10016 = vst [vmem:[#allocation80_spill] sm:$0xff] %v6477_v18  ;;  %1531 = vmatpush.msrb.mxu2 %v6492_v9  ;;  %v6495_v18 = vld [vmem:[#allocation6 + $0x118] sm:$0xff] }
 0x1da   :  { %10017 = vst [vmem:[#allocation70_spill] sm:$0xff] %v6480_v27  ;;  %1550 = vmatpush.msrb.mxu3 %v6495_v18  ;;  %v6498_v27 = vld [vmem:[#allocation6 + $0xc0] sm:$0xff] }
 0x1db   :  { %10018 = vst [vmem:[#allocation77_spill] sm:$0xff] %v6483_v32  ;;  %1492 = vmatpush.msrb.mxu0 %v6498_v27  ;;  %v6501_v32 = vld [vmem:[#allocation6 + $0xc8] sm:$0xff] }
 0x1dc   :  { %10019 = vst [vmem:[#allocation79_spill] sm:$0xff] %v6486_v52  ;;  %1512 = vmatpush.msrb.mxu1 %v6501_v32  ;;  %v6504_v52 = vld [vmem:[#allocation6 + $0xd0] sm:$0xff] }
 0x1dd   :  { %10020 = vst [vmem:[#allocation84_spill] sm:$0xff] %v6489_v17  ;;  %1532 = vmatpush.msrb.mxu2 %v6504_v52  ;;  %v6507_v17 = vld [vmem:[#allocation6 + $0xf8] sm:$0xff] }
 0x1de   :  { %10021 = vst [vmem:[#allocation71_spill] sm:$0xff] %v6492_v9  ;;  %1551 = vmatpush.msrb.mxu3 %v6507_v17  ;;  %v6510_v9 = vld [vmem:[#allocation6 + $0xa0] sm:$0xff] }
 0x1df   :  { %10022 = vst [vmem:[#allocation81_spill] sm:$0xff] %v6495_v18  ;;  %1493 = vmatpush.msrb.mxu0 %v6510_v9  ;;  %v6513_v18 = vld [vmem:[#allocation6 + $0xa8] sm:$0xff] }
 0x1e0   :  { %10023 = vst [vmem:[#allocation83_spill] sm:$0xff] %v6498_v27  ;;  %1513 = vmatpush.msrb.mxu1 %v6513_v18  ;;  %v6516_v27 = vld [vmem:[#allocation6 + $0xb0] sm:$0xff] }
 0x1e1   :  { %10024 = vst [vmem:[#allocation88_spill] sm:$0xff] %v6501_v32  ;;  %1533 = vmatpush.msrb.mxu2 %v6516_v27  ;;  %v6519_v32 = vld [vmem:[#allocation6 + $0xd8] sm:$0xff] }
 0x1e2   :  { %10025 = vst [vmem:[#allocation74_spill] sm:$0xff] %v6504_v52  ;;  %1552 = vmatpush.msrb.mxu3 %v6519_v32  ;;  %v6522_v52 = vld [vmem:[#allocation6 + $0x80] sm:$0xff] }
 0x1e3   :  { %10026 = vst [vmem:[#allocation85_spill] sm:$0xff] %v6507_v17  ;;  %1494 = vmatpush.msrb.mxu0 %v6522_v52  ;;  %v6525_v17 = vld [vmem:[#allocation6 + $0x88] sm:$0xff] }
 0x1e4   :  { %10027 = vst [vmem:[#allocation87_spill] sm:$0xff] %v6510_v9  ;;  %1514 = vmatpush.msrb.mxu1 %v6525_v17  ;;  %v6528_v9 = vld [vmem:[#allocation6 + $0x90] sm:$0xff] }
 0x1e5   :  { %10028 = vst [vmem:[#allocation89_spill] sm:$0xff] %v6513_v18  ;;  %1534 = vmatpush.msrb.mxu2 %v6528_v9  ;;  %v6531_v18 = vld [vmem:[#allocation6 + $0xb8] sm:$0xff] }
 0x1e6   :  { %10029 = vst [vmem:[#allocation78_spill] sm:$0xff] %v6516_v27  ;;  %1553 = vmatpush.msrb.mxu3 %v6531_v18  ;;  %v6534_v27 = vld [vmem:[#allocation6 + $0x60] sm:$0xff] }
 0x1e7   :  { %10030 = vst [vmem:[#allocation91_spill] sm:$0xff] %v6519_v32  ;;  %1495 = vmatpush.msrb.mxu0 %v6534_v27  ;;  %v6537_v32 = vld [vmem:[#allocation6 + $0x68] sm:$0xff] }
 0x1e8   :  { %10031 = vst [vmem:[#allocation92_spill] sm:$0xff] %v6522_v52  ;;  %1515 = vmatpush.msrb.mxu1 %v6537_v32  ;;  %v6540_v52 = vld [vmem:[#allocation6 + $0x70] sm:$0xff] }
 0x1e9   :  { %10032 = vst [vmem:[#allocation93_spill] sm:$0xff] %v6525_v17  ;;  %1535 = vmatpush.msrb.mxu2 %v6540_v52  ;;  %v6543_v17 = vld [vmem:[#allocation6 + $0x98] sm:$0xff] }
 0x1ea   :  { %10033 = vst [vmem:[#allocation82_spill] sm:$0xff] %v6528_v9  ;;  %1554 = vmatpush.msrb.mxu3 %v6543_v17  ;;  %v6546_v9 = vld [vmem:[#allocation6 + $0x40] sm:$0xff] }
 0x1eb   :  { %10034 = vst [vmem:[#allocation95_spill] sm:$0xff] %v6531_v18  ;;  %1496 = vmatpush.msrb.mxu0 %v6546_v9  ;;  %v6549_v18 = vld [vmem:[#allocation6 + $0x48] sm:$0xff] }
 0x1ec   :  { %10035 = vst [vmem:[#allocation96_spill] sm:$0xff] %v6534_v27  ;;  %1516 = vmatpush.msrb.mxu1 %v6549_v18  ;;  %v6552_v27 = vld [vmem:[#allocation6 + $0x50] sm:$0xff] }
 0x1ed   :  { %10036 = vst [vmem:[#allocation97_spill] sm:$0xff] %v6537_v32  ;;  %1536 = vmatpush.msrb.mxu2 %v6552_v27  ;;  %v6555_v32 = vld [vmem:[#allocation6 + $0x78] sm:$0xff] }
 0x1ee   :  { %10037 = vst [vmem:[#allocation86_spill] sm:$0xff] %v6540_v52  ;;  %1555 = vmatpush.msrb.mxu3 %v6555_v32  ;;  %v6558_v52 = vld [vmem:[#allocation6 + $0x20] sm:$0xff] }
 0x1ef   :  { %10038 = vst [vmem:[#allocation99_spill] sm:$0xff] %v6543_v17  ;;  %1497 = vmatpush.msrb.mxu0 %v6558_v52  ;;  %v6561_v17 = vld [vmem:[#allocation6 + $0x28] sm:$0xff] }
 0x1f0   :  { %10039 = vst [vmem:[#allocation90_spill] sm:$0xff] %v6546_v9  ;;  %1517 = vmatpush.msrb.mxu1 %v6561_v17  ;;  %v6564_v9 = vld [vmem:[#allocation6 + $0x30] sm:$0xff] }
 0x1f1   :  { %10040 = vst [vmem:[#allocation100_spill] sm:$0xff] %v6549_v18  ;;  %1537 = vmatpush.msrb.mxu2 %v6564_v9  ;;  %v6567_v18 = vld [vmem:[#allocation6 + $0x58] sm:$0xff] }
 0x1f2   :  { %10041 = vst [vmem:[#allocation101_spill] sm:$0xff] %v6552_v27  ;;  %1556 = vmatpush.msrb.mxu3 %v6567_v18  ;;  %v6570_v27 = vld [vmem:[#allocation6] sm:$0xff] }
 0x1f3   :  { %10042 = vst [vmem:[#allocation103_spill] sm:$0xff] %v6555_v32  ;;  %1498 = vmatpush.msrb.mxu0 %v6570_v27  ;;  %v6573_v32 = vld [vmem:[#allocation6 + $0x8] sm:$0xff] }
 0x1f4   :  { %10043 = vst [vmem:[#allocation94_spill] sm:$0xff] %v6558_v52  ;;  %1518 = vmatpush.msrb.mxu1 %v6573_v32  ;;  %v6576_v52 = vld [vmem:[#allocation6 + $0x10] sm:$0xff] }
 0x1f5   :  { %10044 = vst [vmem:[#allocation104_spill] sm:$0xff] %v6561_v17  ;;  %1538 = vmatpush.msrb.mxu2 %v6576_v52  ;;  %v6579_v17 = vld [vmem:[#allocation6 + $0x38] sm:$0xff] }
 0x1f6   :  { %10045 = vst [vmem:[#allocation105_spill] sm:$0xff] %v6564_v9  ;;  %1557 = vmatpush.msrb.mxu3 %v6579_v17  ;;  %v6582_v9 = vld [vmem:[#allocation4 + $0x1e0] sm:$0xff] }
 0x1f7   :  { %10046 = vst [vmem:[#allocation107_spill] sm:$0xff] %v6567_v18  ;;  %1563 = vmatpush.msra.mxu0 %v6582_v9  ;;  %v6585_v18 = vld [vmem:[#allocation4 + $0x1e8] sm:$0xff] }
 0x1f8   :  { %10047 = vst [vmem:[#allocation98_spill] sm:$0xff] %v6570_v27  ;;  %1583 = vmatpush.msra.mxu1 %v6585_v18  ;;  %v6588_v27 = vld [vmem:[#allocation4 + $0x1f0] sm:$0xff] }
 0x1f9   :  { %10048 = vst [vmem:[#allocation108_spill] sm:$0xff] %v6573_v32  ;;  %1603 = vmatpush.msra.mxu2 %v6588_v27  ;;  %v6591_v32 = vld [vmem:[#allocation6 + $0x18] sm:$0xff] }
 0x1fa   :  { %10049 = vst [vmem:[#allocation109_spill] sm:$0xff] %v6576_v52  ;;  %1558 = vmatpush.msrb.mxu3 %v6591_v32  ;;  %v6594_v52 = vld [vmem:[#allocation4 + $0x1c0] sm:$0xff] }
 0x1fb   :  { %10050 = vst [vmem:[#allocation111_spill] sm:$0xff] %v6579_v17  ;;  %1564 = vmatpush.msra.mxu0 %v6594_v52  ;;  %v6597_v17 = vld [vmem:[#allocation4 + $0x1f8] sm:$0xff] }
 0x1fc   :  { %10051 = vst [vmem:[#allocation102_spill] sm:$0xff] %v6582_v9  ;;  %1623 = vmatpush.msra.mxu3 %v6597_v17  ;;  %v6600_v9 = vld [vmem:[#allocation4 + $0x1c8] sm:$0xff] }
 0x1fd   :  { %10052 = vst [vmem:[#allocation112_spill] sm:$0xff] %v6585_v18  ;;  %1584 = vmatpush.msra.mxu1 %v6600_v9  ;;  %v6603_v18 = vld [vmem:[#allocation4 + $0x1d0] sm:$0xff] }
 0x1fe   :  { %10053 = vst [vmem:[#allocation113_spill] sm:$0xff] %v6588_v27  ;;  %1604 = vmatpush.msra.mxu2 %v6603_v18  ;;  %v6606_v27 = vld [vmem:[#allocation4 + $0x1a0] sm:$0xff] }
 0x1ff   :  { %10054 = vst [vmem:[#allocation115_spill] sm:$0xff] %v6591_v32  ;;  %1565 = vmatpush.msra.mxu0 %v6606_v27  ;;  %v6609_v32 = vld [vmem:[#allocation4 + $0x1d8] sm:$0xff] }
 0x200   :  { %10055 = vst [vmem:[#allocation106_spill] sm:$0xff] %v6594_v52  ;;  %1624 = vmatpush.msra.mxu3 %v6609_v32  ;;  %v6612_v52 = vld [vmem:[#allocation4 + $0x1a8] sm:$0xff] }
 0x201   :  { %10056 = vst [vmem:[#allocation116_spill] sm:$0xff] %v6597_v17  ;;  %1585 = vmatpush.msra.mxu1 %v6612_v52  ;;  %v6615_v17 = vld [vmem:[#allocation4 + $0x1b0] sm:$0xff] }
 0x202   :  { %10057 = vst [vmem:[#allocation117_spill] sm:$0xff] %v6600_v9  ;;  %1605 = vmatpush.msra.mxu2 %v6615_v17  ;;  %v6618_v9 = vld [vmem:[#allocation4 + $0x180] sm:$0xff] }
 0x203   :  { %10058 = vst [vmem:[#allocation119_spill] sm:$0xff] %v6603_v18  ;;  %1566 = vmatpush.msra.mxu0 %v6618_v9  ;;  %v6621_v18 = vld [vmem:[#allocation4 + $0x1b8] sm:$0xff] }
 0x204   :  { %10059 = vst [vmem:[#allocation110_spill] sm:$0xff] %v6606_v27  ;;  %1625 = vmatpush.msra.mxu3 %v6621_v18  ;;  %v6624_v27 = vld [vmem:[#allocation4 + $0x188] sm:$0xff] }
 0x205   :  { %10060 = vst [vmem:[#allocation120_spill] sm:$0xff] %v6609_v32  ;;  %1586 = vmatpush.msra.mxu1 %v6624_v27  ;;  %v6627_v32 = vld [vmem:[#allocation4 + $0x190] sm:$0xff] }
 0x206   :  { %10061 = vst [vmem:[#allocation121_spill] sm:$0xff] %v6612_v52  ;;  %1606 = vmatpush.msra.mxu2 %v6627_v32  ;;  %v6630_v52 = vld [vmem:[#allocation4 + $0x160] sm:$0xff] }
 0x207   :  { %10062 = vst [vmem:[#allocation123_spill] sm:$0xff] %v6615_v17  ;;  %1567 = vmatpush.msra.mxu0 %v6630_v52  ;;  %v6633_v17 = vld [vmem:[#allocation4 + $0x198] sm:$0xff] }
 0x208   :  { %10063 = vst [vmem:[#allocation114_spill] sm:$0xff] %v6618_v9  ;;  %1626 = vmatpush.msra.mxu3 %v6633_v17  ;;  %v6636_v9 = vld [vmem:[#allocation4 + $0x168] sm:$0xff] }
 0x209   :  { %10064 = vst [vmem:[#allocation124_spill] sm:$0xff] %v6621_v18  ;;  %1587 = vmatpush.msra.mxu1 %v6636_v9  ;;  %v6639_v18 = vld [vmem:[#allocation4 + $0x170] sm:$0xff] }
 0x20a   :  { %10065 = vst [vmem:[#allocation125_spill] sm:$0xff] %v6624_v27  ;;  %1607 = vmatpush.msra.mxu2 %v6639_v18  ;;  %v6642_v27 = vld [vmem:[#allocation4 + $0x140] sm:$0xff] }
 0x20b   :  { %10066 = vst [vmem:[#allocation127_spill] sm:$0xff] %v6627_v32  ;;  %1568 = vmatpush.msra.mxu0 %v6642_v27  ;;  %v6645_v32 = vld [vmem:[#allocation4 + $0x178] sm:$0xff] }
 0x20c   :  { %10067 = vst [vmem:[#allocation118_spill] sm:$0xff] %v6630_v52  ;;  %1627 = vmatpush.msra.mxu3 %v6645_v32  ;;  %v6648_v52 = vld [vmem:[#allocation4 + $0x148] sm:$0xff] }
 0x20d   :  { %10068 = vst [vmem:[#allocation128_spill] sm:$0xff] %v6633_v17  ;;  %1588 = vmatpush.msra.mxu1 %v6648_v52  ;;  %v6651_v17 = vld [vmem:[#allocation4 + $0x150] sm:$0xff] }
 0x20e   :  { %10069 = vst [vmem:[#allocation129_spill] sm:$0xff] %v6636_v9  ;;  %1608 = vmatpush.msra.mxu2 %v6651_v17  ;;  %v6654_v9 = vld [vmem:[#allocation4 + $0x120] sm:$0xff] }
 0x20f   :  { %10070 = vst [vmem:[#allocation131_spill] sm:$0xff] %v6639_v18  ;;  %1569 = vmatpush.msra.mxu0 %v6654_v9  ;;  %v6657_v18 = vld [vmem:[#allocation4 + $0x158] sm:$0xff] }
 0x210   :  { %10071 = vst [vmem:[#allocation122_spill] sm:$0xff] %v6642_v27  ;;  %1628 = vmatpush.msra.mxu3 %v6657_v18  ;;  %v6660_v27 = vld [vmem:[#allocation4 + $0x128] sm:$0xff] }
 0x211   :  { %10072 = vst [vmem:[#allocation132_spill] sm:$0xff] %v6645_v32  ;;  %1589 = vmatpush.msra.mxu1 %v6660_v27  ;;  %v6663_v32 = vld [vmem:[#allocation4 + $0x130] sm:$0xff]  ;;  %v1048_v59 = vpop.f32.mrf.mxu1 }
 0x212   :  { %10073 = vst [vmem:[#allocation133_spill] sm:$0xff] %v6648_v52  ;;  %1609 = vmatpush.msra.mxu2 %v6663_v32  ;;  %v6666_v52 = vld [vmem:[#allocation4 + $0x100] sm:$0xff] }
 0x213   :  { %10074 = vst [vmem:[#allocation135_spill] sm:$0xff] %v6651_v17  ;;  %1570 = vmatpush.msra.mxu0 %v6666_v52  ;;  %v6669_v17 = vld [vmem:[#allocation4 + $0x138] sm:$0xff] }
 0x214   :  { %10075 = vst [vmem:[#allocation126_spill] sm:$0xff] %v6654_v9  ;;  %1629 = vmatpush.msra.mxu3 %v6669_v17  ;;  %v6672_v9 = vld [vmem:[#allocation4 + $0x108] sm:$0xff] }
 0x215   :  { %10076 = vst [vmem:[#allocation136_spill] sm:$0xff] %v6657_v18  ;;  %1590 = vmatpush.msra.mxu1 %v6672_v9  ;;  %v6675_v18 = vld [vmem:[#allocation4 + $0x110] sm:$0xff] }
 0x216   :  { %10077 = vst [vmem:[#allocation137_spill] sm:$0xff] %v6660_v27  ;;  %1610 = vmatpush.msra.mxu2 %v6675_v18  ;;  %v6678_v27 = vld [vmem:[#allocation4 + $0xe0] sm:$0xff] }
 0x217   :  { %10078 = vst [vmem:[#allocation139_spill] sm:$0xff] %v6663_v32  ;;  %1571 = vmatpush.msra.mxu0 %v6678_v27  ;;  %v6681_v32 = vld [vmem:[#allocation4 + $0x118] sm:$0xff] }
 0x218   :  { %10079 = vst [vmem:[#allocation130_spill] sm:$0xff] %v6666_v52  ;;  %1630 = vmatpush.msra.mxu3 %v6681_v32  ;;  %v6684_v52 = vld [vmem:[#allocation4 + $0xe8] sm:$0xff]  ;;  %v1088_v22 = vpop.f32.mrf.mxu3  ;;  %v1068_v6 = vpop.f32.mrf.mxu2 }
 0x219   :  { %10080 = vst [vmem:[#allocation140_spill] sm:$0xff] %v6669_v17  ;;  %1591 = vmatpush.msra.mxu1 %v6684_v52  ;;  %v6687_v17 = vld [vmem:[#allocation4 + $0xf0] sm:$0xff] }
 0x21a   :  { %10081 = vst [vmem:[#allocation141_spill] sm:$0xff] %v6672_v9  ;;  %1611 = vmatpush.msra.mxu2 %v6687_v17  ;;  %v6690_v9 = vld [vmem:[#allocation4 + $0xc0] sm:$0xff] }
 0x21b   :  { %10082 = vst [vmem:[#allocation143_spill] sm:$0xff] %v6675_v18  ;;  %1572 = vmatpush.msra.mxu0 %v6690_v9  ;;  %v6693_v18 = vld [vmem:[#allocation4 + $0xf8] sm:$0xff] }
 0x21c   :  { %10083 = vst [vmem:[#allocation134_spill] sm:$0xff] %v6678_v27  ;;  %1631 = vmatpush.msra.mxu3 %v6693_v18  ;;  %v6696_v27 = vld [vmem:[#allocation4 + $0xc8] sm:$0xff] }
 0x21d   :  { %10084 = vst [vmem:[#allocation144_spill] sm:$0xff] %v6681_v32  ;;  %1592 = vmatpush.msra.mxu1 %v6696_v27  ;;  %v6699_v32 = vld [vmem:[#allocation4 + $0xd0] sm:$0xff] }
 0x21e   :  { %10085 = vst [vmem:[#allocation145_spill] sm:$0xff] %v6684_v52  ;;  %1612 = vmatpush.msra.mxu2 %v6699_v32  ;;  %v6702_v52 = vld [vmem:[#allocation4 + $0xa0] sm:$0xff] }
 0x21f   :  { %10086 = vst [vmem:[#allocation138_spill] sm:$0xff] %v6687_v17  ;;  %1573 = vmatpush.msra.mxu0 %v6702_v52  ;;  %v6705_v17 = vld [vmem:[#allocation4 + $0xd8] sm:$0xff] }
 0x220   :  { %10087 = vst [vmem:[#allocation148_spill] sm:$0xff] %v6690_v9  ;;  %1632 = vmatpush.msra.mxu3 %v6705_v17  ;;  %v6708_v9 = vld [vmem:[#allocation4 + $0xa8] sm:$0xff] }
 0x221   :  { %10088 = vst [vmem:[#allocation142_spill] sm:$0xff] %v6693_v18  ;;  %1593 = vmatpush.msra.mxu1 %v6708_v9  ;;  %v6711_v18 = vld [vmem:[#allocation4 + $0xb0] sm:$0xff] }
 0x222   :  { %10089 = vst [vmem:[#allocation146_spill] sm:$0xff] %v6696_v27  ;;  %1613 = vmatpush.msra.mxu2 %v6711_v18  ;;  %v6714_v27 = vld [vmem:[#allocation4 + $0x80] sm:$0xff] }
 0x223   :  { %10090 = vst [vmem:[#allocation150_spill] sm:$0xff] %v6699_v32  ;;  %1574 = vmatpush.msra.mxu0 %v6714_v27  ;;  %v6717_v32 = vld [vmem:[#allocation4 + $0xb8] sm:$0xff] }
 0x224   :  { %10091 = vst [vmem:[#allocation151_spill] sm:$0xff] %v6702_v52  ;;  %1633 = vmatpush.msra.mxu3 %v6717_v32  ;;  %v6720_v52 = vld [vmem:[#allocation4 + $0x88] sm:$0xff] }
 0x225   :  { %10092 = vst [vmem:[#allocation152_spill] sm:$0xff] %v6705_v17  ;;  %1594 = vmatpush.msra.mxu1 %v6720_v52  ;;  %v6723_v17 = vld [vmem:[#allocation4 + $0x90] sm:$0xff] }
 0x226   :  { %10093 = vst [vmem:[#allocation153_spill] sm:$0xff] %v6708_v9  ;;  %1614 = vmatpush.msra.mxu2 %v6723_v17  ;;  %v6726_v9 = vld [vmem:[#allocation4 + $0x60] sm:$0xff] }
 0x227   :  { %10094 = vst [vmem:[#allocation154_spill] sm:$0xff] %v6711_v18  ;;  %1575 = vmatpush.msra.mxu0 %v6726_v9  ;;  %v6729_v18 = vld [vmem:[#allocation4 + $0x98] sm:$0xff] }
 0x228   :  { %10095 = vst [vmem:[#allocation155_spill] sm:$0xff] %v6714_v27  ;;  %1634 = vmatpush.msra.mxu3 %v6729_v18  ;;  %v6732_v27 = vld [vmem:[#allocation4 + $0x68] sm:$0xff] }
 0x229   :  { %10096 = vst [vmem:[#allocation156_spill] sm:$0xff] %v6717_v32  ;;  %1595 = vmatpush.msra.mxu1 %v6732_v27  ;;  %v6735_v32 = vld [vmem:[#allocation4 + $0x70] sm:$0xff]  ;;  %v1128_v25 = vpop.f32.mrf.mxu1 }
 0x22a   :  { %10097 = vst [vmem:[#allocation157_spill] sm:$0xff] %v6720_v52  ;;  %1615 = vmatpush.msra.mxu2 %v6735_v32  ;;  %v6738_v52 = vld [vmem:[#allocation4 + $0x40] sm:$0xff]  ;;  %v1129_v42 = vadd.f32 %v1128_v25, %v1048_v59 }
 0x22b   :  { %10098 = vst [vmem:[#allocation158_spill] sm:$0xff] %v6723_v17  ;;  %1576 = vmatpush.msra.mxu0 %v6738_v52  ;;  %v6741_v17 = vld [vmem:[#allocation4 + $0x78] sm:$0xff] }
 0x22c   :  { %10099 = vst [vmem:[#allocation159_spill] sm:$0xff] %v6726_v9  ;;  %1635 = vmatpush.msra.mxu3 %v6741_v17  ;;  %v6744_v9 = vld [vmem:[#allocation4 + $0x48] sm:$0xff]  ;;  %v1172_v14 = vadd.f32 %v1129_v42, %v6078_v48 }
 0x22d   :  { %10100 = vst [vmem:[#allocation160_spill] sm:$0xff] %v6729_v18  ;;  %1596 = vmatpush.msra.mxu1 %v6744_v9  ;;  %v6747_v18 = vld [vmem:[#allocation4 + $0x50] sm:$0xff] }
 0x22e   :  { %10101 = vst [vmem:[#allocation161_spill] sm:$0xff] %v6732_v27  ;;  %1616 = vmatpush.msra.mxu2 %v6747_v18  ;;  %v6750_v27 = vld [vmem:[#allocation4 + $0x20] sm:$0xff]  ;;  %v4145_v13 = vmul.f32 -1.442695, %v1172_v14 }
 0x22f   :  { %10102 = vst [vmem:[#allocation162_spill] sm:$0xff] %v6735_v32  ;;  %1577 = vmatpush.msra.mxu0 %v6750_v27  ;;  %v6753_v32 = vld [vmem:[#allocation4 + $0x58] sm:$0xff] }
 0x230   :  { %10103 = vst [vmem:[#allocation163_spill] sm:$0xff] %v6738_v52  ;;  %1636 = vmatpush.msra.mxu3 %v6753_v32  ;;  %v6756_v52 = vld [vmem:[#allocation4 + $0x28] sm:$0xff] }
 0x231   :  { %10104 = vst [vmem:[#allocation164_spill] sm:$0xff] %v6741_v17  ;;  %1597 = vmatpush.msra.mxu1 %v6756_v52  ;;  %v6759_v17 = vld [vmem:[#allocation4 + $0x30] sm:$0xff] }
 0x232   :  { %10105 = vst [vmem:[#allocation165_spill] sm:$0xff] %v6744_v9  ;;  %1617 = vmatpush.msra.mxu2 %v6759_v17  ;;  %v6762_v9 = vld [vmem:[#allocation4] sm:$0xff] }
 0x233   :  { %10106 = vst [vmem:[#allocation166_spill] sm:$0xff] %v6747_v18  ;;  %1578 = vmatpush.msra.mxu0 %v6762_v9  ;;  %v6765_v18 = vld [vmem:[#allocation4 + $0x38] sm:$0xff] }
 0x234   :  { %10107 = vst [vmem:[#allocation167_spill] sm:$0xff] %v6750_v27  ;;  %1637 = vmatpush.msra.mxu3 %v6765_v18  ;;  %v6768_v27 = vld [vmem:[#allocation4 + $0x8] sm:$0xff] }
 0x235   :  { %10108 = vst [vmem:[#allocation168_spill] sm:$0xff] %v6753_v32  ;;  %1598 = vmatpush.msra.mxu1 %v6768_v27  ;;  %v6771_v32 = vld [vmem:[#allocation4 + $0x10] sm:$0xff]  ;;  %v1277_v53 = vpop.f32.mrf.mxu1 }
 0x236   :  { %10109 = vst [vmem:[#allocation169_spill] sm:$0xff] %v6756_v52  ;;  %1618 = vmatpush.msra.mxu2 %v6771_v32  ;;  %v6774_v52 = vld [vmem:[#allocation4 + $0x18] sm:$0xff] }
 0x237   :  { %10110 = vst [vmem:[#allocation170_spill] sm:$0xff] %v6759_v17  ;;  %1638 = vmatpush.msra.mxu3 %v6774_v52  ;;  %v1028_v17 = vpop.f32.mrf.mxu0 }
 0x238   :  { %10111 = vst [vmem:[#allocation171_spill] sm:$0xff] %v6762_v9 }
 0x239   :  { %10112 = vst [vmem:[#allocation172_spill] sm:$0xff] %v6765_v18 }
 0x23a   :  { %10113 = vst [vmem:[#allocation173_spill] sm:$0xff] %v6768_v27 }
 0x23b   :  { %10114 = vst [vmem:[#allocation174_spill] sm:$0xff] %v6771_v32  ;;  %v1168_v32 = vpop.f32.mrf.mxu3 }
 0x23c   :  { %10115 = vst [vmem:[#allocation175_spill] sm:$0xff] %v6774_v52  ;;  %v1169_v58 = vadd.f32 %v1168_v32, %v1088_v22 }
 0x23e   :  { %v1174_v52 = vadd.f32 %v1169_v58, %v6082_v47 }
 0x23f   :  { %v1108_v9 = vpop.f32.mrf.mxu0 }
 0x240   :  { %v1109_v43 = vadd.f32 %v1108_v9, %v1028_v17  ;;  %v4146_v54 = vmul.f32 -1.442695, %v1174_v52  ;;  %v1148_v9 = vpop.f32.mrf.mxu2 }
 0x241   :  { %v1149_v42 = vadd.f32 %v1148_v9, %v1068_v6 }
 0x242   :  { %v1171_v18 = vadd.f32 %v1109_v43, %v6076_v40 }
 0x243   :  { %v1317_v43 = vpop.f32.mrf.mxu3  ;;  %v1173_v58 = vadd.f32 %v1149_v42, %v6087_v2 }
 0x244   :  { %v4144_v27 = vmul.f32 -1.442695, %v1171_v18  ;;  %v1373_v18 = vpop.f32.mrf.mxu1 }
 0x246   :  { %4292 = vpow2.f32 %v4144_v27 }
 0x247   :  { %4294 = vpow2.f32 %v4145_v13  ;;  %v1374_v13 = vadd.f32 %v1373_v18, %v1277_v53  ;;  %v1257_v53 = vpop.f32.mrf.mxu0 }
 0x248   :  { %4296 = vpow2.f32 %v4146_v54 }
 0x24b   :  { %v1353_v18 = vpop.f32.mrf.mxu3 }
 0x24c   :  { %v4293_v46 = vpop.eup %4292  ;;  %v1354_v48 = vadd.f32 %v1353_v18, %v1257_v53 }
 0x24d   :  { %v4295_v44 = vpop.eup %4294  ;;  %v1178_v21 = vadd.f32 1.0, %v4293_v46  ;;  %v1417_v46 = vadd.f32 %v1374_v13, %v5842_v0 }
 0x24e   :  { %v1197_v25 = vadd.f32 1.0, %v4295_v44  ;;  %v4297_v14 = vpop.eup %4296 }
 0x24f   :  { %4298 = vrcp.f32 %v1178_v21  ;;  %v6780_v27 = vadd.f32 1.0, %v4297_v14  ;;  %v4157_v59 = vmul.f32 -1.442695, %v1417_v46  ;;  %v1188_v6 = vand.u32 2147483647, %v1178_v21 }
 0x250   :  { %4300 = vrcp.f32 %v1197_v25  ;;  %v1190_v9 = vand.u32 2147483648, %v1178_v21  ;;  %v1209_v47 = vand.u32 2147483648, %v1197_v25  ;;  %v1207_v2 = vand.u32 2147483647, %v1197_v25 }
 0x251   :  { %4302 = vrcp.f32 %v6780_v27  ;;  %vm1203_vm12 = vweird.f32 %v1197_v25  ;;  %vm1184_vm13 = vweird.f32 %v1178_v21  ;;  %vm1189_vm2 = vcmp.eq.f32.partialorder %v1188_v6, 8.507059e+37 }
 0x252   :  { %4304 = vtanh.f32 %v1173_v58  ;;  %v1416_v58 = vadd.f32 %v1354_v48, %v5811_v61  ;;  %vm1208_vm3 = vcmp.eq.f32.partialorder %v1207_v2, 8.507059e+37  ;;  %v1229_v2 = vand.u32 2147483648, %v6780_v27 }
 0x253   :  { %4306 = vpow2.f32 %v4157_v59  ;;  %v1297_v59 = vpop.f32.mrf.mxu2  ;;  %v1413_v48 = vpop.f32.mrf.mxu3  ;;  %vm1223_vm5 = vweird.f32 %v6780_v27 }
 0x254   :  { %v4156_v53 = vmul.f32 -1.442695, %v1416_v58 }
 0x255   :  { %v4299_v22 = vpop.eup %4298 }
 0x256   :  { %v4301_v32 = vpop.eup %4300  ;;  %v1180_v52 = vmul.f32 %v4299_v22, %v1178_v21  ;;  %vm1185_vm10 = vweird.f32 %v4299_v22  ;;  %4308 = vpow2.f32 %v4156_v53 }
 0x257   :  { %v1199_v44 = vmul.f32 %v4301_v32, %v1197_v25  ;;  %vm1204_vm11 = vweird.f32 %v4301_v32  ;;  %v4303_v40 = vpop.eup %4302  ;;  %vm1186_vm14 = vmor %vm1184_vm13, %vm1185_vm10 }
 0x258   :  { %v1181_v54 = vsub.f32 1.0, %v1180_v52  ;;  %v1191_v52 = vor.u32 1.1754944e-38, %v1190_v9  ;;  %vm1205_vm15 = vmor %vm1203_vm12, %vm1204_vm11  ;;  %vm1224_vm4 = vweird.f32 %v4303_v40 }
 0x259   :  { %v1200_v17 = vsub.f32 1.0, %v1199_v44  ;;  %v1219_v44 = vmul.f32 %v4303_v40, %v6780_v27  ;;  %vm1225_vm6 = vmor %vm1223_vm5, %vm1224_vm4 }
 0x25a   :  { %v1182_v14 = vmul.f32 %v4299_v22, %v1181_v54  ;;  %v1210_v54 = vor.u32 1.1754944e-38, %v1209_v47 }
 0x25b   :  { %v1201_v42 = vmul.f32 %v4301_v32, %v1200_v17  ;;  %v4305_v17 = vpop.eup %4304  ;;  %v1220_v18 = vsub.f32 1.0, %v1219_v44  ;;  %v1393_v6 = vpop.f32.mrf.mxu2 }
 0x25c   :  { %v1183_v13 = vadd.f32 %v4299_v22, %v1182_v14  ;;  %v4307_v25 = vpop.eup %4306  ;;  %v1394_v58 = vadd.f32 %v1393_v6, %v1297_v59 }
 0x25d   :  { %v1202_v46 = vadd.f32 %v4301_v32, %v1201_v42  ;;  %v6788_v42 = vadd.f32 1.0, %v4307_v25  ;;  %v1221_v61 = vmul.f32 %v4303_v40, %v1220_v18 }
 0x25e   :  { %v1187_v0 = vsel %vm1186_vm14, %v4299_v22, %v1183_v13  ;;  %v1414_v22 = vadd.f32 %v1413_v48, %v1317_v43 }
 0x25f   :  { %v1192_v39 = vsel %vm1189_vm2, %v1191_v52, %v1187_v0  ;;  %v1206_v37 = vsel %vm1205_vm15, %v4301_v32, %v1202_v46  ;;  %4310 = vrcp.f32 %v6788_v42  ;;  %v1222_v0 = vadd.f32 %v4303_v40, %v1221_v61 }
 0x260   :  { %v1211_v14 = vsel %vm1208_vm3, %v1210_v54, %v1206_v37  ;;  %v1234_v21 = vmul.f32 %v4305_v17, %v1192_v39  ;;  %v1419_v37 = vadd.f32 %v1414_v22, %v5835_v36  ;;  %v4309_v39 = vpop.eup %4308  ;;  %v1230_v61 = vor.u32 1.1754944e-38, %v1229_v2 }
 0x261   :  { %v1233_v9 = vmul.f32 %v1211_v14, %v6102_v60  ;;  %v1227_v60 = vand.u32 2147483647, %v6780_v27  ;;  %v6798_v32 = vadd.f32 1.0, %v4309_v39  ;;  %v1226_v52 = vsel %vm1225_vm6, %v4303_v40, %v1222_v0  ;;  %v10127_v39 = vld [vmem:[#allocation17_spill] sm:$0xff] }
 0x262   :  { %v4158_v13 = vmul.f32 -1.442695, %v1419_v37  ;;  %v1418_v40 = vadd.f32 %v1394_v58, %v5894_v19  ;;  %v1454_v14 = vand.u32 2147483648, %v6788_v42  ;;  %vm1448_vm9 = vweird.f32 %v6788_v42  ;;  %v10125_v37 = vld [vmem:[#allocation16_spill] sm:$0xff]  ;;  %v10133_v58 = vld [vmem:[#allocation23_spill] sm:$0xff] }
 0x263   :  { %v6790_v47 = vadd.f32 %v1234_v21, %v1233_v9  ;;  %vm1228_vm7 = vcmp.eq.f32.partialorder %v1227_v60, 8.507059e+37  ;;  %v1433_v48 = vand.u32 2147483647, %v6798_v32  ;;  %vm1429_vm12 = vweird.f32 %v6798_v32  ;;  %v10126_v60 = vld [vmem:[#allocation27_spill] sm:$0xff] }
 0x264   :  { %v1231_v27 = vsel %vm1228_vm7, %v1230_v61, %v1226_v52  ;;  %v10129_v52 = vld [vmem:[#allocation22_spill] sm:$0xff] }
 0x265   :  { %4312 = vtanh.f32 %v6790_v47  ;;  %v6800_v43 = vpop.eup %4310  ;;  %vm1434_vm15 = vcmp.eq.f32.partialorder %v1433_v48, 8.507059e+37  ;;  %v10149_v48 = vld [vmem:[#allocation39_spill] sm:$0xff] }
 0x266   :  { %v1444_v46 = vmul.f32 %v6800_v43, %v6788_v42  ;;  %4314 = vrcp.f32 %v6798_v32  ;;  %vm1449_vm8 = vweird.f32 %v6800_v43 }
 0x267   :  { %4316 = vpow2.f32 %v4158_v13  ;;  %vm6823_vm10 = vmor %vm1448_vm9, %vm1449_vm8 }
 0x268   :  { %v1445_v54 = vsub.f32 1.0, %v1444_v46  ;;  %4318 = vtanh.f32 %v1418_v40  ;;  %v10131_v46 = vld [vmem:[#allocation29_spill] sm:$0xff] }
 0x269   :  { %v10138_v40 = vld [vmem:[#allocation33_spill] sm:$0xff] }
 0x26a   :  { %v1446_v53 = vmul.f32 %v6800_v43, %v1445_v54  ;;  %v10135_v54 = vld [vmem:[#allocation30_spill] sm:$0xff] }
 0x26b   :  { %v4313_v44 = vpop.eup %4312 }
 0x26c   :  { %v1237_v17 = vmul.f32 %v4313_v44, %v1231_v27  ;;  %v4315_v25 = vpop.eup %4314  ;;  %v1447_v18 = vadd.f32 %v6800_v43, %v1446_v53  ;;  %v10132_v44 = vld [vmem:[#allocation28_spill] sm:$0xff]  ;;  %v10134_v27 = vld [vmem:[#allocation34_spill] sm:$0xff] }
 0x26d   :  { %v4317_v59 = vpop.eup %4316  ;;  %v1425_v21 = vmul.f32 %v4315_v25, %v6798_v32  ;;  %vm1430_vm11 = vweird.f32 %v4315_v25  ;;  %v10137_v53 = vld [vmem:[#allocation38_spill] sm:$0xff] }
 0x26e   :  { %1499 = vmatmul.f32.vlgmr.msrb.gmra.mxu0 %v1237_v17  ;;  %1519 = vmatmul.f32.vlgmr.msrb.gmra.mxu1 %v1237_v17  ;;  %v6815_v9 = vadd.f32 1.0, %v4317_v59  ;;  %vm1431_vm14 = vmor %vm1429_vm12, %vm1430_vm11  ;;  %v10141_v59 = vld [vmem:[#allocation31_spill] sm:$0xff] }
 0x26f   :  { %1539 = vmatmul.f32.vlgmr.msrb.gmra.mxu2 %v1237_v17  ;;  %1559 = vmatmul.f32.vlgmr.msrb.gmra.mxu3 %v1237_v17  ;;  %v10136_v17 = vld [vmem:[#allocation26_spill] sm:$0xff] }
 0x270   :  { %1712 = vmatpush.msrb.mxu0 %v6136_v28  ;;  %1732 = vmatpush.msrb.mxu1 %v6139_v29  ;;  %v1426_v28 = vsub.f32 1.0, %v1425_v21  ;;  %v1452_v29 = vand.u32 2147483647, %v6788_v42  ;;  %4320 = vrcp.f32 %v6815_v9  ;;  %v6839_v42 = vld.sshfl [vmem:[#allocation1 + $0x8] sm:$0xff pattern:$0x73625140]  ;;  %vm1468_vm3 = vweird.f32 %v6815_v9 }
 0x271   :  { %1752 = vmatpush.msrb.mxu2 %v6146_v33  ;;  %1772 = vmatpush.msrb.mxu3 %v6149_v34  ;;  %v1455_v34 = vor.u32 1.1754944e-38, %v1454_v14  ;;  %v10140_v14 = vld [vmem:[#allocation42_spill] sm:$0xff]  ;;  %v10142_v21 = vld [vmem:[#allocation37_spill] sm:$0xff] }
 0x272   :  { %1713 = vmatpush.msrb.mxu0 %v6152_v57  ;;  %1733 = vmatpush.msrb.mxu1 %v6155_v38  ;;  %v1435_v57 = vand.u32 2147483648, %v6798_v32  ;;  %v1427_v38 = vmul.f32 %v4315_v25, %v1426_v28  ;;  %vm1453_vm13 = vcmp.eq.f32.partialorder %v1452_v29, 8.507059e+37  ;;  %v10128_v32 = vld [vmem:[#allocation9_spill] sm:$0xff]  ;;  %v10145_v28 = vld [vmem:[#allocation35_spill] sm:$0xff]  ;;  %v10146_v29 = vld [vmem:[#allocation40_spill] sm:$0xff] }
 0x273   :  { %1753 = vmatpush.msrb.mxu2 %v6159_v41  ;;  %1773 = vmatpush.msrb.mxu3 %v6162_v62  ;;  %v1451_v41 = vsel %vm6823_vm10, %v6800_v43, %v1447_v18  ;;  %v6837_v62 = vld.sshfl [vmem:[#allocation1] sm:$0xff pattern:$0x73625140]  ;;  %v10130_v43 = vld [vmem:[#allocation25_spill] sm:$0xff] }
 0x274   :  { %1714 = vmatpush.msrb.mxu0 %v6170_v51  ;;  %1734 = vmatpush.msrb.mxu1 %v6173_v45  ;;  %v6843_v51 = vld.sshfl [vmem:[#allocation1 + $0x18] sm:$0xff pattern:$0x73625140]  ;;  %v6845_v45 = vld.sshfl [vmem:[#allocation1 + $0x10] sm:$0xff pattern:$0x73625140]  ;;  %v1428_v22 = vadd.f32 %v4315_v25, %v1427_v38 }
 0x275   :  { %1754 = vmatpush.msrb.mxu2 %v6178_v49  ;;  %1774 = vmatpush.msrb.mxu3 %v6181_v50  ;;  %2264 = vst [vmem:[#allocation1] ss:$4 sm:$0xff] %v9820_v3  ;;  %v1436_v49 = vor.u32 1.1754944e-38, %v1435_v57  ;;  %v1456_v50 = vsel %vm1453_vm13, %v1455_v34, %v1451_v41  ;;  %v10143_v18 = vld [vmem:[#allocation36_spill] sm:$0xff]  ;;  %v10147_v33 = vld [vmem:[#allocation41_spill] sm:$0xff]  ;;  %v10148_v34 = vld [vmem:[#allocation50_spill] sm:$0xff] }
 0x276   :  { %1715 = vmatpush.msrb.mxu0 %v6185_v63  ;;  %1735 = vmatpush.msrb.mxu1 %v6188_v55  ;;  %v4319_v63 = vpop.eup %4318  ;;  %v1432_v55 = vsel %vm1431_vm14, %v4315_v25, %v1428_v22  ;;  %v10139_v25 = vld [vmem:[#allocation32_spill] sm:$0xff]  ;;  %v10151_v38 = vld [vmem:[#allocation45_spill] sm:$0xff]  ;;  %v10152_v41 = vld [vmem:[#allocation54_spill] sm:$0xff] }
 0x277   :  { %1755 = vmatpush.msrb.mxu2 %v6192_v1  ;;  %1775 = vmatpush.msrb.mxu3 %v6195_v7  ;;  %v4321_v1 = vpop.eup %4320  ;;  %v1437_v0 = vsel %vm1434_vm15, %v1436_v49, %v1432_v55  ;;  %v1478_v7 = vmul.f32 %v1456_v50, %v6205_v10  ;;  %v10150_v57 = vld [vmem:[#allocation44_spill] sm:$0xff]  ;;  %v4162_v22 = vld [vmem:[%s9004_s0 + $0x18] sm:$0xff]  ;;  %v10160_v55 = vld [vmem:[#allocation58_spill] sm:$0xff] }
 0x278   :  { %1716 = vmatpush.msrb.mxu0 %v6198_v4  ;;  %1736 = vmatpush.msrb.mxu1 %v6201_v5  ;;  %v1479_v2 = vmul.f32 %v4319_v63, %v1437_v0  ;;  %v1464_v4 = vmul.f32 %v4321_v1, %v6815_v9  ;;  %vm1469_vm2 = vweird.f32 %v4321_v1  ;;  %v10153_v49 = vld [vmem:[#allocation43_spill] sm:$0xff]  ;;  %v10155_v50 = vld [vmem:[#allocation48_spill] sm:$0xff]  ;;  %v10158_v63 = vld [vmem:[#allocation57_spill] sm:$0xff] }
 0x279   :  { %1756 = vmatpush.msrb.mxu2 %v6207_v8  ;;  %1776 = vmatpush.msrb.mxu3 %v6210_v12  ;;  %v1474_v12 = vand.u32 2147483648, %v6815_v9  ;;  %vm1470_vm4 = vmor %vm1468_vm3, %vm1469_vm2  ;;  %v10162_v0 = vld [vmem:[#allocation61_spill] sm:$0xff] }
 0x27a   :  { %1717 = vmatpush.msrb.mxu0 %v6215_v15  ;;  %1737 = vmatpush.msrb.mxu1 %v6218_v16  ;;  %v6864_v5 = vadd.f32 %v1479_v2, %v1478_v7  ;;  %v1465_v8 = vsub.f32 1.0, %v1464_v4  ;;  %v10118_v15 = vld [vmem:[#allocation21_spill] sm:$0xff]  ;;  %v1472_v16 = vand.u32 2147483647, %v6815_v9  ;;  %v10144_v9 = vld [vmem:[#allocation46_spill] sm:$0xff]  ;;  %v10163_v7 = vld [vmem:[#allocation56_spill] sm:$0xff] }
 0x27b   :  { %1757 = vmatpush.msrb.mxu2 %v6226_v11  ;;  %1777 = vmatpush.msrb.mxu3 %v6229_v20  ;;  %v10119_v11 = vld [vmem:[#allocation12_spill] sm:$0xff]  ;;  %v10120_v20 = vld [vmem:[#allocation18_spill] sm:$0xff]  ;;  %v10165_v4 = vld [vmem:[#allocation55_spill] sm:$0xff] }
 0x27c   :  { %1718 = vmatpush.msrb.mxu0 %v6238_v23  ;;  %1738 = vmatpush.msrb.mxu1 %v6241_v24  ;;  %4322 = vtanh.f32 %v6864_v5  ;;  %v1466_v10 = vmul.f32 %v4321_v1, %v1465_v8  ;;  %v10121_v24 = vld [vmem:[#allocation13_spill] sm:$0xff]  ;;  %vm1473_vm5 = vcmp.eq.f32.partialorder %v1472_v16, 8.507059e+37  ;;  %v10164_v2 = vld [vmem:[#allocation62_spill] sm:$0xff]  ;;  %v10170_v16 = vld [vmem:[#allocation68_spill] sm:$0xff] }
 0x27d   :  { %1758 = vmatpush.msrb.mxu2 %v6251_v26  ;;  %1778 = vmatpush.msrb.mxu3 %v6254_v56  ;;  %v10122_v26 = vld [vmem:[#allocation24_spill] sm:$0xff]  ;;  %v10123_v56 = vld [vmem:[#allocation14_spill] sm:$0xff]  ;;  %v10166_v8 = vld [vmem:[#allocation65_spill] sm:$0xff] }
 0x27e   :  { %1719 = vmatpush.msrb.mxu0 %v6260_v30  ;;  %1739 = vmatpush.msrb.mxu1 %v6263_v31  ;;  %v1467_v23 = vadd.f32 %v4321_v1, %v1466_v10  ;;  %v10124_v30 = vld [vmem:[#allocation20_spill] sm:$0xff] }
 0x27f   :  { %1759 = vmatpush.msrb.mxu2 %v6266_v35  ;;  %1779 = vmatpush.msrb.mxu3 %v10118_v15  ;;  %v1475_v35 = vor.u32 1.1754944e-38, %v1474_v12  ;;  %v10167_v10 = vld [vmem:[#allocation60_spill] sm:$0xff]  ;;  %v10168_v12 = vld [vmem:[#allocation66_spill] sm:$0xff]  ;;  %v10169_v15 = vld [vmem:[#allocation59_spill] sm:$0xff] }
 0x280   :  { %1720 = vmatpush.msrb.mxu0 %v10119_v11  ;;  %1740 = vmatpush.msrb.mxu1 %v10120_v20  ;;  %v1471_v31 = vsel %vm1470_vm4, %v4321_v1, %v1467_v23  ;;  %v10161_v1 = vld [vmem:[#allocation51_spill] sm:$0xff]  ;;  %v10171_v11 = vld [vmem:[#allocation64_spill] sm:$0xff] }
 0x281   :  { %1760 = vmatpush.msrb.mxu2 %v10121_v24  ;;  %1780 = vmatpush.msrb.mxu3 %v10122_v26  ;;  %v1476_v13 = vsel %vm1473_vm5, %v1475_v35, %v1471_v31  ;;  %v10172_v20 = vld [vmem:[#allocation72_spill] sm:$0xff]  ;;  %v10173_v23 = vld [vmem:[#allocation63_spill] sm:$0xff]  ;;  %v10174_v24 = vld [vmem:[#allocation73_spill] sm:$0xff] }
 0x282   :  { %1721 = vmatpush.msrb.mxu0 %v10123_v56  ;;  %1741 = vmatpush.msrb.mxu1 %v10124_v30  ;;  %v4323_v6 = vpop.eup %4322  ;;  %v10175_v26 = vld [vmem:[#allocation69_spill] sm:$0xff]  ;;  %v10176_v56 = vld [vmem:[#allocation76_spill] sm:$0xff]  ;;  %v10177_v30 = vld [vmem:[#allocation67_spill] sm:$0xff] }
 0x283   :  { %1761 = vmatpush.msrb.mxu2 %v10125_v37  ;;  %1781 = vmatpush.msrb.mxu3 %v10126_v60  ;;  %v1482_v61 = vmul.f32 %v4323_v6, %v1476_v13  ;;  %v10178_v31 = vld [vmem:[#allocation77_spill] sm:$0xff]  ;;  %v10179_v35 = vld [vmem:[#allocation75_spill] sm:$0xff]  ;;  %v10180_v37 = vld [vmem:[#allocation80_spill] sm:$0xff] }
 0x284   :  { %1722 = vmatpush.msrb.mxu0 %v10127_v39  ;;  %1742 = vmatpush.msrb.mxu1 %v10128_v32  ;;  %v10181_v60 = vld [vmem:[#allocation70_spill] sm:$0xff]  ;;  %v10182_v39 = vld [vmem:[#allocation81_spill] sm:$0xff]  ;;  %v10183_v32 = vld [vmem:[#allocation79_spill] sm:$0xff] }
 0x285   :  { %1762 = vmatpush.msrb.mxu2 %v10129_v52  ;;  %1782 = vmatpush.msrb.mxu3 %v10130_v43  ;;  %v10184_v6 = vld [vmem:[#allocation84_spill] sm:$0xff]  ;;  %v10185_v13 = vld [vmem:[#allocation71_spill] sm:$0xff]  ;;  %v10186_v52 = vld [vmem:[#allocation85_spill] sm:$0xff] }
 0x286   :  { %1723 = vmatpush.msrb.mxu0 %v10131_v46  ;;  %1743 = vmatpush.msrb.mxu1 %v10132_v44  ;;  %v10187_v43 = vld [vmem:[#allocation83_spill] sm:$0xff]  ;;  %v10189_v46 = vld [vmem:[#allocation74_spill] sm:$0xff] }
 0x287   :  { %1763 = vmatpush.msrb.mxu2 %v10133_v58  ;;  %1783 = vmatpush.msrb.mxu3 %v10134_v27  ;;  %v10190_v44 = vld [vmem:[#allocation91_spill] sm:$0xff]  ;;  %v10192_v27 = vld [vmem:[#allocation89_spill] sm:$0xff] }
 0x288   :  { %1579 = vmatmul.f32.vlgmr.msra.gmra.mxu0 %v1482_v61  ;;  %1599 = vmatmul.f32.vlgmr.msra.gmra.mxu1 %v1482_v61  ;;  %v10191_v58 = vld [vmem:[#allocation87_spill] sm:$0xff] }
 0x289   :  { %1619 = vmatmul.f32.vlgmr.msra.gmra.mxu2 %v1482_v61  ;;  %1639 = vmatmul.f32.vlgmr.msra.gmra.mxu3 %v1482_v61 }
 0x28a   :  { %1724 = vmatpush.msrb.mxu0 %v10135_v54  ;;  %1744 = vmatpush.msrb.mxu1 %v10136_v17  ;;  %v10193_v54 = vld [vmem:[#allocation78_spill] sm:$0xff]  ;;  %v10194_v17 = vld [vmem:[#allocation95_spill] sm:$0xff] }
 0x28b   :  { %1764 = vmatpush.msrb.mxu2 %v10137_v53  ;;  %1784 = vmatpush.msrb.mxu3 %v10138_v40  ;;  %v10195_v53 = vld [vmem:[#allocation92_spill] sm:$0xff]  ;;  %v10196_v40 = vld [vmem:[#allocation93_spill] sm:$0xff] }
 0x28c   :  { %1725 = vmatpush.msrb.mxu0 %v10139_v25  ;;  %1745 = vmatpush.msrb.mxu1 %v10140_v14  ;;  %v10197_v25 = vld [vmem:[#allocation82_spill] sm:$0xff]  ;;  %v10198_v14 = vld [vmem:[#allocation99_spill] sm:$0xff] }
 0x28d   :  { %1765 = vmatpush.msrb.mxu2 %v10141_v59  ;;  %1785 = vmatpush.msrb.mxu3 %v10142_v21  ;;  %v10199_v59 = vld [vmem:[#allocation96_spill] sm:$0xff]  ;;  %v10200_v21 = vld [vmem:[#allocation97_spill] sm:$0xff] }
 0x28e   :  { %1726 = vmatpush.msrb.mxu0 %v10143_v18  ;;  %1746 = vmatpush.msrb.mxu1 %v10144_v9  ;;  %v10201_v18 = vld [vmem:[#allocation86_spill] sm:$0xff]  ;;  %v10202_v9 = vld [vmem:[#allocation103_spill] sm:$0xff] }
 0x28f   :  { %1766 = vmatpush.msrb.mxu2 %v10145_v28  ;;  %1786 = vmatpush.msrb.mxu3 %v10146_v29  ;;  %v10203_v28 = vld [vmem:[#allocation90_spill] sm:$0xff]  ;;  %v10204_v29 = vld [vmem:[#allocation100_spill] sm:$0xff] }
 0x290   :  { %1727 = vmatpush.msrb.mxu0 %v10147_v33  ;;  %1747 = vmatpush.msrb.mxu1 %v10148_v34  ;;  %v10205_v33 = vld [vmem:[#allocation101_spill] sm:$0xff]  ;;  %v10206_v34 = vld [vmem:[#allocation107_spill] sm:$0xff] }
 0x291   :  { %1767 = vmatpush.msrb.mxu2 %v10149_v48  ;;  %1787 = vmatpush.msrb.mxu3 %v10150_v57  ;;  %v10207_v48 = vld [vmem:[#allocation94_spill] sm:$0xff]  ;;  %v10208_v57 = vld [vmem:[#allocation104_spill] sm:$0xff] }
 0x292   :  { %1728 = vmatmul.f32.vlgmr.msrb.gmra.mxu0 %v1482_v61  ;;  %1748 = vmatmul.f32.vlgmr.msrb.gmra.mxu1 %v1482_v61 }
 0x293   :  { %1768 = vmatmul.f32.vlgmr.msrb.gmra.mxu2 %v1482_v61  ;;  %1788 = vmatmul.f32.vlgmr.msrb.gmra.mxu3 %v1482_v61  ;;  %v10188_v61 = vld [vmem:[#allocation88_spill] sm:$0xff] }
 0x294   :  { %4163 = vmatpush.msk.msra.mxu0 %vm383_vm0, %v6837_v62  ;;  %4165 = vmatpush.msk.msra.mxu1 %vm383_vm0, %v6839_v42  ;;  %v10154_v62 = vld [vmem:[#allocation53_spill] sm:$0xff] }
 0x295   :  { %4169 = vmatpush.msk.msra.mxu3 %vm383_vm0, %v6843_v51  ;;  %4167 = vmatpush.msk.msra.mxu2 %vm383_vm0, %v6845_v45  ;;  %v10156_v42 = vld [vmem:[#allocation49_spill] sm:$0xff]  ;;  %v10157_v51 = vld [vmem:[#allocation47_spill] sm:$0xff]  ;;  %v10159_v45 = vld [vmem:[#allocation52_spill] sm:$0xff] }
 0x296   :  { %1955 = vmatpush.msrb.mxu0 %v10151_v38  ;;  %1975 = vmatpush.msrb.mxu1 %v10152_v41  ;;  %v10209_v38 = vld [vmem:[#allocation105_spill] sm:$0xff]  ;;  %v10210_v41 = vld [vmem:[#allocation111_spill] sm:$0xff] }
 0x297   :  { %1995 = vmatpush.msrb.mxu2 %v10153_v49  ;;  %2015 = vmatpush.msrb.mxu3 %v10154_v62  ;;  %v10212_v49 = vld [vmem:[#allocation108_spill] sm:$0xff]  ;;  %v10213_v62 = vld [vmem:[#allocation109_spill] sm:$0xff] }
 0x298   :  { %1956 = vmatpush.msrb.mxu0 %v10155_v50  ;;  %1976 = vmatpush.msrb.mxu1 %v10156_v42  ;;  %v10214_v50 = vld [vmem:[#allocation115_spill] sm:$0xff]  ;;  %v10215_v42 = vld [vmem:[#allocation102_spill] sm:$0xff] }
 0x299   :  { %1996 = vmatpush.msrb.mxu2 %v10157_v51  ;;  %2016 = vmatpush.msrb.mxu3 %v10158_v63  ;;  %v10216_v51 = vld [vmem:[#allocation112_spill] sm:$0xff]  ;;  %v10217_v63 = vld [vmem:[#allocation113_spill] sm:$0xff] }
 0x29a   :  { %4164 = vmatmul.msk.f32.vlgmr.msra.gmra.mxu0 %vm379_vm1, %v4162_v22  ;;  %4166 = vmatmul.msk.f32.vlgmr.msra.gmra.mxu1 %vm379_vm1, %v4162_v22 }
 0x29b   :  { %4168 = vmatmul.msk.f32.vlgmr.msra.gmra.mxu2 %vm379_vm1, %v4162_v22  ;;  %4170 = vmatmul.msk.f32.vlgmr.msra.gmra.mxu3 %vm379_vm1, %v4162_v22  ;;  %v10211_v22 = vld [vmem:[#allocation98_spill] sm:$0xff] }
 0x29c   :  { %1957 = vmatpush.msrb.mxu0 %v10159_v45  ;;  %1977 = vmatpush.msrb.mxu1 %v10160_v55  ;;  %v10218_v45 = vld [vmem:[#allocation116_spill] sm:$0xff]  ;;  %v10219_v55 = vld [vmem:[#allocation106_spill] sm:$0xff] }
 0x29d   :  { %1997 = vmatpush.msrb.mxu2 %v10161_v1  ;;  %2017 = vmatpush.msrb.mxu3 %v10162_v0  ;;  %v10220_v1 = vld [vmem:[#allocation117_spill] sm:$0xff]  ;;  %v10221_v0 = vld [vmem:[#allocation119_spill] sm:$0xff] }
 0x29e   :  { %1958 = vmatpush.msrb.mxu0 %v10163_v7  ;;  %1978 = vmatpush.msrb.mxu1 %v10164_v2  ;;  %v10222_v7 = vld [vmem:[#allocation120_spill] sm:$0xff]  ;;  %v10223_v2 = vld [vmem:[#allocation110_spill] sm:$0xff] }
 0x29f   :  { %1998 = vmatpush.msrb.mxu2 %v10165_v4  ;;  %2018 = vmatpush.msrb.mxu3 %v10166_v8  ;;  %v10224_v4 = vld [vmem:[#allocation121_spill] sm:$0xff]  ;;  %v10225_v8 = vld [vmem:[#allocation123_spill] sm:$0xff] }
 0x2a0   :  { %1959 = vmatpush.msrb.mxu0 %v10167_v10  ;;  %1979 = vmatpush.msrb.mxu1 %v10168_v12  ;;  %v10226_v10 = vld [vmem:[#allocation124_spill] sm:$0xff]  ;;  %v10227_v12 = vld [vmem:[#allocation114_spill] sm:$0xff] }
 0x2a1   :  { %1999 = vmatpush.msrb.mxu2 %v10169_v15  ;;  %2019 = vmatpush.msrb.mxu3 %v10170_v16  ;;  %v10228_v15 = vld [vmem:[#allocation125_spill] sm:$0xff]  ;;  %v10229_v16 = vld [vmem:[#allocation127_spill] sm:$0xff] }
 0x2a2   :  { %1960 = vmatpush.msrb.mxu0 %v10171_v11  ;;  %1980 = vmatpush.msrb.mxu1 %v10172_v20  ;;  %v10230_v11 = vld [vmem:[#allocation128_spill] sm:$0xff]  ;;  %v10231_v20 = vld [vmem:[#allocation118_spill] sm:$0xff] }
 0x2a3   :  { %2000 = vmatpush.msrb.mxu2 %v10173_v23  ;;  %2020 = vmatpush.msrb.mxu3 %v10174_v24  ;;  %v10232_v23 = vld [vmem:[#allocation129_spill] sm:$0xff]  ;;  %v10233_v24 = vld [vmem:[#allocation131_spill] sm:$0xff] }
 0x2a4   :  { %1961 = vmatpush.msrb.mxu0 %v10175_v26  ;;  %1981 = vmatpush.msrb.mxu1 %v10176_v56  ;;  %v10234_v26 = vld [vmem:[#allocation132_spill] sm:$0xff]  ;;  %v10235_v56 = vld [vmem:[#allocation122_spill] sm:$0xff] }
 0x2a5   :  { %2001 = vmatpush.msrb.mxu2 %v10177_v30  ;;  %2021 = vmatpush.msrb.mxu3 %v10178_v31  ;;  %v10236_v30 = vld [vmem:[#allocation133_spill] sm:$0xff]  ;;  %v10237_v31 = vld [vmem:[#allocation135_spill] sm:$0xff] }
 0x2a6   :  { %1962 = vmatpush.msrb.mxu0 %v10179_v35  ;;  %1982 = vmatpush.msrb.mxu1 %v10180_v37  ;;  %v10238_v35 = vld [vmem:[#allocation136_spill] sm:$0xff]  ;;  %v10239_v37 = vld [vmem:[#allocation126_spill] sm:$0xff] }
 0x2a7   :  { %2002 = vmatpush.msrb.mxu2 %v10181_v60  ;;  %2022 = vmatpush.msrb.mxu3 %v10182_v39  ;;  %v10240_v60 = vld [vmem:[#allocation137_spill] sm:$0xff]  ;;  %v10241_v39 = vld [vmem:[#allocation139_spill] sm:$0xff] }
 0x2a8   :  { %1963 = vmatpush.msrb.mxu0 %v10183_v32  ;;  %1983 = vmatpush.msrb.mxu1 %v10184_v6  ;;  %v10242_v32 = vld [vmem:[#allocation140_spill] sm:$0xff]  ;;  %v10243_v6 = vld [vmem:[#allocation130_spill] sm:$0xff] }
 0x2a9   :  { %2003 = vmatpush.msrb.mxu2 %v10185_v13  ;;  %2023 = vmatpush.msrb.mxu3 %v10186_v52  ;;  %v10244_v13 = vld [vmem:[#allocation141_spill] sm:$0xff]  ;;  %v10245_v52 = vld [vmem:[#allocation143_spill] sm:$0xff] }
 0x2aa   :  { %1964 = vmatpush.msrb.mxu0 %v10187_v43  ;;  %1984 = vmatpush.msrb.mxu1 %v10188_v61  ;;  %v10246_v43 = vld [vmem:[#allocation144_spill] sm:$0xff]  ;;  %v10247_v61 = vld [vmem:[#allocation134_spill] sm:$0xff] }
 0x2ab   :  { %2004 = vmatpush.msrb.mxu2 %v10189_v46  ;;  %2024 = vmatpush.msrb.mxu3 %v10190_v44  ;;  %v10248_v46 = vld [vmem:[#allocation145_spill] sm:$0xff]  ;;  %v10249_v44 = vld [vmem:[#allocation138_spill] sm:$0xff] }
 0x2ac   :  { %1965 = vmatpush.msrb.mxu0 %v10191_v58  ;;  %1985 = vmatpush.msrb.mxu1 %v10192_v27  ;;  %v10250_v58 = vld [vmem:[#allocation142_spill] sm:$0xff]  ;;  %v10251_v27 = vld [vmem:[#allocation148_spill] sm:$0xff] }
 0x2ad   :  { %2005 = vmatpush.msrb.mxu2 %v10193_v54  ;;  %2025 = vmatpush.msrb.mxu3 %v10194_v17  ;;  %v10252_v54 = vld [vmem:[#allocation146_spill] sm:$0xff] }
 0x2ae   :  { %1966 = vmatpush.msrb.mxu0 %v10195_v53  ;;  %1986 = vmatpush.msrb.mxu1 %v10196_v40  ;;  %v10253_v17 = vld [vmem:[#allocation150_spill] sm:$0xff]  ;;  %v10254_v53 = vld [vmem:[#allocation152_spill] sm:$0xff]  ;;  %v10255_v40 = vld [vmem:[#allocation151_spill] sm:$0xff] }
 0x2af   :  { %2006 = vmatpush.msrb.mxu2 %v10197_v25  ;;  %2026 = vmatpush.msrb.mxu3 %v10198_v14  ;;  %v10256_v25 = vld [vmem:[#allocation153_spill] sm:$0xff]  ;;  %v10257_v14 = vld [vmem:[#allocation154_spill] sm:$0xff] }
 0x2b0   :  { %1967 = vmatpush.msrb.mxu0 %v10199_v59  ;;  %1987 = vmatpush.msrb.mxu1 %v10200_v21  ;;  %v10258_v59 = vld [vmem:[#allocation156_spill] sm:$0xff]  ;;  %v10259_v21 = vld [vmem:[#allocation155_spill] sm:$0xff] }
 0x2b1   :  { %2007 = vmatpush.msrb.mxu2 %v10201_v18  ;;  %2027 = vmatpush.msrb.mxu3 %v10202_v9  ;;  %v10260_v18 = vld [vmem:[#allocation157_spill] sm:$0xff]  ;;  %v10261_v9 = vld [vmem:[#allocation158_spill] sm:$0xff] }
 0x2b2   :  { %1968 = vmatpush.msrb.mxu0 %v10203_v28  ;;  %1988 = vmatpush.msrb.mxu1 %v10204_v29  ;;  %v10262_v28 = vld [vmem:[#allocation160_spill] sm:$0xff]  ;;  %v10263_v29 = vld [vmem:[#allocation159_spill] sm:$0xff] }
 0x2b3   :  { %2008 = vmatpush.msrb.mxu2 %v10205_v33  ;;  %2028 = vmatpush.msrb.mxu3 %v10206_v34  ;;  %v10264_v33 = vld [vmem:[#allocation161_spill] sm:$0xff]  ;;  %v10265_v34 = vld [vmem:[#allocation162_spill] sm:$0xff] }
 0x2b4   :  { %1969 = vmatpush.msrb.mxu0 %v10207_v48  ;;  %1989 = vmatpush.msrb.mxu1 %v10208_v57  ;;  %v10266_v48 = vld [vmem:[#allocation164_spill] sm:$0xff]  ;;  %v10267_v57 = vld [vmem:[#allocation163_spill] sm:$0xff] }
 0x2b5   :  { %2009 = vmatpush.msrb.mxu2 %v10209_v38  ;;  %2029 = vmatpush.msrb.mxu3 %v10210_v41  ;;  %v10268_v38 = vld [vmem:[#allocation165_spill] sm:$0xff]  ;;  %v10269_v41 = vld [vmem:[#allocation166_spill] sm:$0xff] }
 0x2b6   :  { %1970 = vmatpush.msrb.mxu0 %v10211_v22  ;;  %1990 = vmatpush.msrb.mxu1 %v10212_v49  ;;  %v10270_v22 = vld [vmem:[#allocation168_spill] sm:$0xff]  ;;  %v10271_v49 = vld [vmem:[#allocation167_spill] sm:$0xff] }
 0x2b7   :  { %2010 = vmatpush.msrb.mxu2 %v10213_v62  ;;  %2030 = vmatpush.msrb.mxu3 %v10214_v50  ;;  %v10272_v62 = vld [vmem:[#allocation169_spill] sm:$0xff]  ;;  %v10273_v50 = vld [vmem:[#allocation170_spill] sm:$0xff] }
 0x2b8   :  { %2035 = vmatpush.msra.mxu0 %v10215_v42  ;;  %2055 = vmatpush.msra.mxu1 %v10216_v51  ;;  %v10274_v42 = vld [vmem:[#allocation172_spill] sm:$0xff]  ;;  %v10275_v51 = vld [vmem:[#allocation171_spill] sm:$0xff] }
 0x2b9   :  { %2075 = vmatpush.msra.mxu2 %v10217_v63  ;;  %2095 = vmatpush.msra.mxu3 %v10218_v45  ;;  %v10276_v63 = vld [vmem:[#allocation173_spill] sm:$0xff]  ;;  %v10277_v45 = vld [vmem:[#allocation174_spill] sm:$0xff] }
 0x2ba   :  { %2036 = vmatpush.msra.mxu0 %v10219_v55  ;;  %2056 = vmatpush.msra.mxu1 %v10220_v1  ;;  %v10278_v55 = vld [vmem:[#allocation175_spill] sm:$0xff] }
 0x2bb   :  { %2076 = vmatpush.msra.mxu2 %v10221_v0  ;;  %2096 = vmatpush.msra.mxu3 %v10222_v7 }
 0x2bc   :  { %2037 = vmatpush.msra.mxu0 %v10223_v2  ;;  %2057 = vmatpush.msra.mxu1 %v10224_v4 }
 0x2bd   :  { %2077 = vmatpush.msra.mxu2 %v10225_v8  ;;  %2097 = vmatpush.msra.mxu3 %v10226_v10 }
 0x2be   :  { %2038 = vmatpush.msra.mxu0 %v10227_v12  ;;  %2058 = vmatpush.msra.mxu1 %v10228_v15  ;;  %v10279_v12 = vld [vmem:[#allocation19_spill] sm:$0xff] }
 0x2bf   :  { %2078 = vmatpush.msra.mxu2 %v10229_v16  ;;  %2098 = vmatpush.msra.mxu3 %v10230_v11  ;;  %v10280_v16 = vld [vmem:[#allocation10_spill] sm:$0xff] }
 0x2c0   :  { %2039 = vmatpush.msra.mxu0 %v10231_v20  ;;  %2059 = vmatpush.msra.mxu1 %v10232_v23 }
 0x2c1   :  { %2079 = vmatpush.msra.mxu2 %v10233_v24  ;;  %2099 = vmatpush.msra.mxu3 %v10234_v26 }
 0x2c2   :  { %2040 = vmatpush.msra.mxu0 %v10235_v56  ;;  %2060 = vmatpush.msra.mxu1 %v10236_v30  ;;  %v10281_v30 = vld [vmem:[#allocation15_spill] sm:$0xff] }
 0x2c3   :  { %2080 = vmatpush.msra.mxu2 %v10237_v31  ;;  %2100 = vmatpush.msra.mxu3 %v10238_v35 }
 0x2c4   :  { %2041 = vmatpush.msra.mxu0 %v10239_v37  ;;  %2061 = vmatpush.msra.mxu1 %v10240_v60 }
 0x2c5   :  { %2081 = vmatpush.msra.mxu2 %v10241_v39  ;;  %2101 = vmatpush.msra.mxu3 %v10242_v32 }
 0x2c6   :  { %2042 = vmatpush.msra.mxu0 %v10243_v6  ;;  %2062 = vmatpush.msra.mxu1 %v10244_v13 }
 0x2c7   :  { %2082 = vmatpush.msra.mxu2 %v10245_v52  ;;  %2102 = vmatpush.msra.mxu3 %v10246_v43 }
 0x2c8   :  { %2043 = vmatpush.msra.mxu0 %v10247_v61  ;;  %2063 = vmatpush.msra.mxu1 %v10248_v46 }
 0x2c9   :  { %2083 = vmatpush.msra.mxu2 %v10249_v44  ;;  %2103 = vmatpush.msra.mxu3 %v10250_v58 }
 0x2ca   :  { %2044 = vmatpush.msra.mxu0 %v10251_v27  ;;  %2064 = vmatpush.msra.mxu1 %v10252_v54 }
 0x2cb   :  { %2084 = vmatpush.msra.mxu2 %v10253_v17  ;;  %2104 = vmatpush.msra.mxu3 %v10254_v53  ;;  %v10282_v17 = vld [vmem:[#allocation11_spill] sm:$0xff] }
 0x2cc   :  { %2045 = vmatpush.msra.mxu0 %v10255_v40  ;;  %2065 = vmatpush.msra.mxu1 %v10256_v25  ;;  %v10283_v25 = vld [vmem:[#allocation147_spill] sm:$0xff] }
 0x2cd   :  { %2085 = vmatpush.msra.mxu2 %v10257_v14  ;;  %2105 = vmatpush.msra.mxu3 %v10258_v59  ;;  %v10284_v59 = vld [vmem:[#allocation149_spill] sm:$0xff] }
 0x2ce   :  { %2046 = vmatpush.msra.mxu0 %v10259_v21  ;;  %2066 = vmatpush.msra.mxu1 %v10260_v18 }
 0x2cf   :  { %2086 = vmatpush.msra.mxu2 %v10261_v9  ;;  %2106 = vmatpush.msra.mxu3 %v10262_v28 }
 0x2d0   :  { %2047 = vmatpush.msra.mxu0 %v10263_v29  ;;  %2067 = vmatpush.msra.mxu1 %v10264_v33 }
 0x2d1   :  { %2087 = vmatpush.msra.mxu2 %v10265_v34  ;;  %2107 = vmatpush.msra.mxu3 %v10266_v48 }
 0x2d2   :  { %2048 = vmatpush.msra.mxu0 %v10267_v57  ;;  %2068 = vmatpush.msra.mxu1 %v10268_v38 }
 0x2d3   :  { %2088 = vmatpush.msra.mxu2 %v10269_v41  ;;  %2108 = vmatpush.msra.mxu3 %v10270_v22 }
 0x2d4   :  { %2049 = vmatpush.msra.mxu0 %v10271_v49  ;;  %2069 = vmatpush.msra.mxu1 %v10272_v62 }
 0x2d5   :  { %2089 = vmatpush.msra.mxu2 %v10273_v50  ;;  %2109 = vmatpush.msra.mxu3 %v10274_v42 }
 0x2d6   :  { %2050 = vmatpush.msra.mxu0 %v10275_v51  ;;  %2070 = vmatpush.msra.mxu1 %v10276_v63 }
 0x2d7   :  { %2090 = vmatpush.msra.mxu2 %v10277_v45  ;;  %2110 = vmatpush.msra.mxu3 %v10278_v55 }
 0x2eb   :  { %v1500_v1 = vpop.f32.mrf.mxu0  ;;  %v1520_v0 = vpop.f32.mrf.mxu1 }
 0x2f2   :  { %v1560_v7 = vpop.f32.mrf.mxu3  ;;  %v1540_v20 = vpop.f32.mrf.mxu2 }
 0x305   :  { %v1580_v2 = vpop.f32.mrf.mxu0  ;;  %v1600_v4 = vpop.f32.mrf.mxu1 }
 0x306   :  { %v1581_v8 = vadd.f32 %v1580_v2, %v1500_v1  ;;  %v1601_v10 = vadd.f32 %v1600_v4, %v1520_v0 }
 0x308   :  { %v1643_v15 = vadd.f32 %v1581_v8, %v10279_v12  ;;  %v1644_v11 = vadd.f32 %v1601_v10, %v10280_v16 }
 0x30a   :  { %v4159_v23 = vmul.f32 -1.442695, %v1643_v15  ;;  %v4160_v24 = vmul.f32 -1.442695, %v1644_v11 }
 0x30c   :  { %4324 = vpow2.f32 %v4159_v23  ;;  %v1640_v26 = vpop.f32.mrf.mxu3  ;;  %v1620_v60 = vpop.f32.mrf.mxu2 }
 0x30d   :  { %4326 = vpow2.f32 %v4160_v24  ;;  %v1641_v56 = vadd.f32 %v1640_v26, %v1560_v7  ;;  %v1621_v43 = vadd.f32 %v1620_v60, %v1540_v20 }
 0x30f   :  { %v1646_v31 = vadd.f32 %v1641_v56, %v10281_v30  ;;  %v1729_v35 = vpop.f32.mrf.mxu0  ;;  %v1749_v37 = vpop.f32.mrf.mxu1  ;;  %v1645_v53 = vadd.f32 %v1621_v43, %v10282_v17 }
 0x311   :  { %v4161_v39 = vmul.f32 -1.442695, %v1646_v31 }
 0x312   :  { %v4325_v32 = vpop.eup %4324 }
 0x313   :  { %v4327_v6 = vpop.eup %4326  ;;  %v1650_v13 = vadd.f32 1.0, %v4325_v32  ;;  %4328 = vpow2.f32 %v4161_v39 }
 0x314   :  { %v1669_v52 = vadd.f32 1.0, %v4327_v6 }
 0x315   :  { %4330 = vrcp.f32 %v1650_v13  ;;  %v1660_v38 = vand.u32 2147483647, %v1650_v13  ;;  %v1662_v49 = vand.u32 2147483648, %v1650_v13  ;;  %vm1656_vm9 = vweird.f32 %v1650_v13 }
 0x316   :  { %4332 = vrcp.f32 %v1669_v52  ;;  %v1789_v61 = vpop.f32.mrf.mxu3  ;;  %v1769_v9 = vpop.f32.mrf.mxu2  ;;  %v1681_v50 = vand.u32 2147483648, %v1669_v52  ;;  %v1679_v51 = vand.u32 2147483647, %v1669_v52  ;;  %vm1675_vm8 = vweird.f32 %v1669_v52 }
 0x317   :  { %v1825_v46 = vpop.f32.mrf.mxu0  ;;  %v1845_v44 = vpop.f32.mrf.mxu1  ;;  %v1663_v7 = vor.u32 1.1754944e-38, %v1662_v49  ;;  %vm1661_vm12 = vcmp.eq.f32.partialorder %v1660_v38, 8.507059e+37 }
 0x318   :  { %v1826_v58 = vadd.f32 %v1825_v46, %v1729_v35  ;;  %v1846_v27 = vadd.f32 %v1845_v44, %v1749_v37  ;;  %v1682_v15 = vor.u32 1.1754944e-38, %v1681_v50  ;;  %vm1680_vm13 = vcmp.eq.f32.partialorder %v1679_v51, 8.507059e+37 }
 0x319   :  { %v4329_v54 = vpop.eup %4328 }
 0x31a   :  { %v7055_v40 = vadd.f32 1.0, %v4329_v54  ;;  %v1888_v14 = vadd.f32 %v1826_v58, %v10283_v25  ;;  %v1889_v21 = vadd.f32 %v1846_v27, %v10284_v59 }
 0x31b   :  { %v4331_v18 = vpop.eup %4330 }
 0x31c   :  { %v4333_v28 = vpop.eup %4332  ;;  %v1652_v29 = vmul.f32 %v4331_v18, %v1650_v13  ;;  %4334 = vrcp.f32 %v7055_v40  ;;  %v4171_v33 = vmul.f32 -1.442695, %v1888_v14  ;;  %v4172_v48 = vmul.f32 -1.442695, %v1889_v21 }
 0x31d   :  { %v1671_v34 = vmul.f32 %v4333_v28, %v1669_v52  ;;  %4336 = vtanh.f32 %v1645_v53  ;;  %vm1657_vm6 = vweird.f32 %v4331_v18  ;;  %vm1676_vm7 = vweird.f32 %v4333_v28 }
 0x31e   :  { %v1653_v57 = vsub.f32 1.0, %v1652_v29  ;;  %4338 = vpow2.f32 %v4171_v33  ;;  %v1885_v41 = vpop.f32.mrf.mxu3  ;;  %vm1658_vm10 = vmor %vm1656_vm9, %vm1657_vm6  ;;  %v1865_v31 = vpop.f32.mrf.mxu2  ;;  %v1701_v43 = vand.u32 2147483648, %v7055_v40  ;;  %vm1695_vm15 = vweird.f32 %v7055_v40 }
 0x31f   :  { %v1672_v22 = vsub.f32 1.0, %v1671_v34  ;;  %4340 = vpow2.f32 %v4172_v48  ;;  %v1886_v62 = vadd.f32 %v1885_v41, %v1789_v61  ;;  %vm1677_vm11 = vmor %vm1675_vm8, %vm1676_vm7  ;;  %v1866_v32 = vadd.f32 %v1865_v31, %v1769_v9  ;;  %v7118_v31 = vld [vmem:[#allocation2 + $0x1d8] sm:$0xff] }
 0x320   :  { %v1654_v42 = vmul.f32 %v4331_v18, %v1653_v57  ;;  %v1702_v21 = vor.u32 1.1754944e-38, %v1701_v43  ;;  %v7140_v43 = vld.sshfl [vmem:[#allocation1 + $0x18] sm:$0xff pattern:$0x73625140] }
 0x321   :  { %v1673_v63 = vmul.f32 %v4333_v28, %v1672_v22  ;;  %v1891_v45 = vadd.f32 %v1886_v62, %v5835_v36  ;;  %v1890_v46 = vadd.f32 %v1866_v32, %v5894_v19  ;;  %v7202_v62 = vld [vmem:[#allocation2 + $0x130] sm:$0xff] }
 0x322   :  { %v4335_v55 = vpop.eup %4334  ;;  %v1655_v1 = vadd.f32 %v4331_v18, %v1654_v42 }
 0x323   :  { %v4337_v0 = vpop.eup %4336  ;;  %v1674_v2 = vadd.f32 %v4333_v28, %v1673_v63  ;;  %v1691_v4 = vmul.f32 %v4335_v55, %v7055_v40  ;;  %v4173_v8 = vmul.f32 -1.442695, %v1891_v45  ;;  %vm1696_vm14 = vweird.f32 %v4335_v55  ;;  %v7213_v63 = vld [vmem:[#allocation2 + $0x108] sm:$0xff] }
 0x324   :  { %v4339_v10 = vpop.eup %4338  ;;  %v1659_v11 = vsel %vm1658_vm10, %v4331_v18, %v1655_v1  ;;  %vm1697_vm2 = vmor %vm1695_vm15, %vm1696_vm14 }
 0x325   :  { %v4341_v20 = vpop.eup %4340  ;;  %v1664_v23 = vsel %vm1661_vm12, %v1663_v7, %v1659_v11  ;;  %v1678_v24 = vsel %vm1677_vm11, %v4333_v28, %v1674_v2  ;;  %v1692_v26 = vsub.f32 1.0, %v1691_v4  ;;  %v1895_v56 = vadd.f32 1.0, %v4339_v10  ;;  %v7097_v7 = vld [vmem:[#allocation2 + $0x1e8] sm:$0xff]  ;;  %v7105_v10 = vld [vmem:[#allocation2 + $0x1f8] sm:$0xff] }
 0x326   :  { %v1683_v35 = vsel %vm1680_vm13, %v1682_v15, %v1678_v24  ;;  %v1706_v37 = vmul.f32 %v4337_v0, %v1664_v23  ;;  %v7062_v60 = vadd.f32 1.0, %v4341_v20  ;;  %4342 = vpow2.f32 %v4173_v8  ;;  %v7094_v0 = vld [vmem:[#allocation2 + $0x1e0] sm:$0xff]  ;;  %v7102_v8 = vld [vmem:[#allocation2 + $0x1f0] sm:$0xff]  ;;  %v7111_v24 = vld [vmem:[#allocation2 + $0x1c8] sm:$0xff] }
 0x327   :  { %v1705_v39 = vmul.f32 %v1683_v35, %v6790_v47  ;;  %4344 = vrcp.f32 %v1895_v56  ;;  %v1693_v13 = vmul.f32 %v4335_v55, %v1692_v26  ;;  %v1699_v47 = vand.u32 2147483647, %v7055_v40  ;;  %v7108_v23 = vld [vmem:[#allocation2 + $0x1c0] sm:$0xff] }
 0x328   :  { %4346 = vrcp.f32 %v7062_v60  ;;  %v1905_v29 = vand.u32 2147483647, %v1895_v56  ;;  %v1907_v33 = vand.u32 2147483648, %v1895_v56  ;;  %v1926_v34 = vand.u32 2147483648, %v7062_v60 }
 0x329   :  { %v7066_v6 = vadd.f32 %v1706_v37, %v1705_v39  ;;  %v1694_v52 = vadd.f32 %v4335_v55, %v1693_v13  ;;  %vm1700_vm3 = vcmp.eq.f32.partialorder %v1699_v47, 8.507059e+37  ;;  %v1924_v41 = vand.u32 2147483647, %v7062_v60  ;;  %v7122_v37 = vld [vmem:[#allocation2 + $0x1a0] sm:$0xff]  ;;  %v7134_v13 = vld [vmem:[#allocation2 + $0x1b0] sm:$0xff] }
 0x32a   :  { %vm1901_vm6 = vweird.f32 %v1895_v56  ;;  %vm1920_vm7 = vweird.f32 %v7062_v60  ;;  %v1908_v50 = vor.u32 1.1754944e-38, %v1907_v33  ;;  %v1927_v45 = vor.u32 1.1754944e-38, %v1926_v34  ;;  %v7128_v39 = vld.sshfl [vmem:[#allocation1] sm:$0xff pattern:$0x73625140]  ;;  %v7146_v47 = vld [vmem:[#allocation2 + $0x180] sm:$0xff] }
 0x32b   :  { %4348 = vtanh.f32 %v7066_v6  ;;  %v1698_v53 = vsel %vm1697_vm2, %v4335_v55, %v1694_v52  ;;  %vm1906_vm10 = vcmp.eq.f32.partialorder %v1905_v29, 8.507059e+37  ;;  %vm1925_vm11 = vcmp.eq.f32.partialorder %v1924_v41, 8.507059e+37  ;;  %v7137_v52 = vld [vmem:[#allocation2 + $0x1b8] sm:$0xff]  ;;  %v7184_v33 = vld [vmem:[#allocation2 + $0x140] sm:$0xff]  ;;  %v7199_v41 = vld [vmem:[#allocation2 + $0x128] sm:$0xff] }
 0x32c   :  { %v4343_v61 = vpop.eup %4342  ;;  %v1703_v40 = vsel %vm1700_vm3, %v1702_v21, %v1698_v53  ;;  %v7158_v53 = vld [vmem:[#allocation2 + $0x198] sm:$0xff]  ;;  %v7163_v21 = vld [vmem:[#allocation2 + $0x160] sm:$0xff] }
 0x32d   :  { %v4345_v44 = vpop.eup %4344  ;;  %v7073_v58 = vadd.f32 1.0, %v4343_v61  ;;  %v7142_v61 = vld.sshfl [vmem:[#allocation1 + $0x10] sm:$0xff pattern:$0x73625140]  ;;  %v7178_v29 = vld [vmem:[#allocation2 + $0x178] sm:$0xff] }
 0x32e   :  { %v4347_v27 = vpop.eup %4346  ;;  %v1897_v54 = vmul.f32 %v4345_v44, %v1895_v56  ;;  %vm1902_vm4 = vweird.f32 %v4345_v44  ;;  %v7115_v56 = vld [vmem:[#allocation2 + $0x1d0] sm:$0xff] }
 0x32f   :  { %v1916_v14 = vmul.f32 %v4347_v27, %v7062_v60  ;;  %4350 = vrcp.f32 %v7073_v58  ;;  %vm1921_vm5 = vweird.f32 %v4347_v27  ;;  %vm7082_vm8 = vmor %vm1901_vm6, %vm1902_vm4  ;;  %v7125_v60 = vld [vmem:[#allocation2 + $0x1a8] sm:$0xff]  ;;  %vm1940_vm13 = vweird.f32 %v7073_v58 }
 0x330   :  { %v1898_v18 = vsub.f32 1.0, %v1897_v54  ;;  %4352 = vtanh.f32 %v1890_v46  ;;  %vm7086_vm9 = vmor %vm1920_vm7, %vm1921_vm5  ;;  %v7155_v54 = vld [vmem:[#allocation2 + $0x190] sm:$0xff] }
 0x331   :  { %v4349_v9 = vpop.eup %4348  ;;  %v1917_v28 = vsub.f32 1.0, %v1916_v14  ;;  %v1944_v14 = vand.u32 2147483647, %v7073_v58 }
 0x332   :  { %v1899_v48 = vmul.f32 %v4345_v44, %v1898_v18  ;;  %v1709_v57 = vmul.f32 %v4349_v9, %v1703_v40  ;;  %v7166_v18 = vld [vmem:[#allocation2 + $0x168] sm:$0xff]  ;;  %v7259_v9 = vld [vmem:[#allocation2 + $0xb8] sm:$0xff] }
 0x333   :  { %v1918_v38 = vmul.f32 %v4347_v27, %v1917_v28  ;;  %v7175_v28 = vld [vmem:[#allocation2 + $0x170] sm:$0xff]  ;;  %v7187_v40 = vld [vmem:[#allocation2 + $0x148] sm:$0xff]  ;;  %vm1945_vm15 = vcmp.eq.f32.partialorder %v1944_v14, 8.507059e+37  ;;  %10304 = vst [vmem:[#allocation29_spill] sm:$0xff] %v7259_v9 }
 0x334   :  { %v1900_v22 = vadd.f32 %v4345_v44, %v1899_v48  ;;  %1971 = vmatmul.f32.vlgmr.msrb.gmra.mxu0 %v1709_v57  ;;  %1991 = vmatmul.f32.vlgmr.msrb.gmra.mxu1 %v1709_v57  ;;  %v7190_v48 = vld [vmem:[#allocation2 + $0x150] sm:$0xff] }
 0x335   :  { %v7079_v49 = vpop.eup %4350  ;;  %v1919_v42 = vadd.f32 %v4347_v27, %v1918_v38  ;;  %2011 = vmatmul.f32.vlgmr.msrb.gmra.mxu2 %v1709_v57  ;;  %2031 = vmatmul.f32.vlgmr.msrb.gmra.mxu3 %v1709_v57  ;;  %v7193_v57 = vld [vmem:[#allocation2 + $0x158] sm:$0xff]  ;;  %v7196_v38 = vld [vmem:[#allocation2 + $0x120] sm:$0xff]  ;;  %v7256_v14 = vld [vmem:[#allocation2 + $0xb0] sm:$0xff] }
 0x336   :  { %v4353_v51 = vpop.eup %4352  ;;  %v1904_v55 = vsel %vm7082_vm8, %v4345_v44, %v1900_v22  ;;  %v1936_v1 = vmul.f32 %v7079_v49, %v7073_v58  ;;  %2184 = vmatpush.msrb.mxu0 %v7094_v0  ;;  %2204 = vmatpush.msrb.mxu1 %v7097_v7  ;;  %vm1941_vm12 = vweird.f32 %v7079_v49  ;;  %v7149_v44 = vld [vmem:[#allocation2 + $0x188] sm:$0xff]  ;;  %10303 = vst [vmem:[#allocation25_spill] sm:$0xff] %v7256_v14 }
 0x337   :  { %v1909_v2 = vsel %vm1906_vm10, %v1908_v50, %v1904_v55  ;;  %v1923_v4 = vsel %vm7086_vm9, %v4347_v27, %v1919_v42  ;;  %2224 = vmatpush.msrb.mxu2 %v7102_v8  ;;  %2244 = vmatpush.msrb.mxu3 %v7105_v10  ;;  %v1946_v27 = vand.u32 2147483648, %v7073_v58  ;;  %vm7171_vm14 = vmor %vm1940_vm13, %vm1941_vm12  ;;  %v7205_v50 = vld [vmem:[#allocation2 + $0x138] sm:$0xff] }
 0x338   :  { %v1928_v15 = vsel %vm1925_vm11, %v1927_v45, %v1923_v4  ;;  %v1951_v11 = vmul.f32 %v4353_v51, %v1909_v2  ;;  %v1937_v20 = vsub.f32 1.0, %v1936_v1  ;;  %2185 = vmatpush.msrb.mxu0 %v7108_v23  ;;  %2205 = vmatpush.msrb.mxu1 %v7111_v24  ;;  %v7210_v51 = vld [vmem:[#allocation2 + $0x100] sm:$0xff]  ;;  %v7216_v45 = vld [vmem:[#allocation2 + $0x110] sm:$0xff]  ;;  %v7219_v55 = vld [vmem:[#allocation2 + $0x118] sm:$0xff] }
 0x339   :  { %v1950_v26 = vmul.f32 %v1928_v15, %v6864_v5  ;;  %2225 = vmatpush.msrb.mxu2 %v7115_v56  ;;  %2245 = vmatpush.msrb.mxu3 %v7118_v31  ;;  %v7130_v5 = vld.sshfl [vmem:[#allocation1 + $0x8] sm:$0xff pattern:$0x73625140]  ;;  %v1947_v34 = vor.u32 1.1754944e-38, %v1946_v27  ;;  %10291 = vst [vmem:[#allocation21_spill] sm:$0xff] %v7216_v45  ;;  %v7229_v2 = vld [vmem:[#allocation2 + $0xe8] sm:$0xff] }
 0x33a   :  { %v1938_v35 = vmul.f32 %v7079_v49, %v1937_v20  ;;  %2186 = vmatpush.msrb.mxu0 %v7122_v37  ;;  %2206 = vmatpush.msrb.mxu1 %v7125_v60  ;;  %2736 = vst [vmem:[#allocation1] ss:$4 sm:$0xff] %v9820_v3  ;;  %v7226_v1 = vld [vmem:[#allocation2 + $0xe0] sm:$0xff]  ;;  %v7232_v4 = vld [vmem:[#allocation2 + $0xf0] sm:$0xff]  ;;  %v7235_v15 = vld [vmem:[#allocation2 + $0xf8] sm:$0xff] }
 0x33b   :  { %v7132_v32 = vadd.f32 %v1951_v11, %v1950_v26  ;;  %2226 = vmatpush.msrb.mxu2 %v7134_v13  ;;  %2246 = vmatpush.msrb.mxu3 %v7137_v52  ;;  %10292 = vst [vmem:[#allocation12_spill] sm:$0xff] %v7219_v55  ;;  %v7238_v11 = vld [vmem:[#allocation2 + $0xc0] sm:$0xff]  ;;  %v7241_v20 = vld [vmem:[#allocation2 + $0xc8] sm:$0xff]  ;;  %v7244_v26 = vld [vmem:[#allocation2 + $0xd0] sm:$0xff] }
 0x33c   :  { %v1939_v46 = vadd.f32 %v7079_v49, %v1938_v35  ;;  %2187 = vmatpush.msrb.mxu0 %v7146_v47  ;;  %2207 = vmatpush.msrb.mxu1 %v7149_v44  ;;  %10293 = vst [vmem:[#allocation18_spill] sm:$0xff] %v7226_v1  ;;  %v7247_v35 = vld [vmem:[#allocation2 + $0xd8] sm:$0xff]  ;;  %v7253_v27 = vld [vmem:[#allocation2 + $0xa8] sm:$0xff] }
 0x33d   :  { %4354 = vtanh.f32 %v7132_v32  ;;  %2227 = vmatpush.msrb.mxu2 %v7155_v54  ;;  %2247 = vmatpush.msrb.mxu3 %v7158_v53  ;;  %10294 = vst [vmem:[#allocation13_spill] sm:$0xff] %v7229_v2 }
 0x33e   :  { %2188 = vmatpush.msrb.mxu0 %v7163_v21  ;;  %2208 = vmatpush.msrb.mxu1 %v7166_v18  ;;  %v1943_v58 = vsel %vm7171_vm14, %v7079_v49, %v1939_v46  ;;  %10295 = vst [vmem:[#allocation24_spill] sm:$0xff] %v7232_v4  ;;  %v7250_v46 = vld [vmem:[#allocation2 + $0xa0] sm:$0xff] }
 0x33f   :  { %2228 = vmatpush.msrb.mxu2 %v7175_v28  ;;  %2248 = vmatpush.msrb.mxu3 %v7178_v29  ;;  %v1948_v49 = vsel %vm1945_vm15, %v1947_v34, %v1943_v58  ;;  %10296 = vst [vmem:[#allocation14_spill] sm:$0xff] %v7235_v15  ;;  %v7262_v58 = vld [vmem:[#allocation2 + $0x80] sm:$0xff]  ;;  %v7265_v34 = vld [vmem:[#allocation2 + $0x88] sm:$0xff] }
 0x340   :  { %2189 = vmatpush.msrb.mxu0 %v7184_v33  ;;  %2209 = vmatpush.msrb.mxu1 %v7187_v40  ;;  %10297 = vst [vmem:[#allocation20_spill] sm:$0xff] %v7238_v11 }
 0x341   :  { %2229 = vmatpush.msrb.mxu2 %v7190_v48  ;;  %2249 = vmatpush.msrb.mxu3 %v7193_v57  ;;  %10298 = vst [vmem:[#allocation16_spill] sm:$0xff] %v7241_v20 }
 0x342   :  { %2190 = vmatpush.msrb.mxu0 %v7196_v38  ;;  %2210 = vmatpush.msrb.mxu1 %v7199_v41  ;;  %10299 = vst [vmem:[#allocation27_spill] sm:$0xff] %v7244_v26 }
 0x343   :  { %v4355_v22 = vpop.eup %4354  ;;  %2230 = vmatpush.msrb.mxu2 %v7202_v62  ;;  %2250 = vmatpush.msrb.mxu3 %v7205_v50  ;;  %10300 = vst [vmem:[#allocation17_spill] sm:$0xff] %v7247_v35 }
 0x344   :  { %v7208_v42 = vmul.f32 %v4355_v22, %v1948_v49  ;;  %2191 = vmatpush.msrb.mxu0 %v7210_v51  ;;  %2211 = vmatpush.msrb.mxu1 %v7213_v63  ;;  %10301 = vst [vmem:[#allocation9_spill] sm:$0xff] %v7250_v46  ;;  %v7268_v22 = vld [vmem:[#allocation2 + $0x90] sm:$0xff]  ;;  %v7271_v49 = vld [vmem:[#allocation2 + $0x98] sm:$0xff] }
 0x345   :  { %2231 = vmatpush.msrb.mxu2 %v7216_v45  ;;  %2251 = vmatpush.msrb.mxu3 %v7219_v55  ;;  %10302 = vst [vmem:[#allocation22_spill] sm:$0xff] %v7253_v27 }
 0x346   :  { %2051 = vmatmul.f32.vlgmr.msra.gmra.mxu0 %v7208_v42  ;;  %2071 = vmatmul.f32.vlgmr.msra.gmra.mxu1 %v7208_v42  ;;  %10305 = vst [vmem:[#allocation28_spill] sm:$0xff] %v7262_v58 }
 0x347   :  { %2091 = vmatmul.f32.vlgmr.msra.gmra.mxu2 %v7208_v42  ;;  %2111 = vmatmul.f32.vlgmr.msra.gmra.mxu3 %v7208_v42  ;;  %10306 = vst [vmem:[#allocation23_spill] sm:$0xff] %v7265_v34 }
 0x348   :  { %2192 = vmatpush.msrb.mxu0 %v7226_v1  ;;  %2212 = vmatpush.msrb.mxu1 %v7229_v2  ;;  %10307 = vst [vmem:[#allocation34_spill] sm:$0xff] %v7268_v22 }
 0x349   :  { %2232 = vmatpush.msrb.mxu2 %v7232_v4  ;;  %2252 = vmatpush.msrb.mxu3 %v7235_v15  ;;  %10308 = vst [vmem:[#allocation30_spill] sm:$0xff] %v7271_v49 }
 0x34a   :  { %2193 = vmatpush.msrb.mxu0 %v7238_v11  ;;  %2213 = vmatpush.msrb.mxu1 %v7241_v20 }
 0x34b   :  { %2233 = vmatpush.msrb.mxu2 %v7244_v26  ;;  %2253 = vmatpush.msrb.mxu3 %v7247_v35 }
 0x34c   :  { %2194 = vmatpush.msrb.mxu0 %v7250_v46  ;;  %2214 = vmatpush.msrb.mxu1 %v7253_v27 }
 0x34d   :  { %2234 = vmatpush.msrb.mxu2 %v7256_v14  ;;  %2254 = vmatpush.msrb.mxu3 %v7259_v9  ;;  %v7274_v14 = vld [vmem:[#allocation2 + $0x60] sm:$0xff]  ;;  %v7277_v9 = vld [vmem:[#allocation2 + $0x68] sm:$0xff] }
 0x34e   :  { %2195 = vmatpush.msrb.mxu0 %v7262_v58  ;;  %2215 = vmatpush.msrb.mxu1 %v7265_v34  ;;  %10309 = vst [vmem:[#allocation26_spill] sm:$0xff] %v7274_v14  ;;  %v7280_v58 = vld [vmem:[#allocation2 + $0x70] sm:$0xff]  ;;  %v7283_v34 = vld [vmem:[#allocation2 + $0x78] sm:$0xff] }
 0x34f   :  { %2235 = vmatpush.msrb.mxu2 %v7268_v22  ;;  %2255 = vmatpush.msrb.mxu3 %v7271_v49  ;;  %10310 = vst [vmem:[#allocation38_spill] sm:$0xff] %v7277_v9  ;;  %v7286_v22 = vld [vmem:[#allocation2 + $0x40] sm:$0xff]  ;;  %v7289_v49 = vld [vmem:[#allocation2 + $0x48] sm:$0xff] }
 0x350   :  { %2196 = vmatpush.msrb.mxu0 %v7274_v14  ;;  %2216 = vmatpush.msrb.mxu1 %v7277_v9  ;;  %10311 = vst [vmem:[#allocation33_spill] sm:$0xff] %v7280_v58  ;;  %v7292_v14 = vld [vmem:[#allocation2 + $0x50] sm:$0xff]  ;;  %v7295_v9 = vld [vmem:[#allocation2 + $0x58] sm:$0xff] }
 0x351   :  { %2236 = vmatpush.msrb.mxu2 %v7280_v58  ;;  %10312 = vst [vmem:[#allocation32_spill] sm:$0xff] %v7283_v34  ;;  %2256 = vmatpush.msrb.mxu3 %v7283_v34  ;;  %v7298_v58 = vld [vmem:[#allocation2 + $0x20] sm:$0xff]  ;;  %v7301_v34 = vld [vmem:[#allocation2 + $0x28] sm:$0xff] }
 0x352   :  { %10313 = vst [vmem:[#allocation42_spill] sm:$0xff] %v7286_v22  ;;  %2197 = vmatpush.msrb.mxu0 %v7286_v22  ;;  %2217 = vmatpush.msrb.mxu1 %v7289_v49  ;;  %v7304_v22 = vld [vmem:[#allocation2 + $0x30] sm:$0xff] }
 0x353   :  { %10314 = vst [vmem:[#allocation31_spill] sm:$0xff] %v7289_v49  ;;  %2237 = vmatpush.msrb.mxu2 %v7292_v14  ;;  %2257 = vmatpush.msrb.mxu3 %v7295_v9  ;;  %v7307_v49 = vld [vmem:[#allocation2 + $0x38] sm:$0xff] }
 0x354   :  { %10315 = vst [vmem:[#allocation37_spill] sm:$0xff] %v7292_v14  ;;  %2198 = vmatpush.msrb.mxu0 %v7298_v58  ;;  %2218 = vmatpush.msrb.mxu1 %v7301_v34  ;;  %v7310_v14 = vld [vmem:[#allocation2] sm:$0xff] }
 0x355   :  { %10316 = vst [vmem:[#allocation36_spill] sm:$0xff] %v7295_v9  ;;  %2238 = vmatpush.msrb.mxu2 %v7304_v22  ;;  %2258 = vmatpush.msrb.mxu3 %v7307_v49  ;;  %v7313_v9 = vld [vmem:[#allocation2 + $0x8] sm:$0xff] }
 0x356   :  { %10317 = vst [vmem:[#allocation46_spill] sm:$0xff] %v7298_v58  ;;  %2199 = vmatpush.msrb.mxu0 %v7310_v14  ;;  %2219 = vmatpush.msrb.mxu1 %v7313_v9  ;;  %v7316_v58 = vld [vmem:[#allocation2 + $0x10] sm:$0xff] }
 0x357   :  { %10318 = vst [vmem:[#allocation35_spill] sm:$0xff] %v7301_v34  ;;  %2239 = vmatpush.msrb.mxu2 %v7316_v58  ;;  %v7319_v34 = vld [vmem:[#allocation2 + $0x18] sm:$0xff]  ;;  %2200 = vmatmul.f32.vlgmr.msrb.gmra.mxu0 %v7208_v42 }
 0x358   :  { %10319 = vst [vmem:[#allocation40_spill] sm:$0xff] %v7304_v22  ;;  %2259 = vmatpush.msrb.mxu3 %v7319_v34  ;;  %2220 = vmatmul.f32.vlgmr.msrb.gmra.mxu1 %v7208_v42 }
 0x359   :  { %10320 = vst [vmem:[#allocation41_spill] sm:$0xff] %v7307_v49  ;;  %2240 = vmatmul.f32.vlgmr.msrb.gmra.mxu2 %v7208_v42  ;;  %2260 = vmatmul.f32.vlgmr.msrb.gmra.mxu3 %v7208_v42  ;;  %v7343_v42 = vld [vmem:[#allocation6 + $0x1f0] sm:$0xff] }
 0x35a   :  { %10321 = vst [vmem:[#allocation50_spill] sm:$0xff] %v7310_v14  ;;  %4178 = vmatpush.msk.msra.mxu0 %vm383_vm0, %v7128_v39  ;;  %4180 = vmatpush.msk.msra.mxu1 %vm383_vm0, %v7130_v5  ;;  %v4177_v39 = vld [vmem:[%s9004_s0 + $0x20] sm:$0xff] }
 0x35b   :  { %10322 = vst [vmem:[#allocation39_spill] sm:$0xff] %v7313_v9  ;;  %4184 = vmatpush.msk.msra.mxu3 %vm383_vm0, %v7140_v43  ;;  %4182 = vmatpush.msk.msra.mxu2 %vm383_vm0, %v7142_v61  ;;  %v7346_v5 = vld [vmem:[#allocation6 + $0x1f8] sm:$0xff]  ;;  %v7349_v43 = vld [vmem:[#allocation6 + $0x1c0] sm:$0xff]  ;;  %v7352_v61 = vld [vmem:[#allocation6 + $0x1c8] sm:$0xff] }
 0x35c   :  { %10323 = vst [vmem:[#allocation44_spill] sm:$0xff] %v7316_v58  ;;  %v7337_v58 = vld [vmem:[#allocation6 + $0x1e8] sm:$0xff] }
 0x35d   :  { %10324 = vst [vmem:[#allocation45_spill] sm:$0xff] %v7319_v34  ;;  %v7334_v34 = vld [vmem:[#allocation6 + $0x1e0] sm:$0xff]  ;;  %2447 = vmatpush.msrb.mxu1 %v7337_v58  ;;  %2467 = vmatpush.msrb.mxu2 %v7343_v42 }
 0x35e   :  { %10325 = vst [vmem:[#allocation54_spill] sm:$0xff] %v7334_v34  ;;  %2427 = vmatpush.msrb.mxu0 %v7334_v34  ;;  %2487 = vmatpush.msrb.mxu3 %v7346_v5  ;;  %v7358_v34 = vld [vmem:[#allocation6 + $0x1d8] sm:$0xff] }
 0x35f   :  { %10326 = vst [vmem:[#allocation43_spill] sm:$0xff] %v7337_v58  ;;  %2448 = vmatpush.msrb.mxu1 %v7352_v61  ;;  %v7355_v58 = vld [vmem:[#allocation6 + $0x1d0] sm:$0xff]  ;;  %4179 = vmatmul.msk.f32.vlgmr.msra.gmra.mxu0 %vm379_vm1, %v4177_v39 }
 0x360   :  { %10327 = vst [vmem:[#allocation53_spill] sm:$0xff] %v7343_v42  ;;  %2428 = vmatpush.msrb.mxu0 %v7349_v43  ;;  %2468 = vmatpush.msrb.mxu2 %v7355_v58 }
 0x361   :  { %10328 = vst [vmem:[#allocation48_spill] sm:$0xff] %v7346_v5  ;;  %2488 = vmatpush.msrb.mxu3 %v7358_v34  ;;  %4181 = vmatmul.msk.f32.vlgmr.msra.gmra.mxu1 %vm379_vm1, %v4177_v39  ;;  %v7377_v5 = vld [vmem:[#allocation6 + $0x180] sm:$0xff] }
 0x362   :  { %10329 = vst [vmem:[#allocation49_spill] sm:$0xff] %v7349_v43  ;;  %4183 = vmatmul.msk.f32.vlgmr.msra.gmra.mxu2 %vm379_vm1, %v4177_v39  ;;  %4185 = vmatmul.msk.f32.vlgmr.msra.gmra.mxu3 %vm379_vm1, %v4177_v39  ;;  %v7365_v43 = vld [vmem:[#allocation6 + $0x1a0] sm:$0xff]  ;;  %v7380_v39 = vld [vmem:[#allocation6 + $0x188] sm:$0xff] }
 0x363   :  { %10330 = vst [vmem:[#allocation47_spill] sm:$0xff] %v7352_v61  ;;  %2429 = vmatpush.msrb.mxu0 %v7365_v43  ;;  %v7368_v61 = vld [vmem:[#allocation6 + $0x1a8] sm:$0xff] }
 0x364   :  { %10331 = vst [vmem:[#allocation57_spill] sm:$0xff] %v7355_v58  ;;  %2449 = vmatpush.msrb.mxu1 %v7368_v61  ;;  %v7371_v58 = vld [vmem:[#allocation6 + $0x1b0] sm:$0xff] }
 0x365   :  { %10332 = vst [vmem:[#allocation52_spill] sm:$0xff] %v7358_v34  ;;  %2469 = vmatpush.msrb.mxu2 %v7371_v58  ;;  %v7374_v34 = vld [vmem:[#allocation6 + $0x1b8] sm:$0xff]  ;;  %2430 = vmatpush.msrb.mxu0 %v7377_v5 }
 0x366   :  { %10333 = vst [vmem:[#allocation58_spill] sm:$0xff] %v7365_v43  ;;  %2489 = vmatpush.msrb.mxu3 %v7374_v34  ;;  %2450 = vmatpush.msrb.mxu1 %v7380_v39  ;;  %v7383_v43 = vld [vmem:[#allocation6 + $0x190] sm:$0xff] }
 0x367   :  { %10334 = vst [vmem:[#allocation51_spill] sm:$0xff] %v7368_v61  ;;  %2470 = vmatpush.msrb.mxu2 %v7383_v43  ;;  %v7386_v61 = vld [vmem:[#allocation6 + $0x198] sm:$0xff] }
 0x368   :  { %10335 = vst [vmem:[#allocation61_spill] sm:$0xff] %v7371_v58  ;;  %2490 = vmatpush.msrb.mxu3 %v7386_v61  ;;  %v7389_v58 = vld [vmem:[#allocation6 + $0x160] sm:$0xff] }
 0x369   :  { %10336 = vst [vmem:[#allocation56_spill] sm:$0xff] %v7374_v34  ;;  %2431 = vmatpush.msrb.mxu0 %v7389_v58  ;;  %v7392_v34 = vld [vmem:[#allocation6 + $0x168] sm:$0xff] }
 0x36a   :  { %10337 = vst [vmem:[#allocation62_spill] sm:$0xff] %v7377_v5  ;;  %2451 = vmatpush.msrb.mxu1 %v7392_v34  ;;  %v7395_v5 = vld [vmem:[#allocation6 + $0x170] sm:$0xff] }
 0x36b   :  { %10338 = vst [vmem:[#allocation55_spill] sm:$0xff] %v7380_v39  ;;  %2471 = vmatpush.msrb.mxu2 %v7395_v5  ;;  %v7398_v39 = vld [vmem:[#allocation6 + $0x178] sm:$0xff] }
 0x36c   :  { %10339 = vst [vmem:[#allocation65_spill] sm:$0xff] %v7383_v43  ;;  %2491 = vmatpush.msrb.mxu3 %v7398_v39  ;;  %v7401_v43 = vld [vmem:[#allocation6 + $0x140] sm:$0xff] }
 0x36d   :  { %10340 = vst [vmem:[#allocation60_spill] sm:$0xff] %v7386_v61  ;;  %2432 = vmatpush.msrb.mxu0 %v7401_v43  ;;  %v7404_v61 = vld [vmem:[#allocation6 + $0x148] sm:$0xff] }
 0x36e   :  { %10341 = vst [vmem:[#allocation66_spill] sm:$0xff] %v7389_v58  ;;  %2452 = vmatpush.msrb.mxu1 %v7404_v61  ;;  %v7407_v58 = vld [vmem:[#allocation6 + $0x150] sm:$0xff] }
 0x36f   :  { %10342 = vst [vmem:[#allocation59_spill] sm:$0xff] %v7392_v34  ;;  %2472 = vmatpush.msrb.mxu2 %v7407_v58  ;;  %v7410_v34 = vld [vmem:[#allocation6 + $0x158] sm:$0xff] }
 0x370   :  { %10343 = vst [vmem:[#allocation68_spill] sm:$0xff] %v7395_v5  ;;  %2492 = vmatpush.msrb.mxu3 %v7410_v34  ;;  %v7413_v5 = vld [vmem:[#allocation6 + $0x120] sm:$0xff] }
 0x371   :  { %10344 = vst [vmem:[#allocation64_spill] sm:$0xff] %v7398_v39  ;;  %2433 = vmatpush.msrb.mxu0 %v7413_v5  ;;  %v7416_v39 = vld [vmem:[#allocation6 + $0x128] sm:$0xff] }
 0x372   :  { %10345 = vst [vmem:[#allocation72_spill] sm:$0xff] %v7401_v43  ;;  %2453 = vmatpush.msrb.mxu1 %v7416_v39  ;;  %v7419_v43 = vld [vmem:[#allocation6 + $0x130] sm:$0xff] }
 0x373   :  { %10346 = vst [vmem:[#allocation63_spill] sm:$0xff] %v7404_v61  ;;  %2473 = vmatpush.msrb.mxu2 %v7419_v43  ;;  %v7422_v61 = vld [vmem:[#allocation6 + $0x138] sm:$0xff] }
 0x374   :  { %10347 = vst [vmem:[#allocation73_spill] sm:$0xff] %v7407_v58  ;;  %2493 = vmatpush.msrb.mxu3 %v7422_v61  ;;  %v7425_v58 = vld [vmem:[#allocation6 + $0x100] sm:$0xff] }
 0x375   :  { %10348 = vst [vmem:[#allocation69_spill] sm:$0xff] %v7410_v34  ;;  %2434 = vmatpush.msrb.mxu0 %v7425_v58  ;;  %v7428_v34 = vld [vmem:[#allocation6 + $0x108] sm:$0xff] }
 0x376   :  { %10349 = vst [vmem:[#allocation76_spill] sm:$0xff] %v7413_v5  ;;  %2454 = vmatpush.msrb.mxu1 %v7428_v34  ;;  %v7431_v5 = vld [vmem:[#allocation6 + $0x110] sm:$0xff] }
 0x377   :  { %10350 = vst [vmem:[#allocation67_spill] sm:$0xff] %v7416_v39  ;;  %2474 = vmatpush.msrb.mxu2 %v7431_v5  ;;  %v7434_v39 = vld [vmem:[#allocation6 + $0x118] sm:$0xff] }
 0x378   :  { %10351 = vst [vmem:[#allocation77_spill] sm:$0xff] %v7419_v43  ;;  %2494 = vmatpush.msrb.mxu3 %v7434_v39  ;;  %v7437_v43 = vld [vmem:[#allocation6 + $0xe0] sm:$0xff] }
 0x379   :  { %10352 = vst [vmem:[#allocation75_spill] sm:$0xff] %v7422_v61  ;;  %2435 = vmatpush.msrb.mxu0 %v7437_v43  ;;  %v7440_v61 = vld [vmem:[#allocation6 + $0xe8] sm:$0xff] }
 0x37a   :  { %10353 = vst [vmem:[#allocation80_spill] sm:$0xff] %v7425_v58  ;;  %2455 = vmatpush.msrb.mxu1 %v7440_v61  ;;  %v7443_v58 = vld [vmem:[#allocation6 + $0xf0] sm:$0xff] }
 0x37b   :  { %10354 = vst [vmem:[#allocation70_spill] sm:$0xff] %v7428_v34  ;;  %2475 = vmatpush.msrb.mxu2 %v7443_v58  ;;  %v7446_v34 = vld [vmem:[#allocation6 + $0xf8] sm:$0xff] }
 0x37c   :  { %10355 = vst [vmem:[#allocation81_spill] sm:$0xff] %v7431_v5  ;;  %2495 = vmatpush.msrb.mxu3 %v7446_v34  ;;  %v7449_v5 = vld [vmem:[#allocation6 + $0xc0] sm:$0xff] }
 0x37d   :  { %10356 = vst [vmem:[#allocation79_spill] sm:$0xff] %v7434_v39  ;;  %2436 = vmatpush.msrb.mxu0 %v7449_v5  ;;  %v7452_v39 = vld [vmem:[#allocation6 + $0xc8] sm:$0xff] }
 0x37e   :  { %10357 = vst [vmem:[#allocation84_spill] sm:$0xff] %v7437_v43  ;;  %2456 = vmatpush.msrb.mxu1 %v7452_v39  ;;  %v7455_v43 = vld [vmem:[#allocation6 + $0xd0] sm:$0xff] }
 0x37f   :  { %10358 = vst [vmem:[#allocation71_spill] sm:$0xff] %v7440_v61  ;;  %2476 = vmatpush.msrb.mxu2 %v7455_v43  ;;  %v7458_v61 = vld [vmem:[#allocation6 + $0xd8] sm:$0xff] }
 0x380   :  { %10359 = vst [vmem:[#allocation85_spill] sm:$0xff] %v7443_v58  ;;  %2496 = vmatpush.msrb.mxu3 %v7458_v61  ;;  %v7461_v58 = vld [vmem:[#allocation6 + $0xa0] sm:$0xff] }
 0x381   :  { %10360 = vst [vmem:[#allocation83_spill] sm:$0xff] %v7446_v34  ;;  %2437 = vmatpush.msrb.mxu0 %v7461_v58  ;;  %v7464_v34 = vld [vmem:[#allocation6 + $0xa8] sm:$0xff] }
 0x382   :  { %10361 = vst [vmem:[#allocation88_spill] sm:$0xff] %v7449_v5  ;;  %2457 = vmatpush.msrb.mxu1 %v7464_v34  ;;  %v7467_v5 = vld [vmem:[#allocation6 + $0xb0] sm:$0xff] }
 0x383   :  { %10362 = vst [vmem:[#allocation74_spill] sm:$0xff] %v7452_v39  ;;  %2477 = vmatpush.msrb.mxu2 %v7467_v5  ;;  %v7470_v39 = vld [vmem:[#allocation6 + $0xb8] sm:$0xff] }
 0x384   :  { %10363 = vst [vmem:[#allocation91_spill] sm:$0xff] %v7455_v43  ;;  %2497 = vmatpush.msrb.mxu3 %v7470_v39  ;;  %v7473_v43 = vld [vmem:[#allocation6 + $0x80] sm:$0xff] }
 0x385   :  { %10364 = vst [vmem:[#allocation87_spill] sm:$0xff] %v7458_v61  ;;  %2438 = vmatpush.msrb.mxu0 %v7473_v43  ;;  %v7476_v61 = vld [vmem:[#allocation6 + $0x88] sm:$0xff] }
 0x386   :  { %10365 = vst [vmem:[#allocation89_spill] sm:$0xff] %v7461_v58  ;;  %2458 = vmatpush.msrb.mxu1 %v7476_v61  ;;  %v7479_v58 = vld [vmem:[#allocation6 + $0x90] sm:$0xff] }
 0x387   :  { %10366 = vst [vmem:[#allocation78_spill] sm:$0xff] %v7464_v34  ;;  %2478 = vmatpush.msrb.mxu2 %v7479_v58  ;;  %v7482_v34 = vld [vmem:[#allocation6 + $0x98] sm:$0xff] }
 0x388   :  { %10367 = vst [vmem:[#allocation95_spill] sm:$0xff] %v7467_v5  ;;  %2498 = vmatpush.msrb.mxu3 %v7482_v34  ;;  %v7485_v5 = vld [vmem:[#allocation6 + $0x60] sm:$0xff] }
 0x389   :  { %10368 = vst [vmem:[#allocation92_spill] sm:$0xff] %v7470_v39  ;;  %2439 = vmatpush.msrb.mxu0 %v7485_v5  ;;  %v7488_v39 = vld [vmem:[#allocation6 + $0x68] sm:$0xff] }
 0x38a   :  { %10369 = vst [vmem:[#allocation93_spill] sm:$0xff] %v7473_v43  ;;  %2459 = vmatpush.msrb.mxu1 %v7488_v39  ;;  %v7491_v43 = vld [vmem:[#allocation6 + $0x70] sm:$0xff] }
 0x38b   :  { %10370 = vst [vmem:[#allocation82_spill] sm:$0xff] %v7476_v61  ;;  %2479 = vmatpush.msrb.mxu2 %v7491_v43  ;;  %v7494_v61 = vld [vmem:[#allocation6 + $0x78] sm:$0xff] }
 0x38c   :  { %10371 = vst [vmem:[#allocation99_spill] sm:$0xff] %v7479_v58  ;;  %2499 = vmatpush.msrb.mxu3 %v7494_v61  ;;  %v7497_v58 = vld [vmem:[#allocation6 + $0x40] sm:$0xff] }
 0x38d   :  { %10372 = vst [vmem:[#allocation96_spill] sm:$0xff] %v7482_v34  ;;  %2440 = vmatpush.msrb.mxu0 %v7497_v58  ;;  %v7500_v34 = vld [vmem:[#allocation6 + $0x48] sm:$0xff] }
 0x38e   :  { %10373 = vst [vmem:[#allocation97_spill] sm:$0xff] %v7485_v5  ;;  %2460 = vmatpush.msrb.mxu1 %v7500_v34  ;;  %v7503_v5 = vld [vmem:[#allocation6 + $0x50] sm:$0xff] }
 0x38f   :  { %10374 = vst [vmem:[#allocation86_spill] sm:$0xff] %v7488_v39  ;;  %2480 = vmatpush.msrb.mxu2 %v7503_v5  ;;  %v7506_v39 = vld [vmem:[#allocation6 + $0x58] sm:$0xff] }
 0x390   :  { %10375 = vst [vmem:[#allocation103_spill] sm:$0xff] %v7491_v43  ;;  %2500 = vmatpush.msrb.mxu3 %v7506_v39  ;;  %v7509_v43 = vld [vmem:[#allocation6 + $0x20] sm:$0xff] }
 0x391   :  { %10376 = vst [vmem:[#allocation90_spill] sm:$0xff] %v7494_v61  ;;  %2441 = vmatpush.msrb.mxu0 %v7509_v43  ;;  %v7512_v61 = vld [vmem:[#allocation6 + $0x28] sm:$0xff] }
 0x392   :  { %10377 = vst [vmem:[#allocation100_spill] sm:$0xff] %v7497_v58  ;;  %2461 = vmatpush.msrb.mxu1 %v7512_v61  ;;  %v7515_v58 = vld [vmem:[#allocation6 + $0x30] sm:$0xff] }
 0x393   :  { %10378 = vst [vmem:[#allocation101_spill] sm:$0xff] %v7500_v34  ;;  %2481 = vmatpush.msrb.mxu2 %v7515_v58  ;;  %v7518_v34 = vld [vmem:[#allocation6 + $0x38] sm:$0xff] }
 0x394   :  { %10379 = vst [vmem:[#allocation107_spill] sm:$0xff] %v7503_v5  ;;  %2501 = vmatpush.msrb.mxu3 %v7518_v34  ;;  %v7521_v5 = vld [vmem:[#allocation6] sm:$0xff] }
 0x395   :  { %10380 = vst [vmem:[#allocation94_spill] sm:$0xff] %v7506_v39  ;;  %2442 = vmatpush.msrb.mxu0 %v7521_v5  ;;  %v7524_v39 = vld [vmem:[#allocation6 + $0x8] sm:$0xff] }
 0x396   :  { %10381 = vst [vmem:[#allocation104_spill] sm:$0xff] %v7509_v43  ;;  %2462 = vmatpush.msrb.mxu1 %v7524_v39  ;;  %v7527_v43 = vld [vmem:[#allocation6 + $0x10] sm:$0xff] }
 0x397   :  { %10382 = vst [vmem:[#allocation105_spill] sm:$0xff] %v7512_v61  ;;  %2482 = vmatpush.msrb.mxu2 %v7527_v43  ;;  %v7530_v61 = vld [vmem:[#allocation6 + $0x18] sm:$0xff] }
 0x398   :  { %10383 = vst [vmem:[#allocation111_spill] sm:$0xff] %v7515_v58  ;;  %2502 = vmatpush.msrb.mxu3 %v7530_v61  ;;  %v7533_v58 = vld [vmem:[#allocation4 + $0x1e0] sm:$0xff] }
 0x399   :  { %10384 = vst [vmem:[#allocation98_spill] sm:$0xff] %v7518_v34  ;;  %2507 = vmatpush.msra.mxu0 %v7533_v58  ;;  %v7536_v34 = vld [vmem:[#allocation4 + $0x1e8] sm:$0xff] }
 0x39a   :  { %10385 = vst [vmem:[#allocation108_spill] sm:$0xff] %v7521_v5  ;;  %2527 = vmatpush.msra.mxu1 %v7536_v34  ;;  %v7539_v5 = vld [vmem:[#allocation4 + $0x1f0] sm:$0xff] }
 0x39b   :  { %10386 = vst [vmem:[#allocation109_spill] sm:$0xff] %v7524_v39  ;;  %2547 = vmatpush.msra.mxu2 %v7539_v5  ;;  %v7542_v39 = vld [vmem:[#allocation4 + $0x1f8] sm:$0xff] }
 0x39c   :  { %10387 = vst [vmem:[#allocation115_spill] sm:$0xff] %v7527_v43  ;;  %2567 = vmatpush.msra.mxu3 %v7542_v39  ;;  %v7545_v43 = vld [vmem:[#allocation4 + $0x1c0] sm:$0xff] }
 0x39d   :  { %10388 = vst [vmem:[#allocation102_spill] sm:$0xff] %v7530_v61  ;;  %2508 = vmatpush.msra.mxu0 %v7545_v43  ;;  %v7548_v61 = vld [vmem:[#allocation4 + $0x1c8] sm:$0xff] }
 0x39e   :  { %10389 = vst [vmem:[#allocation112_spill] sm:$0xff] %v7533_v58  ;;  %2528 = vmatpush.msra.mxu1 %v7548_v61  ;;  %v7551_v58 = vld [vmem:[#allocation4 + $0x1d0] sm:$0xff] }
 0x39f   :  { %10390 = vst [vmem:[#allocation113_spill] sm:$0xff] %v7536_v34  ;;  %2548 = vmatpush.msra.mxu2 %v7551_v58  ;;  %v7554_v34 = vld [vmem:[#allocation4 + $0x1d8] sm:$0xff] }
 0x3a0   :  { %10391 = vst [vmem:[#allocation116_spill] sm:$0xff] %v7539_v5  ;;  %2568 = vmatpush.msra.mxu3 %v7554_v34  ;;  %v7557_v5 = vld [vmem:[#allocation4 + $0x1a0] sm:$0xff] }
 0x3a1   :  { %10392 = vst [vmem:[#allocation106_spill] sm:$0xff] %v7542_v39  ;;  %2509 = vmatpush.msra.mxu0 %v7557_v5  ;;  %v7560_v39 = vld [vmem:[#allocation4 + $0x1a8] sm:$0xff] }
 0x3a2   :  { %10393 = vst [vmem:[#allocation117_spill] sm:$0xff] %v7545_v43  ;;  %2529 = vmatpush.msra.mxu1 %v7560_v39  ;;  %v7563_v43 = vld [vmem:[#allocation4 + $0x1b0] sm:$0xff] }
 0x3a3   :  { %10394 = vst [vmem:[#allocation119_spill] sm:$0xff] %v7548_v61  ;;  %2549 = vmatpush.msra.mxu2 %v7563_v43  ;;  %v7566_v61 = vld [vmem:[#allocation4 + $0x1b8] sm:$0xff] }
 0x3a4   :  { %10395 = vst [vmem:[#allocation120_spill] sm:$0xff] %v7551_v58  ;;  %2569 = vmatpush.msra.mxu3 %v7566_v61  ;;  %v7569_v58 = vld [vmem:[#allocation4 + $0x180] sm:$0xff] }
 0x3a5   :  { %10396 = vst [vmem:[#allocation110_spill] sm:$0xff] %v7554_v34  ;;  %2510 = vmatpush.msra.mxu0 %v7569_v58  ;;  %v7572_v34 = vld [vmem:[#allocation4 + $0x188] sm:$0xff] }
 0x3a6   :  { %10397 = vst [vmem:[#allocation121_spill] sm:$0xff] %v7557_v5  ;;  %2530 = vmatpush.msra.mxu1 %v7572_v34  ;;  %v7575_v5 = vld [vmem:[#allocation4 + $0x190] sm:$0xff] }
 0x3a7   :  { %10398 = vst [vmem:[#allocation123_spill] sm:$0xff] %v7560_v39  ;;  %2550 = vmatpush.msra.mxu2 %v7575_v5  ;;  %v7578_v39 = vld [vmem:[#allocation4 + $0x198] sm:$0xff] }
 0x3a8   :  { %10399 = vst [vmem:[#allocation124_spill] sm:$0xff] %v7563_v43  ;;  %2570 = vmatpush.msra.mxu3 %v7578_v39  ;;  %v7581_v43 = vld [vmem:[#allocation4 + $0x160] sm:$0xff] }
 0x3a9   :  { %10400 = vst [vmem:[#allocation114_spill] sm:$0xff] %v7566_v61  ;;  %2511 = vmatpush.msra.mxu0 %v7581_v43  ;;  %v7584_v61 = vld [vmem:[#allocation4 + $0x168] sm:$0xff] }
 0x3aa   :  { %10401 = vst [vmem:[#allocation125_spill] sm:$0xff] %v7569_v58  ;;  %2531 = vmatpush.msra.mxu1 %v7584_v61  ;;  %v7587_v58 = vld [vmem:[#allocation4 + $0x170] sm:$0xff] }
 0x3ab   :  { %10402 = vst [vmem:[#allocation127_spill] sm:$0xff] %v7572_v34  ;;  %2551 = vmatpush.msra.mxu2 %v7587_v58  ;;  %v7590_v34 = vld [vmem:[#allocation4 + $0x178] sm:$0xff] }
 0x3ac   :  { %10403 = vst [vmem:[#allocation128_spill] sm:$0xff] %v7575_v5  ;;  %2571 = vmatpush.msra.mxu3 %v7590_v34  ;;  %v7593_v5 = vld [vmem:[#allocation4 + $0x140] sm:$0xff] }
 0x3ad   :  { %10404 = vst [vmem:[#allocation118_spill] sm:$0xff] %v7578_v39  ;;  %2512 = vmatpush.msra.mxu0 %v7593_v5  ;;  %v7596_v39 = vld [vmem:[#allocation4 + $0x148] sm:$0xff] }
 0x3ae   :  { %10405 = vst [vmem:[#allocation129_spill] sm:$0xff] %v7581_v43  ;;  %2532 = vmatpush.msra.mxu1 %v7596_v39  ;;  %v7599_v43 = vld [vmem:[#allocation4 + $0x150] sm:$0xff] }
 0x3af   :  { %10406 = vst [vmem:[#allocation131_spill] sm:$0xff] %v7584_v61  ;;  %2552 = vmatpush.msra.mxu2 %v7599_v43  ;;  %v7602_v61 = vld [vmem:[#allocation4 + $0x158] sm:$0xff] }
 0x3b0   :  { %10407 = vst [vmem:[#allocation132_spill] sm:$0xff] %v7587_v58  ;;  %2572 = vmatpush.msra.mxu3 %v7602_v61  ;;  %v7605_v58 = vld [vmem:[#allocation4 + $0x120] sm:$0xff] }
 0x3b1   :  { %10408 = vst [vmem:[#allocation122_spill] sm:$0xff] %v7590_v34  ;;  %2513 = vmatpush.msra.mxu0 %v7605_v58  ;;  %v7608_v34 = vld [vmem:[#allocation4 + $0x128] sm:$0xff]  ;;  %v1992_v42 = vpop.f32.mrf.mxu1 }
 0x3b2   :  { %10409 = vst [vmem:[#allocation133_spill] sm:$0xff] %v7593_v5  ;;  %2533 = vmatpush.msra.mxu1 %v7608_v34  ;;  %v7611_v5 = vld [vmem:[#allocation4 + $0x130] sm:$0xff] }
 0x3b3   :  { %10410 = vst [vmem:[#allocation135_spill] sm:$0xff] %v7596_v39  ;;  %2553 = vmatpush.msra.mxu2 %v7611_v5  ;;  %v7614_v39 = vld [vmem:[#allocation4 + $0x138] sm:$0xff] }
 0x3b4   :  { %10411 = vst [vmem:[#allocation136_spill] sm:$0xff] %v7599_v43  ;;  %2573 = vmatpush.msra.mxu3 %v7614_v39  ;;  %v7617_v43 = vld [vmem:[#allocation4 + $0x100] sm:$0xff] }
 0x3b5   :  { %10412 = vst [vmem:[#allocation126_spill] sm:$0xff] %v7602_v61  ;;  %2514 = vmatpush.msra.mxu0 %v7617_v43  ;;  %v7620_v61 = vld [vmem:[#allocation4 + $0x108] sm:$0xff] }
 0x3b6   :  { %10413 = vst [vmem:[#allocation137_spill] sm:$0xff] %v7605_v58  ;;  %2534 = vmatpush.msra.mxu1 %v7620_v61  ;;  %v7623_v58 = vld [vmem:[#allocation4 + $0x110] sm:$0xff] }
 0x3b7   :  { %10414 = vst [vmem:[#allocation139_spill] sm:$0xff] %v7608_v34  ;;  %2554 = vmatpush.msra.mxu2 %v7623_v58  ;;  %v7626_v34 = vld [vmem:[#allocation4 + $0x118] sm:$0xff] }
 0x3b8   :  { %10415 = vst [vmem:[#allocation140_spill] sm:$0xff] %v7611_v5  ;;  %2574 = vmatpush.msra.mxu3 %v7626_v34  ;;  %v7629_v5 = vld [vmem:[#allocation4 + $0xe0] sm:$0xff]  ;;  %v2032_v9 = vpop.f32.mrf.mxu3  ;;  %v2012_v35 = vpop.f32.mrf.mxu2 }
 0x3b9   :  { %10416 = vst [vmem:[#allocation130_spill] sm:$0xff] %v7614_v39  ;;  %2515 = vmatpush.msra.mxu0 %v7629_v5  ;;  %v7632_v39 = vld [vmem:[#allocation4 + $0xe8] sm:$0xff] }
 0x3ba   :  { %10417 = vst [vmem:[#allocation141_spill] sm:$0xff] %v7617_v43  ;;  %2535 = vmatpush.msra.mxu1 %v7632_v39  ;;  %v7635_v43 = vld [vmem:[#allocation4 + $0xf0] sm:$0xff] }
 0x3bb   :  { %10418 = vst [vmem:[#allocation143_spill] sm:$0xff] %v7620_v61  ;;  %2555 = vmatpush.msra.mxu2 %v7635_v43  ;;  %v7638_v61 = vld [vmem:[#allocation4 + $0xf8] sm:$0xff] }
 0x3bc   :  { %10419 = vst [vmem:[#allocation144_spill] sm:$0xff] %v7623_v58  ;;  %2575 = vmatpush.msra.mxu3 %v7638_v61  ;;  %v7641_v58 = vld [vmem:[#allocation4 + $0xc0] sm:$0xff] }
 0x3bd   :  { %10420 = vst [vmem:[#allocation134_spill] sm:$0xff] %v7626_v34  ;;  %2516 = vmatpush.msra.mxu0 %v7641_v58  ;;  %v7644_v34 = vld [vmem:[#allocation4 + $0xc8] sm:$0xff] }
 0x3be   :  { %10421 = vst [vmem:[#allocation145_spill] sm:$0xff] %v7629_v5  ;;  %2536 = vmatpush.msra.mxu1 %v7644_v34  ;;  %v7647_v5 = vld [vmem:[#allocation4 + $0xd0] sm:$0xff] }
 0x3bf   :  { %10422 = vst [vmem:[#allocation138_spill] sm:$0xff] %v7632_v39  ;;  %2556 = vmatpush.msra.mxu2 %v7647_v5  ;;  %v7650_v39 = vld [vmem:[#allocation4 + $0xd8] sm:$0xff] }
 0x3c0   :  { %10423 = vst [vmem:[#allocation142_spill] sm:$0xff] %v7635_v43  ;;  %2576 = vmatpush.msra.mxu3 %v7650_v39  ;;  %v7653_v43 = vld [vmem:[#allocation4 + $0xa0] sm:$0xff] }
 0x3c1   :  { %10424 = vst [vmem:[#allocation148_spill] sm:$0xff] %v7638_v61  ;;  %2517 = vmatpush.msra.mxu0 %v7653_v43  ;;  %v7656_v61 = vld [vmem:[#allocation4 + $0xa8] sm:$0xff] }
 0x3c2   :  { %10425 = vst [vmem:[#allocation146_spill] sm:$0xff] %v7641_v58  ;;  %2537 = vmatpush.msra.mxu1 %v7656_v61  ;;  %v7659_v58 = vld [vmem:[#allocation4 + $0xb0] sm:$0xff] }
 0x3c3   :  { %10426 = vst [vmem:[#allocation150_spill] sm:$0xff] %v7644_v34  ;;  %2557 = vmatpush.msra.mxu2 %v7659_v58  ;;  %v7662_v34 = vld [vmem:[#allocation4 + $0xb8] sm:$0xff]  ;;  %v2072_v14 = vpop.f32.mrf.mxu1 }
 0x3c4   :  { %10427 = vst [vmem:[#allocation152_spill] sm:$0xff] %v7647_v5  ;;  %2577 = vmatpush.msra.mxu3 %v7662_v34  ;;  %v7665_v5 = vld [vmem:[#allocation4 + $0x80] sm:$0xff]  ;;  %v2073_v22 = vadd.f32 %v2072_v14, %v1992_v42 }
 0x3c5   :  { %10428 = vst [vmem:[#allocation151_spill] sm:$0xff] %v7650_v39  ;;  %2518 = vmatpush.msra.mxu0 %v7665_v5  ;;  %v7668_v39 = vld [vmem:[#allocation4 + $0x88] sm:$0xff] }
 0x3c6   :  { %10429 = vst [vmem:[#allocation153_spill] sm:$0xff] %v7653_v43  ;;  %2538 = vmatpush.msra.mxu1 %v7668_v39  ;;  %v7671_v43 = vld [vmem:[#allocation4 + $0x90] sm:$0xff]  ;;  %v2116_v27 = vadd.f32 %v2073_v22, %v10280_v16 }
 0x3c7   :  { %10430 = vst [vmem:[#allocation154_spill] sm:$0xff] %v7656_v61  ;;  %2558 = vmatpush.msra.mxu2 %v7671_v43  ;;  %v7674_v61 = vld [vmem:[#allocation4 + $0x98] sm:$0xff] }
 0x3c8   :  { %10431 = vst [vmem:[#allocation156_spill] sm:$0xff] %v7659_v58  ;;  %2578 = vmatpush.msra.mxu3 %v7674_v61  ;;  %v7677_v58 = vld [vmem:[#allocation4 + $0x60] sm:$0xff]  ;;  %v4175_v46 = vmul.f32 -1.442695, %v2116_v27 }
 0x3c9   :  { %10432 = vst [vmem:[#allocation155_spill] sm:$0xff] %v7662_v34  ;;  %2519 = vmatpush.msra.mxu0 %v7677_v58  ;;  %v7680_v34 = vld [vmem:[#allocation4 + $0x68] sm:$0xff] }
 0x3ca   :  { %10433 = vst [vmem:[#allocation157_spill] sm:$0xff] %v7665_v5  ;;  %2539 = vmatpush.msra.mxu1 %v7680_v34  ;;  %v7683_v5 = vld [vmem:[#allocation4 + $0x70] sm:$0xff]  ;;  %v2092_v2 = vpop.f32.mrf.mxu2 }
 0x3cb   :  { %10434 = vst [vmem:[#allocation158_spill] sm:$0xff] %v7668_v39  ;;  %2559 = vmatpush.msra.mxu2 %v7683_v5  ;;  %v7686_v39 = vld [vmem:[#allocation4 + $0x78] sm:$0xff] }
 0x3cc   :  { %10435 = vst [vmem:[#allocation160_spill] sm:$0xff] %v7671_v43  ;;  %2579 = vmatpush.msra.mxu3 %v7686_v39  ;;  %v7689_v43 = vld [vmem:[#allocation4 + $0x40] sm:$0xff] }
 0x3cd   :  { %10436 = vst [vmem:[#allocation159_spill] sm:$0xff] %v7674_v61  ;;  %2520 = vmatpush.msra.mxu0 %v7689_v43  ;;  %v7692_v61 = vld [vmem:[#allocation4 + $0x48] sm:$0xff] }
 0x3ce   :  { %10437 = vst [vmem:[#allocation161_spill] sm:$0xff] %v7677_v58  ;;  %2540 = vmatpush.msra.mxu1 %v7692_v61  ;;  %v7695_v58 = vld [vmem:[#allocation4 + $0x50] sm:$0xff] }
 0x3cf   :  { %10438 = vst [vmem:[#allocation162_spill] sm:$0xff] %v7680_v34  ;;  %2560 = vmatpush.msra.mxu2 %v7695_v58  ;;  %v7698_v34 = vld [vmem:[#allocation4 + $0x58] sm:$0xff] }
 0x3d0   :  { %10439 = vst [vmem:[#allocation164_spill] sm:$0xff] %v7683_v5  ;;  %2580 = vmatpush.msra.mxu3 %v7698_v34  ;;  %v7701_v5 = vld [vmem:[#allocation4 + $0x20] sm:$0xff] }
 0x3d1   :  { %10440 = vst [vmem:[#allocation163_spill] sm:$0xff] %v7686_v39  ;;  %2521 = vmatpush.msra.mxu0 %v7701_v5  ;;  %v7704_v39 = vld [vmem:[#allocation4 + $0x28] sm:$0xff] }
 0x3d2   :  { %10441 = vst [vmem:[#allocation165_spill] sm:$0xff] %v7689_v43  ;;  %2541 = vmatpush.msra.mxu1 %v7704_v39  ;;  %v7707_v43 = vld [vmem:[#allocation4 + $0x30] sm:$0xff] }
 0x3d3   :  { %10442 = vst [vmem:[#allocation166_spill] sm:$0xff] %v7692_v61  ;;  %2561 = vmatpush.msra.mxu2 %v7707_v43  ;;  %v7710_v61 = vld [vmem:[#allocation4 + $0x38] sm:$0xff] }
 0x3d4   :  { %10443 = vst [vmem:[#allocation168_spill] sm:$0xff] %v7695_v58  ;;  %2581 = vmatpush.msra.mxu3 %v7710_v61  ;;  %v7713_v58 = vld [vmem:[#allocation4] sm:$0xff] }
 0x3d5   :  { %10444 = vst [vmem:[#allocation167_spill] sm:$0xff] %v7698_v34  ;;  %2522 = vmatpush.msra.mxu0 %v7713_v58  ;;  %v7716_v34 = vld [vmem:[#allocation4 + $0x8] sm:$0xff] }
 0x3d6   :  { %10445 = vst [vmem:[#allocation169_spill] sm:$0xff] %v7701_v5  ;;  %2542 = vmatpush.msra.mxu1 %v7716_v34  ;;  %v7719_v5 = vld [vmem:[#allocation4 + $0x10] sm:$0xff] }
 0x3d7   :  { %10446 = vst [vmem:[#allocation170_spill] sm:$0xff] %v7704_v39  ;;  %2562 = vmatpush.msra.mxu2 %v7719_v5  ;;  %v7722_v39 = vld [vmem:[#allocation4 + $0x18] sm:$0xff] }
 0x3d8   :  { %10447 = vst [vmem:[#allocation172_spill] sm:$0xff] %v7707_v43  ;;  %2582 = vmatpush.msra.mxu3 %v7722_v39  ;;  %v1972_v43 = vpop.f32.mrf.mxu0 }
 0x3d9   :  { %10448 = vst [vmem:[#allocation171_spill] sm:$0xff] %v7710_v61 }
 0x3da   :  { %10449 = vst [vmem:[#allocation173_spill] sm:$0xff] %v7713_v58 }
 0x3db   :  { %10450 = vst [vmem:[#allocation174_spill] sm:$0xff] %v7716_v34 }
 0x3dc   :  { %10451 = vst [vmem:[#allocation175_spill] sm:$0xff] %v7719_v5  ;;  %v2112_v5 = vpop.f32.mrf.mxu3  ;;  %v2241_v45 = vpop.f32.mrf.mxu2 }
 0x3dd   :  { %10452 = vst [vmem:[#allocation176_spill] sm:$0xff] %v7722_v39  ;;  %v2113_v26 = vadd.f32 %v2112_v5, %v2032_v9 }
 0x3df   :  { %v2118_v39 = vadd.f32 %v2113_v26, %v10281_v30 }
 0x3e0   :  { %v2052_v61 = vpop.f32.mrf.mxu0 }
 0x3e1   :  { %v2053_v49 = vadd.f32 %v2052_v61, %v1972_v43  ;;  %v4176_v20 = vmul.f32 -1.442695, %v2118_v39 }
 0x3e3   :  { %v2115_v58 = vadd.f32 %v2053_v49, %v10279_v12  ;;  %v2093_v49 = vadd.f32 %v2092_v2, %v2012_v35 }
 0x3e5   :  { %v4174_v34 = vmul.f32 -1.442695, %v2115_v58  ;;  %v2221_v58 = vpop.f32.mrf.mxu1 }
 0x3e7   :  { %4356 = vpow2.f32 %v4174_v34  ;;  %v2117_v34 = vadd.f32 %v2093_v49, %v10282_v17 }
 0x3e8   :  { %4358 = vpow2.f32 %v4175_v46  ;;  %v2201_v22 = vpop.f32.mrf.mxu0 }
 0x3e9   :  { %4360 = vpow2.f32 %v4176_v20  ;;  %v2261_v20 = vpop.f32.mrf.mxu3 }
 0x3ed   :  { %v4357_v11 = vpop.eup %4356  ;;  %v2317_v39 = vpop.f32.mrf.mxu1 }
 0x3ee   :  { %v4359_v15 = vpop.eup %4358  ;;  %v2122_v4 = vadd.f32 1.0, %v4357_v11 }
 0x3ef   :  { %v2141_v14 = vadd.f32 1.0, %v4359_v15  ;;  %v4361_v27 = vpop.eup %4360 }
 0x3f0   :  { %4362 = vrcp.f32 %v2122_v4  ;;  %v7729_v42 = vadd.f32 1.0, %v4361_v27  ;;  %v2132_v61 = vand.u32 2147483647, %v2122_v4  ;;  %v2134_v2 = vand.u32 2147483648, %v2122_v4  ;;  %v2297_v35 = vpop.f32.mrf.mxu0 }
 0x3f1   :  { %4364 = vrcp.f32 %v2141_v14  ;;  %v2153_v43 = vand.u32 2147483648, %v2141_v14  ;;  %v2298_v49 = vadd.f32 %v2297_v35, %v2201_v22  ;;  %v2318_v27 = vadd.f32 %v2317_v39, %v2221_v58 }
 0x3f2   :  { %4366 = vrcp.f32 %v7729_v42  ;;  %vm2128_vm4 = vweird.f32 %v2122_v4  ;;  %v2151_v16 = vand.u32 2147483647, %v2141_v14  ;;  %vm2147_vm5 = vweird.f32 %v2141_v14 }
 0x3f3   :  { %4368 = vtanh.f32 %v2117_v34  ;;  %v2360_v34 = vadd.f32 %v2298_v49, %v10283_v25  ;;  %vm2133_vm7 = vcmp.eq.f32.partialorder %v2132_v61, 8.507059e+37  ;;  %v2154_v58 = vor.u32 1.1754944e-38, %v2153_v43  ;;  %v2357_v61 = vpop.f32.mrf.mxu3 }
 0x3f4   :  { %vm2152_vm9 = vcmp.eq.f32.partialorder %v2151_v16, 8.507059e+37  ;;  %v2173_v16 = vand.u32 2147483648, %v7729_v42  ;;  %vm2167_vm11 = vweird.f32 %v7729_v42 }
 0x3f6   :  { %v4363_v46 = vpop.eup %4362 }
 0x3f7   :  { %v4365_v9 = vpop.eup %4364  ;;  %v2124_v26 = vmul.f32 %v4363_v46, %v2122_v4  ;;  %vm2129_vm2 = vweird.f32 %v4363_v46 }
 0x3f8   :  { %v2143_v5 = vmul.f32 %v4365_v9, %v2141_v14  ;;  %vm2148_vm3 = vweird.f32 %v4365_v9  ;;  %v4367_v12 = vpop.eup %4366  ;;  %vm2130_vm6 = vmor %vm2128_vm4, %vm2129_vm2 }
 0x3f9   :  { %v2125_v11 = vsub.f32 1.0, %v2124_v26  ;;  %v2361_v26 = vadd.f32 %v2318_v27, %v10284_v59  ;;  %v4369_v22 = vpop.eup %4368  ;;  %vm2149_vm8 = vmor %vm2147_vm5, %vm2148_vm3  ;;  %vm2168_vm10 = vweird.f32 %v4367_v12 }
 0x3fa   :  { %v2144_v15 = vsub.f32 1.0, %v2143_v5  ;;  %v2135_v5 = vor.u32 1.1754944e-38, %v2134_v2  ;;  %v2358_v2 = vadd.f32 %v2357_v61, %v2261_v20  ;;  %v2337_v20 = vpop.f32.mrf.mxu2  ;;  %vm2169_vm12 = vmor %vm2167_vm11, %vm2168_vm10 }
 0x3fb   :  { %v2126_v30 = vmul.f32 %v4363_v46, %v2125_v11  ;;  %v2163_v11 = vmul.f32 %v4367_v12, %v7729_v42  ;;  %v4187_v35 = vmul.f32 -1.442695, %v2361_v26 }
 0x3fc   :  { %v2145_v17 = vmul.f32 %v4365_v9, %v2144_v15  ;;  %v4186_v15 = vmul.f32 -1.442695, %v2360_v34  ;;  %v2363_v43 = vadd.f32 %v2358_v2, %v5835_v36 }
 0x3fd   :  { %v2127_v1 = vadd.f32 %v4363_v46, %v2126_v30  ;;  %v2164_v39 = vsub.f32 1.0, %v2163_v11  ;;  %v2338_v11 = vadd.f32 %v2337_v20, %v2241_v45 }
 0x3fe   :  { %v2146_v55 = vadd.f32 %v4365_v9, %v2145_v17  ;;  %4370 = vpow2.f32 %v4186_v15 }
 0x3ff   :  { %v2131_v4 = vsel %vm2130_vm6, %v4363_v46, %v2127_v1  ;;  %4372 = vpow2.f32 %v4187_v35  ;;  %v2165_v59 = vmul.f32 %v4367_v12, %v2164_v39  ;;  %v2362_v15 = vadd.f32 %v2338_v11, %v5894_v19 }
 0x400   :  { %v2136_v14 = vsel %vm2133_vm7, %v2135_v5, %v2131_v4  ;;  %v2150_v30 = vsel %vm2149_vm8, %v4365_v9, %v2146_v55  ;;  %v4188_v55 = vmul.f32 -1.442695, %v2363_v43  ;;  %v2171_v9 = vand.u32 2147483647, %v7729_v42 }
 0x401   :  { %v2155_v49 = vsel %vm2152_vm9, %v2154_v58, %v2150_v30  ;;  %v2178_v27 = vmul.f32 %v4369_v22, %v2136_v14  ;;  %v2166_v1 = vadd.f32 %v4367_v12, %v2165_v59  ;;  %v2174_v5 = vor.u32 1.1754944e-38, %v2173_v16 }
 0x402   :  { %v2177_v17 = vmul.f32 %v2155_v49, %v7066_v6  ;;  %vm2172_vm13 = vcmp.eq.f32.partialorder %v2171_v9, 8.507059e+37  ;;  %v10462_v9 = vld [vmem:[#allocation17_spill] sm:$0xff] }
 0x403   :  { %v2170_v59 = vsel %vm2169_vm12, %v4367_v12, %v2166_v1 }
 0x404   :  { %v7737_v25 = vadd.f32 %v2178_v27, %v2177_v17  ;;  %v4371_v46 = vpop.eup %4370  ;;  %v2175_v58 = vsel %vm2172_vm13, %v2174_v5, %v2170_v59  ;;  %v7776_v17 = vld.sshfl [vmem:[#allocation1 + $0x18] sm:$0xff pattern:$0x73625140]  ;;  %v10465_v59 = vld [vmem:[#allocation25_spill] sm:$0xff] }
 0x405   :  { %v4373_v6 = vpop.eup %4372  ;;  %v7744_v34 = vadd.f32 1.0, %v4371_v46  ;;  %v10461_v46 = vld [vmem:[#allocation27_spill] sm:$0xff]  ;;  %v10466_v5 = vld [vmem:[#allocation29_spill] sm:$0xff] }
 0x406   :  { %4374 = vtanh.f32 %v7737_v25  ;;  %v7746_v26 = vadd.f32 1.0, %v4373_v6  ;;  %v10463_v6 = vld [vmem:[#allocation9_spill] sm:$0xff] }
 0x407   :  { %4376 = vpow2.f32 %v4188_v55  ;;  %v2377_v49 = vand.u32 2147483647, %v7744_v34  ;;  %vm2373_vm2 = vweird.f32 %v7744_v34 }
 0x408   :  { %4378 = vrcp.f32 %v7744_v34  ;;  %v2398_v61 = vand.u32 2147483648, %v7746_v26  ;;  %vm2392_vm3 = vweird.f32 %v7746_v26 }
 0x409   :  { %4380 = vrcp.f32 %v7746_v26  ;;  %vm2378_vm6 = vcmp.eq.f32.partialorder %v2377_v49, 8.507059e+37  ;;  %v10478_v49 = vld [vmem:[#allocation36_spill] sm:$0xff] }
 0x40c   :  { %v4375_v22 = vpop.eup %4374 }
 0x40d   :  { %v2181_v4 = vmul.f32 %v4375_v22, %v2175_v58  ;;  %v4377_v42 = vpop.eup %4376  ;;  %v10467_v22 = vld [vmem:[#allocation28_spill] sm:$0xff]  ;;  %v10468_v58 = vld [vmem:[#allocation23_spill] sm:$0xff] }
 0x40e   :  { %v7751_v35 = vadd.f32 1.0, %v4377_v42  ;;  %v4379_v14 = vpop.eup %4378  ;;  %v10470_v42 = vld [vmem:[#allocation30_spill] sm:$0xff] }
 0x40f   :  { %2443 = vmatmul.f32.vlgmr.msrb.gmra.mxu0 %v2181_v4  ;;  %2463 = vmatmul.f32.vlgmr.msrb.gmra.mxu1 %v2181_v4  ;;  %v4381_v12 = vpop.eup %4380  ;;  %v2369_v30 = vmul.f32 %v4379_v14, %v7744_v34  ;;  %vm2374_vm14 = vweird.f32 %v4379_v14 }
 0x410   :  { %2483 = vmatmul.f32.vlgmr.msrb.gmra.mxu2 %v2181_v4  ;;  %2503 = vmatmul.f32.vlgmr.msrb.gmra.mxu3 %v2181_v4  ;;  %4382 = vrcp.f32 %v7751_v35  ;;  %v2388_v45 = vmul.f32 %v4381_v12, %v7746_v26  ;;  %vm2393_vm15 = vweird.f32 %v4381_v12  ;;  %vm2375_vm4 = vmor %vm2373_vm2, %vm2374_vm14  ;;  %vm2412_vm9 = vweird.f32 %v7751_v35  ;;  %v10469_v4 = vld [vmem:[#allocation34_spill] sm:$0xff] }
 0x411   :  { %2656 = vmatpush.msrb.mxu0 %v7094_v0  ;;  %2676 = vmatpush.msrb.mxu1 %v7097_v7  ;;  %v2370_v39 = vsub.f32 1.0, %v2369_v30  ;;  %4384 = vtanh.f32 %v2362_v15  ;;  %v2379_v0 = vand.u32 2147483648, %v7744_v34  ;;  %v2396_v7 = vand.u32 2147483647, %v7746_v26  ;;  %vm2394_vm5 = vmor %vm2392_vm3, %vm2393_vm15  ;;  %v10464_v34 = vld [vmem:[#allocation22_spill] sm:$0xff] }
 0x412   :  { %2696 = vmatpush.msrb.mxu2 %v7102_v8  ;;  %2716 = vmatpush.msrb.mxu3 %v7105_v10  ;;  %v2389_v27 = vsub.f32 1.0, %v2388_v45  ;;  %v7770_v10 = vld.sshfl [vmem:[#allocation1] sm:$0xff pattern:$0x73625140]  ;;  %v10471_v15 = vld [vmem:[#allocation26_spill] sm:$0xff]  ;;  %v10476_v45 = vld [vmem:[#allocation31_spill] sm:$0xff] }
 0x413   :  { %2657 = vmatpush.msrb.mxu0 %v7108_v23  ;;  %2677 = vmatpush.msrb.mxu1 %v7111_v24  ;;  %v2371_v8 = vmul.f32 %v4379_v14, %v2370_v39  ;;  %v7772_v23 = vld.sshfl [vmem:[#allocation1 + $0x8] sm:$0xff pattern:$0x73625140]  ;;  %vm2397_vm7 = vcmp.eq.f32.partialorder %v2396_v7, 8.507059e+37  ;;  %v10475_v30 = vld [vmem:[#allocation42_spill] sm:$0xff] }
 0x414   :  { %2697 = vmatpush.msrb.mxu2 %v7115_v56  ;;  %2717 = vmatpush.msrb.mxu3 %v7118_v31  ;;  %v2390_v24 = vmul.f32 %v4381_v12, %v2389_v27  ;;  %v7778_v56 = vld.sshfl [vmem:[#allocation1 + $0x10] sm:$0xff pattern:$0x73625140]  ;;  %v10477_v39 = vld [vmem:[#allocation37_spill] sm:$0xff] }
 0x415   :  { %2658 = vmatpush.msrb.mxu0 %v7122_v37  ;;  %2678 = vmatpush.msrb.mxu1 %v7125_v60  ;;  %v2372_v2 = vadd.f32 %v4379_v14, %v2371_v8  ;;  %3208 = vst [vmem:[#allocation1] ss:$4 sm:$0xff] %v9820_v3  ;;  %v2380_v37 = vor.u32 1.1754944e-38, %v2379_v0  ;;  %v10479_v27 = vld [vmem:[#allocation46_spill] sm:$0xff]  ;;  %v10481_v0 = vld [vmem:[#allocation40_spill] sm:$0xff]  ;;  %v10482_v7 = vld [vmem:[#allocation41_spill] sm:$0xff] }
 0x416   :  { %2698 = vmatpush.msrb.mxu2 %v7134_v13  ;;  %2718 = vmatpush.msrb.mxu3 %v7137_v52  ;;  %v7780_v31 = vpop.eup %4382  ;;  %v2391_v60 = vadd.f32 %v4381_v12, %v2390_v24  ;;  %v10483_v8 = vld [vmem:[#allocation50_spill] sm:$0xff]  ;;  %v10484_v24 = vld [vmem:[#allocation39_spill] sm:$0xff] }
 0x417   :  { %2659 = vmatpush.msrb.mxu0 %v7146_v47  ;;  %2679 = vmatpush.msrb.mxu1 %v7149_v44  ;;  %v2408_v13 = vmul.f32 %v7780_v31, %v7751_v35  ;;  %v4385_v52 = vpop.eup %4384  ;;  %v2399_v47 = vor.u32 1.1754944e-38, %v2398_v61  ;;  %v2376_v44 = vsel %vm2375_vm4, %v4379_v14, %v2372_v2  ;;  %vm2413_vm8 = vweird.f32 %v7780_v31  ;;  %v10473_v14 = vld [vmem:[#allocation33_spill] sm:$0xff]  ;;  %v10480_v61 = vld [vmem:[#allocation35_spill] sm:$0xff] }
 0x418   :  { %2699 = vmatpush.msrb.mxu2 %v7155_v54  ;;  %2719 = vmatpush.msrb.mxu3 %v7158_v53  ;;  %v2381_v43 = vsel %vm2378_vm6, %v2380_v37, %v2376_v44  ;;  %v2395_v1 = vsel %vm2394_vm5, %v4381_v12, %v2391_v60  ;;  %vm2414_vm10 = vmor %vm2412_vm9, %vm2413_vm8  ;;  %v10474_v12 = vld [vmem:[#allocation32_spill] sm:$0xff]  ;;  %v10486_v2 = vld [vmem:[#allocation45_spill] sm:$0xff] }
 0x419   :  { %2660 = vmatpush.msrb.mxu0 %v7163_v21  ;;  %2680 = vmatpush.msrb.mxu1 %v7166_v18  ;;  %v2409_v55 = vsub.f32 1.0, %v2408_v13  ;;  %v2400_v54 = vsel %vm2397_vm7, %v2399_v47, %v2395_v1  ;;  %v2423_v53 = vmul.f32 %v4385_v52, %v2381_v43  ;;  %v10487_v37 = vld [vmem:[#allocation54_spill] sm:$0xff]  ;;  %v10488_v60 = vld [vmem:[#allocation43_spill] sm:$0xff]  ;;  %v4192_v13 = vld [vmem:[%s9004_s0 + $0x28] sm:$0xff] }
 0x41a   :  { %2700 = vmatpush.msrb.mxu2 %v7175_v28  ;;  %2720 = vmatpush.msrb.mxu3 %v7178_v29  ;;  %v2422_v16 = vmul.f32 %v2400_v54, %v7132_v32  ;;  %v2418_v32 = vand.u32 2147483648, %v7751_v35  ;;  %v10453_v29 = vld [vmem:[#allocation21_spill] sm:$0xff]  ;;  %v10494_v44 = vld [vmem:[#allocation52_spill] sm:$0xff]  ;;  %v10496_v43 = vld [vmem:[#allocation51_spill] sm:$0xff] }
 0x41b   :  { %2661 = vmatpush.msrb.mxu0 %v7184_v33  ;;  %2681 = vmatpush.msrb.mxu1 %v7187_v40  ;;  %v2410_v21 = vmul.f32 %v7780_v31, %v2409_v55  ;;  %v10454_v33 = vld [vmem:[#allocation12_spill] sm:$0xff]  ;;  %v2416_v40 = vand.u32 2147483647, %v7751_v35  ;;  %v10472_v35 = vld [vmem:[#allocation38_spill] sm:$0xff]  ;;  %v10489_v52 = vld [vmem:[#allocation53_spill] sm:$0xff] }
 0x41c   :  { %2701 = vmatpush.msrb.mxu2 %v7190_v48  ;;  %2721 = vmatpush.msrb.mxu3 %v7193_v57  ;;  %v7805_v18 = vadd.f32 %v2423_v53, %v2422_v16  ;;  %v10455_v48 = vld [vmem:[#allocation18_spill] sm:$0xff]  ;;  %v10456_v57 = vld [vmem:[#allocation13_spill] sm:$0xff]  ;;  %v10498_v55 = vld [vmem:[#allocation56_spill] sm:$0xff] }
 0x41d   :  { %2662 = vmatpush.msrb.mxu0 %v7196_v38  ;;  %2682 = vmatpush.msrb.mxu1 %v7199_v41  ;;  %v2411_v28 = vadd.f32 %v7780_v31, %v2410_v21  ;;  %v10457_v38 = vld [vmem:[#allocation24_spill] sm:$0xff]  ;;  %v10458_v41 = vld [vmem:[#allocation14_spill] sm:$0xff]  ;;  %vm2417_vm11 = vcmp.eq.f32.partialorder %v2416_v40, 8.507059e+37  ;;  %v10491_v47 = vld [vmem:[#allocation49_spill] sm:$0xff] }
 0x41e   :  { %2702 = vmatpush.msrb.mxu2 %v7202_v62  ;;  %2722 = vmatpush.msrb.mxu3 %v7205_v50  ;;  %4386 = vtanh.f32 %v7805_v18  ;;  %v10459_v50 = vld [vmem:[#allocation20_spill] sm:$0xff]  ;;  %v10497_v1 = vld [vmem:[#allocation61_spill] sm:$0xff]  ;;  %v10499_v54 = vld [vmem:[#allocation62_spill] sm:$0xff] }
 0x41f   :  { %2663 = vmatpush.msrb.mxu0 %v7210_v51  ;;  %2683 = vmatpush.msrb.mxu1 %v7213_v63  ;;  %v2415_v62 = vsel %vm2414_vm10, %v7780_v31, %v2411_v28  ;;  %v10460_v51 = vld [vmem:[#allocation16_spill] sm:$0xff]  ;;  %v2419_v63 = vor.u32 1.1754944e-38, %v2418_v32  ;;  %v10500_v53 = vld [vmem:[#allocation55_spill] sm:$0xff]  ;;  %v10501_v16 = vld [vmem:[#allocation65_spill] sm:$0xff] }
 0x420   :  { %2703 = vmatpush.msrb.mxu2 %v10453_v29  ;;  %2723 = vmatpush.msrb.mxu3 %v10454_v33  ;;  %v10485_v31 = vld [vmem:[#allocation44_spill] sm:$0xff]  ;;  %v10503_v28 = vld [vmem:[#allocation66_spill] sm:$0xff]  ;;  %v10504_v32 = vld [vmem:[#allocation59_spill] sm:$0xff] }
 0x421   :  { %2664 = vmatpush.msrb.mxu0 %v10455_v48  ;;  %2684 = vmatpush.msrb.mxu1 %v10456_v57  ;;  %v2420_v26 = vsel %vm2417_vm11, %v2419_v63, %v2415_v62  ;;  %v10502_v21 = vld [vmem:[#allocation60_spill] sm:$0xff]  ;;  %v10508_v48 = vld [vmem:[#allocation63_spill] sm:$0xff]  ;;  %v10509_v57 = vld [vmem:[#allocation73_spill] sm:$0xff] }
 0x422   :  { %2704 = vmatpush.msrb.mxu2 %v10457_v38  ;;  %2724 = vmatpush.msrb.mxu3 %v10458_v41  ;;  %v10505_v29 = vld [vmem:[#allocation68_spill] sm:$0xff]  ;;  %v10510_v38 = vld [vmem:[#allocation69_spill] sm:$0xff]  ;;  %v10512_v62 = vld [vmem:[#allocation67_spill] sm:$0xff] }
 0x423   :  { %2665 = vmatpush.msrb.mxu0 %v10459_v50  ;;  %2685 = vmatpush.msrb.mxu1 %v10460_v51  ;;  %v10506_v33 = vld [vmem:[#allocation64_spill] sm:$0xff]  ;;  %v10513_v50 = vld [vmem:[#allocation77_spill] sm:$0xff]  ;;  %v10514_v51 = vld [vmem:[#allocation75_spill] sm:$0xff] }
 0x424   :  { %2705 = vmatpush.msrb.mxu2 %v10461_v46  ;;  %2725 = vmatpush.msrb.mxu3 %v10462_v9  ;;  %v4387_v20 = vpop.eup %4386  ;;  %v10507_v40 = vld [vmem:[#allocation72_spill] sm:$0xff]  ;;  %v10516_v46 = vld [vmem:[#allocation70_spill] sm:$0xff]  ;;  %v10517_v9 = vld [vmem:[#allocation81_spill] sm:$0xff] }
 0x425   :  { %2666 = vmatpush.msrb.mxu0 %v10463_v6  ;;  %2686 = vmatpush.msrb.mxu1 %v10464_v34  ;;  %v2426_v11 = vmul.f32 %v4387_v20, %v2420_v26  ;;  %v10511_v41 = vld [vmem:[#allocation76_spill] sm:$0xff]  ;;  %v10518_v6 = vld [vmem:[#allocation79_spill] sm:$0xff]  ;;  %v10521_v26 = vld [vmem:[#allocation85_spill] sm:$0xff] }
 0x426   :  { %2706 = vmatpush.msrb.mxu2 %v10465_v59  ;;  %2726 = vmatpush.msrb.mxu3 %v10466_v5  ;;  %v10515_v63 = vld [vmem:[#allocation80_spill] sm:$0xff]  ;;  %v10520_v20 = vld [vmem:[#allocation71_spill] sm:$0xff] }
 0x427   :  { %2667 = vmatpush.msrb.mxu0 %v10467_v22  ;;  %2687 = vmatpush.msrb.mxu1 %v10468_v58  ;;  %v10519_v34 = vld [vmem:[#allocation84_spill] sm:$0xff]  ;;  %v10522_v59 = vld [vmem:[#allocation83_spill] sm:$0xff] }
 0x428   :  { %2707 = vmatpush.msrb.mxu2 %v10469_v4  ;;  %2727 = vmatpush.msrb.mxu3 %v10470_v42  ;;  %v10523_v5 = vld [vmem:[#allocation88_spill] sm:$0xff]  ;;  %v10525_v22 = vld [vmem:[#allocation91_spill] sm:$0xff]  ;;  %v10527_v4 = vld [vmem:[#allocation89_spill] sm:$0xff] }
 0x429   :  { %2523 = vmatmul.f32.vlgmr.msra.gmra.mxu0 %v2426_v11  ;;  %2543 = vmatmul.f32.vlgmr.msra.gmra.mxu1 %v2426_v11  ;;  %v10526_v58 = vld [vmem:[#allocation87_spill] sm:$0xff]  ;;  %v10528_v42 = vld [vmem:[#allocation78_spill] sm:$0xff] }
 0x42a   :  { %2563 = vmatmul.f32.vlgmr.msra.gmra.mxu2 %v2426_v11  ;;  %2583 = vmatmul.f32.vlgmr.msra.gmra.mxu3 %v2426_v11 }
 0x42b   :  { %2668 = vmatpush.msrb.mxu0 %v10471_v15  ;;  %2688 = vmatpush.msrb.mxu1 %v10472_v35  ;;  %v10529_v15 = vld [vmem:[#allocation95_spill] sm:$0xff]  ;;  %v10530_v35 = vld [vmem:[#allocation92_spill] sm:$0xff] }
 0x42c   :  { %2708 = vmatpush.msrb.mxu2 %v10473_v14  ;;  %2728 = vmatpush.msrb.mxu3 %v10474_v12  ;;  %v10531_v14 = vld [vmem:[#allocation93_spill] sm:$0xff]  ;;  %v10532_v12 = vld [vmem:[#allocation82_spill] sm:$0xff] }
 0x42d   :  { %2669 = vmatpush.msrb.mxu0 %v10475_v30  ;;  %2689 = vmatpush.msrb.mxu1 %v10476_v45  ;;  %v10533_v30 = vld [vmem:[#allocation99_spill] sm:$0xff]  ;;  %v10534_v45 = vld [vmem:[#allocation96_spill] sm:$0xff] }
 0x42e   :  { %2709 = vmatpush.msrb.mxu2 %v10477_v39  ;;  %2729 = vmatpush.msrb.mxu3 %v10478_v49  ;;  %v10535_v39 = vld [vmem:[#allocation97_spill] sm:$0xff]  ;;  %v10536_v49 = vld [vmem:[#allocation86_spill] sm:$0xff] }
 0x42f   :  { %2670 = vmatpush.msrb.mxu0 %v10479_v27  ;;  %2690 = vmatpush.msrb.mxu1 %v10480_v61  ;;  %v10537_v27 = vld [vmem:[#allocation103_spill] sm:$0xff]  ;;  %v10538_v61 = vld [vmem:[#allocation90_spill] sm:$0xff] }
 0x430   :  { %2710 = vmatpush.msrb.mxu2 %v10481_v0  ;;  %2730 = vmatpush.msrb.mxu3 %v10482_v7  ;;  %v10539_v0 = vld [vmem:[#allocation100_spill] sm:$0xff]  ;;  %v10540_v7 = vld [vmem:[#allocation101_spill] sm:$0xff] }
 0x431   :  { %2671 = vmatpush.msrb.mxu0 %v10483_v8  ;;  %2691 = vmatpush.msrb.mxu1 %v10484_v24  ;;  %v10541_v8 = vld [vmem:[#allocation107_spill] sm:$0xff]  ;;  %v10542_v24 = vld [vmem:[#allocation94_spill] sm:$0xff] }
 0x432   :  { %2711 = vmatpush.msrb.mxu2 %v10485_v31  ;;  %2731 = vmatpush.msrb.mxu3 %v10486_v2  ;;  %v10543_v31 = vld [vmem:[#allocation104_spill] sm:$0xff]  ;;  %v10544_v2 = vld [vmem:[#allocation105_spill] sm:$0xff] }
 0x433   :  { %2672 = vmatmul.f32.vlgmr.msrb.gmra.mxu0 %v2426_v11  ;;  %2692 = vmatmul.f32.vlgmr.msrb.gmra.mxu1 %v2426_v11 }
 0x434   :  { %2712 = vmatmul.f32.vlgmr.msrb.gmra.mxu2 %v2426_v11  ;;  %2732 = vmatmul.f32.vlgmr.msrb.gmra.mxu3 %v2426_v11  ;;  %v10524_v11 = vld [vmem:[#allocation74_spill] sm:$0xff] }
 0x435   :  { %4193 = vmatpush.msk.msra.mxu0 %vm383_vm0, %v7770_v10  ;;  %4195 = vmatpush.msk.msra.mxu1 %vm383_vm0, %v7772_v23  ;;  %v10490_v10 = vld [vmem:[#allocation48_spill] sm:$0xff]  ;;  %v10492_v23 = vld [vmem:[#allocation47_spill] sm:$0xff] }
 0x436   :  { %4199 = vmatpush.msk.msra.mxu3 %vm383_vm0, %v7776_v17  ;;  %4197 = vmatpush.msk.msra.mxu2 %vm383_vm0, %v7778_v56  ;;  %v10493_v17 = vld [vmem:[#allocation57_spill] sm:$0xff]  ;;  %v10495_v56 = vld [vmem:[#allocation58_spill] sm:$0xff] }
 0x437   :  { %2899 = vmatpush.msrb.mxu0 %v10487_v37  ;;  %2919 = vmatpush.msrb.mxu1 %v10488_v60  ;;  %v10545_v37 = vld [vmem:[#allocation111_spill] sm:$0xff]  ;;  %v10546_v60 = vld [vmem:[#allocation98_spill] sm:$0xff] }
 0x438   :  { %2939 = vmatpush.msrb.mxu2 %v10489_v52  ;;  %2959 = vmatpush.msrb.mxu3 %v10490_v10  ;;  %v10548_v52 = vld [vmem:[#allocation109_spill] sm:$0xff]  ;;  %v10549_v10 = vld [vmem:[#allocation115_spill] sm:$0xff] }
 0x439   :  { %2900 = vmatpush.msrb.mxu0 %v10491_v47  ;;  %2920 = vmatpush.msrb.mxu1 %v10492_v23  ;;  %v10550_v47 = vld [vmem:[#allocation102_spill] sm:$0xff]  ;;  %v10551_v23 = vld [vmem:[#allocation112_spill] sm:$0xff] }
 0x43a   :  { %2940 = vmatpush.msrb.mxu2 %v10493_v17  ;;  %2960 = vmatpush.msrb.mxu3 %v10494_v44  ;;  %v10552_v17 = vld [vmem:[#allocation113_spill] sm:$0xff]  ;;  %v10553_v44 = vld [vmem:[#allocation116_spill] sm:$0xff] }
 0x43b   :  { %4194 = vmatmul.msk.f32.vlgmr.msra.gmra.mxu0 %vm379_vm1, %v4192_v13  ;;  %4196 = vmatmul.msk.f32.vlgmr.msra.gmra.mxu1 %vm379_vm1, %v4192_v13 }
 0x43c   :  { %4198 = vmatmul.msk.f32.vlgmr.msra.gmra.mxu2 %vm379_vm1, %v4192_v13  ;;  %4200 = vmatmul.msk.f32.vlgmr.msra.gmra.mxu3 %vm379_vm1, %v4192_v13  ;;  %v10547_v13 = vld [vmem:[#allocation108_spill] sm:$0xff] }
 0x43d   :  { %2901 = vmatpush.msrb.mxu0 %v10495_v56  ;;  %2921 = vmatpush.msrb.mxu1 %v10496_v43  ;;  %v10554_v56 = vld [vmem:[#allocation106_spill] sm:$0xff]  ;;  %v10555_v43 = vld [vmem:[#allocation117_spill] sm:$0xff] }
 0x43e   :  { %2941 = vmatpush.msrb.mxu2 %v10497_v1  ;;  %2961 = vmatpush.msrb.mxu3 %v10498_v55  ;;  %v10556_v1 = vld [vmem:[#allocation119_spill] sm:$0xff]  ;;  %v10557_v55 = vld [vmem:[#allocation120_spill] sm:$0xff] }
 0x43f   :  { %2902 = vmatpush.msrb.mxu0 %v10499_v54  ;;  %2922 = vmatpush.msrb.mxu1 %v10500_v53  ;;  %v10558_v54 = vld [vmem:[#allocation110_spill] sm:$0xff]  ;;  %v10559_v53 = vld [vmem:[#allocation121_spill] sm:$0xff] }
 0x440   :  { %2942 = vmatpush.msrb.mxu2 %v10501_v16  ;;  %2962 = vmatpush.msrb.mxu3 %v10502_v21  ;;  %v10560_v16 = vld [vmem:[#allocation123_spill] sm:$0xff]  ;;  %v10561_v21 = vld [vmem:[#allocation124_spill] sm:$0xff] }
 0x441   :  { %2903 = vmatpush.msrb.mxu0 %v10503_v28  ;;  %2923 = vmatpush.msrb.mxu1 %v10504_v32  ;;  %v10562_v28 = vld [vmem:[#allocation114_spill] sm:$0xff]  ;;  %v10563_v32 = vld [vmem:[#allocation125_spill] sm:$0xff] }
 0x442   :  { %2943 = vmatpush.msrb.mxu2 %v10505_v29  ;;  %2963 = vmatpush.msrb.mxu3 %v10506_v33  ;;  %v10564_v29 = vld [vmem:[#allocation127_spill] sm:$0xff]  ;;  %v10565_v33 = vld [vmem:[#allocation128_spill] sm:$0xff] }
 0x443   :  { %2904 = vmatpush.msrb.mxu0 %v10507_v40  ;;  %2924 = vmatpush.msrb.mxu1 %v10508_v48  ;;  %v10566_v40 = vld [vmem:[#allocation118_spill] sm:$0xff]  ;;  %v10567_v48 = vld [vmem:[#allocation129_spill] sm:$0xff] }
 0x444   :  { %2944 = vmatpush.msrb.mxu2 %v10509_v57  ;;  %2964 = vmatpush.msrb.mxu3 %v10510_v38  ;;  %v10568_v57 = vld [vmem:[#allocation131_spill] sm:$0xff]  ;;  %v10569_v38 = vld [vmem:[#allocation132_spill] sm:$0xff] }
 0x445   :  { %2905 = vmatpush.msrb.mxu0 %v10511_v41  ;;  %2925 = vmatpush.msrb.mxu1 %v10512_v62  ;;  %v10570_v41 = vld [vmem:[#allocation122_spill] sm:$0xff]  ;;  %v10571_v62 = vld [vmem:[#allocation133_spill] sm:$0xff] }
 0x446   :  { %2945 = vmatpush.msrb.mxu2 %v10513_v50  ;;  %2965 = vmatpush.msrb.mxu3 %v10514_v51  ;;  %v10572_v50 = vld [vmem:[#allocation135_spill] sm:$0xff]  ;;  %v10573_v51 = vld [vmem:[#allocation136_spill] sm:$0xff] }
 0x447   :  { %2906 = vmatpush.msrb.mxu0 %v10515_v63  ;;  %2926 = vmatpush.msrb.mxu1 %v10516_v46  ;;  %v10574_v63 = vld [vmem:[#allocation126_spill] sm:$0xff]  ;;  %v10575_v46 = vld [vmem:[#allocation137_spill] sm:$0xff] }
 0x448   :  { %2946 = vmatpush.msrb.mxu2 %v10517_v9  ;;  %2966 = vmatpush.msrb.mxu3 %v10518_v6  ;;  %v10576_v9 = vld [vmem:[#allocation139_spill] sm:$0xff]  ;;  %v10577_v6 = vld [vmem:[#allocation140_spill] sm:$0xff] }
 0x449   :  { %2907 = vmatpush.msrb.mxu0 %v10519_v34  ;;  %2927 = vmatpush.msrb.mxu1 %v10520_v20  ;;  %v10578_v34 = vld [vmem:[#allocation130_spill] sm:$0xff]  ;;  %v10579_v20 = vld [vmem:[#allocation141_spill] sm:$0xff] }
 0x44a   :  { %2947 = vmatpush.msrb.mxu2 %v10521_v26  ;;  %2967 = vmatpush.msrb.mxu3 %v10522_v59  ;;  %v10580_v26 = vld [vmem:[#allocation143_spill] sm:$0xff]  ;;  %v10581_v59 = vld [vmem:[#allocation144_spill] sm:$0xff] }
 0x44b   :  { %2908 = vmatpush.msrb.mxu0 %v10523_v5  ;;  %2928 = vmatpush.msrb.mxu1 %v10524_v11  ;;  %v10582_v5 = vld [vmem:[#allocation134_spill] sm:$0xff]  ;;  %v10583_v11 = vld [vmem:[#allocation145_spill] sm:$0xff] }
 0x44c   :  { %2948 = vmatpush.msrb.mxu2 %v10525_v22  ;;  %2968 = vmatpush.msrb.mxu3 %v10526_v58  ;;  %v10584_v22 = vld [vmem:[#allocation138_spill] sm:$0xff] }
 0x44d   :  { %2909 = vmatpush.msrb.mxu0 %v10527_v4  ;;  %2929 = vmatpush.msrb.mxu1 %v10528_v42  ;;  %v10585_v58 = vld [vmem:[#allocation142_spill] sm:$0xff]  ;;  %v10586_v4 = vld [vmem:[#allocation148_spill] sm:$0xff] }
 0x44e   :  { %2949 = vmatpush.msrb.mxu2 %v10529_v15  ;;  %2969 = vmatpush.msrb.mxu3 %v10530_v35  ;;  %v10587_v42 = vld [vmem:[#allocation146_spill] sm:$0xff]  ;;  %v10589_v35 = vld [vmem:[#allocation152_spill] sm:$0xff] }
 0x44f   :  { %2910 = vmatpush.msrb.mxu0 %v10531_v14  ;;  %2930 = vmatpush.msrb.mxu1 %v10532_v12  ;;  %v10588_v15 = vld [vmem:[#allocation150_spill] sm:$0xff]  ;;  %v10590_v14 = vld [vmem:[#allocation151_spill] sm:$0xff]  ;;  %v10591_v12 = vld [vmem:[#allocation153_spill] sm:$0xff] }
 0x450   :  { %2950 = vmatpush.msrb.mxu2 %v10533_v30  ;;  %2970 = vmatpush.msrb.mxu3 %v10534_v45  ;;  %v10592_v30 = vld [vmem:[#allocation154_spill] sm:$0xff]  ;;  %v10593_v45 = vld [vmem:[#allocation156_spill] sm:$0xff] }
 0x451   :  { %2911 = vmatpush.msrb.mxu0 %v10535_v39  ;;  %2931 = vmatpush.msrb.mxu1 %v10536_v49  ;;  %v10594_v39 = vld [vmem:[#allocation155_spill] sm:$0xff]  ;;  %v10595_v49 = vld [vmem:[#allocation157_spill] sm:$0xff] }
 0x452   :  { %2951 = vmatpush.msrb.mxu2 %v10537_v27  ;;  %2971 = vmatpush.msrb.mxu3 %v10538_v61  ;;  %v10596_v27 = vld [vmem:[#allocation158_spill] sm:$0xff]  ;;  %v10597_v61 = vld [vmem:[#allocation160_spill] sm:$0xff] }
 0x453   :  { %2912 = vmatpush.msrb.mxu0 %v10539_v0  ;;  %2932 = vmatpush.msrb.mxu1 %v10540_v7  ;;  %v10598_v0 = vld [vmem:[#allocation159_spill] sm:$0xff]  ;;  %v10599_v7 = vld [vmem:[#allocation161_spill] sm:$0xff] }
 0x454   :  { %2952 = vmatpush.msrb.mxu2 %v10541_v8  ;;  %2972 = vmatpush.msrb.mxu3 %v10542_v24  ;;  %v10600_v8 = vld [vmem:[#allocation162_spill] sm:$0xff]  ;;  %v10601_v24 = vld [vmem:[#allocation164_spill] sm:$0xff] }
 0x455   :  { %2913 = vmatpush.msrb.mxu0 %v10543_v31  ;;  %2933 = vmatpush.msrb.mxu1 %v10544_v2  ;;  %v10602_v31 = vld [vmem:[#allocation163_spill] sm:$0xff]  ;;  %v10603_v2 = vld [vmem:[#allocation165_spill] sm:$0xff] }
 0x456   :  { %2953 = vmatpush.msrb.mxu2 %v10545_v37  ;;  %2973 = vmatpush.msrb.mxu3 %v10546_v60  ;;  %v10604_v37 = vld [vmem:[#allocation166_spill] sm:$0xff]  ;;  %v10605_v60 = vld [vmem:[#allocation168_spill] sm:$0xff] }
 0x457   :  { %2914 = vmatpush.msrb.mxu0 %v10547_v13  ;;  %2934 = vmatpush.msrb.mxu1 %v10548_v52  ;;  %v10606_v13 = vld [vmem:[#allocation167_spill] sm:$0xff]  ;;  %v10607_v52 = vld [vmem:[#allocation169_spill] sm:$0xff] }
 0x458   :  { %2954 = vmatpush.msrb.mxu2 %v10549_v10  ;;  %2974 = vmatpush.msrb.mxu3 %v10550_v47  ;;  %v10608_v10 = vld [vmem:[#allocation170_spill] sm:$0xff]  ;;  %v10609_v47 = vld [vmem:[#allocation172_spill] sm:$0xff] }
 0x459   :  { %2979 = vmatpush.msra.mxu0 %v10551_v23  ;;  %2999 = vmatpush.msra.mxu1 %v10552_v17  ;;  %v10610_v23 = vld [vmem:[#allocation171_spill] sm:$0xff]  ;;  %v10611_v17 = vld [vmem:[#allocation173_spill] sm:$0xff] }
 0x45a   :  { %3019 = vmatpush.msra.mxu2 %v10553_v44  ;;  %3039 = vmatpush.msra.mxu3 %v10554_v56  ;;  %v10612_v44 = vld [vmem:[#allocation174_spill] sm:$0xff]  ;;  %v10613_v56 = vld [vmem:[#allocation175_spill] sm:$0xff] }
 0x45b   :  { %2980 = vmatpush.msra.mxu0 %v10555_v43  ;;  %3000 = vmatpush.msra.mxu1 %v10556_v1  ;;  %v10614_v43 = vld [vmem:[#allocation176_spill] sm:$0xff] }
 0x45c   :  { %3020 = vmatpush.msra.mxu2 %v10557_v55  ;;  %3040 = vmatpush.msra.mxu3 %v10558_v54 }
 0x45d   :  { %2981 = vmatpush.msra.mxu0 %v10559_v53  ;;  %3001 = vmatpush.msra.mxu1 %v10560_v16 }
 0x45e   :  { %3021 = vmatpush.msra.mxu2 %v10561_v21  ;;  %3041 = vmatpush.msra.mxu3 %v10562_v28 }
 0x45f   :  { %2982 = vmatpush.msra.mxu0 %v10563_v32  ;;  %3002 = vmatpush.msra.mxu1 %v10564_v29  ;;  %v10615_v32 = vld [vmem:[#allocation19_spill] sm:$0xff] }
 0x460   :  { %3022 = vmatpush.msra.mxu2 %v10565_v33  ;;  %3042 = vmatpush.msra.mxu3 %v10566_v40  ;;  %v10616_v33 = vld [vmem:[#allocation10_spill] sm:$0xff] }
 0x461   :  { %2983 = vmatpush.msra.mxu0 %v10567_v48  ;;  %3003 = vmatpush.msra.mxu1 %v10568_v57 }
 0x462   :  { %3023 = vmatpush.msra.mxu2 %v10569_v38  ;;  %3043 = vmatpush.msra.mxu3 %v10570_v41 }
 0x463   :  { %2984 = vmatpush.msra.mxu0 %v10571_v62  ;;  %3004 = vmatpush.msra.mxu1 %v10572_v50  ;;  %v10617_v50 = vld [vmem:[#allocation15_spill] sm:$0xff] }
 0x464   :  { %3024 = vmatpush.msra.mxu2 %v10573_v51  ;;  %3044 = vmatpush.msra.mxu3 %v10574_v63 }
 0x465   :  { %2985 = vmatpush.msra.mxu0 %v10575_v46  ;;  %3005 = vmatpush.msra.mxu1 %v10576_v9 }
 0x466   :  { %3025 = vmatpush.msra.mxu2 %v10577_v6  ;;  %3045 = vmatpush.msra.mxu3 %v10578_v34 }
 0x467   :  { %2986 = vmatpush.msra.mxu0 %v10579_v20  ;;  %3006 = vmatpush.msra.mxu1 %v10580_v26 }
 0x468   :  { %3026 = vmatpush.msra.mxu2 %v10581_v59  ;;  %3046 = vmatpush.msra.mxu3 %v10582_v5 }
 0x469   :  { %2987 = vmatpush.msra.mxu0 %v10583_v11  ;;  %3007 = vmatpush.msra.mxu1 %v10584_v22 }
 0x46a   :  { %3027 = vmatpush.msra.mxu2 %v10585_v58  ;;  %3047 = vmatpush.msra.mxu3 %v10586_v4 }
 0x46b   :  { %2988 = vmatpush.msra.mxu0 %v10587_v42  ;;  %3008 = vmatpush.msra.mxu1 %v10588_v15 }
 0x46c   :  { %3028 = vmatpush.msra.mxu2 %v10589_v35  ;;  %3048 = vmatpush.msra.mxu3 %v10590_v14  ;;  %v10618_v35 = vld [vmem:[#allocation11_spill] sm:$0xff] }
 0x46d   :  { %2989 = vmatpush.msra.mxu0 %v10591_v12  ;;  %3009 = vmatpush.msra.mxu1 %v10592_v30  ;;  %v10619_v30 = vld [vmem:[#allocation147_spill] sm:$0xff] }
 0x46e   :  { %3029 = vmatpush.msra.mxu2 %v10593_v45  ;;  %3049 = vmatpush.msra.mxu3 %v10594_v39  ;;  %v10620_v39 = vld [vmem:[#allocation149_spill] sm:$0xff] }
 0x46f   :  { %2990 = vmatpush.msra.mxu0 %v10595_v49  ;;  %3010 = vmatpush.msra.mxu1 %v10596_v27 }
 0x470   :  { %3030 = vmatpush.msra.mxu2 %v10597_v61  ;;  %3050 = vmatpush.msra.mxu3 %v10598_v0 }
 0x471   :  { %2991 = vmatpush.msra.mxu0 %v10599_v7  ;;  %3011 = vmatpush.msra.mxu1 %v10600_v8 }
 0x472   :  { %3031 = vmatpush.msra.mxu2 %v10601_v24  ;;  %3051 = vmatpush.msra.mxu3 %v10602_v31 }
 0x473   :  { %2992 = vmatpush.msra.mxu0 %v10603_v2  ;;  %3012 = vmatpush.msra.mxu1 %v10604_v37 }
 0x474   :  { %3032 = vmatpush.msra.mxu2 %v10605_v60  ;;  %3052 = vmatpush.msra.mxu3 %v10606_v13 }
 0x475   :  { %2993 = vmatpush.msra.mxu0 %v10607_v52  ;;  %3013 = vmatpush.msra.mxu1 %v10608_v10 }
 0x476   :  { %3033 = vmatpush.msra.mxu2 %v10609_v47  ;;  %3053 = vmatpush.msra.mxu3 %v10610_v23 }
 0x477   :  { %2994 = vmatpush.msra.mxu0 %v10611_v17  ;;  %3014 = vmatpush.msra.mxu1 %v10612_v44 }
 0x478   :  { %3034 = vmatpush.msra.mxu2 %v10613_v56  ;;  %3054 = vmatpush.msra.mxu3 %v10614_v43 }
 0x48c   :  { %v2444_v1 = vpop.f32.mrf.mxu0  ;;  %v2464_v55 = vpop.f32.mrf.mxu1 }
 0x493   :  { %v2504_v54 = vpop.f32.mrf.mxu3  ;;  %v2484_v48 = vpop.f32.mrf.mxu2 }
 0x4a6   :  { %v2524_v53 = vpop.f32.mrf.mxu0  ;;  %v2544_v16 = vpop.f32.mrf.mxu1 }
 0x4a7   :  { %v2525_v21 = vadd.f32 %v2524_v53, %v2444_v1  ;;  %v2545_v28 = vadd.f32 %v2544_v16, %v2464_v55 }
 0x4a9   :  { %v2587_v29 = vadd.f32 %v2525_v21, %v10615_v32  ;;  %v2588_v40 = vadd.f32 %v2545_v28, %v10616_v33 }
 0x4ab   :  { %v4189_v57 = vmul.f32 -1.442695, %v2587_v29  ;;  %v4190_v38 = vmul.f32 -1.442695, %v2588_v40 }
 0x4ad   :  { %4388 = vpow2.f32 %v4189_v57  ;;  %v2584_v41 = vpop.f32.mrf.mxu3  ;;  %v2564_v9 = vpop.f32.mrf.mxu2 }
 0x4ae   :  { %4390 = vpow2.f32 %v4190_v38  ;;  %v2585_v62 = vadd.f32 %v2584_v41, %v2504_v54  ;;  %v2565_v5 = vadd.f32 %v2564_v9, %v2484_v48 }
 0x4b0   :  { %v2590_v51 = vadd.f32 %v2585_v62, %v10617_v50  ;;  %v2673_v63 = vpop.f32.mrf.mxu0  ;;  %v2693_v46 = vpop.f32.mrf.mxu1  ;;  %v2589_v14 = vadd.f32 %v2565_v5, %v10618_v35 }
 0x4b2   :  { %v4191_v6 = vmul.f32 -1.442695, %v2590_v51 }
 0x4b3   :  { %v4389_v34 = vpop.eup %4388 }
 0x4b4   :  { %v4391_v20 = vpop.eup %4390  ;;  %v2594_v26 = vadd.f32 1.0, %v4389_v34  ;;  %4392 = vpow2.f32 %v4191_v6 }
 0x4b5   :  { %v2613_v59 = vadd.f32 1.0, %v4391_v20 }
 0x4b6   :  { %4394 = vrcp.f32 %v2594_v26  ;;  %v2604_v37 = vand.u32 2147483647, %v2594_v26  ;;  %v2606_v52 = vand.u32 2147483648, %v2594_v26  ;;  %vm2600_vm15 = vweird.f32 %v2594_v26 }
 0x4b7   :  { %4396 = vrcp.f32 %v2613_v59  ;;  %v2733_v11 = vpop.f32.mrf.mxu3  ;;  %v2713_v61 = vpop.f32.mrf.mxu2  ;;  %v2625_v47 = vand.u32 2147483648, %v2613_v59  ;;  %v2623_v17 = vand.u32 2147483647, %v2613_v59  ;;  %vm2619_vm14 = vweird.f32 %v2613_v59 }
 0x4b8   :  { %v2769_v22 = vpop.f32.mrf.mxu0  ;;  %v2789_v58 = vpop.f32.mrf.mxu1  ;;  %v2607_v54 = vor.u32 1.1754944e-38, %v2606_v52  ;;  %vm2605_vm4 = vcmp.eq.f32.partialorder %v2604_v37, 8.507059e+37 }
 0x4b9   :  { %v2770_v4 = vadd.f32 %v2769_v22, %v2673_v63  ;;  %v2790_v42 = vadd.f32 %v2789_v58, %v2693_v46  ;;  %v2626_v29 = vor.u32 1.1754944e-38, %v2625_v47  ;;  %vm2624_vm5 = vcmp.eq.f32.partialorder %v2623_v17, 8.507059e+37 }
 0x4ba   :  { %v4393_v15 = vpop.eup %4392 }
 0x4bb   :  { %v7999_v12 = vadd.f32 1.0, %v4393_v15  ;;  %v2832_v45 = vadd.f32 %v2770_v4, %v10619_v30  ;;  %v2833_v49 = vadd.f32 %v2790_v42, %v10620_v39 }
 0x4bc   :  { %v4395_v27 = vpop.eup %4394 }
 0x4bd   :  { %v4397_v0 = vpop.eup %4396  ;;  %v2596_v7 = vmul.f32 %v4395_v27, %v2594_v26  ;;  %4398 = vrcp.f32 %v7999_v12  ;;  %v4201_v8 = vmul.f32 -1.442695, %v2832_v45  ;;  %v4202_v31 = vmul.f32 -1.442695, %v2833_v49 }
 0x4be   :  { %v2615_v24 = vmul.f32 %v4397_v0, %v2613_v59  ;;  %4400 = vtanh.f32 %v2589_v14  ;;  %vm2601_vm12 = vweird.f32 %v4395_v27  ;;  %vm2620_vm13 = vweird.f32 %v4397_v0 }
 0x4bf   :  { %v2597_v2 = vsub.f32 1.0, %v2596_v7  ;;  %4402 = vpow2.f32 %v4201_v8  ;;  %v2829_v60 = vpop.f32.mrf.mxu3  ;;  %vm2602_vm2 = vmor %vm2600_vm15, %vm2601_vm12  ;;  %v2809_v51 = vpop.f32.mrf.mxu2  ;;  %v2645_v5 = vand.u32 2147483648, %v7999_v12  ;;  %vm2639_vm7 = vweird.f32 %v7999_v12 }
 0x4c0   :  { %v2616_v13 = vsub.f32 1.0, %v2615_v24  ;;  %4404 = vpow2.f32 %v4202_v31  ;;  %v2830_v10 = vadd.f32 %v2829_v60, %v2733_v11  ;;  %vm2621_vm3 = vmor %vm2619_vm14, %vm2620_vm13  ;;  %v2810_v34 = vadd.f32 %v2809_v51, %v2713_v61  ;;  %v8062_v51 = vld [vmem:[#allocation2 + $0x1d8] sm:$0xff] }
 0x4c1   :  { %v2598_v23 = vmul.f32 %v4395_v27, %v2597_v2  ;;  %v2646_v49 = vor.u32 1.1754944e-38, %v2645_v5  ;;  %v8084_v5 = vld.sshfl [vmem:[#allocation1 + $0x18] sm:$0xff pattern:$0x73625140] }
 0x4c2   :  { %v2617_v44 = vmul.f32 %v4397_v0, %v2616_v13  ;;  %v2835_v56 = vadd.f32 %v2830_v10, %v5835_v36  ;;  %v2834_v22 = vadd.f32 %v2810_v34, %v5894_v19  ;;  %v8149_v10 = vld [vmem:[#allocation2 + $0x138] sm:$0xff] }
 0x4c3   :  { %v4399_v43 = vpop.eup %4398  ;;  %v2599_v1 = vadd.f32 %v4395_v27, %v2598_v23 }
 0x4c4   :  { %v4401_v55 = vpop.eup %4400  ;;  %v2618_v53 = vadd.f32 %v4397_v0, %v2617_v44  ;;  %v2635_v16 = vmul.f32 %v4399_v43, %v7999_v12  ;;  %v4203_v21 = vmul.f32 -1.442695, %v2835_v56  ;;  %vm2640_vm6 = vweird.f32 %v4399_v43  ;;  %v8160_v44 = vld [vmem:[#allocation2 + $0x110] sm:$0xff] }
 0x4c5   :  { %v4403_v28 = vpop.eup %4402  ;;  %v2603_v40 = vsel %vm2602_vm2, %v4395_v27, %v2599_v1  ;;  %vm2641_vm8 = vmor %vm2639_vm7, %vm2640_vm6 }
 0x4c6   :  { %v4405_v48 = vpop.eup %4404  ;;  %v2608_v57 = vsel %vm2605_vm4, %v2607_v54, %v2603_v40  ;;  %v2622_v38 = vsel %vm2621_vm3, %v4397_v0, %v2618_v53  ;;  %v2636_v41 = vsub.f32 1.0, %v2635_v16  ;;  %v2839_v62 = vadd.f32 1.0, %v4403_v28  ;;  %v8041_v54 = vld [vmem:[#allocation2 + $0x1e8] sm:$0xff]  ;;  %v8049_v28 = vld [vmem:[#allocation2 + $0x1f8] sm:$0xff] }
 0x4c7   :  { %v2627_v63 = vsel %vm2624_vm5, %v2626_v29, %v2622_v38  ;;  %v2650_v46 = vmul.f32 %v4401_v55, %v2608_v57  ;;  %v8006_v9 = vadd.f32 1.0, %v4405_v48  ;;  %4406 = vpow2.f32 %v4203_v21  ;;  %v8038_v55 = vld [vmem:[#allocation2 + $0x1e0] sm:$0xff]  ;;  %v8046_v21 = vld [vmem:[#allocation2 + $0x1f0] sm:$0xff]  ;;  %v8055_v38 = vld [vmem:[#allocation2 + $0x1c8] sm:$0xff] }
 0x4c8   :  { %v2649_v6 = vmul.f32 %v2627_v63, %v7737_v25  ;;  %4408 = vrcp.f32 %v2839_v62  ;;  %v2637_v26 = vmul.f32 %v4399_v43, %v2636_v41  ;;  %v2643_v25 = vand.u32 2147483647, %v7999_v12  ;;  %v8052_v57 = vld [vmem:[#allocation2 + $0x1c0] sm:$0xff] }
 0x4c9   :  { %4410 = vrcp.f32 %v8006_v9  ;;  %v2849_v7 = vand.u32 2147483647, %v2839_v62  ;;  %v2851_v8 = vand.u32 2147483648, %v2839_v62  ;;  %v2870_v24 = vand.u32 2147483648, %v8006_v9 }
 0x4ca   :  { %v8010_v20 = vadd.f32 %v2650_v46, %v2649_v6  ;;  %v2638_v59 = vadd.f32 %v4399_v43, %v2637_v26  ;;  %vm2644_vm9 = vcmp.eq.f32.partialorder %v2643_v25, 8.507059e+37  ;;  %v2868_v60 = vand.u32 2147483647, %v8006_v9  ;;  %v8066_v46 = vld [vmem:[#allocation2 + $0x1a0] sm:$0xff]  ;;  %v8078_v26 = vld [vmem:[#allocation2 + $0x1b0] sm:$0xff] }
 0x4cb   :  { %vm2845_vm12 = vweird.f32 %v2839_v62  ;;  %vm2864_vm13 = vweird.f32 %v8006_v9  ;;  %v2852_v47 = vor.u32 1.1754944e-38, %v2851_v8  ;;  %v2871_v56 = vor.u32 1.1754944e-38, %v2870_v24  ;;  %v8072_v6 = vld.sshfl [vmem:[#allocation1] sm:$0xff pattern:$0x73625140]  ;;  %v8090_v25 = vld [vmem:[#allocation2 + $0x180] sm:$0xff] }
 0x4cc   :  { %4412 = vtanh.f32 %v8010_v20  ;;  %v2642_v14 = vsel %vm2641_vm8, %v4399_v43, %v2638_v59  ;;  %vm2850_vm2 = vcmp.eq.f32.partialorder %v2849_v7, 8.507059e+37  ;;  %vm2869_vm3 = vcmp.eq.f32.partialorder %v2868_v60, 8.507059e+37  ;;  %v8081_v59 = vld [vmem:[#allocation2 + $0x1b8] sm:$0xff]  ;;  %v8128_v7 = vld [vmem:[#allocation2 + $0x140] sm:$0xff]  ;;  %v8131_v8 = vld [vmem:[#allocation2 + $0x148] sm:$0xff] }
 0x4cd   :  { %v4407_v11 = vpop.eup %4406  ;;  %v2647_v12 = vsel %vm2644_vm9, %v2646_v49, %v2642_v14  ;;  %v8102_v14 = vld [vmem:[#allocation2 + $0x198] sm:$0xff]  ;;  %v8107_v49 = vld [vmem:[#allocation2 + $0x160] sm:$0xff]  ;;  %v8134_v24 = vld [vmem:[#allocation2 + $0x150] sm:$0xff] }
 0x4ce   :  { %v4409_v58 = vpop.eup %4408  ;;  %v8017_v4 = vadd.f32 1.0, %v4407_v11  ;;  %v8086_v11 = vld.sshfl [vmem:[#allocation1 + $0x10] sm:$0xff pattern:$0x73625140] }
 0x4cf   :  { %v4411_v42 = vpop.eup %4410  ;;  %v2841_v15 = vmul.f32 %v4409_v58, %v2839_v62  ;;  %vm2846_vm10 = vweird.f32 %v4409_v58  ;;  %v8059_v62 = vld [vmem:[#allocation2 + $0x1d0] sm:$0xff] }
 0x4d0   :  { %v2860_v45 = vmul.f32 %v4411_v42, %v8006_v9  ;;  %4414 = vrcp.f32 %v8017_v4  ;;  %vm2865_vm11 = vweird.f32 %v4411_v42  ;;  %vm8026_vm14 = vmor %vm2845_vm12, %vm2846_vm10  ;;  %v8069_v9 = vld [vmem:[#allocation2 + $0x1a8] sm:$0xff]  ;;  %vm2884_vm5 = vweird.f32 %v8017_v4 }
 0x4d1   :  { %v2842_v27 = vsub.f32 1.0, %v2841_v15  ;;  %4416 = vtanh.f32 %v2834_v22  ;;  %vm8030_vm15 = vmor %vm2864_vm13, %vm2865_vm11  ;;  %v8099_v15 = vld [vmem:[#allocation2 + $0x190] sm:$0xff] }
 0x4d2   :  { %v4413_v61 = vpop.eup %4412  ;;  %v2861_v0 = vsub.f32 1.0, %v2860_v45  ;;  %v2888_v45 = vand.u32 2147483647, %v8017_v4 }
 0x4d3   :  { %v2843_v31 = vmul.f32 %v4409_v58, %v2842_v27  ;;  %v2653_v2 = vmul.f32 %v4413_v61, %v2647_v12  ;;  %v8119_v61 = vld [vmem:[#allocation2 + $0x170] sm:$0xff]  ;;  %v8206_v27 = vld [vmem:[#allocation2 + $0x80] sm:$0xff] }
 0x4d4   :  { %v2862_v37 = vmul.f32 %v4411_v42, %v2861_v0  ;;  %v8122_v0 = vld [vmem:[#allocation2 + $0x178] sm:$0xff]  ;;  %vm2889_vm7 = vcmp.eq.f32.partialorder %v2888_v45, 8.507059e+37  ;;  %10640 = vst [vmem:[#allocation29_spill] sm:$0xff] %v8206_v27 }
 0x4d5   :  { %v2844_v13 = vadd.f32 %v4409_v58, %v2843_v31  ;;  %2915 = vmatmul.f32.vlgmr.msrb.gmra.mxu0 %v2653_v2  ;;  %2935 = vmatmul.f32.vlgmr.msrb.gmra.mxu1 %v2653_v2  ;;  %v8137_v31 = vld [vmem:[#allocation2 + $0x158] sm:$0xff] }
 0x4d6   :  { %v8023_v52 = vpop.eup %4414  ;;  %v2863_v23 = vadd.f32 %v4411_v42, %v2862_v37  ;;  %2955 = vmatmul.f32.vlgmr.msrb.gmra.mxu2 %v2653_v2  ;;  %2975 = vmatmul.f32.vlgmr.msrb.gmra.mxu3 %v2653_v2  ;;  %v8140_v2 = vld [vmem:[#allocation2 + $0x120] sm:$0xff]  ;;  %v8143_v37 = vld [vmem:[#allocation2 + $0x128] sm:$0xff]  ;;  %v8203_v45 = vld [vmem:[#allocation2 + $0xb8] sm:$0xff] }
 0x4d7   :  { %v4417_v17 = vpop.eup %4416  ;;  %v2848_v43 = vsel %vm8026_vm14, %v4409_v58, %v2844_v13  ;;  %v2880_v1 = vmul.f32 %v8023_v52, %v8017_v4  ;;  %3128 = vmatpush.msrb.mxu0 %v8038_v55  ;;  %3148 = vmatpush.msrb.mxu1 %v8041_v54  ;;  %vm2885_vm4 = vweird.f32 %v8023_v52  ;;  %v8093_v58 = vld [vmem:[#allocation2 + $0x188] sm:$0xff]  ;;  %10639 = vst [vmem:[#allocation25_spill] sm:$0xff] %v8203_v45 }
 0x4d8   :  { %v2853_v53 = vsel %vm2850_vm2, %v2852_v47, %v2848_v43  ;;  %v2867_v16 = vsel %vm8030_vm15, %v4411_v42, %v2863_v23  ;;  %3168 = vmatpush.msrb.mxu2 %v8046_v21  ;;  %3188 = vmatpush.msrb.mxu3 %v8049_v28  ;;  %v2890_v42 = vand.u32 2147483648, %v8017_v4  ;;  %vm8115_vm6 = vmor %vm2884_vm5, %vm2885_vm4  ;;  %v8154_v23 = vld [vmem:[#allocation2 + $0x100] sm:$0xff] }
 0x4d9   :  { %v2872_v29 = vsel %vm2869_vm3, %v2871_v56, %v2867_v16  ;;  %v2895_v40 = vmul.f32 %v4417_v17, %v2853_v53  ;;  %v2881_v48 = vsub.f32 1.0, %v2880_v1  ;;  %3129 = vmatpush.msrb.mxu0 %v8052_v57  ;;  %3149 = vmatpush.msrb.mxu1 %v8055_v38  ;;  %v8157_v17 = vld [vmem:[#allocation2 + $0x108] sm:$0xff]  ;;  %v8163_v56 = vld [vmem:[#allocation2 + $0x118] sm:$0xff]  ;;  %v8170_v43 = vld [vmem:[#allocation2 + $0xe0] sm:$0xff] }
 0x4da   :  { %v2894_v41 = vmul.f32 %v2872_v29, %v7805_v18  ;;  %3169 = vmatpush.msrb.mxu2 %v8059_v62  ;;  %3189 = vmatpush.msrb.mxu3 %v8062_v51  ;;  %v8074_v18 = vld.sshfl [vmem:[#allocation1 + $0x8] sm:$0xff pattern:$0x73625140]  ;;  %v2891_v12 = vor.u32 1.1754944e-38, %v2890_v42  ;;  %10627 = vst [vmem:[#allocation21_spill] sm:$0xff] %v8163_v56  ;;  %v8173_v1 = vld [vmem:[#allocation2 + $0xe8] sm:$0xff] }
 0x4db   :  { %v2882_v63 = vmul.f32 %v8023_v52, %v2881_v48  ;;  %3130 = vmatpush.msrb.mxu0 %v8066_v46  ;;  %3150 = vmatpush.msrb.mxu1 %v8069_v9  ;;  %3680 = vst [vmem:[#allocation1] ss:$4 sm:$0xff] %v9820_v3  ;;  %v8110_v3 = vld [vmem:[#allocation2 + $0x168] sm:$0xff]  ;;  %v8176_v53 = vld [vmem:[#allocation2 + $0xf0] sm:$0xff]  ;;  %v8179_v16 = vld [vmem:[#allocation2 + $0xf8] sm:$0xff] }
 0x4dc   :  { %v8076_v34 = vadd.f32 %v2895_v40, %v2894_v41  ;;  %3170 = vmatpush.msrb.mxu2 %v8078_v26  ;;  %3190 = vmatpush.msrb.mxu3 %v8081_v59  ;;  %10628 = vst [vmem:[#allocation12_spill] sm:$0xff] %v8170_v43  ;;  %v8182_v29 = vld [vmem:[#allocation2 + $0xc0] sm:$0xff]  ;;  %v8185_v40 = vld [vmem:[#allocation2 + $0xc8] sm:$0xff]  ;;  %v8188_v48 = vld [vmem:[#allocation2 + $0xd0] sm:$0xff] }
 0x4dd   :  { %v2883_v22 = vadd.f32 %v8023_v52, %v2882_v63  ;;  %3131 = vmatpush.msrb.mxu0 %v8090_v25  ;;  %3151 = vmatpush.msrb.mxu1 %v8093_v58  ;;  %10629 = vst [vmem:[#allocation18_spill] sm:$0xff] %v8173_v1  ;;  %v8191_v41 = vld [vmem:[#allocation2 + $0xd8] sm:$0xff]  ;;  %v8194_v63 = vld [vmem:[#allocation2 + $0xa0] sm:$0xff]  ;;  %v8200_v42 = vld [vmem:[#allocation2 + $0xb0] sm:$0xff] }
 0x4de   :  { %4418 = vtanh.f32 %v8076_v34  ;;  %3171 = vmatpush.msrb.mxu2 %v8099_v15  ;;  %3191 = vmatpush.msrb.mxu3 %v8102_v14  ;;  %10630 = vst [vmem:[#allocation13_spill] sm:$0xff] %v8176_v53 }
 0x4df   :  { %3132 = vmatpush.msrb.mxu0 %v8107_v49  ;;  %3152 = vmatpush.msrb.mxu1 %v8110_v3  ;;  %v2887_v4 = vsel %vm8115_vm6, %v8023_v52, %v2883_v22  ;;  %v8146_v52 = vld [vmem:[#allocation2 + $0x130] sm:$0xff]  ;;  %10631 = vst [vmem:[#allocation24_spill] sm:$0xff] %v8179_v16  ;;  %v8197_v22 = vld [vmem:[#allocation2 + $0xa8] sm:$0xff] }
 0x4e0   :  { %3172 = vmatpush.msrb.mxu2 %v8119_v61  ;;  %3192 = vmatpush.msrb.mxu3 %v8122_v0  ;;  %v2892_v13 = vsel %vm2889_vm7, %v2891_v12, %v2887_v4  ;;  %10632 = vst [vmem:[#allocation14_spill] sm:$0xff] %v8182_v29  ;;  %v8209_v4 = vld [vmem:[#allocation2 + $0x88] sm:$0xff]  ;;  %v8212_v12 = vld [vmem:[#allocation2 + $0x90] sm:$0xff] }
 0x4e1   :  { %3133 = vmatpush.msrb.mxu0 %v8128_v7  ;;  %3153 = vmatpush.msrb.mxu1 %v8131_v8  ;;  %10633 = vst [vmem:[#allocation20_spill] sm:$0xff] %v8185_v40 }
 0x4e2   :  { %3173 = vmatpush.msrb.mxu2 %v8134_v24  ;;  %3193 = vmatpush.msrb.mxu3 %v8137_v31  ;;  %10634 = vst [vmem:[#allocation16_spill] sm:$0xff] %v8188_v48 }
 0x4e3   :  { %3134 = vmatpush.msrb.mxu0 %v8140_v2  ;;  %3154 = vmatpush.msrb.mxu1 %v8143_v37  ;;  %10635 = vst [vmem:[#allocation27_spill] sm:$0xff] %v8191_v41 }
 0x4e4   :  { %v4419_v60 = vpop.eup %4418  ;;  %3174 = vmatpush.msrb.mxu2 %v8146_v52  ;;  %3194 = vmatpush.msrb.mxu3 %v8149_v10  ;;  %10636 = vst [vmem:[#allocation17_spill] sm:$0xff] %v8194_v63 }
 0x4e5   :  { %v8152_v47 = vmul.f32 %v4419_v60, %v2892_v13  ;;  %3135 = vmatpush.msrb.mxu0 %v8154_v23  ;;  %3155 = vmatpush.msrb.mxu1 %v8157_v17  ;;  %10637 = vst [vmem:[#allocation9_spill] sm:$0xff] %v8197_v22  ;;  %v8215_v60 = vld [vmem:[#allocation2 + $0x98] sm:$0xff]  ;;  %v8218_v13 = vld [vmem:[#allocation2 + $0x60] sm:$0xff] }
 0x4e6   :  { %3175 = vmatpush.msrb.mxu2 %v8160_v44  ;;  %3195 = vmatpush.msrb.mxu3 %v8163_v56  ;;  %10638 = vst [vmem:[#allocation22_spill] sm:$0xff] %v8200_v42 }
 0x4e7   :  { %2995 = vmatmul.f32.vlgmr.msra.gmra.mxu0 %v8152_v47  ;;  %3015 = vmatmul.f32.vlgmr.msra.gmra.mxu1 %v8152_v47  ;;  %10641 = vst [vmem:[#allocation28_spill] sm:$0xff] %v8209_v4 }
 0x4e8   :  { %3035 = vmatmul.f32.vlgmr.msra.gmra.mxu2 %v8152_v47  ;;  %3055 = vmatmul.f32.vlgmr.msra.gmra.mxu3 %v8152_v47  ;;  %10642 = vst [vmem:[#allocation23_spill] sm:$0xff] %v8212_v12 }
 0x4e9   :  { %3136 = vmatpush.msrb.mxu0 %v8170_v43  ;;  %3156 = vmatpush.msrb.mxu1 %v8173_v1  ;;  %10643 = vst [vmem:[#allocation34_spill] sm:$0xff] %v8215_v60 }
 0x4ea   :  { %3176 = vmatpush.msrb.mxu2 %v8176_v53  ;;  %3196 = vmatpush.msrb.mxu3 %v8179_v16  ;;  %10644 = vst [vmem:[#allocation30_spill] sm:$0xff] %v8218_v13 }
 0x4eb   :  { %3137 = vmatpush.msrb.mxu0 %v8182_v29  ;;  %3157 = vmatpush.msrb.mxu1 %v8185_v40 }
 0x4ec   :  { %3177 = vmatpush.msrb.mxu2 %v8188_v48  ;;  %3197 = vmatpush.msrb.mxu3 %v8191_v41 }
 0x4ed   :  { %3138 = vmatpush.msrb.mxu0 %v8194_v63  ;;  %3158 = vmatpush.msrb.mxu1 %v8197_v22 }
 0x4ee   :  { %3178 = vmatpush.msrb.mxu2 %v8200_v42  ;;  %3198 = vmatpush.msrb.mxu3 %v8203_v45  ;;  %v8221_v45 = vld [vmem:[#allocation2 + $0x68] sm:$0xff] }
 0x4ef   :  { %3139 = vmatpush.msrb.mxu0 %v8206_v27  ;;  %3159 = vmatpush.msrb.mxu1 %v8209_v4  ;;  %10645 = vst [vmem:[#allocation26_spill] sm:$0xff] %v8221_v45  ;;  %v8224_v27 = vld [vmem:[#allocation2 + $0x70] sm:$0xff]  ;;  %v8227_v4 = vld [vmem:[#allocation2 + $0x78] sm:$0xff] }
 0x4f0   :  { %3179 = vmatpush.msrb.mxu2 %v8212_v12  ;;  %3199 = vmatpush.msrb.mxu3 %v8215_v60  ;;  %10646 = vst [vmem:[#allocation38_spill] sm:$0xff] %v8224_v27  ;;  %v8230_v12 = vld [vmem:[#allocation2 + $0x40] sm:$0xff]  ;;  %v8233_v60 = vld [vmem:[#allocation2 + $0x48] sm:$0xff] }
 0x4f1   :  { %3140 = vmatpush.msrb.mxu0 %v8218_v13  ;;  %3160 = vmatpush.msrb.mxu1 %v8221_v45  ;;  %10647 = vst [vmem:[#allocation33_spill] sm:$0xff] %v8227_v4  ;;  %v8236_v13 = vld [vmem:[#allocation2 + $0x50] sm:$0xff]  ;;  %v8239_v45 = vld [vmem:[#allocation2 + $0x58] sm:$0xff] }
 0x4f2   :  { %3180 = vmatpush.msrb.mxu2 %v8224_v27  ;;  %3200 = vmatpush.msrb.mxu3 %v8227_v4  ;;  %10648 = vst [vmem:[#allocation32_spill] sm:$0xff] %v8230_v12  ;;  %v8242_v27 = vld [vmem:[#allocation2 + $0x20] sm:$0xff]  ;;  %v8245_v4 = vld [vmem:[#allocation2 + $0x28] sm:$0xff] }
 0x4f3   :  { %3141 = vmatpush.msrb.mxu0 %v8230_v12  ;;  %10649 = vst [vmem:[#allocation42_spill] sm:$0xff] %v8233_v60  ;;  %3161 = vmatpush.msrb.mxu1 %v8233_v60  ;;  %v8248_v12 = vld [vmem:[#allocation2 + $0x30] sm:$0xff]  ;;  %v8251_v60 = vld [vmem:[#allocation2 + $0x38] sm:$0xff] }
 0x4f4   :  { %10650 = vst [vmem:[#allocation31_spill] sm:$0xff] %v8236_v13  ;;  %3181 = vmatpush.msrb.mxu2 %v8236_v13  ;;  %3201 = vmatpush.msrb.mxu3 %v8239_v45  ;;  %v8254_v13 = vld [vmem:[#allocation2] sm:$0xff] }
 0x4f5   :  { %10651 = vst [vmem:[#allocation37_spill] sm:$0xff] %v8239_v45  ;;  %3142 = vmatpush.msrb.mxu0 %v8242_v27  ;;  %3162 = vmatpush.msrb.mxu1 %v8245_v4  ;;  %v8257_v45 = vld [vmem:[#allocation2 + $0x8] sm:$0xff] }
 0x4f6   :  { %10652 = vst [vmem:[#allocation36_spill] sm:$0xff] %v8242_v27  ;;  %3182 = vmatpush.msrb.mxu2 %v8248_v12  ;;  %3202 = vmatpush.msrb.mxu3 %v8251_v60  ;;  %v8260_v27 = vld [vmem:[#allocation2 + $0x10] sm:$0xff] }
 0x4f7   :  { %10653 = vst [vmem:[#allocation46_spill] sm:$0xff] %v8245_v4  ;;  %3143 = vmatpush.msrb.mxu0 %v8254_v13  ;;  %3163 = vmatpush.msrb.mxu1 %v8257_v45  ;;  %v8263_v4 = vld [vmem:[#allocation2 + $0x18] sm:$0xff] }
 0x4f8   :  { %10654 = vst [vmem:[#allocation35_spill] sm:$0xff] %v8248_v12  ;;  %3183 = vmatpush.msrb.mxu2 %v8260_v27  ;;  %3203 = vmatpush.msrb.mxu3 %v8263_v4 }
 0x4f9   :  { %10655 = vst [vmem:[#allocation40_spill] sm:$0xff] %v8251_v60  ;;  %3144 = vmatmul.f32.vlgmr.msrb.gmra.mxu0 %v8152_v47  ;;  %3164 = vmatmul.f32.vlgmr.msrb.gmra.mxu1 %v8152_v47 }
 0x4fa   :  { %10656 = vst [vmem:[#allocation41_spill] sm:$0xff] %v8254_v13  ;;  %3184 = vmatmul.f32.vlgmr.msrb.gmra.mxu2 %v8152_v47  ;;  %3204 = vmatmul.f32.vlgmr.msrb.gmra.mxu3 %v8152_v47  ;;  %v8287_v47 = vld [vmem:[#allocation6 + $0x1f0] sm:$0xff] }
 0x4fb   :  { %10657 = vst [vmem:[#allocation50_spill] sm:$0xff] %v8257_v45  ;;  %4208 = vmatpush.msk.msra.mxu0 %vm383_vm0, %v8072_v6  ;;  %4210 = vmatpush.msk.msra.mxu1 %vm383_vm0, %v8074_v18  ;;  %v4207_v6 = vld [vmem:[%s9004_s0 + $0x30] sm:$0xff]  ;;  %v8290_v18 = vld [vmem:[#allocation6 + $0x1f8] sm:$0xff] }
 0x4fc   :  { %10658 = vst [vmem:[#allocation39_spill] sm:$0xff] %v8260_v27  ;;  %4214 = vmatpush.msk.msra.mxu3 %vm383_vm0, %v8084_v5  ;;  %4212 = vmatpush.msk.msra.mxu2 %vm383_vm0, %v8086_v11  ;;  %v8281_v27 = vld [vmem:[#allocation6 + $0x1e8] sm:$0xff]  ;;  %v8293_v5 = vld [vmem:[#allocation6 + $0x1c0] sm:$0xff] }
 0x4fd   :  { %10659 = vst [vmem:[#allocation44_spill] sm:$0xff] %v8263_v4  ;;  %v8278_v4 = vld [vmem:[#allocation6 + $0x1e0] sm:$0xff]  ;;  %3391 = vmatpush.msrb.mxu1 %v8281_v27  ;;  %v8296_v11 = vld [vmem:[#allocation6 + $0x1c8] sm:$0xff] }
 0x4fe   :  { %10660 = vst [vmem:[#allocation45_spill] sm:$0xff] %v8278_v4  ;;  %3371 = vmatpush.msrb.mxu0 %v8278_v4  ;;  %3411 = vmatpush.msrb.mxu2 %v8287_v47  ;;  %v8302_v4 = vld [vmem:[#allocation6 + $0x1d8] sm:$0xff] }
 0x4ff   :  { %10661 = vst [vmem:[#allocation54_spill] sm:$0xff] %v8281_v27  ;;  %3431 = vmatpush.msrb.mxu3 %v8290_v18  ;;  %3392 = vmatpush.msrb.mxu1 %v8296_v11  ;;  %v8299_v27 = vld [vmem:[#allocation6 + $0x1d0] sm:$0xff] }
 0x500   :  { %10662 = vst [vmem:[#allocation43_spill] sm:$0xff] %v8287_v47  ;;  %3372 = vmatpush.msrb.mxu0 %v8293_v5  ;;  %3412 = vmatpush.msrb.mxu2 %v8299_v27 }
 0x501   :  { %10663 = vst [vmem:[#allocation53_spill] sm:$0xff] %v8290_v18  ;;  %3432 = vmatpush.msrb.mxu3 %v8302_v4  ;;  %4209 = vmatmul.msk.f32.vlgmr.msra.gmra.mxu0 %vm379_vm1, %v4207_v6  ;;  %v8321_v18 = vld [vmem:[#allocation6 + $0x180] sm:$0xff] }
 0x502   :  { %10664 = vst [vmem:[#allocation48_spill] sm:$0xff] %v8293_v5  ;;  %4211 = vmatmul.msk.f32.vlgmr.msra.gmra.mxu1 %vm379_vm1, %v4207_v6  ;;  %4213 = vmatmul.msk.f32.vlgmr.msra.gmra.mxu2 %vm379_vm1, %v4207_v6  ;;  %v8309_v5 = vld [vmem:[#allocation6 + $0x1a0] sm:$0xff] }
 0x503   :  { %10665 = vst [vmem:[#allocation49_spill] sm:$0xff] %v8296_v11  ;;  %4215 = vmatmul.msk.f32.vlgmr.msra.gmra.mxu3 %vm379_vm1, %v4207_v6  ;;  %3373 = vmatpush.msrb.mxu0 %v8309_v5  ;;  %v8312_v11 = vld [vmem:[#allocation6 + $0x1a8] sm:$0xff] }
 0x504   :  { %10666 = vst [vmem:[#allocation47_spill] sm:$0xff] %v8299_v27  ;;  %3393 = vmatpush.msrb.mxu1 %v8312_v11  ;;  %v8315_v27 = vld [vmem:[#allocation6 + $0x1b0] sm:$0xff]  ;;  %v8324_v6 = vld [vmem:[#allocation6 + $0x188] sm:$0xff] }
 0x505   :  { %10667 = vst [vmem:[#allocation57_spill] sm:$0xff] %v8302_v4  ;;  %3413 = vmatpush.msrb.mxu2 %v8315_v27  ;;  %v8318_v4 = vld [vmem:[#allocation6 + $0x1b8] sm:$0xff]  ;;  %3374 = vmatpush.msrb.mxu0 %v8321_v18 }
 0x506   :  { %10668 = vst [vmem:[#allocation52_spill] sm:$0xff] %v8309_v5  ;;  %3433 = vmatpush.msrb.mxu3 %v8318_v4  ;;  %3394 = vmatpush.msrb.mxu1 %v8324_v6  ;;  %v8327_v5 = vld [vmem:[#allocation6 + $0x190] sm:$0xff] }
 0x507   :  { %10669 = vst [vmem:[#allocation58_spill] sm:$0xff] %v8312_v11  ;;  %3414 = vmatpush.msrb.mxu2 %v8327_v5  ;;  %v8330_v11 = vld [vmem:[#allocation6 + $0x198] sm:$0xff] }
 0x508   :  { %10670 = vst [vmem:[#allocation51_spill] sm:$0xff] %v8315_v27  ;;  %3434 = vmatpush.msrb.mxu3 %v8330_v11  ;;  %v8333_v27 = vld [vmem:[#allocation6 + $0x160] sm:$0xff] }
 0x509   :  { %10671 = vst [vmem:[#allocation61_spill] sm:$0xff] %v8318_v4  ;;  %3375 = vmatpush.msrb.mxu0 %v8333_v27  ;;  %v8336_v4 = vld [vmem:[#allocation6 + $0x168] sm:$0xff] }
 0x50a   :  { %10672 = vst [vmem:[#allocation56_spill] sm:$0xff] %v8321_v18  ;;  %3395 = vmatpush.msrb.mxu1 %v8336_v4  ;;  %v8339_v18 = vld [vmem:[#allocation6 + $0x170] sm:$0xff] }
 0x50b   :  { %10673 = vst [vmem:[#allocation62_spill] sm:$0xff] %v8324_v6  ;;  %3415 = vmatpush.msrb.mxu2 %v8339_v18  ;;  %v8342_v6 = vld [vmem:[#allocation6 + $0x178] sm:$0xff] }
 0x50c   :  { %10674 = vst [vmem:[#allocation55_spill] sm:$0xff] %v8327_v5  ;;  %3435 = vmatpush.msrb.mxu3 %v8342_v6  ;;  %v8345_v5 = vld [vmem:[#allocation6 + $0x140] sm:$0xff] }
 0x50d   :  { %10675 = vst [vmem:[#allocation65_spill] sm:$0xff] %v8330_v11  ;;  %3376 = vmatpush.msrb.mxu0 %v8345_v5  ;;  %v8348_v11 = vld [vmem:[#allocation6 + $0x148] sm:$0xff] }
 0x50e   :  { %10676 = vst [vmem:[#allocation60_spill] sm:$0xff] %v8333_v27  ;;  %3396 = vmatpush.msrb.mxu1 %v8348_v11  ;;  %v8351_v27 = vld [vmem:[#allocation6 + $0x150] sm:$0xff] }
 0x50f   :  { %10677 = vst [vmem:[#allocation66_spill] sm:$0xff] %v8336_v4  ;;  %3416 = vmatpush.msrb.mxu2 %v8351_v27  ;;  %v8354_v4 = vld [vmem:[#allocation6 + $0x158] sm:$0xff] }
 0x510   :  { %10678 = vst [vmem:[#allocation59_spill] sm:$0xff] %v8339_v18  ;;  %3436 = vmatpush.msrb.mxu3 %v8354_v4  ;;  %v8357_v18 = vld [vmem:[#allocation6 + $0x120] sm:$0xff] }
 0x511   :  { %10679 = vst [vmem:[#allocation68_spill] sm:$0xff] %v8342_v6  ;;  %3377 = vmatpush.msrb.mxu0 %v8357_v18  ;;  %v8360_v6 = vld [vmem:[#allocation6 + $0x128] sm:$0xff] }
 0x512   :  { %10680 = vst [vmem:[#allocation64_spill] sm:$0xff] %v8345_v5  ;;  %3397 = vmatpush.msrb.mxu1 %v8360_v6  ;;  %v8363_v5 = vld [vmem:[#allocation6 + $0x130] sm:$0xff] }
 0x513   :  { %10681 = vst [vmem:[#allocation72_spill] sm:$0xff] %v8348_v11  ;;  %3417 = vmatpush.msrb.mxu2 %v8363_v5  ;;  %v8366_v11 = vld [vmem:[#allocation6 + $0x138] sm:$0xff] }
 0x514   :  { %10682 = vst [vmem:[#allocation63_spill] sm:$0xff] %v8351_v27  ;;  %3437 = vmatpush.msrb.mxu3 %v8366_v11  ;;  %v8369_v27 = vld [vmem:[#allocation6 + $0x100] sm:$0xff] }
 0x515   :  { %10683 = vst [vmem:[#allocation73_spill] sm:$0xff] %v8354_v4  ;;  %3378 = vmatpush.msrb.mxu0 %v8369_v27  ;;  %v8372_v4 = vld [vmem:[#allocation6 + $0x108] sm:$0xff] }
 0x516   :  { %10684 = vst [vmem:[#allocation69_spill] sm:$0xff] %v8357_v18  ;;  %3398 = vmatpush.msrb.mxu1 %v8372_v4  ;;  %v8375_v18 = vld [vmem:[#allocation6 + $0x110] sm:$0xff] }
 0x517   :  { %10685 = vst [vmem:[#allocation76_spill] sm:$0xff] %v8360_v6  ;;  %3418 = vmatpush.msrb.mxu2 %v8375_v18  ;;  %v8378_v6 = vld [vmem:[#allocation6 + $0x118] sm:$0xff] }
 0x518   :  { %10686 = vst [vmem:[#allocation67_spill] sm:$0xff] %v8363_v5  ;;  %3438 = vmatpush.msrb.mxu3 %v8378_v6  ;;  %v8381_v5 = vld [vmem:[#allocation6 + $0xe0] sm:$0xff] }
 0x519   :  { %10687 = vst [vmem:[#allocation77_spill] sm:$0xff] %v8366_v11  ;;  %3379 = vmatpush.msrb.mxu0 %v8381_v5  ;;  %v8384_v11 = vld [vmem:[#allocation6 + $0xe8] sm:$0xff] }
 0x51a   :  { %10688 = vst [vmem:[#allocation75_spill] sm:$0xff] %v8369_v27  ;;  %3399 = vmatpush.msrb.mxu1 %v8384_v11  ;;  %v8387_v27 = vld [vmem:[#allocation6 + $0xf0] sm:$0xff] }
 0x51b   :  { %10689 = vst [vmem:[#allocation80_spill] sm:$0xff] %v8372_v4  ;;  %3419 = vmatpush.msrb.mxu2 %v8387_v27  ;;  %v8390_v4 = vld [vmem:[#allocation6 + $0xf8] sm:$0xff] }
 0x51c   :  { %10690 = vst [vmem:[#allocation70_spill] sm:$0xff] %v8375_v18  ;;  %3439 = vmatpush.msrb.mxu3 %v8390_v4  ;;  %v8393_v18 = vld [vmem:[#allocation6 + $0xc0] sm:$0xff] }
 0x51d   :  { %10691 = vst [vmem:[#allocation81_spill] sm:$0xff] %v8378_v6  ;;  %3380 = vmatpush.msrb.mxu0 %v8393_v18  ;;  %v8396_v6 = vld [vmem:[#allocation6 + $0xc8] sm:$0xff] }
 0x51e   :  { %10692 = vst [vmem:[#allocation79_spill] sm:$0xff] %v8381_v5  ;;  %3400 = vmatpush.msrb.mxu1 %v8396_v6  ;;  %v8399_v5 = vld [vmem:[#allocation6 + $0xd0] sm:$0xff] }
 0x51f   :  { %10693 = vst [vmem:[#allocation84_spill] sm:$0xff] %v8384_v11  ;;  %3420 = vmatpush.msrb.mxu2 %v8399_v5  ;;  %v8402_v11 = vld [vmem:[#allocation6 + $0xd8] sm:$0xff] }
 0x520   :  { %10694 = vst [vmem:[#allocation71_spill] sm:$0xff] %v8387_v27  ;;  %3440 = vmatpush.msrb.mxu3 %v8402_v11  ;;  %v8405_v27 = vld [vmem:[#allocation6 + $0xa0] sm:$0xff] }
 0x521   :  { %10695 = vst [vmem:[#allocation85_spill] sm:$0xff] %v8390_v4  ;;  %3381 = vmatpush.msrb.mxu0 %v8405_v27  ;;  %v8408_v4 = vld [vmem:[#allocation6 + $0xa8] sm:$0xff] }
 0x522   :  { %10696 = vst [vmem:[#allocation83_spill] sm:$0xff] %v8393_v18  ;;  %3401 = vmatpush.msrb.mxu1 %v8408_v4  ;;  %v8411_v18 = vld [vmem:[#allocation6 + $0xb0] sm:$0xff] }
 0x523   :  { %10697 = vst [vmem:[#allocation88_spill] sm:$0xff] %v8396_v6  ;;  %3421 = vmatpush.msrb.mxu2 %v8411_v18  ;;  %v8414_v6 = vld [vmem:[#allocation6 + $0xb8] sm:$0xff] }
 0x524   :  { %10698 = vst [vmem:[#allocation74_spill] sm:$0xff] %v8399_v5  ;;  %3441 = vmatpush.msrb.mxu3 %v8414_v6  ;;  %v8417_v5 = vld [vmem:[#allocation6 + $0x80] sm:$0xff] }
 0x525   :  { %10699 = vst [vmem:[#allocation91_spill] sm:$0xff] %v8402_v11  ;;  %3382 = vmatpush.msrb.mxu0 %v8417_v5  ;;  %v8420_v11 = vld [vmem:[#allocation6 + $0x88] sm:$0xff] }
 0x526   :  { %10700 = vst [vmem:[#allocation87_spill] sm:$0xff] %v8405_v27  ;;  %3402 = vmatpush.msrb.mxu1 %v8420_v11  ;;  %v8423_v27 = vld [vmem:[#allocation6 + $0x90] sm:$0xff] }
 0x527   :  { %10701 = vst [vmem:[#allocation89_spill] sm:$0xff] %v8408_v4  ;;  %3422 = vmatpush.msrb.mxu2 %v8423_v27  ;;  %v8426_v4 = vld [vmem:[#allocation6 + $0x98] sm:$0xff] }
 0x528   :  { %10702 = vst [vmem:[#allocation78_spill] sm:$0xff] %v8411_v18  ;;  %3442 = vmatpush.msrb.mxu3 %v8426_v4  ;;  %v8429_v18 = vld [vmem:[#allocation6 + $0x60] sm:$0xff] }
 0x529   :  { %10703 = vst [vmem:[#allocation95_spill] sm:$0xff] %v8414_v6  ;;  %3383 = vmatpush.msrb.mxu0 %v8429_v18  ;;  %v8432_v6 = vld [vmem:[#allocation6 + $0x68] sm:$0xff] }
 0x52a   :  { %10704 = vst [vmem:[#allocation92_spill] sm:$0xff] %v8417_v5  ;;  %3403 = vmatpush.msrb.mxu1 %v8432_v6  ;;  %v8435_v5 = vld [vmem:[#allocation6 + $0x70] sm:$0xff] }
 0x52b   :  { %10705 = vst [vmem:[#allocation93_spill] sm:$0xff] %v8420_v11  ;;  %3423 = vmatpush.msrb.mxu2 %v8435_v5  ;;  %v8438_v11 = vld [vmem:[#allocation6 + $0x78] sm:$0xff] }
 0x52c   :  { %10706 = vst [vmem:[#allocation82_spill] sm:$0xff] %v8423_v27  ;;  %3443 = vmatpush.msrb.mxu3 %v8438_v11  ;;  %v8441_v27 = vld [vmem:[#allocation6 + $0x40] sm:$0xff] }
 0x52d   :  { %10707 = vst [vmem:[#allocation99_spill] sm:$0xff] %v8426_v4  ;;  %3384 = vmatpush.msrb.mxu0 %v8441_v27  ;;  %v8444_v4 = vld [vmem:[#allocation6 + $0x48] sm:$0xff] }
 0x52e   :  { %10708 = vst [vmem:[#allocation96_spill] sm:$0xff] %v8429_v18  ;;  %3404 = vmatpush.msrb.mxu1 %v8444_v4  ;;  %v8447_v18 = vld [vmem:[#allocation6 + $0x50] sm:$0xff] }
 0x52f   :  { %10709 = vst [vmem:[#allocation97_spill] sm:$0xff] %v8432_v6  ;;  %3424 = vmatpush.msrb.mxu2 %v8447_v18  ;;  %v8450_v6 = vld [vmem:[#allocation6 + $0x58] sm:$0xff] }
 0x530   :  { %10710 = vst [vmem:[#allocation86_spill] sm:$0xff] %v8435_v5  ;;  %3444 = vmatpush.msrb.mxu3 %v8450_v6  ;;  %v8453_v5 = vld [vmem:[#allocation6 + $0x20] sm:$0xff] }
 0x531   :  { %10711 = vst [vmem:[#allocation103_spill] sm:$0xff] %v8438_v11  ;;  %3385 = vmatpush.msrb.mxu0 %v8453_v5  ;;  %v8456_v11 = vld [vmem:[#allocation6 + $0x28] sm:$0xff] }
 0x532   :  { %10712 = vst [vmem:[#allocation90_spill] sm:$0xff] %v8441_v27  ;;  %3405 = vmatpush.msrb.mxu1 %v8456_v11  ;;  %v8459_v27 = vld [vmem:[#allocation6 + $0x30] sm:$0xff] }
 0x533   :  { %10713 = vst [vmem:[#allocation100_spill] sm:$0xff] %v8444_v4  ;;  %3425 = vmatpush.msrb.mxu2 %v8459_v27  ;;  %v8462_v4 = vld [vmem:[#allocation6 + $0x38] sm:$0xff] }
 0x534   :  { %10714 = vst [vmem:[#allocation101_spill] sm:$0xff] %v8447_v18  ;;  %3445 = vmatpush.msrb.mxu3 %v8462_v4  ;;  %v8465_v18 = vld [vmem:[#allocation6] sm:$0xff] }
 0x535   :  { %10715 = vst [vmem:[#allocation107_spill] sm:$0xff] %v8450_v6  ;;  %3386 = vmatpush.msrb.mxu0 %v8465_v18  ;;  %v8468_v6 = vld [vmem:[#allocation6 + $0x8] sm:$0xff] }
 0x536   :  { %10716 = vst [vmem:[#allocation94_spill] sm:$0xff] %v8453_v5  ;;  %3406 = vmatpush.msrb.mxu1 %v8468_v6  ;;  %v8471_v5 = vld [vmem:[#allocation6 + $0x10] sm:$0xff] }
 0x537   :  { %10717 = vst [vmem:[#allocation104_spill] sm:$0xff] %v8456_v11  ;;  %3426 = vmatpush.msrb.mxu2 %v8471_v5  ;;  %v8474_v11 = vld [vmem:[#allocation6 + $0x18] sm:$0xff] }
 0x538   :  { %10718 = vst [vmem:[#allocation105_spill] sm:$0xff] %v8459_v27  ;;  %3446 = vmatpush.msrb.mxu3 %v8474_v11  ;;  %v8477_v27 = vld [vmem:[#allocation4 + $0x1e0] sm:$0xff] }
 0x539   :  { %10719 = vst [vmem:[#allocation111_spill] sm:$0xff] %v8462_v4  ;;  %3451 = vmatpush.msra.mxu0 %v8477_v27  ;;  %v8480_v4 = vld [vmem:[#allocation4 + $0x1e8] sm:$0xff] }
 0x53a   :  { %10720 = vst [vmem:[#allocation98_spill] sm:$0xff] %v8465_v18  ;;  %3471 = vmatpush.msra.mxu1 %v8480_v4  ;;  %v8483_v18 = vld [vmem:[#allocation4 + $0x1f0] sm:$0xff] }
 0x53b   :  { %10721 = vst [vmem:[#allocation108_spill] sm:$0xff] %v8468_v6  ;;  %3491 = vmatpush.msra.mxu2 %v8483_v18  ;;  %v8486_v6 = vld [vmem:[#allocation4 + $0x1f8] sm:$0xff] }
 0x53c   :  { %10722 = vst [vmem:[#allocation109_spill] sm:$0xff] %v8471_v5  ;;  %3511 = vmatpush.msra.mxu3 %v8486_v6  ;;  %v8489_v5 = vld [vmem:[#allocation4 + $0x1c0] sm:$0xff] }
 0x53d   :  { %10723 = vst [vmem:[#allocation115_spill] sm:$0xff] %v8474_v11  ;;  %3452 = vmatpush.msra.mxu0 %v8489_v5  ;;  %v8492_v11 = vld [vmem:[#allocation4 + $0x1c8] sm:$0xff] }
 0x53e   :  { %10724 = vst [vmem:[#allocation102_spill] sm:$0xff] %v8477_v27  ;;  %3472 = vmatpush.msra.mxu1 %v8492_v11  ;;  %v8495_v27 = vld [vmem:[#allocation4 + $0x1d0] sm:$0xff] }
 0x53f   :  { %10725 = vst [vmem:[#allocation112_spill] sm:$0xff] %v8480_v4  ;;  %3492 = vmatpush.msra.mxu2 %v8495_v27  ;;  %v8498_v4 = vld [vmem:[#allocation4 + $0x1d8] sm:$0xff] }
 0x540   :  { %10726 = vst [vmem:[#allocation113_spill] sm:$0xff] %v8483_v18  ;;  %3512 = vmatpush.msra.mxu3 %v8498_v4  ;;  %v8501_v18 = vld [vmem:[#allocation4 + $0x1a0] sm:$0xff] }
 0x541   :  { %10727 = vst [vmem:[#allocation116_spill] sm:$0xff] %v8486_v6  ;;  %3453 = vmatpush.msra.mxu0 %v8501_v18  ;;  %v8504_v6 = vld [vmem:[#allocation4 + $0x1a8] sm:$0xff] }
 0x542   :  { %10728 = vst [vmem:[#allocation106_spill] sm:$0xff] %v8489_v5  ;;  %3473 = vmatpush.msra.mxu1 %v8504_v6  ;;  %v8507_v5 = vld [vmem:[#allocation4 + $0x1b0] sm:$0xff] }
 0x543   :  { %10729 = vst [vmem:[#allocation117_spill] sm:$0xff] %v8492_v11  ;;  %3493 = vmatpush.msra.mxu2 %v8507_v5  ;;  %v8510_v11 = vld [vmem:[#allocation4 + $0x1b8] sm:$0xff] }
 0x544   :  { %10730 = vst [vmem:[#allocation119_spill] sm:$0xff] %v8495_v27  ;;  %3513 = vmatpush.msra.mxu3 %v8510_v11  ;;  %v8513_v27 = vld [vmem:[#allocation4 + $0x180] sm:$0xff] }
 0x545   :  { %10731 = vst [vmem:[#allocation120_spill] sm:$0xff] %v8498_v4  ;;  %3454 = vmatpush.msra.mxu0 %v8513_v27  ;;  %v8516_v4 = vld [vmem:[#allocation4 + $0x188] sm:$0xff] }
 0x546   :  { %10732 = vst [vmem:[#allocation110_spill] sm:$0xff] %v8501_v18  ;;  %3474 = vmatpush.msra.mxu1 %v8516_v4  ;;  %v8519_v18 = vld [vmem:[#allocation4 + $0x190] sm:$0xff] }
 0x547   :  { %10733 = vst [vmem:[#allocation121_spill] sm:$0xff] %v8504_v6  ;;  %3494 = vmatpush.msra.mxu2 %v8519_v18  ;;  %v8522_v6 = vld [vmem:[#allocation4 + $0x198] sm:$0xff] }
 0x548   :  { %10734 = vst [vmem:[#allocation123_spill] sm:$0xff] %v8507_v5  ;;  %3514 = vmatpush.msra.mxu3 %v8522_v6  ;;  %v8525_v5 = vld [vmem:[#allocation4 + $0x160] sm:$0xff] }
 0x549   :  { %10735 = vst [vmem:[#allocation124_spill] sm:$0xff] %v8510_v11  ;;  %3455 = vmatpush.msra.mxu0 %v8525_v5  ;;  %v8528_v11 = vld [vmem:[#allocation4 + $0x168] sm:$0xff] }
 0x54a   :  { %10736 = vst [vmem:[#allocation114_spill] sm:$0xff] %v8513_v27  ;;  %3475 = vmatpush.msra.mxu1 %v8528_v11  ;;  %v8531_v27 = vld [vmem:[#allocation4 + $0x170] sm:$0xff] }
 0x54b   :  { %10737 = vst [vmem:[#allocation125_spill] sm:$0xff] %v8516_v4  ;;  %3495 = vmatpush.msra.mxu2 %v8531_v27  ;;  %v8534_v4 = vld [vmem:[#allocation4 + $0x178] sm:$0xff] }
 0x54c   :  { %10738 = vst [vmem:[#allocation127_spill] sm:$0xff] %v8519_v18  ;;  %3515 = vmatpush.msra.mxu3 %v8534_v4  ;;  %v8537_v18 = vld [vmem:[#allocation4 + $0x140] sm:$0xff] }
 0x54d   :  { %10739 = vst [vmem:[#allocation128_spill] sm:$0xff] %v8522_v6  ;;  %3456 = vmatpush.msra.mxu0 %v8537_v18  ;;  %v8540_v6 = vld [vmem:[#allocation4 + $0x148] sm:$0xff] }
 0x54e   :  { %10740 = vst [vmem:[#allocation118_spill] sm:$0xff] %v8525_v5  ;;  %3476 = vmatpush.msra.mxu1 %v8540_v6  ;;  %v8543_v5 = vld [vmem:[#allocation4 + $0x150] sm:$0xff] }
 0x54f   :  { %10741 = vst [vmem:[#allocation129_spill] sm:$0xff] %v8528_v11  ;;  %3496 = vmatpush.msra.mxu2 %v8543_v5  ;;  %v8546_v11 = vld [vmem:[#allocation4 + $0x158] sm:$0xff] }
 0x550   :  { %10742 = vst [vmem:[#allocation131_spill] sm:$0xff] %v8531_v27  ;;  %3516 = vmatpush.msra.mxu3 %v8546_v11  ;;  %v8549_v27 = vld [vmem:[#allocation4 + $0x120] sm:$0xff] }
 0x551   :  { %10743 = vst [vmem:[#allocation132_spill] sm:$0xff] %v8534_v4  ;;  %3457 = vmatpush.msra.mxu0 %v8549_v27  ;;  %v8552_v4 = vld [vmem:[#allocation4 + $0x128] sm:$0xff] }
 0x552   :  { %10744 = vst [vmem:[#allocation122_spill] sm:$0xff] %v8537_v18  ;;  %3477 = vmatpush.msra.mxu1 %v8552_v4  ;;  %v8555_v18 = vld [vmem:[#allocation4 + $0x130] sm:$0xff]  ;;  %v2936_v47 = vpop.f32.mrf.mxu1 }
 0x553   :  { %10745 = vst [vmem:[#allocation133_spill] sm:$0xff] %v8540_v6  ;;  %3497 = vmatpush.msra.mxu2 %v8555_v18  ;;  %v8558_v6 = vld [vmem:[#allocation4 + $0x138] sm:$0xff] }
 0x554   :  { %10746 = vst [vmem:[#allocation135_spill] sm:$0xff] %v8543_v5  ;;  %3517 = vmatpush.msra.mxu3 %v8558_v6  ;;  %v8561_v5 = vld [vmem:[#allocation4 + $0x100] sm:$0xff] }
 0x555   :  { %10747 = vst [vmem:[#allocation136_spill] sm:$0xff] %v8546_v11  ;;  %3458 = vmatpush.msra.mxu0 %v8561_v5  ;;  %v8564_v11 = vld [vmem:[#allocation4 + $0x108] sm:$0xff] }
 0x556   :  { %10748 = vst [vmem:[#allocation126_spill] sm:$0xff] %v8549_v27  ;;  %3478 = vmatpush.msra.mxu1 %v8564_v11  ;;  %v8567_v27 = vld [vmem:[#allocation4 + $0x110] sm:$0xff] }
 0x557   :  { %10749 = vst [vmem:[#allocation137_spill] sm:$0xff] %v8552_v4  ;;  %3498 = vmatpush.msra.mxu2 %v8567_v27  ;;  %v8570_v4 = vld [vmem:[#allocation4 + $0x118] sm:$0xff] }
 0x558   :  { %10750 = vst [vmem:[#allocation139_spill] sm:$0xff] %v8555_v18  ;;  %3518 = vmatpush.msra.mxu3 %v8570_v4  ;;  %v8573_v18 = vld [vmem:[#allocation4 + $0xe0] sm:$0xff] }
 0x559   :  { %10751 = vst [vmem:[#allocation140_spill] sm:$0xff] %v8558_v6  ;;  %3459 = vmatpush.msra.mxu0 %v8573_v18  ;;  %v8576_v6 = vld [vmem:[#allocation4 + $0xe8] sm:$0xff]  ;;  %v2976_v45 = vpop.f32.mrf.mxu3  ;;  %v2956_v63 = vpop.f32.mrf.mxu2 }
 0x55a   :  { %10752 = vst [vmem:[#allocation130_spill] sm:$0xff] %v8561_v5  ;;  %3479 = vmatpush.msra.mxu1 %v8576_v6  ;;  %v8579_v5 = vld [vmem:[#allocation4 + $0xf0] sm:$0xff] }
 0x55b   :  { %10753 = vst [vmem:[#allocation141_spill] sm:$0xff] %v8564_v11  ;;  %3499 = vmatpush.msra.mxu2 %v8579_v5  ;;  %v8582_v11 = vld [vmem:[#allocation4 + $0xf8] sm:$0xff] }
 0x55c   :  { %10754 = vst [vmem:[#allocation143_spill] sm:$0xff] %v8567_v27  ;;  %3519 = vmatpush.msra.mxu3 %v8582_v11  ;;  %v8585_v27 = vld [vmem:[#allocation4 + $0xc0] sm:$0xff] }
 0x55d   :  { %10755 = vst [vmem:[#allocation144_spill] sm:$0xff] %v8570_v4  ;;  %3460 = vmatpush.msra.mxu0 %v8585_v27  ;;  %v8588_v4 = vld [vmem:[#allocation4 + $0xc8] sm:$0xff] }
 0x55e   :  { %10756 = vst [vmem:[#allocation134_spill] sm:$0xff] %v8573_v18  ;;  %3480 = vmatpush.msra.mxu1 %v8588_v4  ;;  %v8591_v18 = vld [vmem:[#allocation4 + $0xd0] sm:$0xff] }
 0x55f   :  { %10757 = vst [vmem:[#allocation145_spill] sm:$0xff] %v8576_v6  ;;  %3500 = vmatpush.msra.mxu2 %v8591_v18  ;;  %v8594_v6 = vld [vmem:[#allocation4 + $0xd8] sm:$0xff] }
 0x560   :  { %10758 = vst [vmem:[#allocation138_spill] sm:$0xff] %v8579_v5  ;;  %3520 = vmatpush.msra.mxu3 %v8594_v6  ;;  %v8597_v5 = vld [vmem:[#allocation4 + $0xa0] sm:$0xff] }
 0x561   :  { %10759 = vst [vmem:[#allocation142_spill] sm:$0xff] %v8582_v11  ;;  %3461 = vmatpush.msra.mxu0 %v8597_v5  ;;  %v8600_v11 = vld [vmem:[#allocation4 + $0xa8] sm:$0xff] }
 0x562   :  { %10760 = vst [vmem:[#allocation148_spill] sm:$0xff] %v8585_v27  ;;  %3481 = vmatpush.msra.mxu1 %v8600_v11  ;;  %v8603_v27 = vld [vmem:[#allocation4 + $0xb0] sm:$0xff] }
 0x563   :  { %10761 = vst [vmem:[#allocation146_spill] sm:$0xff] %v8588_v4  ;;  %3501 = vmatpush.msra.mxu2 %v8603_v27  ;;  %v8606_v4 = vld [vmem:[#allocation4 + $0xb8] sm:$0xff] }
 0x564   :  { %10762 = vst [vmem:[#allocation150_spill] sm:$0xff] %v8591_v18  ;;  %3521 = vmatpush.msra.mxu3 %v8606_v4  ;;  %v8609_v18 = vld [vmem:[#allocation4 + $0x80] sm:$0xff]  ;;  %v3016_v13 = vpop.f32.mrf.mxu1 }
 0x565   :  { %10763 = vst [vmem:[#allocation152_spill] sm:$0xff] %v8594_v6  ;;  %3462 = vmatpush.msra.mxu0 %v8609_v18  ;;  %v8612_v6 = vld [vmem:[#allocation4 + $0x88] sm:$0xff]  ;;  %v3017_v12 = vadd.f32 %v3016_v13, %v2936_v47 }
 0x566   :  { %10764 = vst [vmem:[#allocation151_spill] sm:$0xff] %v8597_v5  ;;  %3482 = vmatpush.msra.mxu1 %v8612_v6  ;;  %v8615_v5 = vld [vmem:[#allocation4 + $0x90] sm:$0xff] }
 0x567   :  { %10765 = vst [vmem:[#allocation153_spill] sm:$0xff] %v8600_v11  ;;  %3502 = vmatpush.msra.mxu2 %v8615_v5  ;;  %v8618_v11 = vld [vmem:[#allocation4 + $0x98] sm:$0xff]  ;;  %v3060_v42 = vadd.f32 %v3017_v12, %v10616_v33 }
 0x568   :  { %10766 = vst [vmem:[#allocation154_spill] sm:$0xff] %v8603_v27  ;;  %3522 = vmatpush.msra.mxu3 %v8618_v11  ;;  %v8621_v27 = vld [vmem:[#allocation4 + $0x60] sm:$0xff] }
 0x569   :  { %10767 = vst [vmem:[#allocation156_spill] sm:$0xff] %v8606_v4  ;;  %3463 = vmatpush.msra.mxu0 %v8621_v27  ;;  %v8624_v4 = vld [vmem:[#allocation4 + $0x68] sm:$0xff]  ;;  %v4205_v22 = vmul.f32 -1.442695, %v3060_v42 }
 0x56a   :  { %10768 = vst [vmem:[#allocation155_spill] sm:$0xff] %v8609_v18  ;;  %3483 = vmatpush.msra.mxu1 %v8624_v4  ;;  %v8627_v18 = vld [vmem:[#allocation4 + $0x70] sm:$0xff] }
 0x56b   :  { %10769 = vst [vmem:[#allocation157_spill] sm:$0xff] %v8612_v6  ;;  %3503 = vmatpush.msra.mxu2 %v8627_v18  ;;  %v8630_v6 = vld [vmem:[#allocation4 + $0x78] sm:$0xff]  ;;  %v3036_v53 = vpop.f32.mrf.mxu2 }
 0x56c   :  { %10770 = vst [vmem:[#allocation158_spill] sm:$0xff] %v8615_v5  ;;  %3523 = vmatpush.msra.mxu3 %v8630_v6  ;;  %v8633_v5 = vld [vmem:[#allocation4 + $0x40] sm:$0xff] }
 0x56d   :  { %10771 = vst [vmem:[#allocation160_spill] sm:$0xff] %v8618_v11  ;;  %3464 = vmatpush.msra.mxu0 %v8633_v5  ;;  %v8636_v11 = vld [vmem:[#allocation4 + $0x48] sm:$0xff] }
 0x56e   :  { %10772 = vst [vmem:[#allocation159_spill] sm:$0xff] %v8621_v27  ;;  %3484 = vmatpush.msra.mxu1 %v8636_v11  ;;  %v8639_v27 = vld [vmem:[#allocation4 + $0x50] sm:$0xff] }
 0x56f   :  { %10773 = vst [vmem:[#allocation161_spill] sm:$0xff] %v8624_v4  ;;  %3504 = vmatpush.msra.mxu2 %v8639_v27  ;;  %v8642_v4 = vld [vmem:[#allocation4 + $0x58] sm:$0xff] }
 0x570   :  { %10774 = vst [vmem:[#allocation162_spill] sm:$0xff] %v8627_v18  ;;  %3524 = vmatpush.msra.mxu3 %v8642_v4  ;;  %v8645_v18 = vld [vmem:[#allocation4 + $0x20] sm:$0xff] }
 0x571   :  { %10775 = vst [vmem:[#allocation164_spill] sm:$0xff] %v8630_v6  ;;  %3465 = vmatpush.msra.mxu0 %v8645_v18  ;;  %v8648_v6 = vld [vmem:[#allocation4 + $0x28] sm:$0xff] }
 0x572   :  { %10776 = vst [vmem:[#allocation163_spill] sm:$0xff] %v8633_v5  ;;  %3485 = vmatpush.msra.mxu1 %v8648_v6  ;;  %v8651_v5 = vld [vmem:[#allocation4 + $0x30] sm:$0xff] }
 0x573   :  { %10777 = vst [vmem:[#allocation165_spill] sm:$0xff] %v8636_v11  ;;  %3505 = vmatpush.msra.mxu2 %v8651_v5  ;;  %v8654_v11 = vld [vmem:[#allocation4 + $0x38] sm:$0xff] }
 0x574   :  { %10778 = vst [vmem:[#allocation166_spill] sm:$0xff] %v8639_v27  ;;  %3525 = vmatpush.msra.mxu3 %v8654_v11  ;;  %v8657_v27 = vld [vmem:[#allocation4] sm:$0xff] }
 0x575   :  { %10779 = vst [vmem:[#allocation168_spill] sm:$0xff] %v8642_v4  ;;  %3466 = vmatpush.msra.mxu0 %v8657_v27  ;;  %v8660_v4 = vld [vmem:[#allocation4 + $0x8] sm:$0xff] }
 0x576   :  { %10780 = vst [vmem:[#allocation167_spill] sm:$0xff] %v8645_v18  ;;  %3486 = vmatpush.msra.mxu1 %v8660_v4  ;;  %v8663_v18 = vld [vmem:[#allocation4 + $0x10] sm:$0xff] }
 0x577   :  { %10781 = vst [vmem:[#allocation169_spill] sm:$0xff] %v8648_v6  ;;  %3506 = vmatpush.msra.mxu2 %v8663_v18  ;;  %v8666_v6 = vld [vmem:[#allocation4 + $0x18] sm:$0xff] }
 0x578   :  { %10782 = vst [vmem:[#allocation170_spill] sm:$0xff] %v8651_v5  ;;  %3526 = vmatpush.msra.mxu3 %v8666_v6  ;;  %v2916_v5 = vpop.f32.mrf.mxu0 }
 0x579   :  { %10783 = vst [vmem:[#allocation172_spill] sm:$0xff] %v8654_v11 }
 0x57a   :  { %10784 = vst [vmem:[#allocation171_spill] sm:$0xff] %v8657_v27 }
 0x57b   :  { %10785 = vst [vmem:[#allocation173_spill] sm:$0xff] %v8660_v4 }
 0x57c   :  { %10786 = vst [vmem:[#allocation174_spill] sm:$0xff] %v8663_v18  ;;  %v3056_v18 = vpop.f32.mrf.mxu3 }
 0x57d   :  { %10787 = vst [vmem:[#allocation175_spill] sm:$0xff] %v8666_v6  ;;  %v3057_v41 = vadd.f32 %v3056_v18, %v2976_v45 }
 0x57f   :  { %v3062_v6 = vadd.f32 %v3057_v41, %v10617_v50 }
 0x580   :  { %v2996_v11 = vpop.f32.mrf.mxu0 }
 0x581   :  { %v2997_v60 = vadd.f32 %v2996_v11, %v2916_v5  ;;  %v4206_v48 = vmul.f32 -1.442695, %v3062_v6 }
 0x583   :  { %v3059_v27 = vadd.f32 %v2997_v60, %v10615_v32  ;;  %v3037_v60 = vadd.f32 %v3036_v53, %v2956_v63 }
 0x585   :  { %v4204_v4 = vmul.f32 -1.442695, %v3059_v27  ;;  %v3165_v27 = vpop.f32.mrf.mxu1 }
 0x587   :  { %4420 = vpow2.f32 %v4204_v4  ;;  %v3061_v4 = vadd.f32 %v3037_v60, %v10618_v35 }
 0x588   :  { %4422 = vpow2.f32 %v4205_v22  ;;  %v3145_v12 = vpop.f32.mrf.mxu0 }
 0x589   :  { %4424 = vpow2.f32 %v4206_v48  ;;  %v3205_v48 = vpop.f32.mrf.mxu3 }
 0x58d   :  { %v4421_v40 = vpop.eup %4420  ;;  %v3261_v6 = vpop.f32.mrf.mxu1 }
 0x58e   :  { %v4423_v29 = vpop.eup %4422  ;;  %v3066_v16 = vadd.f32 1.0, %v4421_v40 }
 0x58f   :  { %v3085_v13 = vadd.f32 1.0, %v4423_v29  ;;  %v4425_v42 = vpop.eup %4424 }
 0x590   :  { %4426 = vrcp.f32 %v3066_v16  ;;  %v8673_v47 = vadd.f32 1.0, %v4425_v42  ;;  %v3076_v11 = vand.u32 2147483647, %v3066_v16  ;;  %v3078_v53 = vand.u32 2147483648, %v3066_v16  ;;  %v3241_v63 = vpop.f32.mrf.mxu0 }
 0x591   :  { %4428 = vrcp.f32 %v3085_v13  ;;  %v3097_v5 = vand.u32 2147483648, %v3085_v13  ;;  %v3242_v60 = vadd.f32 %v3241_v63, %v3145_v12  ;;  %v3262_v42 = vadd.f32 %v3261_v6, %v3165_v27 }
 0x592   :  { %4430 = vrcp.f32 %v8673_v47  ;;  %vm3072_vm10 = vweird.f32 %v3066_v16  ;;  %v3095_v33 = vand.u32 2147483647, %v3085_v13  ;;  %vm3091_vm11 = vweird.f32 %v3085_v13 }
 0x593   :  { %4432 = vtanh.f32 %v3061_v4  ;;  %v3304_v4 = vadd.f32 %v3242_v60, %v10619_v30  ;;  %vm3077_vm13 = vcmp.eq.f32.partialorder %v3076_v11, 8.507059e+37  ;;  %v3098_v12 = vor.u32 1.1754944e-38, %v3097_v5 }
 0x594   :  { %vm3096_vm15 = vcmp.eq.f32.partialorder %v3095_v33, 8.507059e+37  ;;  %v3117_v33 = vand.u32 2147483648, %v8673_v47  ;;  %vm3111_vm3 = vweird.f32 %v8673_v47 }
 0x596   :  { %v4427_v22 = vpop.eup %4426 }
 0x597   :  { %v4429_v45 = vpop.eup %4428  ;;  %v3068_v41 = vmul.f32 %v4427_v22, %v3066_v16  ;;  %vm3073_vm8 = vweird.f32 %v4427_v22  ;;  %v4216_v16 = vmul.f32 -1.442695, %v3304_v4 }
 0x598   :  { %v3087_v18 = vmul.f32 %v4429_v45, %v3085_v13  ;;  %vm3092_vm9 = vweird.f32 %v4429_v45  ;;  %v4431_v32 = vpop.eup %4430  ;;  %vm3074_vm12 = vmor %vm3072_vm10, %vm3073_vm8 }
 0x599   :  { %v3069_v40 = vsub.f32 1.0, %v3068_v41  ;;  %v3305_v41 = vadd.f32 %v3262_v42, %v10620_v39  ;;  %v4433_v56 = vpop.eup %4432  ;;  %vm3093_vm14 = vmor %vm3091_vm11, %vm3092_vm9  ;;  %4434 = vpow2.f32 %v4216_v16  ;;  %v3301_v42 = vpop.f32.mrf.mxu3  ;;  %vm3112_vm2 = vweird.f32 %v4431_v32 }
 0x59a   :  { %v3088_v29 = vsub.f32 1.0, %v3087_v18  ;;  %v3079_v18 = vor.u32 1.1754944e-38, %v3078_v53  ;;  %vm3113_vm4 = vmor %vm3111_vm3, %vm3112_vm2 }
 0x59b   :  { %v3070_v50 = vmul.f32 %v4427_v22, %v3069_v40  ;;  %v3107_v40 = vmul.f32 %v4431_v32, %v8673_v47  ;;  %v4217_v63 = vmul.f32 -1.442695, %v3305_v41  ;;  %v3118_v41 = vor.u32 1.1754944e-38, %v3117_v33 }
 0x59c   :  { %v3089_v35 = vmul.f32 %v4429_v45, %v3088_v29  ;;  %v3185_v29 = vpop.f32.mrf.mxu2 }
 0x59d   :  { %v3071_v1 = vadd.f32 %v4427_v22, %v3070_v50  ;;  %v3108_v50 = vsub.f32 1.0, %v3107_v40  ;;  %4436 = vpow2.f32 %v4217_v63 }
 0x59e   :  { %v3090_v43 = vadd.f32 %v4429_v45, %v3089_v35  ;;  %v3302_v35 = vadd.f32 %v3301_v42, %v3205_v48 }
 0x59f   :  { %v3075_v27 = vsel %vm3074_vm12, %v4427_v22, %v3071_v1  ;;  %v3109_v53 = vmul.f32 %v4431_v32, %v3108_v50 }
 0x5a0   :  { %v3080_v6 = vsel %vm3077_vm13, %v3079_v18, %v3075_v27  ;;  %v3094_v13 = vsel %vm3093_vm14, %v4429_v45, %v3090_v43  ;;  %v3307_v1 = vadd.f32 %v3302_v35, %v5835_v36  ;;  %v4435_v45 = vpop.eup %4434 }
 0x5a1   :  { %v3099_v60 = vsel %vm3096_vm15, %v3098_v12, %v3094_v13  ;;  %v3122_v30 = vmul.f32 %v4433_v56, %v3080_v6  ;;  %v3110_v22 = vadd.f32 %v4431_v32, %v3109_v53  ;;  %v3115_v56 = vand.u32 2147483647, %v8673_v47 }
 0x5a2   :  { %v3121_v11 = vmul.f32 %v3099_v60, %v8010_v20  ;;  %v4218_v43 = vmul.f32 -1.442695, %v3307_v1  ;;  %v8687_v5 = vadd.f32 1.0, %v4435_v45  ;;  %v10797_v1 = vld [vmem:[#allocation17_spill] sm:$0xff]  ;;  %v10799_v45 = vld [vmem:[#allocation22_spill] sm:$0xff] }
 0x5a3   :  { %v4437_v20 = vpop.eup %4436  ;;  %v3114_v4 = vsel %vm3113_vm4, %v4431_v32, %v3110_v22  ;;  %vm3116_vm5 = vcmp.eq.f32.partialorder %v3115_v56, 8.507059e+37  ;;  %v10798_v22 = vld [vmem:[#allocation9_spill] sm:$0xff] }
 0x5a4   :  { %v8680_v39 = vadd.f32 %v3122_v30, %v3121_v11  ;;  %v8689_v30 = vadd.f32 1.0, %v4437_v20  ;;  %v3281_v48 = vpop.f32.mrf.mxu2  ;;  %v3119_v12 = vsel %vm3116_vm5, %v3118_v41, %v3114_v4  ;;  %v3323_v42 = vand.u32 2147483648, %v8687_v5  ;;  %v10800_v56 = vld [vmem:[#allocation25_spill] sm:$0xff]  ;;  %v10804_v4 = vld [vmem:[#allocation34_spill] sm:$0xff] }
 0x5a5   :  { %v3282_v40 = vadd.f32 %v3281_v48, %v3185_v29  ;;  %vm3317_vm8 = vweird.f32 %v8687_v5  ;;  %v10803_v48 = vld [vmem:[#allocation23_spill] sm:$0xff]  ;;  %v10805_v41 = vld [vmem:[#allocation30_spill] sm:$0xff] }
 0x5a6   :  { %4438 = vtanh.f32 %v8680_v39  ;;  %vm3336_vm9 = vweird.f32 %v8689_v30 }
 0x5a7   :  { %4440 = vpow2.f32 %v4218_v43  ;;  %v3306_v6 = vadd.f32 %v3282_v40, %v5894_v19  ;;  %v10807_v40 = vld [vmem:[#allocation38_spill] sm:$0xff] }
 0x5a8   :  { %4442 = vrcp.f32 %v8687_v5 }
 0x5a9   :  { %4444 = vrcp.f32 %v8689_v30 }
 0x5ac   :  { %v4439_v18 = vpop.eup %4438 }
 0x5ad   :  { %v3125_v27 = vmul.f32 %v4439_v18, %v3119_v12  ;;  %v4441_v47 = vpop.eup %4440  ;;  %v10806_v18 = vld [vmem:[#allocation26_spill] sm:$0xff]  ;;  %v10808_v12 = vld [vmem:[#allocation33_spill] sm:$0xff] }
 0x5ae   :  { %v8693_v16 = vadd.f32 1.0, %v4441_v47  ;;  %v4443_v63 = vpop.eup %4442  ;;  %v10810_v47 = vld [vmem:[#allocation42_spill] sm:$0xff] }
 0x5af   :  { %3387 = vmatmul.f32.vlgmr.msrb.gmra.mxu0 %v3125_v27  ;;  %3407 = vmatmul.f32.vlgmr.msrb.gmra.mxu1 %v3125_v27  ;;  %v4445_v32 = vpop.eup %4444  ;;  %v3313_v13 = vmul.f32 %v4443_v63, %v8687_v5  ;;  %vm3318_vm6 = vweird.f32 %v4443_v63 }
 0x5b0   :  { %3427 = vmatmul.f32.vlgmr.msrb.gmra.mxu2 %v3125_v27  ;;  %3447 = vmatmul.f32.vlgmr.msrb.gmra.mxu3 %v3125_v27  ;;  %4446 = vrcp.f32 %v8693_v16  ;;  %v3332_v29 = vmul.f32 %v4445_v32, %v8689_v30  ;;  %vm3337_vm7 = vweird.f32 %v4445_v32  ;;  %vm3319_vm10 = vmor %vm3317_vm8, %vm3318_vm6  ;;  %vm3356_vm15 = vweird.f32 %v8693_v16  ;;  %v10809_v27 = vld [vmem:[#allocation32_spill] sm:$0xff] }
 0x5b1   :  { %3600 = vmatpush.msrb.mxu0 %v8038_v55  ;;  %3620 = vmatpush.msrb.mxu1 %v8041_v54  ;;  %v3314_v50 = vsub.f32 1.0, %v3313_v13  ;;  %4448 = vtanh.f32 %v3306_v6  ;;  %v3342_v55 = vand.u32 2147483648, %v8689_v30  ;;  %vm3338_vm11 = vmor %vm3336_vm9, %vm3337_vm7  ;;  %v10813_v6 = vld [vmem:[#allocation36_spill] sm:$0xff]  ;;  %v10815_v13 = vld [vmem:[#allocation35_spill] sm:$0xff] }
 0x5b2   :  { %3640 = vmatpush.msrb.mxu2 %v8046_v21  ;;  %3660 = vmatpush.msrb.mxu3 %v8049_v28  ;;  %v3333_v60 = vsub.f32 1.0, %v3332_v29  ;;  %v3321_v21 = vand.u32 2147483647, %v8687_v5  ;;  %v10801_v5 = vld [vmem:[#allocation29_spill] sm:$0xff]  ;;  %v10816_v29 = vld [vmem:[#allocation40_spill] sm:$0xff] }
 0x5b3   :  { %3601 = vmatpush.msrb.mxu0 %v8052_v57  ;;  %3621 = vmatpush.msrb.mxu1 %v8055_v38  ;;  %v3315_v54 = vmul.f32 %v4443_v63, %v3314_v50  ;;  %v3340_v57 = vand.u32 2147483647, %v8689_v30  ;;  %v10802_v30 = vld [vmem:[#allocation28_spill] sm:$0xff]  ;;  %v10817_v50 = vld [vmem:[#allocation41_spill] sm:$0xff] }
 0x5b4   :  { %3641 = vmatpush.msrb.mxu2 %v8059_v62  ;;  %3661 = vmatpush.msrb.mxu3 %v8062_v51  ;;  %v3334_v28 = vmul.f32 %v4445_v32, %v3333_v60  ;;  %v3324_v51 = vor.u32 1.1754944e-38, %v3323_v42  ;;  %vm3322_vm12 = vcmp.eq.f32.partialorder %v3321_v21, 8.507059e+37  ;;  %v10818_v60 = vld [vmem:[#allocation50_spill] sm:$0xff]  ;;  %v10819_v42 = vld [vmem:[#allocation39_spill] sm:$0xff] }
 0x5b5   :  { %3602 = vmatpush.msrb.mxu0 %v8066_v46  ;;  %3622 = vmatpush.msrb.mxu1 %v8069_v9  ;;  %v3316_v62 = vadd.f32 %v4443_v63, %v3315_v54  ;;  %vm3341_vm13 = vcmp.eq.f32.partialorder %v3340_v57, 8.507059e+37  ;;  %v3681_v54 = vld.sshfl [vmem:[#allocation1] sm:$0xff pattern:$0x73625140] }
 0x5b6   :  { %3642 = vmatpush.msrb.mxu2 %v8078_v26  ;;  %3662 = vmatpush.msrb.mxu3 %v8081_v59  ;;  %v8715_v38 = vpop.eup %4446  ;;  %v3335_v46 = vadd.f32 %v4445_v32, %v3334_v28  ;;  %v3343_v26 = vor.u32 1.1754944e-38, %v3342_v55  ;;  %v10820_v55 = vld [vmem:[#allocation44_spill] sm:$0xff]  ;;  %v3682_v21 = vld.sshfl [vmem:[#allocation1 + $0x8] sm:$0xff pattern:$0x73625140] }
 0x5b7   :  { %3603 = vmatpush.msrb.mxu0 %v8090_v25  ;;  %3623 = vmatpush.msrb.mxu1 %v8093_v58  ;;  %v3352_v9 = vmul.f32 %v8715_v38, %v8693_v16  ;;  %v3320_v59 = vsel %vm3319_vm10, %v4443_v63, %v3316_v62  ;;  %v4449_v25 = vpop.eup %4448  ;;  %vm3357_vm14 = vweird.f32 %v8715_v38  ;;  %v10812_v63 = vld [vmem:[#allocation37_spill] sm:$0xff]  ;;  %v3684_v28 = vld.sshfl [vmem:[#allocation1 + $0x18] sm:$0xff pattern:$0x73625140]  ;;  %v10822_v62 = vld [vmem:[#allocation54_spill] sm:$0xff] }
 0x5b8   :  { %3643 = vmatpush.msrb.mxu2 %v8099_v15  ;;  %3663 = vmatpush.msrb.mxu3 %v8102_v14  ;;  %v3325_v58 = vsel %vm3322_vm12, %v3324_v51, %v3320_v59  ;;  %v3339_v11 = vsel %vm3338_vm11, %v4445_v32, %v3335_v46  ;;  %vm3358_vm2 = vmor %vm3356_vm15, %vm3357_vm14  ;;  %v10814_v32 = vld [vmem:[#allocation46_spill] sm:$0xff]  ;;  %v4222_v51 = vld [vmem:[%s9004_s0 + $0x38] sm:$0xff] }
 0x5b9   :  { %3604 = vmatpush.msrb.mxu0 %v8107_v49  ;;  %3624 = vmatpush.msrb.mxu1 %v8110_v3  ;;  %v3353_v35 = vsub.f32 1.0, %v3352_v9  ;;  %v3344_v15 = vsel %vm3341_vm13, %v3343_v26, %v3339_v11  ;;  %v3367_v14 = vmul.f32 %v4449_v25, %v3325_v58  ;;  %v3683_v57 = vld.sshfl [vmem:[#allocation1 + $0x10] sm:$0xff pattern:$0x73625140]  ;;  %v10823_v46 = vld [vmem:[#allocation43_spill] sm:$0xff]  ;;  %v10824_v9 = vld [vmem:[#allocation53_spill] sm:$0xff] }
 0x5ba   :  { %3644 = vmatpush.msrb.mxu2 %v8119_v61  ;;  %3664 = vmatpush.msrb.mxu3 %v8122_v0  ;;  %v3366_v53 = vmul.f32 %v3344_v15, %v8076_v34  ;;  %v3362_v34 = vand.u32 2147483648, %v8693_v16  ;;  %v10788_v0 = vld [vmem:[#allocation21_spill] sm:$0xff]  ;;  %v10825_v26 = vld [vmem:[#allocation48_spill] sm:$0xff]  ;;  %v10827_v25 = vld [vmem:[#allocation47_spill] sm:$0xff] }
 0x5bb   :  { %3605 = vmatpush.msrb.mxu0 %v8128_v7  ;;  %3625 = vmatpush.msrb.mxu1 %v8131_v8  ;;  %v3354_v49 = vmul.f32 %v8715_v38, %v3353_v35  ;;  %v3360_v7 = vand.u32 2147483647, %v8693_v16  ;;  %v10789_v8 = vld [vmem:[#allocation12_spill] sm:$0xff]  ;;  %v10811_v16 = vld [vmem:[#allocation31_spill] sm:$0xff]  ;;  %v10826_v59 = vld [vmem:[#allocation49_spill] sm:$0xff] }
 0x5bc   :  { %3645 = vmatpush.msrb.mxu2 %v8134_v24  ;;  %3665 = vmatpush.msrb.mxu3 %v8137_v31  ;;  %v8739_v3 = vadd.f32 %v3367_v14, %v3366_v53  ;;  %v10790_v24 = vld [vmem:[#allocation18_spill] sm:$0xff]  ;;  %v10791_v31 = vld [vmem:[#allocation13_spill] sm:$0xff]  ;;  %v10829_v11 = vld [vmem:[#allocation52_spill] sm:$0xff] }
 0x5bd   :  { %3606 = vmatpush.msrb.mxu0 %v8140_v2  ;;  %3626 = vmatpush.msrb.mxu1 %v8143_v37  ;;  %v3355_v61 = vadd.f32 %v8715_v38, %v3354_v49  ;;  %v10792_v2 = vld [vmem:[#allocation24_spill] sm:$0xff]  ;;  %vm3361_vm3 = vcmp.eq.f32.partialorder %v3360_v7, 8.507059e+37  ;;  %v10828_v58 = vld [vmem:[#allocation57_spill] sm:$0xff]  ;;  %v10830_v35 = vld [vmem:[#allocation58_spill] sm:$0xff] }
 0x5be   :  { %3646 = vmatpush.msrb.mxu2 %v8146_v52  ;;  %3666 = vmatpush.msrb.mxu3 %v8149_v10  ;;  %4450 = vtanh.f32 %v8739_v3  ;;  %v10793_v52 = vld [vmem:[#allocation14_spill] sm:$0xff]  ;;  %v10794_v10 = vld [vmem:[#allocation20_spill] sm:$0xff]  ;;  %v10831_v15 = vld [vmem:[#allocation51_spill] sm:$0xff] }
 0x5bf   :  { %3607 = vmatpush.msrb.mxu0 %v8154_v23  ;;  %3627 = vmatpush.msrb.mxu1 %v8157_v17  ;;  %v3359_v37 = vsel %vm3358_vm2, %v8715_v38, %v3355_v61  ;;  %v3363_v23 = vor.u32 1.1754944e-38, %v3362_v34  ;;  %v10795_v17 = vld [vmem:[#allocation16_spill] sm:$0xff]  ;;  %v10821_v38 = vld [vmem:[#allocation45_spill] sm:$0xff]  ;;  %v10834_v49 = vld [vmem:[#allocation62_spill] sm:$0xff] }
 0x5c0   :  { %3647 = vmatpush.msrb.mxu2 %v8160_v44  ;;  %3667 = vmatpush.msrb.mxu3 %v10788_v0  ;;  %v10796_v44 = vld [vmem:[#allocation27_spill] sm:$0xff]  ;;  %v10832_v14 = vld [vmem:[#allocation61_spill] sm:$0xff]  ;;  %v10833_v53 = vld [vmem:[#allocation56_spill] sm:$0xff] }
 0x5c1   :  { %3608 = vmatpush.msrb.mxu0 %v10789_v8  ;;  %3628 = vmatpush.msrb.mxu1 %v10790_v24  ;;  %v3364_v33 = vsel %vm3361_vm3, %v3363_v23, %v3359_v37  ;;  %v10835_v61 = vld [vmem:[#allocation55_spill] sm:$0xff]  ;;  %v10836_v34 = vld [vmem:[#allocation65_spill] sm:$0xff]  ;;  %v10837_v0 = vld [vmem:[#allocation60_spill] sm:$0xff] }
 0x5c2   :  { %3648 = vmatpush.msrb.mxu2 %v10791_v31  ;;  %3668 = vmatpush.msrb.mxu3 %v10792_v2  ;;  %v10838_v7 = vld [vmem:[#allocation66_spill] sm:$0xff]  ;;  %v10839_v8 = vld [vmem:[#allocation59_spill] sm:$0xff]  ;;  %v10840_v24 = vld [vmem:[#allocation68_spill] sm:$0xff] }
 0x5c3   :  { %3609 = vmatpush.msrb.mxu0 %v10793_v52  ;;  %3629 = vmatpush.msrb.mxu1 %v10794_v10  ;;  %v10841_v31 = vld [vmem:[#allocation64_spill] sm:$0xff]  ;;  %v10843_v37 = vld [vmem:[#allocation63_spill] sm:$0xff]  ;;  %v10844_v52 = vld [vmem:[#allocation73_spill] sm:$0xff] }
 0x5c4   :  { %3649 = vmatpush.msrb.mxu2 %v10795_v17  ;;  %3669 = vmatpush.msrb.mxu3 %v10796_v44  ;;  %v4451_v43 = vpop.eup %4450  ;;  %v10842_v2 = vld [vmem:[#allocation72_spill] sm:$0xff]  ;;  %v10845_v10 = vld [vmem:[#allocation69_spill] sm:$0xff]  ;;  %v10847_v17 = vld [vmem:[#allocation67_spill] sm:$0xff] }
 0x5c5   :  { %3610 = vmatpush.msrb.mxu0 %v10797_v1  ;;  %3630 = vmatpush.msrb.mxu1 %v10798_v22  ;;  %v3370_v20 = vmul.f32 %v4451_v43, %v3364_v33  ;;  %v10846_v23 = vld [vmem:[#allocation76_spill] sm:$0xff]  ;;  %v10848_v44 = vld [vmem:[#allocation77_spill] sm:$0xff]  ;;  %v10849_v1 = vld [vmem:[#allocation75_spill] sm:$0xff] }
 0x5c6   :  { %3650 = vmatpush.msrb.mxu2 %v10799_v45  ;;  %3670 = vmatpush.msrb.mxu3 %v10800_v56  ;;  %v10850_v22 = vld [vmem:[#allocation80_spill] sm:$0xff]  ;;  %v10851_v43 = vld [vmem:[#allocation70_spill] sm:$0xff]  ;;  %v10852_v33 = vld [vmem:[#allocation81_spill] sm:$0xff] }
 0x5c7   :  { %3611 = vmatpush.msrb.mxu0 %v10801_v5  ;;  %3631 = vmatpush.msrb.mxu1 %v10802_v30  ;;  %v10853_v45 = vld [vmem:[#allocation79_spill] sm:$0xff]  ;;  %v10854_v56 = vld [vmem:[#allocation84_spill] sm:$0xff]  ;;  %v10856_v5 = vld [vmem:[#allocation85_spill] sm:$0xff] }
 0x5c8   :  { %3651 = vmatpush.msrb.mxu2 %v10803_v48  ;;  %3671 = vmatpush.msrb.mxu3 %v10804_v4  ;;  %v10857_v30 = vld [vmem:[#allocation83_spill] sm:$0xff]  ;;  %v10858_v48 = vld [vmem:[#allocation88_spill] sm:$0xff]  ;;  %v10859_v4 = vld [vmem:[#allocation74_spill] sm:$0xff] }
 0x5c9   :  { %3467 = vmatmul.f32.vlgmr.msra.gmra.mxu0 %v3370_v20  ;;  %3487 = vmatmul.f32.vlgmr.msra.gmra.mxu1 %v3370_v20 }
 0x5ca   :  { %3507 = vmatmul.f32.vlgmr.msra.gmra.mxu2 %v3370_v20  ;;  %3527 = vmatmul.f32.vlgmr.msra.gmra.mxu3 %v3370_v20 }
 0x5cb   :  { %3612 = vmatpush.msrb.mxu0 %v10805_v41  ;;  %3632 = vmatpush.msrb.mxu1 %v10806_v18  ;;  %v10860_v41 = vld [vmem:[#allocation91_spill] sm:$0xff] }
 0x5cc   :  { %3652 = vmatpush.msrb.mxu2 %v10807_v40  ;;  %3672 = vmatpush.msrb.mxu3 %v10808_v12  ;;  %v10861_v18 = vld [vmem:[#allocation87_spill] sm:$0xff]  ;;  %v10862_v40 = vld [vmem:[#allocation89_spill] sm:$0xff]  ;;  %v10863_v12 = vld [vmem:[#allocation78_spill] sm:$0xff] }
 0x5cd   :  { %3613 = vmatpush.msrb.mxu0 %v10809_v27  ;;  %3633 = vmatpush.msrb.mxu1 %v10810_v47  ;;  %v10864_v27 = vld [vmem:[#allocation95_spill] sm:$0xff]  ;;  %v10865_v47 = vld [vmem:[#allocation92_spill] sm:$0xff] }
 0x5ce   :  { %3653 = vmatpush.msrb.mxu2 %v10811_v16  ;;  %3673 = vmatpush.msrb.mxu3 %v10812_v63  ;;  %v10866_v16 = vld [vmem:[#allocation93_spill] sm:$0xff]  ;;  %v10867_v63 = vld [vmem:[#allocation82_spill] sm:$0xff] }
 0x5cf   :  { %3614 = vmatpush.msrb.mxu0 %v10813_v6  ;;  %3634 = vmatpush.msrb.mxu1 %v10814_v32  ;;  %v10868_v6 = vld [vmem:[#allocation99_spill] sm:$0xff]  ;;  %v10869_v32 = vld [vmem:[#allocation96_spill] sm:$0xff] }
 0x5d0   :  { %3654 = vmatpush.msrb.mxu2 %v10815_v13  ;;  %3674 = vmatpush.msrb.mxu3 %v10816_v29  ;;  %v10870_v13 = vld [vmem:[#allocation97_spill] sm:$0xff]  ;;  %v10871_v29 = vld [vmem:[#allocation86_spill] sm:$0xff] }
 0x5d1   :  { %3615 = vmatpush.msrb.mxu0 %v10817_v50  ;;  %3635 = vmatpush.msrb.mxu1 %v10818_v60  ;;  %v10872_v50 = vld [vmem:[#allocation103_spill] sm:$0xff]  ;;  %v10873_v60 = vld [vmem:[#allocation90_spill] sm:$0xff] }
 0x5d2   :  { %3655 = vmatpush.msrb.mxu2 %v10819_v42  ;;  %3675 = vmatpush.msrb.mxu3 %v10820_v55  ;;  %v10874_v42 = vld [vmem:[#allocation100_spill] sm:$0xff]  ;;  %v10875_v55 = vld [vmem:[#allocation101_spill] sm:$0xff] }
 0x5d3   :  { %3616 = vmatmul.f32.vlgmr.msrb.gmra.mxu0 %v3370_v20  ;;  %3636 = vmatmul.f32.vlgmr.msrb.gmra.mxu1 %v3370_v20 }
 0x5d4   :  { %3656 = vmatmul.f32.vlgmr.msrb.gmra.mxu2 %v3370_v20  ;;  %3676 = vmatmul.f32.vlgmr.msrb.gmra.mxu3 %v3370_v20  ;;  %v10855_v20 = vld [vmem:[#allocation71_spill] sm:$0xff] }
 0x5d5   :  { %4223 = vmatpush.msk.msra.mxu0 %vm383_vm0, %v3681_v54  ;;  %4225 = vmatpush.msk.msra.mxu1 %vm383_vm0, %v3682_v21  ;;  %v10876_v54 = vld [vmem:[#allocation107_spill] sm:$0xff]  ;;  %v10877_v21 = vld [vmem:[#allocation94_spill] sm:$0xff] }
 0x5d6   :  { %4229 = vmatpush.msk.msra.mxu3 %vm383_vm0, %v3684_v28  ;;  %4227 = vmatpush.msk.msra.mxu2 %vm383_vm0, %v3683_v57  ;;  %v10878_v28 = vld [vmem:[#allocation104_spill] sm:$0xff]  ;;  %v10879_v57 = vld [vmem:[#allocation105_spill] sm:$0xff] }
 0x5d7   :  { %3843 = vmatpush.msrb.mxu0 %v10821_v38  ;;  %3863 = vmatpush.msrb.mxu1 %v10822_v62  ;;  %v10880_v38 = vld [vmem:[#allocation111_spill] sm:$0xff]  ;;  %v10881_v62 = vld [vmem:[#allocation98_spill] sm:$0xff] }
 0x5d8   :  { %3883 = vmatpush.msrb.mxu2 %v10823_v46  ;;  %3903 = vmatpush.msrb.mxu3 %v10824_v9  ;;  %v10883_v46 = vld [vmem:[#allocation109_spill] sm:$0xff]  ;;  %v10884_v9 = vld [vmem:[#allocation115_spill] sm:$0xff] }
 0x5d9   :  { %3844 = vmatpush.msrb.mxu0 %v10825_v26  ;;  %3864 = vmatpush.msrb.mxu1 %v10826_v59  ;;  %v10885_v26 = vld [vmem:[#allocation102_spill] sm:$0xff]  ;;  %v10886_v59 = vld [vmem:[#allocation112_spill] sm:$0xff] }
 0x5da   :  { %3884 = vmatpush.msrb.mxu2 %v10827_v25  ;;  %3904 = vmatpush.msrb.mxu3 %v10828_v58  ;;  %v10887_v25 = vld [vmem:[#allocation113_spill] sm:$0xff]  ;;  %v10888_v58 = vld [vmem:[#allocation116_spill] sm:$0xff] }
 0x5db   :  { %4224 = vmatmul.msk.f32.vlgmr.msra.gmra.mxu0 %vm379_vm1, %v4222_v51  ;;  %4226 = vmatmul.msk.f32.vlgmr.msra.gmra.mxu1 %vm379_vm1, %v4222_v51 }
 0x5dc   :  { %4228 = vmatmul.msk.f32.vlgmr.msra.gmra.mxu2 %vm379_vm1, %v4222_v51  ;;  %4230 = vmatmul.msk.f32.vlgmr.msra.gmra.mxu3 %vm379_vm1, %v4222_v51  ;;  %v10882_v51 = vld [vmem:[#allocation108_spill] sm:$0xff] }
 0x5dd   :  { %3845 = vmatpush.msrb.mxu0 %v10829_v11  ;;  %3865 = vmatpush.msrb.mxu1 %v10830_v35  ;;  %v10889_v11 = vld [vmem:[#allocation106_spill] sm:$0xff]  ;;  %v10890_v35 = vld [vmem:[#allocation117_spill] sm:$0xff] }
 0x5de   :  { %3885 = vmatpush.msrb.mxu2 %v10831_v15  ;;  %3905 = vmatpush.msrb.mxu3 %v10832_v14  ;;  %v10891_v15 = vld [vmem:[#allocation119_spill] sm:$0xff]  ;;  %v10892_v14 = vld [vmem:[#allocation120_spill] sm:$0xff] }
 0x5df   :  { %3846 = vmatpush.msrb.mxu0 %v10833_v53  ;;  %3866 = vmatpush.msrb.mxu1 %v10834_v49  ;;  %v10893_v53 = vld [vmem:[#allocation110_spill] sm:$0xff]  ;;  %v10894_v49 = vld [vmem:[#allocation121_spill] sm:$0xff] }
 0x5e0   :  { %3886 = vmatpush.msrb.mxu2 %v10835_v61  ;;  %3906 = vmatpush.msrb.mxu3 %v10836_v34  ;;  %v10895_v61 = vld [vmem:[#allocation123_spill] sm:$0xff]  ;;  %v10896_v34 = vld [vmem:[#allocation124_spill] sm:$0xff] }
 0x5e1   :  { %3847 = vmatpush.msrb.mxu0 %v10837_v0  ;;  %3867 = vmatpush.msrb.mxu1 %v10838_v7  ;;  %v10897_v0 = vld [vmem:[#allocation114_spill] sm:$0xff]  ;;  %v10898_v7 = vld [vmem:[#allocation125_spill] sm:$0xff] }
 0x5e2   :  { %3887 = vmatpush.msrb.mxu2 %v10839_v8  ;;  %3907 = vmatpush.msrb.mxu3 %v10840_v24  ;;  %v10899_v8 = vld [vmem:[#allocation127_spill] sm:$0xff]  ;;  %v10900_v24 = vld [vmem:[#allocation128_spill] sm:$0xff] }
 0x5e3   :  { %3848 = vmatpush.msrb.mxu0 %v10841_v31  ;;  %3868 = vmatpush.msrb.mxu1 %v10842_v2  ;;  %v10901_v31 = vld [vmem:[#allocation118_spill] sm:$0xff]  ;;  %v10902_v2 = vld [vmem:[#allocation129_spill] sm:$0xff] }
 0x5e4   :  { %3888 = vmatpush.msrb.mxu2 %v10843_v37  ;;  %3908 = vmatpush.msrb.mxu3 %v10844_v52  ;;  %v10903_v37 = vld [vmem:[#allocation131_spill] sm:$0xff]  ;;  %v10904_v52 = vld [vmem:[#allocation132_spill] sm:$0xff] }
 0x5e5   :  { %3849 = vmatpush.msrb.mxu0 %v10845_v10  ;;  %3869 = vmatpush.msrb.mxu1 %v10846_v23  ;;  %v10905_v10 = vld [vmem:[#allocation122_spill] sm:$0xff]  ;;  %v10906_v23 = vld [vmem:[#allocation133_spill] sm:$0xff] }
 0x5e6   :  { %3889 = vmatpush.msrb.mxu2 %v10847_v17  ;;  %3909 = vmatpush.msrb.mxu3 %v10848_v44  ;;  %v10907_v17 = vld [vmem:[#allocation135_spill] sm:$0xff]  ;;  %v10908_v44 = vld [vmem:[#allocation136_spill] sm:$0xff] }
 0x5e7   :  { %3850 = vmatpush.msrb.mxu0 %v10849_v1  ;;  %3870 = vmatpush.msrb.mxu1 %v10850_v22  ;;  %v10909_v1 = vld [vmem:[#allocation126_spill] sm:$0xff]  ;;  %v10910_v22 = vld [vmem:[#allocation137_spill] sm:$0xff] }
 0x5e8   :  { %3890 = vmatpush.msrb.mxu2 %v10851_v43  ;;  %3910 = vmatpush.msrb.mxu3 %v10852_v33  ;;  %v10911_v43 = vld [vmem:[#allocation139_spill] sm:$0xff]  ;;  %v10912_v33 = vld [vmem:[#allocation140_spill] sm:$0xff] }
 0x5e9   :  { %3851 = vmatpush.msrb.mxu0 %v10853_v45  ;;  %3871 = vmatpush.msrb.mxu1 %v10854_v56  ;;  %v10913_v45 = vld [vmem:[#allocation130_spill] sm:$0xff]  ;;  %v10914_v56 = vld [vmem:[#allocation141_spill] sm:$0xff] }
 0x5ea   :  { %3891 = vmatpush.msrb.mxu2 %v10855_v20  ;;  %3911 = vmatpush.msrb.mxu3 %v10856_v5  ;;  %v10915_v20 = vld [vmem:[#allocation143_spill] sm:$0xff]  ;;  %v10916_v5 = vld [vmem:[#allocation144_spill] sm:$0xff] }
 0x5eb   :  { %3852 = vmatpush.msrb.mxu0 %v10857_v30  ;;  %3872 = vmatpush.msrb.mxu1 %v10858_v48  ;;  %v10917_v30 = vld [vmem:[#allocation134_spill] sm:$0xff]  ;;  %v10918_v48 = vld [vmem:[#allocation145_spill] sm:$0xff] }
 0x5ec   :  { %3892 = vmatpush.msrb.mxu2 %v10859_v4  ;;  %3912 = vmatpush.msrb.mxu3 %v10860_v41  ;;  %v10919_v4 = vld [vmem:[#allocation138_spill] sm:$0xff] }
 0x5ed   :  { %3853 = vmatpush.msrb.mxu0 %v10861_v18  ;;  %3873 = vmatpush.msrb.mxu1 %v10862_v40  ;;  %v10920_v41 = vld [vmem:[#allocation142_spill] sm:$0xff]  ;;  %v10921_v18 = vld [vmem:[#allocation148_spill] sm:$0xff] }
 0x5ee   :  { %3893 = vmatpush.msrb.mxu2 %v10863_v12  ;;  %3913 = vmatpush.msrb.mxu3 %v10864_v27  ;;  %v10922_v40 = vld [vmem:[#allocation146_spill] sm:$0xff]  ;;  %v10924_v27 = vld [vmem:[#allocation152_spill] sm:$0xff] }
 0x5ef   :  { %3854 = vmatpush.msrb.mxu0 %v10865_v47  ;;  %3874 = vmatpush.msrb.mxu1 %v10866_v16  ;;  %v10923_v12 = vld [vmem:[#allocation150_spill] sm:$0xff]  ;;  %v10925_v47 = vld [vmem:[#allocation151_spill] sm:$0xff]  ;;  %v10926_v16 = vld [vmem:[#allocation153_spill] sm:$0xff] }
 0x5f0   :  { %3894 = vmatpush.msrb.mxu2 %v10867_v63  ;;  %3914 = vmatpush.msrb.mxu3 %v10868_v6  ;;  %v10927_v63 = vld [vmem:[#allocation154_spill] sm:$0xff]  ;;  %v10928_v6 = vld [vmem:[#allocation156_spill] sm:$0xff] }
 0x5f1   :  { %3855 = vmatpush.msrb.mxu0 %v10869_v32  ;;  %3875 = vmatpush.msrb.mxu1 %v10870_v13  ;;  %v10929_v32 = vld [vmem:[#allocation155_spill] sm:$0xff]  ;;  %v10930_v13 = vld [vmem:[#allocation157_spill] sm:$0xff] }
 0x5f2   :  { %3895 = vmatpush.msrb.mxu2 %v10871_v29  ;;  %3915 = vmatpush.msrb.mxu3 %v10872_v50  ;;  %v10931_v29 = vld [vmem:[#allocation158_spill] sm:$0xff]  ;;  %v10932_v50 = vld [vmem:[#allocation160_spill] sm:$0xff] }
 0x5f3   :  { %3856 = vmatpush.msrb.mxu0 %v10873_v60  ;;  %3876 = vmatpush.msrb.mxu1 %v10874_v42  ;;  %v10933_v60 = vld [vmem:[#allocation159_spill] sm:$0xff]  ;;  %v10934_v42 = vld [vmem:[#allocation161_spill] sm:$0xff] }
 0x5f4   :  { %3896 = vmatpush.msrb.mxu2 %v10875_v55  ;;  %3916 = vmatpush.msrb.mxu3 %v10876_v54  ;;  %v10935_v55 = vld [vmem:[#allocation162_spill] sm:$0xff]  ;;  %v10936_v54 = vld [vmem:[#allocation164_spill] sm:$0xff] }
 0x5f5   :  { %3857 = vmatpush.msrb.mxu0 %v10877_v21  ;;  %3877 = vmatpush.msrb.mxu1 %v10878_v28  ;;  %v10937_v21 = vld [vmem:[#allocation163_spill] sm:$0xff]  ;;  %v10938_v28 = vld [vmem:[#allocation165_spill] sm:$0xff] }
 0x5f6   :  { %3897 = vmatpush.msrb.mxu2 %v10879_v57  ;;  %3917 = vmatpush.msrb.mxu3 %v10880_v38  ;;  %v10939_v57 = vld [vmem:[#allocation166_spill] sm:$0xff]  ;;  %v10940_v38 = vld [vmem:[#allocation168_spill] sm:$0xff] }
 0x5f7   :  { %3858 = vmatpush.msrb.mxu0 %v10881_v62  ;;  %3878 = vmatpush.msrb.mxu1 %v10882_v51  ;;  %v10941_v62 = vld [vmem:[#allocation167_spill] sm:$0xff]  ;;  %v10942_v51 = vld [vmem:[#allocation169_spill] sm:$0xff] }
 0x5f8   :  { %3898 = vmatpush.msrb.mxu2 %v10883_v46  ;;  %3918 = vmatpush.msrb.mxu3 %v10884_v9  ;;  %v10943_v46 = vld [vmem:[#allocation170_spill] sm:$0xff]  ;;  %v10944_v9 = vld [vmem:[#allocation172_spill] sm:$0xff] }
 0x5f9   :  { %3923 = vmatpush.msra.mxu0 %v10885_v26  ;;  %3943 = vmatpush.msra.mxu1 %v10886_v59  ;;  %v10945_v26 = vld [vmem:[#allocation171_spill] sm:$0xff]  ;;  %v10946_v59 = vld [vmem:[#allocation173_spill] sm:$0xff] }
 0x5fa   :  { %3963 = vmatpush.msra.mxu2 %v10887_v25  ;;  %3983 = vmatpush.msra.mxu3 %v10888_v58  ;;  %v10947_v25 = vld [vmem:[#allocation174_spill] sm:$0xff]  ;;  %v10948_v58 = vld [vmem:[#allocation175_spill] sm:$0xff] }
 0x5fb   :  { %3924 = vmatpush.msra.mxu0 %v10889_v11  ;;  %3944 = vmatpush.msra.mxu1 %v10890_v35 }
 0x5fc   :  { %3964 = vmatpush.msra.mxu2 %v10891_v15  ;;  %3984 = vmatpush.msra.mxu3 %v10892_v14 }
 0x5fd   :  { %3925 = vmatpush.msra.mxu0 %v10893_v53  ;;  %3945 = vmatpush.msra.mxu1 %v10894_v49 }
 0x5fe   :  { %3965 = vmatpush.msra.mxu2 %v10895_v61  ;;  %3985 = vmatpush.msra.mxu3 %v10896_v34  ;;  %v10949_v34 = vld [vmem:[#allocation19_spill] sm:$0xff] }
 0x5ff   :  { %3926 = vmatpush.msra.mxu0 %v10897_v0  ;;  %3946 = vmatpush.msra.mxu1 %v10898_v7  ;;  %v10950_v7 = vld [vmem:[#allocation10_spill] sm:$0xff] }
 0x600   :  { %3966 = vmatpush.msra.mxu2 %v10899_v8  ;;  %3986 = vmatpush.msra.mxu3 %v10900_v24 }
 0x601   :  { %3927 = vmatpush.msra.mxu0 %v10901_v31  ;;  %3947 = vmatpush.msra.mxu1 %v10902_v2 }
 0x602   :  { %3967 = vmatpush.msra.mxu2 %v10903_v37  ;;  %3987 = vmatpush.msra.mxu3 %v10904_v52 }
 0x603   :  { %3928 = vmatpush.msra.mxu0 %v10905_v10  ;;  %3948 = vmatpush.msra.mxu1 %v10906_v23  ;;  %v10951_v10 = vld [vmem:[#allocation15_spill] sm:$0xff] }
 0x604   :  { %3968 = vmatpush.msra.mxu2 %v10907_v17  ;;  %3988 = vmatpush.msra.mxu3 %v10908_v44 }
 0x605   :  { %3929 = vmatpush.msra.mxu0 %v10909_v1  ;;  %3949 = vmatpush.msra.mxu1 %v10910_v22 }
 0x606   :  { %3969 = vmatpush.msra.mxu2 %v10911_v43  ;;  %3989 = vmatpush.msra.mxu3 %v10912_v33 }
 0x607   :  { %3930 = vmatpush.msra.mxu0 %v10913_v45  ;;  %3950 = vmatpush.msra.mxu1 %v10914_v56 }
 0x608   :  { %3970 = vmatpush.msra.mxu2 %v10915_v20  ;;  %3990 = vmatpush.msra.mxu3 %v10916_v5 }
 0x609   :  { %3931 = vmatpush.msra.mxu0 %v10917_v30  ;;  %3951 = vmatpush.msra.mxu1 %v10918_v48 }
 0x60a   :  { %3971 = vmatpush.msra.mxu2 %v10919_v4  ;;  %3991 = vmatpush.msra.mxu3 %v10920_v41 }
 0x60b   :  { %3932 = vmatpush.msra.mxu0 %v10921_v18  ;;  %3952 = vmatpush.msra.mxu1 %v10922_v40  ;;  %v10952_v40 = vld [vmem:[#allocation11_spill] sm:$0xff] }
 0x60c   :  { %3972 = vmatpush.msra.mxu2 %v10923_v12  ;;  %3992 = vmatpush.msra.mxu3 %v10924_v27 }
 0x60d   :  { %3933 = vmatpush.msra.mxu0 %v10925_v47  ;;  %3953 = vmatpush.msra.mxu1 %v10926_v16  ;;  %v10953_v47 = vld [vmem:[#allocation147_spill] sm:$0xff] }
 0x60e   :  { %3973 = vmatpush.msra.mxu2 %v10927_v63  ;;  %3993 = vmatpush.msra.mxu3 %v10928_v6  ;;  %v10954_v63 = vld [vmem:[#allocation149_spill] sm:$0xff] }
 0x60f   :  { %3934 = vmatpush.msra.mxu0 %v10929_v32  ;;  %3954 = vmatpush.msra.mxu1 %v10930_v13 }
 0x610   :  { %3974 = vmatpush.msra.mxu2 %v10931_v29  ;;  %3994 = vmatpush.msra.mxu3 %v10932_v50 }
 0x611   :  { %3935 = vmatpush.msra.mxu0 %v10933_v60  ;;  %3955 = vmatpush.msra.mxu1 %v10934_v42 }
 0x612   :  { %3975 = vmatpush.msra.mxu2 %v10935_v55  ;;  %3995 = vmatpush.msra.mxu3 %v10936_v54 }
 0x613   :  { %3936 = vmatpush.msra.mxu0 %v10937_v21  ;;  %3956 = vmatpush.msra.mxu1 %v10938_v28 }
 0x614   :  { %3976 = vmatpush.msra.mxu2 %v10939_v57  ;;  %3996 = vmatpush.msra.mxu3 %v10940_v38 }
 0x615   :  { %3937 = vmatpush.msra.mxu0 %v10941_v62  ;;  %3957 = vmatpush.msra.mxu1 %v10942_v51 }
 0x616   :  { %3977 = vmatpush.msra.mxu2 %v10943_v46  ;;  %3997 = vmatpush.msra.mxu3 %v10944_v9 }
 0x617   :  { %3938 = vmatpush.msra.mxu0 %v10945_v26  ;;  %3958 = vmatpush.msra.mxu1 %v10946_v59 }
 0x618   :  { %3978 = vmatpush.msra.mxu2 %v10947_v25  ;;  %3998 = vmatpush.msra.mxu3 %v10948_v58 }
 0x62c   :  { %v3388_v11 = vpop.f32.mrf.mxu0  ;;  %v3408_v35 = vpop.f32.mrf.mxu1 }
 0x633   :  { %v3448_v15 = vpop.f32.mrf.mxu3  ;;  %v3428_v24 = vpop.f32.mrf.mxu2 }
 0x646   :  { %v3468_v14 = vpop.f32.mrf.mxu0  ;;  %v3488_v53 = vpop.f32.mrf.mxu1 }
 0x647   :  { %v3469_v49 = vadd.f32 %v3468_v14, %v3388_v11  ;;  %v3489_v61 = vadd.f32 %v3488_v53, %v3408_v35 }
 0x649   :  { %v3531_v0 = vadd.f32 %v3469_v49, %v10949_v34  ;;  %v3532_v8 = vadd.f32 %v3489_v61, %v10950_v7 }
 0x64b   :  { %v4219_v31 = vmul.f32 -1.442695, %v3531_v0  ;;  %v4220_v2 = vmul.f32 -1.442695, %v3532_v8 }
 0x64d   :  { %4452 = vpow2.f32 %v4219_v31  ;;  %v3528_v37 = vpop.f32.mrf.mxu3  ;;  %v3508_v43 = vpop.f32.mrf.mxu2 }
 0x64e   :  { %4454 = vpow2.f32 %v4220_v2  ;;  %v3529_v52 = vadd.f32 %v3528_v37, %v3448_v15  ;;  %v3509_v20 = vadd.f32 %v3508_v43, %v3428_v24 }
 0x650   :  { %v3534_v23 = vadd.f32 %v3529_v52, %v10951_v10  ;;  %v3617_v17 = vpop.f32.mrf.mxu0  ;;  %v3637_v44 = vpop.f32.mrf.mxu1  ;;  %v3533_v12 = vadd.f32 %v3509_v20, %v10952_v40 }
 0x652   :  { %v4221_v1 = vmul.f32 -1.442695, %v3534_v23 }
 0x653   :  { %v4453_v22 = vpop.eup %4452 }
 0x654   :  { %v4455_v33 = vpop.eup %4454  ;;  %v3538_v45 = vadd.f32 1.0, %v4453_v22  ;;  %4456 = vpow2.f32 %v4221_v1 }
 0x655   :  { %v3557_v56 = vadd.f32 1.0, %v4455_v33 }
 0x656   :  { %4458 = vrcp.f32 %v3538_v45  ;;  %v3548_v54 = vand.u32 2147483647, %v3538_v45  ;;  %v3550_v21 = vand.u32 2147483648, %v3538_v45  ;;  %vm3544_vm5 = vweird.f32 %v3538_v45 }
 0x657   :  { %4460 = vrcp.f32 %v3557_v56  ;;  %v3677_v5 = vpop.f32.mrf.mxu3  ;;  %v3657_v60 = vpop.f32.mrf.mxu2  ;;  %v3569_v62 = vand.u32 2147483648, %v3557_v56  ;;  %v3567_v9 = vand.u32 2147483647, %v3557_v56  ;;  %vm3563_vm4 = vweird.f32 %v3557_v56 }
 0x658   :  { %v3713_v30 = vpop.f32.mrf.mxu0  ;;  %v3733_v48 = vpop.f32.mrf.mxu1  ;;  %v3551_v35 = vor.u32 1.1754944e-38, %v3550_v21  ;;  %vm3549_vm8 = vcmp.eq.f32.partialorder %v3548_v54, 8.507059e+37 }
 0x659   :  { %v3714_v4 = vadd.f32 %v3713_v30, %v3617_v17  ;;  %v3734_v41 = vadd.f32 %v3733_v48, %v3637_v44  ;;  %v3570_v49 = vor.u32 1.1754944e-38, %v3569_v62  ;;  %vm3568_vm9 = vcmp.eq.f32.partialorder %v3567_v9, 8.507059e+37 }
 0x65a   :  { %v4457_v18 = vpop.eup %4456 }
 0x65b   :  { %v8929_v27 = vadd.f32 1.0, %v4457_v18  ;;  %v3776_v16 = vadd.f32 %v3714_v4, %v10953_v47  ;;  %v3777_v6 = vadd.f32 %v3734_v41, %v10954_v63 }
 0x65c   :  { %v4459_v32 = vpop.eup %4458 }
 0x65d   :  { %v4461_v13 = vpop.eup %4460  ;;  %v3540_v29 = vmul.f32 %v4459_v32, %v3538_v45  ;;  %4462 = vrcp.f32 %v8929_v27  ;;  %v4231_v42 = vmul.f32 -1.442695, %v3776_v16  ;;  %v4232_v28 = vmul.f32 -1.442695, %v3777_v6 }
 0x65e   :  { %v3559_v50 = vmul.f32 %v4461_v13, %v3557_v56  ;;  %4464 = vtanh.f32 %v3533_v12  ;;  %vm3545_vm0 = vweird.f32 %v4459_v32  ;;  %vm3564_vm1 = vweird.f32 %v4461_v13 }
 0x65f   :  { %v3541_v55 = vsub.f32 1.0, %v3540_v29  ;;  %v3773_v57 = vpop.f32.mrf.mxu3  ;;  %4466 = vpow2.f32 %v4231_v42  ;;  %vm3546_vm6 = vmor %vm3544_vm5, %vm3545_vm0  ;;  %v3753_v1 = vpop.f32.mrf.mxu2  ;;  %v3589_v56 = vand.u32 2147483648, %v8929_v27  ;;  %vm3583_vm11 = vweird.f32 %v8929_v27 }
 0x660   :  { %v3560_v38 = vsub.f32 1.0, %v3559_v50  ;;  %v3774_v51 = vadd.f32 %v3773_v57, %v3677_v5  ;;  %4468 = vpow2.f32 %v4232_v28  ;;  %vm3565_vm7 = vmor %vm3563_vm4, %vm3564_vm1  ;;  %v3754_v43 = vadd.f32 %v3753_v1, %v3657_v60 }
 0x661   :  { %v3542_v46 = vmul.f32 %v4459_v32, %v3541_v55  ;;  %v3590_v18 = vor.u32 1.1754944e-38, %v3589_v56 }
 0x662   :  { %v3561_v26 = vmul.f32 %v4461_v13, %v3560_v38  ;;  %v3779_v59 = vadd.f32 %v3774_v51, %v5835_v36  ;;  %v3778_v30 = vadd.f32 %v3754_v43, %v5894_v19 }
 0x663   :  { %v4463_v25 = vpop.eup %4462  ;;  %v3543_v58 = vadd.f32 %v4459_v32, %v3542_v46 }
 0x664   :  { %v4465_v11 = vpop.eup %4464  ;;  %v3562_v15 = vadd.f32 %v4461_v13, %v3561_v26  ;;  %v3579_v14 = vmul.f32 %v4463_v25, %v8929_v27  ;;  %v4233_v53 = vmul.f32 -1.442695, %v3779_v59  ;;  %vm3584_vm10 = vweird.f32 %v4463_v25 }
 0x665   :  { %v3547_v61 = vsel %vm3546_vm6, %v4459_v32, %v3543_v58  ;;  %v4467_v0 = vpop.eup %4466  ;;  %vm3585_vm12 = vmor %vm3583_vm11, %vm3584_vm10 }
 0x666   :  { %v3552_v8 = vsel %vm3549_vm8, %v3551_v35, %v3547_v61  ;;  %v3566_v24 = vsel %vm3565_vm7, %v4461_v13, %v3562_v15  ;;  %v3580_v36 = vsub.f32 1.0, %v3579_v14  ;;  %4470 = vpow2.f32 %v4233_v53  ;;  %v4469_v31 = vpop.eup %4468 }
 0x667   :  { %v3571_v2 = vsel %vm3568_vm9, %v3570_v49, %v3566_v24  ;;  %v3594_v37 = vmul.f32 %v4465_v11, %v3552_v8  ;;  %v3783_v52 = vadd.f32 1.0, %v4467_v0  ;;  %v3802_v44 = vadd.f32 1.0, %v4469_v31  ;;  %v4084_v24 = vld [vmem:[%s9011_s7 + $0x70] sm:$0xff]  ;;  %v4082_v31 = vld [vmem:[%s9011_s7 + $0x60] sm:$0xff] }
 0x668   :  { %v3593_v23 = vmul.f32 %v3571_v2, %v8680_v39  ;;  %v3581_v17 = vmul.f32 %v4463_v25, %v3580_v36  ;;  %v3587_v39 = vand.u32 2147483647, %v8929_v27  ;;  %v4083_v36 = vld [vmem:[%s9011_s7 + $0x68] sm:$0xff] }
 0x669   :  { %4472 = vrcp.f32 %v3783_v52  ;;  %v3795_v32 = vand.u32 2147483648, %v3783_v52  ;;  %v3814_v29 = vand.u32 2147483648, %v3802_v44  ;;  %v3793_v50 = vand.u32 2147483647, %v3783_v52 }
 0x66a   :  { %v8937_v22 = vadd.f32 %v3594_v37, %v3593_v23  ;;  %4474 = vrcp.f32 %v3802_v44  ;;  %v3582_v33 = vadd.f32 %v4463_v25, %v3581_v17  ;;  %vm3588_vm13 = vcmp.eq.f32.partialorder %v3587_v39, 8.507059e+37  ;;  %v4080_v23 = vld [vmem:[%s9011_s7 + $0x50] sm:$0xff]  ;;  %v4079_v17 = vld [vmem:[%s9011_s7 + $0x48] sm:$0xff] }
 0x66b   :  { %v3812_v42 = vand.u32 2147483647, %v3802_v44  ;;  %vm3789_vm2 = vweird.f32 %v3783_v52  ;;  %vm3808_vm3 = vweird.f32 %v3802_v44  ;;  %v3796_v21 = vor.u32 1.1754944e-38, %v3795_v32  ;;  %v4076_v39 = vld [vmem:[%s9011_s7 + $0x30] sm:$0xff] }
 0x66c   :  { %v4471_v45 = vpop.eup %4470  ;;  %4476 = vtanh.f32 %v8937_v22  ;;  %v3586_v48 = vsel %vm3585_vm12, %v4463_v25, %v3582_v33  ;;  %v3815_v57 = vor.u32 1.1754944e-38, %v3814_v29  ;;  %vm3794_vm4 = vcmp.eq.f32.partialorder %v3793_v50, 8.507059e+37 }
 0x66d   :  { %v3822_v20 = vadd.f32 1.0, %v4471_v45  ;;  %v3591_v63 = vsel %vm3588_vm13, %v3590_v18, %v3586_v48  ;;  %vm3813_vm5 = vcmp.eq.f32.partialorder %v3812_v42, 8.507059e+37  ;;  %v4077_v45 = vld [vmem:[%s9011_s7 + $0x38] sm:$0xff]  ;;  %v4075_v48 = vld [vmem:[%s9011_s7 + $0x28] sm:$0xff]  ;;  %v4074_v18 = vld [vmem:[%s9011_s7 + $0x20] sm:$0xff] }
 0x66f   :  { %v4473_v5 = vpop.eup %4472  ;;  %4478 = vrcp.f32 %v3822_v20  ;;  %v3834_v15 = vand.u32 2147483648, %v3822_v20  ;;  %vm3828_vm7 = vweird.f32 %v3822_v20  ;;  %v3832_v14 = vand.u32 2147483647, %v3822_v20 }
 0x670   :  { %v4475_v4 = vpop.eup %4474  ;;  %v3785_v41 = vmul.f32 %v4473_v5, %v3783_v52  ;;  %4480 = vtanh.f32 %v3778_v30  ;;  %vm3790_vm14 = vweird.f32 %v4473_v5  ;;  %v4081_v52 = vld [vmem:[%s9011_s7 + $0x58] sm:$0xff] }
 0x671   :  { %v3804_v12 = vmul.f32 %v4475_v4, %v3802_v44  ;;  %vm3809_vm15 = vweird.f32 %v4475_v4  ;;  %vm3791_vm0 = vmor %vm3789_vm2, %vm3790_vm14  ;;  %v3835_v49 = vor.u32 1.1754944e-38, %v3834_v15  ;;  %vm3833_vm9 = vcmp.eq.f32.partialorder %v3832_v14, 8.507059e+37  ;;  %v4078_v44 = vld [vmem:[%s9011_s7 + $0x40] sm:$0xff] }
 0x672   :  { %v4477_v47 = vpop.eup %4476  ;;  %v3786_v16 = vsub.f32 1.0, %v3785_v41  ;;  %vm3810_vm1 = vmor %vm3808_vm3, %vm3809_vm15 }
 0x673   :  { %v3805_v6 = vsub.f32 1.0, %v3804_v12  ;;  %v3597_v13 = vmul.f32 %v4477_v47, %v3591_v63  ;;  %v4073_v12 = vld [vmem:[%s9011_s7 + $0x18] sm:$0xff] }
 0x674   :  { %v3787_v27 = vmul.f32 %v4473_v5, %v3786_v16  ;;  %v4072_v16 = vld [vmem:[%s9011_s7 + $0x10] sm:$0xff] }
 0x675   :  { %v4479_v60 = vpop.eup %4478  ;;  %v3806_v19 = vmul.f32 %v4475_v4, %v3805_v6  ;;  %3859 = vmatmul.f32.vlgmr.msrb.gmra.mxu0 %v3597_v13  ;;  %3879 = vmatmul.f32.vlgmr.msrb.gmra.mxu1 %v3597_v13  ;;  %v4071_v6 = vld [vmem:[%s9011_s7 + $0x8] sm:$0xff] }
 0x676   :  { %v3788_v55 = vadd.f32 %v4473_v5, %v3787_v27  ;;  %v3824_v54 = vmul.f32 %v4479_v60, %v3822_v20  ;;  %3899 = vmatmul.f32.vlgmr.msrb.gmra.mxu2 %v3597_v13  ;;  %3919 = vmatmul.f32.vlgmr.msrb.gmra.mxu3 %v3597_v13  ;;  %v4481_v51 = vpop.eup %4480  ;;  %vm3829_vm6 = vweird.f32 %v4479_v60  ;;  %v4070_v13 = vld [vmem:[%s9011_s7] sm:$0xff] }
 0x677   :  { %v3807_v28 = vadd.f32 %v4475_v4, %v3806_v19  ;;  %vm3830_vm8 = vmor %vm3828_vm7, %vm3829_vm6  ;;  %vm4110_vm6 = vcmask 31744  }
 0x678   :  { %v3792_v38 = vsel %vm3791_vm0, %v4473_v5, %v3788_v55  ;;  %v3825_v62 = vsub.f32 1.0, %v3824_v54 }
 0x679   :  { %v3797_v46 = vsel %vm3794_vm4, %v3796_v21, %v3792_v38  ;;  %v3811_v9 = vsel %vm3810_vm1, %v4475_v4, %v3807_v28 }
 0x67a   :  { %v3816_v26 = vsel %vm3813_vm5, %v3815_v57, %v3811_v9  ;;  %v3839_v59 = vmul.f32 %v4481_v51, %v3797_v46  ;;  %v3826_v25 = vmul.f32 %v4479_v60, %v3825_v62 }
 0x67b   :  { %v3838_v58 = vmul.f32 %v3816_v26, %v8739_v3  ;;  %v4085_v3 = vld [vmem:[%s9011_s7 + $0x78] sm:$0xff] }
 0x67c   :  { %v3827_v35 = vadd.f32 %v4479_v60, %v3826_v25  ;;  %4090 = vmatpush.msrb.mxu0 %v4085_v3 }
 0x67d   :  { %v3840_v11 = vadd.f32 %v3839_v59, %v3838_v58 }
 0x67e   :  { %v3831_v53 = vsel %vm3830_vm8, %v4479_v60, %v3827_v35  ;;  %4091 = vmatpush.msrb.mxu0 %v4084_v24 }
 0x67f   :  { %4482 = vtanh.f32 %v3840_v11  ;;  %v3836_v0 = vsel %vm3833_vm9, %v3835_v49, %v3831_v53 }
 0x680   :  { %4092 = vmatpush.msrb.mxu0 %v4083_v36 }
 0x682   :  { %4093 = vmatpush.msrb.mxu0 %v4082_v31 }
 0x684   :  { %4094 = vmatpush.msrb.mxu0 %v4081_v52 }
 0x685   :  { %v4483_v61 = vpop.eup %4482 }
 0x686   :  { %v3842_v8 = vmul.f32 %v4483_v61, %v3836_v0  ;;  %4095 = vmatpush.msrb.mxu0 %v4080_v23 }
 0x688   :  { %3939 = vmatmul.f32.vlgmr.msra.gmra.mxu0 %v3842_v8  ;;  %3959 = vmatmul.f32.vlgmr.msra.gmra.mxu1 %v3842_v8 }
 0x689   :  { %3979 = vmatmul.f32.vlgmr.msra.gmra.mxu2 %v3842_v8  ;;  %3999 = vmatmul.f32.vlgmr.msra.gmra.mxu3 %v3842_v8 }
 0x68a   :  { %4096 = vmatpush.msrb.mxu0 %v4079_v17 }
 0x68c   :  { %4097 = vmatpush.msrb.mxu0 %v4078_v44 }
 0x68e   :  { %4098 = vmatpush.msrb.mxu0 %v4077_v45 }
 0x690   :  { %4099 = vmatpush.msrb.mxu0 %v4076_v39 }
 0x692   :  { %4100 = vmatpush.msrb.mxu0 %v4075_v48 }
 0x694   :  { %4101 = vmatpush.msrb.mxu0 %v4074_v18 }
 0x696   :  { %4102 = vmatpush.msrb.mxu0 %v4073_v12 }
 0x698   :  { %4103 = vmatpush.msrb.mxu0 %v4072_v16 }
 0x69a   :  { %4104 = vmatpush.msrb.mxu0 %v4071_v6 }
 0x69c   :  { %4105 = vmatpush.msrb.mxu0 %v4070_v13 }
 0x6f2   :  { %v3860_v2 = vpop.f32.mrf.mxu0  ;;  %v3880_v37 = vpop.f32.mrf.mxu1 }
 0x6f9   :  { %v3920_v1 = vpop.f32.mrf.mxu3  ;;  %v3900_v47 = vpop.f32.mrf.mxu2 }
 0x705   :  { %v3940_v43 = vpop.f32.mrf.mxu0  ;;  %v3960_v33 = vpop.f32.mrf.mxu1 }
 0x706   :  { %v3941_v56 = vadd.f32 %v3940_v43, %v3860_v2  ;;  %v3961_v20 = vadd.f32 %v3960_v33, %v3880_v37 }
 0x708   :  { %v4003_v5 = vadd.f32 %v3941_v56, %v10949_v34  ;;  %v4004_v30 = vadd.f32 %v3961_v20, %v10950_v7 }
 0x70a   :  { %v4234_v4 = vmul.f32 -1.442695, %v4003_v5  ;;  %v4235_v41 = vmul.f32 -1.442695, %v4004_v30 }
 0x70c   :  { %4484 = vpow2.f32 %v4234_v4  ;;  %v4000_v34 = vpop.f32.mrf.mxu3  ;;  %v3980_v19 = vpop.f32.mrf.mxu2 }
 0x70d   :  { %4486 = vpow2.f32 %v4235_v41  ;;  %v4001_v7 = vadd.f32 %v4000_v34, %v3920_v1 }
 0x70f   :  { %v4006_v63 = vadd.f32 %v4001_v7, %v10951_v10  ;;  %v3981_v10 = vadd.f32 %v3980_v19, %v3900_v47 }
 0x711   :  { %v4236_v32 = vmul.f32 -1.442695, %v4006_v63  ;;  %v4005_v21 = vadd.f32 %v3981_v10, %v10952_v40 }
 0x712   :  { %v4485_v29 = vpop.eup %4484 }
 0x713   :  { %v4487_v27 = vpop.eup %4486  ;;  %v4010_v50 = vadd.f32 1.0, %v4485_v29  ;;  %4488 = vpow2.f32 %v4236_v32 }
 0x714   :  { %v4029_v60 = vadd.f32 1.0, %v4487_v27 }
 0x715   :  { %4490 = vrcp.f32 %v4010_v50  ;;  %v4022_v46 = vand.u32 2147483648, %v4010_v50  ;;  %v4020_v59 = vand.u32 2147483647, %v4010_v50  ;;  %vm4016_vm12 = vweird.f32 %v4010_v50 }
 0x716   :  { %4492 = vrcp.f32 %v4029_v60  ;;  %v4041_v9 = vand.u32 2147483648, %v4029_v60  ;;  %v4039_v58 = vand.u32 2147483647, %v4029_v60  ;;  %vm4035_vm13 = vweird.f32 %v4029_v60 }
 0x717   :  { %v4023_v40 = vor.u32 1.1754944e-38, %v4022_v46  ;;  %vm4021_vm2 = vcmp.eq.f32.partialorder %v4020_v59, 8.507059e+37 }
 0x718   :  { %v4042_v53 = vor.u32 1.1754944e-38, %v4041_v9  ;;  %vm4040_vm3 = vcmp.eq.f32.partialorder %v4039_v58, 8.507059e+37 }
 0x719   :  { %v4489_v42 = vpop.eup %4488 }
 0x71a   :  { %v4049_v55 = vadd.f32 1.0, %v4489_v42 }
 0x71b   :  { %v4491_v54 = vpop.eup %4490 }
 0x71c   :  { %v4493_v28 = vpop.eup %4492  ;;  %v4012_v57 = vmul.f32 %v4491_v54, %v4010_v50  ;;  %4494 = vrcp.f32 %v4049_v55  ;;  %vm4017_vm10 = vweird.f32 %v4491_v54  ;;  %v4061_v23 = vand.u32 2147483648, %v4049_v55 }
 0x71d   :  { %v4031_v38 = vmul.f32 %v4493_v28, %v4029_v60  ;;  %4496 = vtanh.f32 %v4005_v21  ;;  %vm4036_vm11 = vweird.f32 %v4493_v28  ;;  %vm4018_vm14 = vmor %vm4016_vm12, %vm4017_vm10  ;;  %vm4055_vm1 = vweird.f32 %v4049_v55 }
 0x71e   :  { %v4013_v62 = vsub.f32 1.0, %v4012_v57  ;;  %vm4037_vm15 = vmor %vm4035_vm13, %vm4036_vm11  ;;  %v4059_v17 = vand.u32 2147483647, %v4049_v55  ;;  %v4062_v1 = vor.u32 1.1754944e-38, %v4061_v23 }
 0x71f   :  { %v4032_v51 = vsub.f32 1.0, %v4031_v38 }
 0x720   :  { %v4014_v26 = vmul.f32 %v4491_v54, %v4013_v62  ;;  %vm4060_vm5 = vcmp.eq.f32.partialorder %v4059_v17, 8.507059e+37 }
 0x721   :  { %v4033_v25 = vmul.f32 %v4493_v28, %v4032_v51 }
 0x722   :  { %v4495_v11 = vpop.eup %4494  ;;  %v4015_v35 = vadd.f32 %v4491_v54, %v4014_v26 }
 0x723   :  { %v4034_v15 = vadd.f32 %v4493_v28, %v4033_v25  ;;  %v4051_v14 = vmul.f32 %v4495_v11, %v4049_v55  ;;  %v4497_v61 = vpop.eup %4496  ;;  %vm4056_vm0 = vweird.f32 %v4495_v11 }
 0x724   :  { %v4019_v49 = vsel %vm4018_vm14, %v4491_v54, %v4015_v35  ;;  %vm4057_vm4 = vmor %vm4055_vm1, %vm4056_vm0 }
 0x725   :  { %v4024_v0 = vsel %vm4021_vm2, %v4023_v40, %v4019_v49  ;;  %v4038_v8 = vsel %vm4037_vm15, %v4493_v28, %v4034_v15  ;;  %v4052_v3 = vsub.f32 1.0, %v4051_v14 }
 0x726   :  { %v4043_v24 = vsel %vm4040_vm3, %v4042_v53, %v4038_v8  ;;  %v4066_v36 = vmul.f32 %v4497_v61, %v4024_v0 }
 0x727   :  { %v4065_v31 = vmul.f32 %v4043_v24, %v8937_v22  ;;  %v4053_v2 = vmul.f32 %v4495_v11, %v4052_v3  ;;  %v4243_v22 = vld [vmem:[%s9012_s8] ss:$0 sm:$0xff] }
 0x729   :  { %v4067_v37 = vadd.f32 %v4066_v36, %v4065_v31  ;;  %v4054_v52 = vadd.f32 %v4495_v11, %v4053_v2 }
 0x72b   :  { %4498 = vtanh.f32 %v4067_v37  ;;  %v4058_v44 = vsel %vm4057_vm4, %v4495_v11, %v4054_v52 }
 0x72c   :  { %v4063_v33 = vsel %vm4060_vm5, %v4062_v1, %v4058_v44 }
 0x731   :  { %v4499_v43 = vpop.eup %4498 }
 0x732   :  { %v4069_v45 = vmul.f32 %v4499_v43, %v4063_v33 }
 0x734   :  { %4106 = vmatmul.f32.vlgmr.msrb.gmra.mxu0 %v4069_v45 }
 0x7b1   :  { %v4107_v56 = vpop.f32.mrf.mxu0 }
 0x7b2   :  { %v4108_v20 = vadd.f32 %v4243_v22, %v4107_v56 }
 0x7b4   :  { %4111 = vst.msk [vmem:[%s9013_s9] sm:$0xff] %vm4110_vm6, %v4108_v20 }
 0x7b5   :  { %4116 = vsyncpa [#allocation3], 1 }
 0x7b6   :  { %4117 = vsyncpa [#allocation5], 1 }

</bundles_post_ra>
